<compile_context>
chip_gen: v5e
topology: v5e:2x2
jax: 0.10.0
libtpu: 0.0.40
codegen_flags: <defaults>
</compile_context>

<pallas_src>
import functools

import numpy as np
import jax
import jax.numpy as jnp
from jax import lax
from jax.experimental import pallas as pl
from jax.experimental.pallas import tpu as pltpu

KSIZE = 7
PAD = 3                      # (KSIZE - 1) // 2
NTAPS = KSIZE * KSIZE
SHUFFLE_GROUPS = 4


def _gam_kernel(C, CM, CR, CP, MP, WP, cdtype,
                x_ref, mask_ref, caw1_ref, caw2_ref, w1_ref, w2_ref, pp_ref,
                o_ref, stk1_ref, stk2_ref):
    f32 = jnp.float32
    x = x_ref[...]                               # (C, FP) f32, zero halo / tail
    FP = x.shape[1]
    mask = mask_ref[...]                         # (1, FP) interior-pixel mask

    pp = pp_ref[...]                             # (C, 6) packed per-channel params
    ca_b1 = pp[0:CR, 0:1]                        # channel-attention fc1 bias
    ca_b2 = pp[:, 1:2]                           # channel-attention fc2 bias
    sc1 = pp[0:MP, 2:3]                          # conv1 bias + BN1 folded (0 on pad rows)
    bi1 = pp[0:MP, 3:4]
    sc2 = pp[:, 4:5]                             # conv2 bias + BN2 folded (shuffled)
    bi2 = pp[:, 5:6]

    # ---- channel attention: per-pixel MLP over channels (lane-dense N = FP) ----
    a = jnp.dot(caw1_ref[...], x.astype(cdtype), preferred_element_type=f32) + ca_b1
    a = jnp.maximum(a, 0.0)
    att = jnp.dot(caw2_ref[...], a.astype(cdtype), preferred_element_type=f32) + ca_b2
    xs = x * att                                 # f32; stays exactly 0 at halo/tail

    shifts = [dh * WP + dw
              for dh in range(-PAD, PAD + 1)
              for dw in range(-PAD, PAD + 1)]

    # ---- conv #1 (grouped 7x7, C -> CM) as ONE stacked-K matmul ---------------
    # Each rolled copy is stored straight to the VMEM stack (one live copy at a
    # time), then a single (MP, 49*CP) x (49*CP, FP) matmul replaces 49 K=C
    # matmuls + 49 accumulator adds.
    xs_c = xs.astype(cdtype)
    if CP > C:                                   # pad channels to the sublane tile
        xs_c = jnp.concatenate(
            [xs_c, jnp.zeros((CP - C, FP), cdtype)], axis=0)
    for idx, s in enumerate(shifts):
        sh = xs_c if s == 0 else pltpu.roll(xs_c, (-s) % FP, 1)
        stk1_ref[pl.ds(idx * CP, CP), :] = sh
    acc1 = jnp.dot(w1_ref[...], stk1_ref[...], preferred_element_type=f32)
    # BN1 + ReLU; re-zero halo/tail so conv #2 sees proper zero padding.
    mid = jnp.maximum(acc1 * sc1 + bi1, 0.0) * mask          # (MP, FP), pad rows 0

    # ---- conv #2 (grouped 7x7, CM -> C) as ONE stacked-K matmul ---------------
    # channel_shuffle(groups=4) is already folded into w2 / sc2 / bi2.
    mid_c = mid.astype(cdtype)
    for idx, s in enumerate(shifts):
        sh = mid_c if s == 0 else pltpu.roll(mid_c, (-s) % FP, 1)
        stk2_ref[pl.ds(idx * MP, MP), :] = sh
    acc2 = jnp.dot(w2_ref[...], stk2_ref[...], preferred_element_type=f32)
    z = acc2 * sc2 + bi2

    if cdtype == jnp.bfloat16:
        # fast path: EUP approx reciprocal instead of a VALU Newton divide
        satt = pl.reciprocal(1.0 + jnp.exp(-z), approx=True)
    else:
        satt = 1.0 / (1.0 + jnp.exp(-z))         # exact for the 1e-4 check

    # out = (x * channel_att) * shuffled spatial_att ; zero at halo/tail lanes.
    o_ref[...] = xs * satt


def gam_attention(x, params, *, groups=4, compute_dtype=jnp.bfloat16):
    """GAM_Attention forward (inference-mode BN) as one Pallas TPU kernel."""
    N, C, H, W = x.shape
    CR = params["ca_w1"].shape[0]               # channel-attention hidden = C // rate
    CM = params["conv1_w"].shape[0]             # spatial-attention mid channels
    HP, WP = H + 2 * PAD, W + 2 * PAD
    FRAME = HP * WP
    FP = ((FRAME + 127) // 128) * 128           # per-frame lane-dense length
    f32 = jnp.float32

    sub = 16 if compute_dtype == jnp.bfloat16 else 8     # sublane tile for dtype
    CP = ((C + sub - 1) // sub) * sub            # stack row stride, conv #1
    MP = ((CM + sub - 1) // sub) * sub           # padded mid-channel count
    assert MP <= C, "packed-param layout assumes padded mid channels <= C"

    # --- layout: NCHW -> (C, N*FP): zero 3px spatial halo per frame + zero tail
    xt = jnp.transpose(x.astype(f32), (1, 0, 2, 3))              # (C, N, H, W)
    xp = jnp.pad(xt, ((0, 0), (0, 0), (PAD, PAD), (PAD, PAD)))   # (C, N, HP, WP)
    xf = jnp.pad(xp.reshape(C, N, FRAME), ((0, 0), (0, 0), (0, FP - FRAME)))
    x_flat = xf.reshape(C, N * FP)
    # TODO(synk): for production sizes fold this transpose/pad (and the inverse
    # slice/transpose) into the kernel via BlockSpec index_maps over NCHW.

    # --- per-frame interior-pixel mask (valid, non-halo, non-tail positions) --
    hp_i, wp_i = np.arange(HP), np.arange(WP)
    m2d = (((hp_i >= PAD) & (hp_i < PAD + H))[:, None] &
           ((wp_i >= PAD) & (wp_i < PAD + W))[None, :])
    mask_np = np.zeros((1, FP), np.float32)
    mask_np[0, :FRAME] = m2d.reshape(-1).astype(np.float32)
    mask = jnp.asarray(mask_np)

    # --- fold BatchNorm (inference) + conv bias into per-channel scale/bias ---
    eps = 1e-5
    sc1 = params["bn1_gamma"] / jnp.sqrt(params["bn1_var"] + eps)
    bi1 = sc1 * (params["conv1_b"] - params["bn1_mean"]) + params["bn1_beta"]
    sc2 = params["bn2_gamma"] / jnp.sqrt(params["bn2_var"] + eps)
    bi2 = sc2 * (params["conv2_b"] - params["bn2_mean"]) + params["bn2_beta"]

    # --- dense-ify grouped conv weights, fold channel_shuffle into conv #2 ----
    w1 = np.asarray(params["conv1_w"], np.float32)   # (CM, C//groups, 7, 7)
    w2 = np.asarray(params["conv2_w"], np.float32)   # (C,  CM//groups, 7, 7)
    ipg1, opg1 = C // groups, CM // groups
    ipg2, opg2 = CM // groups, C // groups
    w1d = np.zeros((CM, C, KSIZE, KSIZE), np.float32)
    for o in range(CM):
        g = o // opg1
        w1d[o, g * ipg1:(g + 1) * ipg1] = w1[o]
    w2d = np.zeros((C, CM, KSIZE, KSIZE), np.float32)
    for o in range(C):
        g = o // opg2
        w2d[o, g * ipg2:(g + 1) * ipg2] = w2[o]

    cpg = C // SHUFFLE_GROUPS
    perm = np.array([(j % SHUFFLE_GROUPS) * cpg + j // SHUFFLE_GROUPS
                     for j in range(C)])
    w2d = w2d[perm]
    sc2 = sc2[perm]
    bi2 = bi2[perm]

    # --- stack the 49 taps into single lane-dense matmul weights --------------
    # conv #1: (MP, 49*CP), conv #2: (C, 49*MP); pad rows/cols are zero so the
    # stacked-K matmul is exactly the sum of the per-tap matmuls.
    w1_taps = w1d.transpose(2, 3, 0, 1).reshape(NTAPS, CM, C)
    w1_taps = np.pad(w1_taps, ((0, 0), (0, MP - CM), (0, CP - C)))
    w1_stack = jnp.asarray(
        w1_taps.transpose(1, 0, 2).reshape(MP, NTAPS * CP)).astype(compute_dtype)
    w2_taps = w2d.transpose(2, 3, 0, 1).reshape(NTAPS, C, CM)
    w2_taps = np.pad(w2_taps, ((0, 0), (0, 0), (0, MP - CM)))
    w2_stack = jnp.asarray(
        w2_taps.transpose(1, 0, 2).reshape(C, NTAPS * MP)).astype(compute_dtype)

    # --- pack all tiny per-channel vectors into ONE (C, 6) ref ----------------
    def col(v):
        v = jnp.asarray(v, f32).reshape(-1)
        return jnp.pad(v, (0, C - v.shape[0]))[:, None]

    packed = jnp.concatenate(
        [col(params["ca_b1"]), col(params["ca_b2"]),
         col(sc1), col(bi1), col(sc2), col(bi2)], axis=1)

    caw1 = jnp.asarray(params["ca_w1"], f32).astype(compute_dtype)
    caw2 = jnp.asarray(params["ca_w2"], f32).astype(compute_dtype)

    kernel = functools.partial(_gam_kernel, C, CM, CR, CP, MP, WP, compute_dtype)
    out_flat = pl.pallas_call(
        kernel,
        out_shape=jax.ShapeDtypeStruct((C, N * FP), f32),
        grid=(N,),
        in_specs=[
            pl.BlockSpec((C, FP), lambda b: (0, b)),            # x: one frame/step
            pl.BlockSpec((1, FP), lambda b: (0, 0)),            # mask (shared)
            pl.BlockSpec((CR, C), lambda b: (0, 0)),            # ca_w1
            pl.BlockSpec((C, CR), lambda b: (0, 0)),            # ca_w2
            pl.BlockSpec((MP, NTAPS * CP), lambda b: (0, 0)),   # stacked conv1 W
            pl.BlockSpec((C, NTAPS * MP), lambda b: (0, 0)),    # stacked conv2 W
            pl.BlockSpec((C, 6), lambda b: (0, 0)),             # packed params
        ],
        out_specs=pl.BlockSpec((C, FP), lambda b: (0, b)),
        scratch_shapes=[pltpu.VMEM((NTAPS * CP, FP), compute_dtype),
                        pltpu.VMEM((NTAPS * MP, FP), compute_dtype)],
        compiler_params=pltpu.CompilerParams(
            dimension_semantics=("parallel",)),                 # v7x: 2 TCs busy
    )(x_flat, mask, caw1, caw2, w1_stack, w2_stack, packed)

    out = out_flat.reshape(C, N, FP)[:, :, :FRAME].reshape(C, N, HP, WP)
    out = out[:, :, PAD:PAD + H, PAD:PAD + W]
    return jnp.transpose(out, (1, 0, 2, 3))                     # back to NCHW


# ----------------------------- pure-JAX reference -----------------------------
def _channel_shuffle(x, groups):
    n, c, h, w = x.shape
    x = x.reshape(n, groups, c // groups, h, w)
    x = jnp.transpose(x, (0, 2, 1, 3, 4))
    return x.reshape(n, c, h, w)


def reference(x, p, *, groups=4):
    N, C, H, W = x.shape
    hi = lax.Precision.HIGHEST
    xp = jnp.transpose(x, (0, 2, 3, 1)).reshape(N, H * W, C)
    a = jnp.maximum(
        jnp.einsum("npc,rc->npr", xp, p["ca_w1"], precision=hi) + p["ca_b1"], 0.0)
    att = jnp.einsum("npr,cr->npc", a, p["ca_w2"], precision=hi) + p["ca_b2"]
    att = jnp.transpose(att.reshape(N, H, W, C), (0, 3, 1, 2))
    xs = x * att

    def conv(inp, w, b, fg):
        y = lax.conv_general_dilated(
            inp, w, (1, 1), ((PAD, PAD), (PAD, PAD)),
            dimension_numbers=("NCHW", "OIHW", "NCHW"),
            feature_group_count=fg, precision=hi)
        return y + b[None, :, None, None]

    def bn(y, g, b, m, v):
        s = g / jnp.sqrt(v + 1e-5)
        return (y - m[None, :, None, None]) * s[None, :, None, None] + \
            b[None, :, None, None]

    y = conv(xs, p["conv1_w"], p["conv1_b"], groups)
    y = jnp.maximum(bn(y, p["bn1_gamma"], p["bn1_beta"],
                       p["bn1_mean"], p["bn1_var"]), 0.0)
    z = conv(y, p["conv2_w"], p["conv2_b"], groups)
    z = bn(z, p["bn2_gamma"], p["bn2_beta"], p["bn2_mean"], p["bn2_var"])
    satt = _channel_shuffle(jax.nn.sigmoid(z), 4)
    return xs * satt


if __name__ == "__main__":
    # GAM_Attention(c1=16, c2=16, group=True, rate=4)
    # (c1=16 is the smallest size satisfying the groups=4 grouped-conv constraint)
    N, C, H, W = 2, 16, 16, 16
    rate, groups = 4, 4
    CR = C // rate          # channel-attention hidden width
    CM = C // rate          # spatial-attention mid channels

    key = jax.random.PRNGKey(0)
    ks = jax.random.split(key, 17)
    nrm = jax.random.normal
    params = {
        "ca_w1": 0.3 * nrm(ks[0], (CR, C), jnp.float32),
        "ca_b1": 0.1 * nrm(ks[1], (CR,), jnp.float32),
        "ca_w2": 0.3 * nrm(ks[2], (C, CR), jnp.float32),
        "ca_b2": 0.1 * nrm(ks[3], (C,), jnp.float32),
        "conv1_w": 0.1 * nrm(ks[4], (CM, C // groups, KSIZE, KSIZE), jnp.float32),
        "conv1_b": 0.1 * nrm(ks[5], (CM,), jnp.float32),
        "bn1_gamma": 1.0 + 0.1 * nrm(ks[6], (CM,), jnp.float32),
        "bn1_beta": 0.1 * nrm(ks[7], (CM,), jnp.float32),
        "bn1_mean": 0.1 * nrm(ks[8], (CM,), jnp.float32),
        "bn1_var": 1.0 + 0.1 * jnp.abs(nrm(ks[9], (CM,), jnp.float32)),
        "conv2_w": 0.1 * nrm(ks[10], (C, CM // groups, KSIZE, KSIZE), jnp.float32),
        "conv2_b": 0.1 * nrm(ks[11], (C,), jnp.float32),
        "bn2_gamma": 1.0 + 0.1 * nrm(ks[12], (C,), jnp.float32),
        "bn2_beta": 0.1 * nrm(ks[13], (C,), jnp.float32),
        "bn2_mean": 0.1 * nrm(ks[14], (C,), jnp.float32),
        "bn2_var": 1.0 + 0.1 * jnp.abs(nrm(ks[15], (C,), jnp.float32)),
    }
    x = jax.random.normal(ks[16], (N, C, H, W), jnp.float32)

    ref = reference(x, params, groups=groups)

    # Exact path (f32 operands): tight check against the f32 reference.
    out = jax.block_until_ready(
        gam_attention(x, params, groups=groups, compute_dtype=jnp.float32))
    assert out.shape == ref.shape == (N, C, H, W), (out.shape, ref.shape)
    err32 = float(jnp.max(jnp.abs(out - ref)))
    assert jnp.allclose(out, ref, atol=1e-4, rtol=1e-4), err32

    # Fast path (bf16 rolls / stacks / MXU operands, f32 accumulation + math).
    # Tolerance is deliberately loose: this is bf16 storage error, not a bug.
    out_bf = jax.block_until_ready(
        gam_attention(x, params, groups=groups, compute_dtype=jnp.bfloat16))
    err_bf = jnp.abs(out_bf - ref)
    assert bool(jnp.all(jnp.isfinite(out_bf)))
    assert float(jnp.max(err_bf)) < 0.75 and float(jnp.mean(err_bf)) < 0.05, (
        float(jnp.max(err_bf)), float(jnp.mean(err_bf)))

    print("KERNEL_OK")
</pallas_src>

<mosaic_0001>
module attributes {stable_mosaic.version = 11 : i64} {
  func.func @_gam_kernel(%arg0: i32, %arg1: memref<16x512xf32, #tpu.memory_space<vmem>>, %arg2: memref<1x512xf32, #tpu.memory_space<vmem>>, %arg3: memref<4x16xf32, #tpu.memory_space<vmem>>, %arg4: memref<16x4xf32, #tpu.memory_space<vmem>>, %arg5: memref<8x784xf32, #tpu.memory_space<vmem>>, %arg6: memref<16x392xf32, #tpu.memory_space<vmem>>, %arg7: memref<16x6xf32, #tpu.memory_space<vmem>>, %arg8: memref<16x512xf32, #tpu.memory_space<vmem>>, %arg9: memref<784x512xf32, #tpu.memory_space<vmem>>, %arg10: memref<392x512xf32, #tpu.memory_space<vmem>>) attributes {dimension_semantics = [#tpu.dimension_semantics<parallel>], iteration_bounds = array<i64: 2>, scalar_prefetch = 0 : i64, scratch_operands = 2 : i64, tpu.core_type = #tpu.core_type<tc>, window_params = [{transform_indices = @transform_0, window_bounds = array<i64: 16, 512>}, {pipeline_mode = #tpu.pipeline_mode<synchronous>, transform_indices = @transform_1, window_bounds = array<i64: 1, 512>}, {pipeline_mode = #tpu.pipeline_mode<synchronous>, transform_indices = @transform_2, window_bounds = array<i64: 4, 16>}, {pipeline_mode = #tpu.pipeline_mode<synchronous>, transform_indices = @transform_3, window_bounds = array<i64: 16, 4>}, {pipeline_mode = #tpu.pipeline_mode<synchronous>, transform_indices = @transform_4, window_bounds = array<i64: 8, 784>}, {pipeline_mode = #tpu.pipeline_mode<synchronous>, transform_indices = @transform_5, window_bounds = array<i64: 16, 392>}, {pipeline_mode = #tpu.pipeline_mode<synchronous>, transform_indices = @transform_6, window_bounds = array<i64: 16, 6>}, {transform_indices = @transform_7, window_bounds = array<i64: 16, 512>}]} {
    %c0 = arith.constant 0 : index
    %c0_0 = arith.constant 0 : index
    %0 = vector.load %arg1[%c0, %c0_0] : memref<16x512xf32, #tpu.memory_space<vmem>>, vector<16x512xf32>
    %c0_1 = arith.constant 0 : index
    %c0_2 = arith.constant 0 : index
    %1 = vector.load %arg2[%c0_1, %c0_2] : memref<1x512xf32, #tpu.memory_space<vmem>>, vector<1x512xf32>
    %c0_3 = arith.constant 0 : index
    %c0_4 = arith.constant 0 : index
    %2 = vector.load %arg7[%c0_3, %c0_4] : memref<16x6xf32, #tpu.memory_space<vmem>>, vector<16x6xf32>
    %3 = vector.extract_strided_slice %2 {offsets = [0, 0], sizes = [4, 1], strides = [1, 1]} : vector<16x6xf32> to vector<4x1xf32>
    %4 = vector.extract_strided_slice %2 {offsets = [0, 1], sizes = [16, 1], strides = [1, 1]} : vector<16x6xf32> to vector<16x1xf32>
    %5 = vector.extract_strided_slice %2 {offsets = [0, 2], sizes = [8, 1], strides = [1, 1]} : vector<16x6xf32> to vector<8x1xf32>
    %6 = vector.extract_strided_slice %2 {offsets = [0, 3], sizes = [8, 1], strides = [1, 1]} : vector<16x6xf32> to vector<8x1xf32>
    %7 = vector.extract_strided_slice %2 {offsets = [0, 4], sizes = [16, 1], strides = [1, 1]} : vector<16x6xf32> to vector<16x1xf32>
    %8 = vector.extract_strided_slice %2 {offsets = [0, 5], sizes = [16, 1], strides = [1, 1]} : vector<16x6xf32> to vector<16x1xf32>
    %c0_5 = arith.constant 0 : index
    %c0_6 = arith.constant 0 : index
    %9 = vector.load %arg3[%c0_5, %c0_6] : memref<4x16xf32, #tpu.memory_space<vmem>>, vector<4x16xf32>
    %cst = arith.constant dense<0.000000e+00> : vector<4x512xf32>
    %10 = tpu.matmul %9, %0, %cst {dimension_numbers = #tpu.dot_dimension_numbers<[1], [0], [0], [1], [0, 0, 1, 1], [], []>} : vector<4x16xf32>, vector<16x512xf32>, vector<4x512xf32> -> vector<4x512xf32>
    %11 = vector.broadcast %3 : vector<4x1xf32> to vector<4x512xf32>
    %12 = arith.addf %10, %11 : vector<4x512xf32>
    %cst_7 = arith.constant 0.000000e+00 : f32
    %13 = vector.broadcast %cst_7 : f32 to vector<4x512xf32>
    %14 = arith.maximumf %12, %13 : vector<4x512xf32>
    %c0_8 = arith.constant 0 : index
    %c0_9 = arith.constant 0 : index
    %15 = vector.load %arg4[%c0_8, %c0_9] : memref<16x4xf32, #tpu.memory_space<vmem>>, vector<16x4xf32>
    %cst_10 = arith.constant dense<0.000000e+00> : vector<16x512xf32>
    %16 = tpu.matmul %15, %14, %cst_10 {dimension_numbers = #tpu.dot_dimension_numbers<[1], [0], [0], [1], [0, 0, 1, 1], [], []>} : vector<16x4xf32>, vector<4x512xf32>, vector<16x512xf32> -> vector<16x512xf32>
    %17 = vector.broadcast %4 : vector<16x1xf32> to vector<16x512xf32>
    %18 = arith.addf %16, %17 : vector<16x512xf32>
    %19 = arith.mulf %0, %18 : vector<16x512xf32>
    %c69_i32 = arith.constant 69 : i32
    %20 = tpu.dynamic_rotate %19 by %c69_i32 dim 1 : vector<16x512xf32>, i32 -> vector<16x512xf32>
    %c0_11 = arith.constant 0 : index
    %c0_12 = arith.constant 0 : index
    %21 = vector.load %arg9[%c0_11, %c0_12] : memref<784x512xf32, #tpu.memory_space<vmem>>, vector<16x512xf32>
    tpu.vector_store %arg9[%c0_11, %c0_12], %20 {strides = array<i32>} : memref<784x512xf32, #tpu.memory_space<vmem>>, vector<16x512xf32>,
    %c68_i32 = arith.constant 68 : i32
    %22 = tpu.dynamic_rotate %19 by %c68_i32 dim 1 : vector<16x512xf32>, i32 -> vector<16x512xf32>
    %c16 = arith.constant 16 : index
    %c0_13 = arith.constant 0 : index
    %23 = vector.load %arg9[%c16, %c0_13] : memref<784x512xf32, #tpu.memory_space<vmem>>, vector<16x512xf32>
    tpu.vector_store %arg9[%c16, %c0_13], %22 {strides = array<i32>} : memref<784x512xf32, #tpu.memory_space<vmem>>, vector<16x512xf32>,
    %c67_i32 = arith.constant 67 : i32
    %24 = tpu.dynamic_rotate %19 by %c67_i32 dim 1 : vector<16x512xf32>, i32 -> vector<16x512xf32>
    %c32 = arith.constant 32 : index
    %c0_14 = arith.constant 0 : index
    %25 = vector.load %arg9[%c32, %c0_14] : memref<784x512xf32, #tpu.memory_space<vmem>>, vector<16x512xf32>
    tpu.vector_store %arg9[%c32, %c0_14], %24 {strides = array<i32>} : memref<784x512xf32, #tpu.memory_space<vmem>>, vector<16x512xf32>,
    %c66_i32 = arith.constant 66 : i32
    %26 = tpu.dynamic_rotate %19 by %c66_i32 dim 1 : vector<16x512xf32>, i32 -> vector<16x512xf32>
    %c48 = arith.constant 48 : index
    %c0_15 = arith.constant 0 : index
    %27 = vector.load %arg9[%c48, %c0_15] : memref<784x512xf32, #tpu.memory_space<vmem>>, vector<16x512xf32>
    tpu.vector_store %arg9[%c48, %c0_15], %26 {strides = array<i32>} : memref<784x512xf32, #tpu.memory_space<vmem>>, vector<16x512xf32>,
    %c65_i32 = arith.constant 65 : i32
    %28 = tpu.dynamic_rotate %19 by %c65_i32 dim 1 : vector<16x512xf32>, i32 -> vector<16x512xf32>
    %c64 = arith.constant 64 : index
    %c0_16 = arith.constant 0 : index
    %29 = vector.load %arg9[%c64, %c0_16] : memref<784x512xf32, #tpu.memory_space<vmem>>, vector<16x512xf32>
    tpu.vector_store %arg9[%c64, %c0_16], %28 {strides = array<i32>} : memref<784x512xf32, #tpu.memory_space<vmem>>, vector<16x512xf32>,
    %c64_i32 = arith.constant 64 : i32
    %30 = tpu.dynamic_rotate %19 by %c64_i32 dim 1 : vector<16x512xf32>, i32 -> vector<16x512xf32>
    %c80 = arith.constant 80 : index
    %c0_17 = arith.constant 0 : index
    %31 = vector.load %arg9[%c80, %c0_17] : memref<784x512xf32, #tpu.memory_space<vmem>>, vector<16x512xf32>
    tpu.vector_store %arg9[%c80, %c0_17], %30 {strides = array<i32>} : memref<784x512xf32, #tpu.memory_space<vmem>>, vector<16x512xf32>,
    %c63_i32 = arith.constant 63 : i32
    %32 = tpu.dynamic_rotate %19 by %c63_i32 dim 1 : vector<16x512xf32>, i32 -> vector<16x512xf32>
    %c96 = arith.constant 96 : index
    %c0_18 = arith.constant 0 : index
    %33 = vector.load %arg9[%c96, %c0_18] : memref<784x512xf32, #tpu.memory_space<vmem>>, vector<16x512xf32>
    tpu.vector_store %arg9[%c96, %c0_18], %32 {strides = array<i32>} : memref<784x512xf32, #tpu.memory_space<vmem>>, vector<16x512xf32>,
    %c47_i32 = arith.constant 47 : i32
    %34 = tpu.dynamic_rotate %19 by %c47_i32 dim 1 : vector<16x512xf32>, i32 -> vector<16x512xf32>
    %c112 = arith.constant 112 : index
    %c0_19 = arith.constant 0 : index
    %35 = vector.load %arg9[%c112, %c0_19] : memref<784x512xf32, #tpu.memory_space<vmem>>, vector<16x512xf32>
    tpu.vector_store %arg9[%c112, %c0_19], %34 {strides = array<i32>} : memref<784x512xf32, #tpu.memory_space<vmem>>, vector<16x512xf32>,
    %c46_i32 = arith.constant 46 : i32
    %36 = tpu.dynamic_rotate %19 by %c46_i32 dim 1 : vector<16x512xf32>, i32 -> vector<16x512xf32>
    %c128 = arith.constant 128 : index
    %c0_20 = arith.constant 0 : index
    %37 = vector.load %arg9[%c128, %c0_20] : memref<784x512xf32, #tpu.memory_space<vmem>>, vector<16x512xf32>
    tpu.vector_store %arg9[%c128, %c0_20], %36 {strides = array<i32>} : memref<784x512xf32, #tpu.memory_space<vmem>>, vector<16x512xf32>,
    %c45_i32 = arith.constant 45 : i32
    %38 = tpu.dynamic_rotate %19 by %c45_i32 dim 1 : vector<16x512xf32>, i32 -> vector<16x512xf32>
    %c144 = arith.constant 144 : index
    %c0_21 = arith.constant 0 : index
    %39 = vector.load %arg9[%c144, %c0_21] : memref<784x512xf32, #tpu.memory_space<vmem>>, vector<16x512xf32>
    tpu.vector_store %arg9[%c144, %c0_21], %38 {strides = array<i32>} : memref<784x512xf32, #tpu.memory_space<vmem>>, vector<16x512xf32>,
    %c44_i32 = arith.constant 44 : i32
    %40 = tpu.dynamic_rotate %19 by %c44_i32 dim 1 : vector<16x512xf32>, i32 -> vector<16x512xf32>
    %c160 = arith.constant 160 : index
    %c0_22 = arith.constant 0 : index
    %41 = vector.load %arg9[%c160, %c0_22] : memref<784x512xf32, #tpu.memory_space<vmem>>, vector<16x512xf32>
    tpu.vector_store %arg9[%c160, %c0_22], %40 {strides = array<i32>} : memref<784x512xf32, #tpu.memory_space<vmem>>, vector<16x512xf32>,
    %c43_i32 = arith.constant 43 : i32
    %42 = tpu.dynamic_rotate %19 by %c43_i32 dim 1 : vector<16x512xf32>, i32 -> vector<16x512xf32>
    %c176 = arith.constant 176 : index
    %c0_23 = arith.constant 0 : index
    %43 = vector.load %arg9[%c176, %c0_23] : memref<784x512xf32, #tpu.memory_space<vmem>>, vector<16x512xf32>
    tpu.vector_store %arg9[%c176, %c0_23], %42 {strides = array<i32>} : memref<784x512xf32, #tpu.memory_space<vmem>>, vector<16x512xf32>,
    %c42_i32 = arith.constant 42 : i32
    %44 = tpu.dynamic_rotate %19 by %c42_i32 dim 1 : vector<16x512xf32>, i32 -> vector<16x512xf32>
    %c192 = arith.constant 192 : index
    %c0_24 = arith.constant 0 : index
    %45 = vector.load %arg9[%c192, %c0_24] : memref<784x512xf32, #tpu.memory_space<vmem>>, vector<16x512xf32>
    tpu.vector_store %arg9[%c192, %c0_24], %44 {strides = array<i32>} : memref<784x512xf32, #tpu.memory_space<vmem>>, vector<16x512xf32>,
    %c41_i32 = arith.constant 41 : i32
    %46 = tpu.dynamic_rotate %19 by %c41_i32 dim 1 : vector<16x512xf32>, i32 -> vector<16x512xf32>
    %c208 = arith.constant 208 : index
    %c0_25 = arith.constant 0 : index
    %47 = vector.load %arg9[%c208, %c0_25] : memref<784x512xf32, #tpu.memory_space<vmem>>, vector<16x512xf32>
    tpu.vector_store %arg9[%c208, %c0_25], %46 {strides = array<i32>} : memref<784x512xf32, #tpu.memory_space<vmem>>, vector<16x512xf32>,
    %c25_i32 = arith.constant 25 : i32
    %48 = tpu.dynamic_rotate %19 by %c25_i32 dim 1 : vector<16x512xf32>, i32 -> vector<16x512xf32>
    %c224 = arith.constant 224 : index
    %c0_26 = arith.constant 0 : index
    %49 = vector.load %arg9[%c224, %c0_26] : memref<784x512xf32, #tpu.memory_space<vmem>>, vector<16x512xf32>
    tpu.vector_store %arg9[%c224, %c0_26], %48 {strides = array<i32>} : memref<784x512xf32, #tpu.memory_space<vmem>>, vector<16x512xf32>,
    %c24_i32 = arith.constant 24 : i32
    %50 = tpu.dynamic_rotate %19 by %c24_i32 dim 1 : vector<16x512xf32>, i32 -> vector<16x512xf32>
    %c240 = arith.constant 240 : index
    %c0_27 = arith.constant 0 : index
    %51 = vector.load %arg9[%c240, %c0_27] : memref<784x512xf32, #tpu.memory_space<vmem>>, vector<16x512xf32>
    tpu.vector_store %arg9[%c240, %c0_27], %50 {strides = array<i32>} : memref<784x512xf32, #tpu.memory_space<vmem>>, vector<16x512xf32>,
    %c23_i32 = arith.constant 23 : i32
    %52 = tpu.dynamic_rotate %19 by %c23_i32 dim 1 : vector<16x512xf32>, i32 -> vector<16x512xf32>
    %c256 = arith.constant 256 : index
    %c0_28 = arith.constant 0 : index
    %53 = vector.load %arg9[%c256, %c0_28] : memref<784x512xf32, #tpu.memory_space<vmem>>, vector<16x512xf32>
    tpu.vector_store %arg9[%c256, %c0_28], %52 {strides = array<i32>} : memref<784x512xf32, #tpu.memory_space<vmem>>, vector<16x512xf32>,
    %c22_i32 = arith.constant 22 : i32
    %54 = tpu.dynamic_rotate %19 by %c22_i32 dim 1 : vector<16x512xf32>, i32 -> vector<16x512xf32>
    %c272 = arith.constant 272 : index
    %c0_29 = arith.constant 0 : index
    %55 = vector.load %arg9[%c272, %c0_29] : memref<784x512xf32, #tpu.memory_space<vmem>>, vector<16x512xf32>
    tpu.vector_store %arg9[%c272, %c0_29], %54 {strides = array<i32>} : memref<784x512xf32, #tpu.memory_space<vmem>>, vector<16x512xf32>,
    %c21_i32 = arith.constant 21 : i32
    %56 = tpu.dynamic_rotate %19 by %c21_i32 dim 1 : vector<16x512xf32>, i32 -> vector<16x512xf32>
    %c288 = arith.constant 288 : index
    %c0_30 = arith.constant 0 : index
    %57 = vector.load %arg9[%c288, %c0_30] : memref<784x512xf32, #tpu.memory_space<vmem>>, vector<16x512xf32>
    tpu.vector_store %arg9[%c288, %c0_30], %56 {strides = array<i32>} : memref<784x512xf32, #tpu.memory_space<vmem>>, vector<16x512xf32>,
    %c20_i32 = arith.constant 20 : i32
    %58 = tpu.dynamic_rotate %19 by %c20_i32 dim 1 : vector<16x512xf32>, i32 -> vector<16x512xf32>
    %c304 = arith.constant 304 : index
    %c0_31 = arith.constant 0 : index
    %59 = vector.load %arg9[%c304, %c0_31] : memref<784x512xf32, #tpu.memory_space<vmem>>, vector<16x512xf32>
    tpu.vector_store %arg9[%c304, %c0_31], %58 {strides = array<i32>} : memref<784x512xf32, #tpu.memory_space<vmem>>, vector<16x512xf32>,
    %c19_i32 = arith.constant 19 : i32
    %60 = tpu.dynamic_rotate %19 by %c19_i32 dim 1 : vector<16x512xf32>, i32 -> vector<16x512xf32>
    %c320 = arith.constant 320 : index
    %c0_32 = arith.constant 0 : index
    %61 = vector.load %arg9[%c320, %c0_32] : memref<784x512xf32, #tpu.memory_space<vmem>>, vector<16x512xf32>
    tpu.vector_store %arg9[%c320, %c0_32], %60 {strides = array<i32>} : memref<784x512xf32, #tpu.memory_space<vmem>>, vector<16x512xf32>,
    %c3_i32 = arith.constant 3 : i32
    %62 = tpu.dynamic_rotate %19 by %c3_i32 dim 1 : vector<16x512xf32>, i32 -> vector<16x512xf32>
    %c336 = arith.constant 336 : index
    %c0_33 = arith.constant 0 : index
    %63 = vector.load %arg9[%c336, %c0_33] : memref<784x512xf32, #tpu.memory_space<vmem>>, vector<16x512xf32>
    tpu.vector_store %arg9[%c336, %c0_33], %62 {strides = array<i32>} : memref<784x512xf32, #tpu.memory_space<vmem>>, vector<16x512xf32>,
    %c2_i32 = arith.constant 2 : i32
    %64 = tpu.dynamic_rotate %19 by %c2_i32 dim 1 : vector<16x512xf32>, i32 -> vector<16x512xf32>
    %c352 = arith.constant 352 : index
    %c0_34 = arith.constant 0 : index
    %65 = vector.load %arg9[%c352, %c0_34] : memref<784x512xf32, #tpu.memory_space<vmem>>, vector<16x512xf32>
    tpu.vector_store %arg9[%c352, %c0_34], %64 {strides = array<i32>} : memref<784x512xf32, #tpu.memory_space<vmem>>, vector<16x512xf32>,
    %c1_i32 = arith.constant 1 : i32
    %66 = tpu.dynamic_rotate %19 by %c1_i32 dim 1 : vector<16x512xf32>, i32 -> vector<16x512xf32>
    %c368 = arith.constant 368 : index
    %c0_35 = arith.constant 0 : index
    %67 = vector.load %arg9[%c368, %c0_35] : memref<784x512xf32, #tpu.memory_space<vmem>>, vector<16x512xf32>
    tpu.vector_store %arg9[%c368, %c0_35], %66 {strides = array<i32>} : memref<784x512xf32, #tpu.memory_space<vmem>>, vector<16x512xf32>,
    %c384 = arith.constant 384 : index
    %c0_36 = arith.constant 0 : index
    %68 = vector.load %arg9[%c384, %c0_36] : memref<784x512xf32, #tpu.memory_space<vmem>>, vector<16x512xf32>
    tpu.vector_store %arg9[%c384, %c0_36], %19 {strides = array<i32>} : memref<784x512xf32, #tpu.memory_space<vmem>>, vector<16x512xf32>,
    %c511_i32 = arith.constant 511 : i32
    %69 = tpu.dynamic_rotate %19 by %c511_i32 dim 1 : vector<16x512xf32>, i32 -> vector<16x512xf32>
    %c400 = arith.constant 400 : index
    %c0_37 = arith.constant 0 : index
    %70 = vector.load %arg9[%c400, %c0_37] : memref<784x512xf32, #tpu.memory_space<vmem>>, vector<16x512xf32>
    tpu.vector_store %arg9[%c400, %c0_37], %69 {strides = array<i32>} : memref<784x512xf32, #tpu.memory_space<vmem>>, vector<16x512xf32>,
    %c510_i32 = arith.constant 510 : i32
    %71 = tpu.dynamic_rotate %19 by %c510_i32 dim 1 : vector<16x512xf32>, i32 -> vector<16x512xf32>
    %c416 = arith.constant 416 : index
    %c0_38 = arith.constant 0 : index
    %72 = vector.load %arg9[%c416, %c0_38] : memref<784x512xf32, #tpu.memory_space<vmem>>, vector<16x512xf32>
    tpu.vector_store %arg9[%c416, %c0_38], %71 {strides = array<i32>} : memref<784x512xf32, #tpu.memory_space<vmem>>, vector<16x512xf32>,
    %c509_i32 = arith.constant 509 : i32
    %73 = tpu.dynamic_rotate %19 by %c509_i32 dim 1 : vector<16x512xf32>, i32 -> vector<16x512xf32>
    %c432 = arith.constant 432 : index
    %c0_39 = arith.constant 0 : index
    %74 = vector.load %arg9[%c432, %c0_39] : memref<784x512xf32, #tpu.memory_space<vmem>>, vector<16x512xf32>
    tpu.vector_store %arg9[%c432, %c0_39], %73 {strides = array<i32>} : memref<784x512xf32, #tpu.memory_space<vmem>>, vector<16x512xf32>,
    %c493_i32 = arith.constant 493 : i32
    %75 = tpu.dynamic_rotate %19 by %c493_i32 dim 1 : vector<16x512xf32>, i32 -> vector<16x512xf32>
    %c448 = arith.constant 448 : index
    %c0_40 = arith.constant 0 : index
    %76 = vector.load %arg9[%c448, %c0_40] : memref<784x512xf32, #tpu.memory_space<vmem>>, vector<16x512xf32>
    tpu.vector_store %arg9[%c448, %c0_40], %75 {strides = array<i32>} : memref<784x512xf32, #tpu.memory_space<vmem>>, vector<16x512xf32>,
    %c492_i32 = arith.constant 492 : i32
    %77 = tpu.dynamic_rotate %19 by %c492_i32 dim 1 : vector<16x512xf32>, i32 -> vector<16x512xf32>
    %c464 = arith.constant 464 : index
    %c0_41 = arith.constant 0 : index
    %78 = vector.load %arg9[%c464, %c0_41] : memref<784x512xf32, #tpu.memory_space<vmem>>, vector<16x512xf32>
    tpu.vector_store %arg9[%c464, %c0_41], %77 {strides = array<i32>} : memref<784x512xf32, #tpu.memory_space<vmem>>, vector<16x512xf32>,
    %c491_i32 = arith.constant 491 : i32
    %79 = tpu.dynamic_rotate %19 by %c491_i32 dim 1 : vector<16x512xf32>, i32 -> vector<16x512xf32>
    %c480 = arith.constant 480 : index
    %c0_42 = arith.constant 0 : index
    %80 = vector.load %arg9[%c480, %c0_42] : memref<784x512xf32, #tpu.memory_space<vmem>>, vector<16x512xf32>
    tpu.vector_store %arg9[%c480, %c0_42], %79 {strides = array<i32>} : memref<784x512xf32, #tpu.memory_space<vmem>>, vector<16x512xf32>,
    %c490_i32 = arith.constant 490 : i32
    %81 = tpu.dynamic_rotate %19 by %c490_i32 dim 1 : vector<16x512xf32>, i32 -> vector<16x512xf32>
    %c496 = arith.constant 496 : index
    %c0_43 = arith.constant 0 : index
    %82 = vector.load %arg9[%c496, %c0_43] : memref<784x512xf32, #tpu.memory_space<vmem>>, vector<16x512xf32>
    tpu.vector_store %arg9[%c496, %c0_43], %81 {strides = array<i32>} : memref<784x512xf32, #tpu.memory_space<vmem>>, vector<16x512xf32>,
    %c489_i32 = arith.constant 489 : i32
    %83 = tpu.dynamic_rotate %19 by %c489_i32 dim 1 : vector<16x512xf32>, i32 -> vector<16x512xf32>
    %c512 = arith.constant 512 : index
    %c0_44 = arith.constant 0 : index
    %84 = vector.load %arg9[%c512, %c0_44] : memref<784x512xf32, #tpu.memory_space<vmem>>, vector<16x512xf32>
    tpu.vector_store %arg9[%c512, %c0_44], %83 {strides = array<i32>} : memref<784x512xf32, #tpu.memory_space<vmem>>, vector<16x512xf32>,
    %c488_i32 = arith.constant 488 : i32
    %85 = tpu.dynamic_rotate %19 by %c488_i32 dim 1 : vector<16x512xf32>, i32 -> vector<16x512xf32>
    %c528 = arith.constant 528 : index
    %c0_45 = arith.constant 0 : index
    %86 = vector.load %arg9[%c528, %c0_45] : memref<784x512xf32, #tpu.memory_space<vmem>>, vector<16x512xf32>
    tpu.vector_store %arg9[%c528, %c0_45], %85 {strides = array<i32>} : memref<784x512xf32, #tpu.memory_space<vmem>>, vector<16x512xf32>,
    %c487_i32 = arith.constant 487 : i32
    %87 = tpu.dynamic_rotate %19 by %c487_i32 dim 1 : vector<16x512xf32>, i32 -> vector<16x512xf32>
    %c544 = arith.constant 544 : index
    %c0_46 = arith.constant 0 : index
    %88 = vector.load %arg9[%c544, %c0_46] : memref<784x512xf32, #tpu.memory_space<vmem>>, vector<16x512xf32>
    tpu.vector_store %arg9[%c544, %c0_46], %87 {strides = array<i32>} : memref<784x512xf32, #tpu.memory_space<vmem>>, vector<16x512xf32>,
    %c471_i32 = arith.constant 471 : i32
    %89 = tpu.dynamic_rotate %19 by %c471_i32 dim 1 : vector<16x512xf32>, i32 -> vector<16x512xf32>
    %c560 = arith.constant 560 : index
    %c0_47 = arith.constant 0 : index
    %90 = vector.load %arg9[%c560, %c0_47] : memref<784x512xf32, #tpu.memory_space<vmem>>, vector<16x512xf32>
    tpu.vector_store %arg9[%c560, %c0_47], %89 {strides = array<i32>} : memref<784x512xf32, #tpu.memory_space<vmem>>, vector<16x512xf32>,
    %c470_i32 = arith.constant 470 : i32
    %91 = tpu.dynamic_rotate %19 by %c470_i32 dim 1 : vector<16x512xf32>, i32 -> vector<16x512xf32>
    %c576 = arith.constant 576 : index
    %c0_48 = arith.constant 0 : index
    %92 = vector.load %arg9[%c576, %c0_48] : memref<784x512xf32, #tpu.memory_space<vmem>>, vector<16x512xf32>
    tpu.vector_store %arg9[%c576, %c0_48], %91 {strides = array<i32>} : memref<784x512xf32, #tpu.memory_space<vmem>>, vector<16x512xf32>,
    %c469_i32 = arith.constant 469 : i32
    %93 = tpu.dynamic_rotate %19 by %c469_i32 dim 1 : vector<16x512xf32>, i32 -> vector<16x512xf32>
    %c592 = arith.constant 592 : index
    %c0_49 = arith.constant 0 : index
    %94 = vector.load %arg9[%c592, %c0_49] : memref<784x512xf32, #tpu.memory_space<vmem>>, vector<16x512xf32>
    tpu.vector_store %arg9[%c592, %c0_49], %93 {strides = array<i32>} : memref<784x512xf32, #tpu.memory_space<vmem>>, vector<16x512xf32>,
    %c468_i32 = arith.constant 468 : i32
    %95 = tpu.dynamic_rotate %19 by %c468_i32 dim 1 : vector<16x512xf32>, i32 -> vector<16x512xf32>
    %c608 = arith.constant 608 : index
    %c0_50 = arith.constant 0 : index
    %96 = vector.load %arg9[%c608, %c0_50] : memref<784x512xf32, #tpu.memory_space<vmem>>, vector<16x512xf32>
    tpu.vector_store %arg9[%c608, %c0_50], %95 {strides = array<i32>} : memref<784x512xf32, #tpu.memory_space<vmem>>, vector<16x512xf32>,
    %c467_i32 = arith.constant 467 : i32
    %97 = tpu.dynamic_rotate %19 by %c467_i32 dim 1 : vector<16x512xf32>, i32 -> vector<16x512xf32>
    %c624 = arith.constant 624 : index
    %c0_51 = arith.constant 0 : index
    %98 = vector.load %arg9[%c624, %c0_51] : memref<784x512xf32, #tpu.memory_space<vmem>>, vector<16x512xf32>
    tpu.vector_store %arg9[%c624, %c0_51], %97 {strides = array<i32>} : memref<784x512xf32, #tpu.memory_space<vmem>>, vector<16x512xf32>,
    %c466_i32 = arith.constant 466 : i32
    %99 = tpu.dynamic_rotate %19 by %c466_i32 dim 1 : vector<16x512xf32>, i32 -> vector<16x512xf32>
    %c640 = arith.constant 640 : index
    %c0_52 = arith.constant 0 : index
    %100 = vector.load %arg9[%c640, %c0_52] : memref<784x512xf32, #tpu.memory_space<vmem>>, vector<16x512xf32>
    tpu.vector_store %arg9[%c640, %c0_52], %99 {strides = array<i32>} : memref<784x512xf32, #tpu.memory_space<vmem>>, vector<16x512xf32>,
    %c465_i32 = arith.constant 465 : i32
    %101 = tpu.dynamic_rotate %19 by %c465_i32 dim 1 : vector<16x512xf32>, i32 -> vector<16x512xf32>
    %c656 = arith.constant 656 : index
    %c0_53 = arith.constant 0 : index
    %102 = vector.load %arg9[%c656, %c0_53] : memref<784x512xf32, #tpu.memory_space<vmem>>, vector<16x512xf32>
    tpu.vector_store %arg9[%c656, %c0_53], %101 {strides = array<i32>} : memref<784x512xf32, #tpu.memory_space<vmem>>, vector<16x512xf32>,
    %c449_i32 = arith.constant 449 : i32
    %103 = tpu.dynamic_rotate %19 by %c449_i32 dim 1 : vector<16x512xf32>, i32 -> vector<16x512xf32>
    %c672 = arith.constant 672 : index
    %c0_54 = arith.constant 0 : index
    %104 = vector.load %arg9[%c672, %c0_54] : memref<784x512xf32, #tpu.memory_space<vmem>>, vector<16x512xf32>
    tpu.vector_store %arg9[%c672, %c0_54], %103 {strides = array<i32>} : memref<784x512xf32, #tpu.memory_space<vmem>>, vector<16x512xf32>,
    %c448_i32 = arith.constant 448 : i32
    %105 = tpu.dynamic_rotate %19 by %c448_i32 dim 1 : vector<16x512xf32>, i32 -> vector<16x512xf32>
    %c688 = arith.constant 688 : index
    %c0_55 = arith.constant 0 : index
    %106 = vector.load %arg9[%c688, %c0_55] : memref<784x512xf32, #tpu.memory_space<vmem>>, vector<16x512xf32>
    tpu.vector_store %arg9[%c688, %c0_55], %105 {strides = array<i32>} : memref<784x512xf32, #tpu.memory_space<vmem>>, vector<16x512xf32>,
    %c447_i32 = arith.constant 447 : i32
    %107 = tpu.dynamic_rotate %19 by %c447_i32 dim 1 : vector<16x512xf32>, i32 -> vector<16x512xf32>
    %c704 = arith.constant 704 : index
    %c0_56 = arith.constant 0 : index
    %108 = vector.load %arg9[%c704, %c0_56] : memref<784x512xf32, #tpu.memory_space<vmem>>, vector<16x512xf32>
    tpu.vector_store %arg9[%c704, %c0_56], %107 {strides = array<i32>} : memref<784x512xf32, #tpu.memory_space<vmem>>, vector<16x512xf32>,
    %c446_i32 = arith.constant 446 : i32
    %109 = tpu.dynamic_rotate %19 by %c446_i32 dim 1 : vector<16x512xf32>, i32 -> vector<16x512xf32>
    %c720 = arith.constant 720 : index
    %c0_57 = arith.constant 0 : index
    %110 = vector.load %arg9[%c720, %c0_57] : memref<784x512xf32, #tpu.memory_space<vmem>>, vector<16x512xf32>
    tpu.vector_store %arg9[%c720, %c0_57], %109 {strides = array<i32>} : memref<784x512xf32, #tpu.memory_space<vmem>>, vector<16x512xf32>,
    %c445_i32 = arith.constant 445 : i32
    %111 = tpu.dynamic_rotate %19 by %c445_i32 dim 1 : vector<16x512xf32>, i32 -> vector<16x512xf32>
    %c736 = arith.constant 736 : index
    %c0_58 = arith.constant 0 : index
    %112 = vector.load %arg9[%c736, %c0_58] : memref<784x512xf32, #tpu.memory_space<vmem>>, vector<16x512xf32>
    tpu.vector_store %arg9[%c736, %c0_58], %111 {strides = array<i32>} : memref<784x512xf32, #tpu.memory_space<vmem>>, vector<16x512xf32>,
    %c444_i32 = arith.constant 444 : i32
    %113 = tpu.dynamic_rotate %19 by %c444_i32 dim 1 : vector<16x512xf32>, i32 -> vector<16x512xf32>
    %c752 = arith.constant 752 : index
    %c0_59 = arith.constant 0 : index
    %114 = vector.load %arg9[%c752, %c0_59] : memref<784x512xf32, #tpu.memory_space<vmem>>, vector<16x512xf32>
    tpu.vector_store %arg9[%c752, %c0_59], %113 {strides = array<i32>} : memref<784x512xf32, #tpu.memory_space<vmem>>, vector<16x512xf32>,
    %c443_i32 = arith.constant 443 : i32
    %115 = tpu.dynamic_rotate %19 by %c443_i32 dim 1 : vector<16x512xf32>, i32 -> vector<16x512xf32>
    %c768 = arith.constant 768 : index
    %c0_60 = arith.constant 0 : index
    %116 = vector.load %arg9[%c768, %c0_60] : memref<784x512xf32, #tpu.memory_space<vmem>>, vector<16x512xf32>
    tpu.vector_store %arg9[%c768, %c0_60], %115 {strides = array<i32>} : memref<784x512xf32, #tpu.memory_space<vmem>>, vector<16x512xf32>,
    %c0_61 = arith.constant 0 : index
    %c0_62 = arith.constant 0 : index
    %117 = vector.load %arg5[%c0_61, %c0_62] : memref<8x784xf32, #tpu.memory_space<vmem>>, vector<8x784xf32>
    %c0_63 = arith.constant 0 : index
    %c0_64 = arith.constant 0 : index
    %118 = vector.load %arg9[%c0_63, %c0_64] : memref<784x512xf32, #tpu.memory_space<vmem>>, vector<784x512xf32>
    %cst_65 = arith.constant dense<0.000000e+00> : vector<8x512xf32>
    %119 = tpu.matmul %117, %118, %cst_65 {dimension_numbers = #tpu.dot_dimension_numbers<[1], [0], [0], [1], [0, 0, 1, 1], [], []>} : vector<8x784xf32>, vector<784x512xf32>, vector<8x512xf32> -> vector<8x512xf32>
    %120 = vector.broadcast %5 : vector<8x1xf32> to vector<8x512xf32>
    %121 = arith.mulf %119, %120 : vector<8x512xf32>
    %122 = vector.broadcast %6 : vector<8x1xf32> to vector<8x512xf32>
    %123 = arith.addf %121, %122 : vector<8x512xf32>
    %cst_66 = arith.constant 0.000000e+00 : f32
    %124 = vector.broadcast %cst_66 : f32 to vector<8x512xf32>
    %125 = arith.maximumf %123, %124 : vector<8x512xf32>
    %126 = vector.broadcast %1 : vector<1x512xf32> to vector<8x512xf32>
    %127 = arith.mulf %125, %126 : vector<8x512xf32>
    %c69_i32_67 = arith.constant 69 : i32
    %128 = tpu.dynamic_rotate %127 by %c69_i32_67 dim 1 : vector<8x512xf32>, i32 -> vector<8x512xf32>
    %c0_68 = arith.constant 0 : index
    %c0_69 = arith.constant 0 : index
    %129 = vector.load %arg10[%c0_68, %c0_69] : memref<392x512xf32, #tpu.memory_space<vmem>>, vector<8x512xf32>
    tpu.vector_store %arg10[%c0_68, %c0_69], %128 {strides = array<i32>} : memref<392x512xf32, #tpu.memory_space<vmem>>, vector<8x512xf32>,
    %c68_i32_70 = arith.constant 68 : i32
    %130 = tpu.dynamic_rotate %127 by %c68_i32_70 dim 1 : vector<8x512xf32>, i32 -> vector<8x512xf32>
    %c8 = arith.constant 8 : index
    %c0_71 = arith.constant 0 : index
    %131 = vector.load %arg10[%c8, %c0_71] : memref<392x512xf32, #tpu.memory_space<vmem>>, vector<8x512xf32>
    tpu.vector_store %arg10[%c8, %c0_71], %130 {strides = array<i32>} : memref<392x512xf32, #tpu.memory_space<vmem>>, vector<8x512xf32>,
    %c67_i32_72 = arith.constant 67 : i32
    %132 = tpu.dynamic_rotate %127 by %c67_i32_72 dim 1 : vector<8x512xf32>, i32 -> vector<8x512xf32>
    %c16_73 = arith.constant 16 : index
    %c0_74 = arith.constant 0 : index
    %133 = vector.load %arg10[%c16_73, %c0_74] : memref<392x512xf32, #tpu.memory_space<vmem>>, vector<8x512xf32>
    tpu.vector_store %arg10[%c16_73, %c0_74], %132 {strides = array<i32>} : memref<392x512xf32, #tpu.memory_space<vmem>>, vector<8x512xf32>,
    %c66_i32_75 = arith.constant 66 : i32
    %134 = tpu.dynamic_rotate %127 by %c66_i32_75 dim 1 : vector<8x512xf32>, i32 -> vector<8x512xf32>
    %c24 = arith.constant 24 : index
    %c0_76 = arith.constant 0 : index
    %135 = vector.load %arg10[%c24, %c0_76] : memref<392x512xf32, #tpu.memory_space<vmem>>, vector<8x512xf32>
    tpu.vector_store %arg10[%c24, %c0_76], %134 {strides = array<i32>} : memref<392x512xf32, #tpu.memory_space<vmem>>, vector<8x512xf32>,
    %c65_i32_77 = arith.constant 65 : i32
    %136 = tpu.dynamic_rotate %127 by %c65_i32_77 dim 1 : vector<8x512xf32>, i32 -> vector<8x512xf32>
    %c32_78 = arith.constant 32 : index
    %c0_79 = arith.constant 0 : index
    %137 = vector.load %arg10[%c32_78, %c0_79] : memref<392x512xf32, #tpu.memory_space<vmem>>, vector<8x512xf32>
    tpu.vector_store %arg10[%c32_78, %c0_79], %136 {strides = array<i32>} : memref<392x512xf32, #tpu.memory_space<vmem>>, vector<8x512xf32>,
    %c64_i32_80 = arith.constant 64 : i32
    %138 = tpu.dynamic_rotate %127 by %c64_i32_80 dim 1 : vector<8x512xf32>, i32 -> vector<8x512xf32>
    %c40 = arith.constant 40 : index
    %c0_81 = arith.constant 0 : index
    %139 = vector.load %arg10[%c40, %c0_81] : memref<392x512xf32, #tpu.memory_space<vmem>>, vector<8x512xf32>
    tpu.vector_store %arg10[%c40, %c0_81], %138 {strides = array<i32>} : memref<392x512xf32, #tpu.memory_space<vmem>>, vector<8x512xf32>,
    %c63_i32_82 = arith.constant 63 : i32
    %140 = tpu.dynamic_rotate %127 by %c63_i32_82 dim 1 : vector<8x512xf32>, i32 -> vector<8x512xf32>
    %c48_83 = arith.constant 48 : index
    %c0_84 = arith.constant 0 : index
    %141 = vector.load %arg10[%c48_83, %c0_84] : memref<392x512xf32, #tpu.memory_space<vmem>>, vector<8x512xf32>
    tpu.vector_store %arg10[%c48_83, %c0_84], %140 {strides = array<i32>} : memref<392x512xf32, #tpu.memory_space<vmem>>, vector<8x512xf32>,
    %c47_i32_85 = arith.constant 47 : i32
    %142 = tpu.dynamic_rotate %127 by %c47_i32_85 dim 1 : vector<8x512xf32>, i32 -> vector<8x512xf32>
    %c56 = arith.constant 56 : index
    %c0_86 = arith.constant 0 : index
    %143 = vector.load %arg10[%c56, %c0_86] : memref<392x512xf32, #tpu.memory_space<vmem>>, vector<8x512xf32>
    tpu.vector_store %arg10[%c56, %c0_86], %142 {strides = array<i32>} : memref<392x512xf32, #tpu.memory_space<vmem>>, vector<8x512xf32>,
    %c46_i32_87 = arith.constant 46 : i32
    %144 = tpu.dynamic_rotate %127 by %c46_i32_87 dim 1 : vector<8x512xf32>, i32 -> vector<8x512xf32>
    %c64_88 = arith.constant 64 : index
    %c0_89 = arith.constant 0 : index
    %145 = vector.load %arg10[%c64_88, %c0_89] : memref<392x512xf32, #tpu.memory_space<vmem>>, vector<8x512xf32>
    tpu.vector_store %arg10[%c64_88, %c0_89], %144 {strides = array<i32>} : memref<392x512xf32, #tpu.memory_space<vmem>>, vector<8x512xf32>,
    %c45_i32_90 = arith.constant 45 : i32
    %146 = tpu.dynamic_rotate %127 by %c45_i32_90 dim 1 : vector<8x512xf32>, i32 -> vector<8x512xf32>
    %c72 = arith.constant 72 : index
    %c0_91 = arith.constant 0 : index
    %147 = vector.load %arg10[%c72, %c0_91] : memref<392x512xf32, #tpu.memory_space<vmem>>, vector<8x512xf32>
    tpu.vector_store %arg10[%c72, %c0_91], %146 {strides = array<i32>} : memref<392x512xf32, #tpu.memory_space<vmem>>, vector<8x512xf32>,
    %c44_i32_92 = arith.constant 44 : i32
    %148 = tpu.dynamic_rotate %127 by %c44_i32_92 dim 1 : vector<8x512xf32>, i32 -> vector<8x512xf32>
    %c80_93 = arith.constant 80 : index
    %c0_94 = arith.constant 0 : index
    %149 = vector.load %arg10[%c80_93, %c0_94] : memref<392x512xf32, #tpu.memory_space<vmem>>, vector<8x512xf32>
    tpu.vector_store %arg10[%c80_93, %c0_94], %148 {strides = array<i32>} : memref<392x512xf32, #tpu.memory_space<vmem>>, vector<8x512xf32>,
    %c43_i32_95 = arith.constant 43 : i32
    %150 = tpu.dynamic_rotate %127 by %c43_i32_95 dim 1 : vector<8x512xf32>, i32 -> vector<8x512xf32>
    %c88 = arith.constant 88 : index
    %c0_96 = arith.constant 0 : index
    %151 = vector.load %arg10[%c88, %c0_96] : memref<392x512xf32, #tpu.memory_space<vmem>>, vector<8x512xf32>
    tpu.vector_store %arg10[%c88, %c0_96], %150 {strides = array<i32>} : memref<392x512xf32, #tpu.memory_space<vmem>>, vector<8x512xf32>,
    %c42_i32_97 = arith.constant 42 : i32
    %152 = tpu.dynamic_rotate %127 by %c42_i32_97 dim 1 : vector<8x512xf32>, i32 -> vector<8x512xf32>
    %c96_98 = arith.constant 96 : index
    %c0_99 = arith.constant 0 : index
    %153 = vector.load %arg10[%c96_98, %c0_99] : memref<392x512xf32, #tpu.memory_space<vmem>>, vector<8x512xf32>
    tpu.vector_store %arg10[%c96_98, %c0_99], %152 {strides = array<i32>} : memref<392x512xf32, #tpu.memory_space<vmem>>, vector<8x512xf32>,
    %c41_i32_100 = arith.constant 41 : i32
    %154 = tpu.dynamic_rotate %127 by %c41_i32_100 dim 1 : vector<8x512xf32>, i32 -> vector<8x512xf32>
    %c104 = arith.constant 104 : index
    %c0_101 = arith.constant 0 : index
    %155 = vector.load %arg10[%c104, %c0_101] : memref<392x512xf32, #tpu.memory_space<vmem>>, vector<8x512xf32>
    tpu.vector_store %arg10[%c104, %c0_101], %154 {strides = array<i32>} : memref<392x512xf32, #tpu.memory_space<vmem>>, vector<8x512xf32>,
    %c25_i32_102 = arith.constant 25 : i32
    %156 = tpu.dynamic_rotate %127 by %c25_i32_102 dim 1 : vector<8x512xf32>, i32 -> vector<8x512xf32>
    %c112_103 = arith.constant 112 : index
    %c0_104 = arith.constant 0 : index
    %157 = vector.load %arg10[%c112_103, %c0_104] : memref<392x512xf32, #tpu.memory_space<vmem>>, vector<8x512xf32>
    tpu.vector_store %arg10[%c112_103, %c0_104], %156 {strides = array<i32>} : memref<392x512xf32, #tpu.memory_space<vmem>>, vector<8x512xf32>,
    %c24_i32_105 = arith.constant 24 : i32
    %158 = tpu.dynamic_rotate %127 by %c24_i32_105 dim 1 : vector<8x512xf32>, i32 -> vector<8x512xf32>
    %c120 = arith.constant 120 : index
    %c0_106 = arith.constant 0 : index
    %159 = vector.load %arg10[%c120, %c0_106] : memref<392x512xf32, #tpu.memory_space<vmem>>, vector<8x512xf32>
    tpu.vector_store %arg10[%c120, %c0_106], %158 {strides = array<i32>} : memref<392x512xf32, #tpu.memory_space<vmem>>, vector<8x512xf32>,
    %c23_i32_107 = arith.constant 23 : i32
    %160 = tpu.dynamic_rotate %127 by %c23_i32_107 dim 1 : vector<8x512xf32>, i32 -> vector<8x512xf32>
    %c128_108 = arith.constant 128 : index
    %c0_109 = arith.constant 0 : index
    %161 = vector.load %arg10[%c128_108, %c0_109] : memref<392x512xf32, #tpu.memory_space<vmem>>, vector<8x512xf32>
    tpu.vector_store %arg10[%c128_108, %c0_109], %160 {strides = array<i32>} : memref<392x512xf32, #tpu.memory_space<vmem>>, vector<8x512xf32>,
    %c22_i32_110 = arith.constant 22 : i32
    %162 = tpu.dynamic_rotate %127 by %c22_i32_110 dim 1 : vector<8x512xf32>, i32 -> vector<8x512xf32>
    %c136 = arith.constant 136 : index
    %c0_111 = arith.constant 0 : index
    %163 = vector.load %arg10[%c136, %c0_111] : memref<392x512xf32, #tpu.memory_space<vmem>>, vector<8x512xf32>
    tpu.vector_store %arg10[%c136, %c0_111], %162 {strides = array<i32>} : memref<392x512xf32, #tpu.memory_space<vmem>>, vector<8x512xf32>,
    %c21_i32_112 = arith.constant 21 : i32
    %164 = tpu.dynamic_rotate %127 by %c21_i32_112 dim 1 : vector<8x512xf32>, i32 -> vector<8x512xf32>
    %c144_113 = arith.constant 144 : index
    %c0_114 = arith.constant 0 : index
    %165 = vector.load %arg10[%c144_113, %c0_114] : memref<392x512xf32, #tpu.memory_space<vmem>>, vector<8x512xf32>
    tpu.vector_store %arg10[%c144_113, %c0_114], %164 {strides = array<i32>} : memref<392x512xf32, #tpu.memory_space<vmem>>, vector<8x512xf32>,
    %c20_i32_115 = arith.constant 20 : i32
    %166 = tpu.dynamic_rotate %127 by %c20_i32_115 dim 1 : vector<8x512xf32>, i32 -> vector<8x512xf32>
    %c152 = arith.constant 152 : index
    %c0_116 = arith.constant 0 : index
    %167 = vector.load %arg10[%c152, %c0_116] : memref<392x512xf32, #tpu.memory_space<vmem>>, vector<8x512xf32>
    tpu.vector_store %arg10[%c152, %c0_116], %166 {strides = array<i32>} : memref<392x512xf32, #tpu.memory_space<vmem>>, vector<8x512xf32>,
    %c19_i32_117 = arith.constant 19 : i32
    %168 = tpu.dynamic_rotate %127 by %c19_i32_117 dim 1 : vector<8x512xf32>, i32 -> vector<8x512xf32>
    %c160_118 = arith.constant 160 : index
    %c0_119 = arith.constant 0 : index
    %169 = vector.load %arg10[%c160_118, %c0_119] : memref<392x512xf32, #tpu.memory_space<vmem>>, vector<8x512xf32>
    tpu.vector_store %arg10[%c160_118, %c0_119], %168 {strides = array<i32>} : memref<392x512xf32, #tpu.memory_space<vmem>>, vector<8x512xf32>,
    %c3_i32_120 = arith.constant 3 : i32
    %170 = tpu.dynamic_rotate %127 by %c3_i32_120 dim 1 : vector<8x512xf32>, i32 -> vector<8x512xf32>
    %c168 = arith.constant 168 : index
    %c0_121 = arith.constant 0 : index
    %171 = vector.load %arg10[%c168, %c0_121] : memref<392x512xf32, #tpu.memory_space<vmem>>, vector<8x512xf32>
    tpu.vector_store %arg10[%c168, %c0_121], %170 {strides = array<i32>} : memref<392x512xf32, #tpu.memory_space<vmem>>, vector<8x512xf32>,
    %c2_i32_122 = arith.constant 2 : i32
    %172 = tpu.dynamic_rotate %127 by %c2_i32_122 dim 1 : vector<8x512xf32>, i32 -> vector<8x512xf32>
    %c176_123 = arith.constant 176 : index
    %c0_124 = arith.constant 0 : index
    %173 = vector.load %arg10[%c176_123, %c0_124] : memref<392x512xf32, #tpu.memory_space<vmem>>, vector<8x512xf32>
    tpu.vector_store %arg10[%c176_123, %c0_124], %172 {strides = array<i32>} : memref<392x512xf32, #tpu.memory_space<vmem>>, vector<8x512xf32>,
    %c1_i32_125 = arith.constant 1 : i32
    %174 = tpu.dynamic_rotate %127 by %c1_i32_125 dim 1 : vector<8x512xf32>, i32 -> vector<8x512xf32>
    %c184 = arith.constant 184 : index
    %c0_126 = arith.constant 0 : index
    %175 = vector.load %arg10[%c184, %c0_126] : memref<392x512xf32, #tpu.memory_space<vmem>>, vector<8x512xf32>
    tpu.vector_store %arg10[%c184, %c0_126], %174 {strides = array<i32>} : memref<392x512xf32, #tpu.memory_space<vmem>>, vector<8x512xf32>,
    %c192_127 = arith.constant 192 : index
    %c0_128 = arith.constant 0 : index
    %176 = vector.load %arg10[%c192_127, %c0_128] : memref<392x512xf32, #tpu.memory_space<vmem>>, vector<8x512xf32>
    tpu.vector_store %arg10[%c192_127, %c0_128], %127 {strides = array<i32>} : memref<392x512xf32, #tpu.memory_space<vmem>>, vector<8x512xf32>,
    %c511_i32_129 = arith.constant 511 : i32
    %177 = tpu.dynamic_rotate %127 by %c511_i32_129 dim 1 : vector<8x512xf32>, i32 -> vector<8x512xf32>
    %c200 = arith.constant 200 : index
    %c0_130 = arith.constant 0 : index
    %178 = vector.load %arg10[%c200, %c0_130] : memref<392x512xf32, #tpu.memory_space<vmem>>, vector<8x512xf32>
    tpu.vector_store %arg10[%c200, %c0_130], %177 {strides = array<i32>} : memref<392x512xf32, #tpu.memory_space<vmem>>, vector<8x512xf32>,
    %c510_i32_131 = arith.constant 510 : i32
    %179 = tpu.dynamic_rotate %127 by %c510_i32_131 dim 1 : vector<8x512xf32>, i32 -> vector<8x512xf32>
    %c208_132 = arith.constant 208 : index
    %c0_133 = arith.constant 0 : index
    %180 = vector.load %arg10[%c208_132, %c0_133] : memref<392x512xf32, #tpu.memory_space<vmem>>, vector<8x512xf32>
    tpu.vector_store %arg10[%c208_132, %c0_133], %179 {strides = array<i32>} : memref<392x512xf32, #tpu.memory_space<vmem>>, vector<8x512xf32>,
    %c509_i32_134 = arith.constant 509 : i32
    %181 = tpu.dynamic_rotate %127 by %c509_i32_134 dim 1 : vector<8x512xf32>, i32 -> vector<8x512xf32>
    %c216 = arith.constant 216 : index
    %c0_135 = arith.constant 0 : index
    %182 = vector.load %arg10[%c216, %c0_135] : memref<392x512xf32, #tpu.memory_space<vmem>>, vector<8x512xf32>
    tpu.vector_store %arg10[%c216, %c0_135], %181 {strides = array<i32>} : memref<392x512xf32, #tpu.memory_space<vmem>>, vector<8x512xf32>,
    %c493_i32_136 = arith.constant 493 : i32
    %183 = tpu.dynamic_rotate %127 by %c493_i32_136 dim 1 : vector<8x512xf32>, i32 -> vector<8x512xf32>
    %c224_137 = arith.constant 224 : index
    %c0_138 = arith.constant 0 : index
    %184 = vector.load %arg10[%c224_137, %c0_138] : memref<392x512xf32, #tpu.memory_space<vmem>>, vector<8x512xf32>
    tpu.vector_store %arg10[%c224_137, %c0_138], %183 {strides = array<i32>} : memref<392x512xf32, #tpu.memory_space<vmem>>, vector<8x512xf32>,
    %c492_i32_139 = arith.constant 492 : i32
    %185 = tpu.dynamic_rotate %127 by %c492_i32_139 dim 1 : vector<8x512xf32>, i32 -> vector<8x512xf32>
    %c232 = arith.constant 232 : index
    %c0_140 = arith.constant 0 : index
    %186 = vector.load %arg10[%c232, %c0_140] : memref<392x512xf32, #tpu.memory_space<vmem>>, vector<8x512xf32>
    tpu.vector_store %arg10[%c232, %c0_140], %185 {strides = array<i32>} : memref<392x512xf32, #tpu.memory_space<vmem>>, vector<8x512xf32>,
    %c491_i32_141 = arith.constant 491 : i32
    %187 = tpu.dynamic_rotate %127 by %c491_i32_141 dim 1 : vector<8x512xf32>, i32 -> vector<8x512xf32>
    %c240_142 = arith.constant 240 : index
    %c0_143 = arith.constant 0 : index
    %188 = vector.load %arg10[%c240_142, %c0_143] : memref<392x512xf32, #tpu.memory_space<vmem>>, vector<8x512xf32>
    tpu.vector_store %arg10[%c240_142, %c0_143], %187 {strides = array<i32>} : memref<392x512xf32, #tpu.memory_space<vmem>>, vector<8x512xf32>,
    %c490_i32_144 = arith.constant 490 : i32
    %189 = tpu.dynamic_rotate %127 by %c490_i32_144 dim 1 : vector<8x512xf32>, i32 -> vector<8x512xf32>
    %c248 = arith.constant 248 : index
    %c0_145 = arith.constant 0 : index
    %190 = vector.load %arg10[%c248, %c0_145] : memref<392x512xf32, #tpu.memory_space<vmem>>, vector<8x512xf32>
    tpu.vector_store %arg10[%c248, %c0_145], %189 {strides = array<i32>} : memref<392x512xf32, #tpu.memory_space<vmem>>, vector<8x512xf32>,
    %c489_i32_146 = arith.constant 489 : i32
    %191 = tpu.dynamic_rotate %127 by %c489_i32_146 dim 1 : vector<8x512xf32>, i32 -> vector<8x512xf32>
    %c256_147 = arith.constant 256 : index
    %c0_148 = arith.constant 0 : index
    %192 = vector.load %arg10[%c256_147, %c0_148] : memref<392x512xf32, #tpu.memory_space<vmem>>, vector<8x512xf32>
    tpu.vector_store %arg10[%c256_147, %c0_148], %191 {strides = array<i32>} : memref<392x512xf32, #tpu.memory_space<vmem>>, vector<8x512xf32>,
    %c488_i32_149 = arith.constant 488 : i32
    %193 = tpu.dynamic_rotate %127 by %c488_i32_149 dim 1 : vector<8x512xf32>, i32 -> vector<8x512xf32>
    %c264 = arith.constant 264 : index
    %c0_150 = arith.constant 0 : index
    %194 = vector.load %arg10[%c264, %c0_150] : memref<392x512xf32, #tpu.memory_space<vmem>>, vector<8x512xf32>
    tpu.vector_store %arg10[%c264, %c0_150], %193 {strides = array<i32>} : memref<392x512xf32, #tpu.memory_space<vmem>>, vector<8x512xf32>,
    %c487_i32_151 = arith.constant 487 : i32
    %195 = tpu.dynamic_rotate %127 by %c487_i32_151 dim 1 : vector<8x512xf32>, i32 -> vector<8x512xf32>
    %c272_152 = arith.constant 272 : index
    %c0_153 = arith.constant 0 : index
    %196 = vector.load %arg10[%c272_152, %c0_153] : memref<392x512xf32, #tpu.memory_space<vmem>>, vector<8x512xf32>
    tpu.vector_store %arg10[%c272_152, %c0_153], %195 {strides = array<i32>} : memref<392x512xf32, #tpu.memory_space<vmem>>, vector<8x512xf32>,
    %c471_i32_154 = arith.constant 471 : i32
    %197 = tpu.dynamic_rotate %127 by %c471_i32_154 dim 1 : vector<8x512xf32>, i32 -> vector<8x512xf32>
    %c280 = arith.constant 280 : index
    %c0_155 = arith.constant 0 : index
    %198 = vector.load %arg10[%c280, %c0_155] : memref<392x512xf32, #tpu.memory_space<vmem>>, vector<8x512xf32>
    tpu.vector_store %arg10[%c280, %c0_155], %197 {strides = array<i32>} : memref<392x512xf32, #tpu.memory_space<vmem>>, vector<8x512xf32>,
    %c470_i32_156 = arith.constant 470 : i32
    %199 = tpu.dynamic_rotate %127 by %c470_i32_156 dim 1 : vector<8x512xf32>, i32 -> vector<8x512xf32>
    %c288_157 = arith.constant 288 : index
    %c0_158 = arith.constant 0 : index
    %200 = vector.load %arg10[%c288_157, %c0_158] : memref<392x512xf32, #tpu.memory_space<vmem>>, vector<8x512xf32>
    tpu.vector_store %arg10[%c288_157, %c0_158], %199 {strides = array<i32>} : memref<392x512xf32, #tpu.memory_space<vmem>>, vector<8x512xf32>,
    %c469_i32_159 = arith.constant 469 : i32
    %201 = tpu.dynamic_rotate %127 by %c469_i32_159 dim 1 : vector<8x512xf32>, i32 -> vector<8x512xf32>
    %c296 = arith.constant 296 : index
    %c0_160 = arith.constant 0 : index
    %202 = vector.load %arg10[%c296, %c0_160] : memref<392x512xf32, #tpu.memory_space<vmem>>, vector<8x512xf32>
    tpu.vector_store %arg10[%c296, %c0_160], %201 {strides = array<i32>} : memref<392x512xf32, #tpu.memory_space<vmem>>, vector<8x512xf32>,
    %c468_i32_161 = arith.constant 468 : i32
    %203 = tpu.dynamic_rotate %127 by %c468_i32_161 dim 1 : vector<8x512xf32>, i32 -> vector<8x512xf32>
    %c304_162 = arith.constant 304 : index
    %c0_163 = arith.constant 0 : index
    %204 = vector.load %arg10[%c304_162, %c0_163] : memref<392x512xf32, #tpu.memory_space<vmem>>, vector<8x512xf32>
    tpu.vector_store %arg10[%c304_162, %c0_163], %203 {strides = array<i32>} : memref<392x512xf32, #tpu.memory_space<vmem>>, vector<8x512xf32>,
    %c467_i32_164 = arith.constant 467 : i32
    %205 = tpu.dynamic_rotate %127 by %c467_i32_164 dim 1 : vector<8x512xf32>, i32 -> vector<8x512xf32>
    %c312 = arith.constant 312 : index
    %c0_165 = arith.constant 0 : index
    %206 = vector.load %arg10[%c312, %c0_165] : memref<392x512xf32, #tpu.memory_space<vmem>>, vector<8x512xf32>
    tpu.vector_store %arg10[%c312, %c0_165], %205 {strides = array<i32>} : memref<392x512xf32, #tpu.memory_space<vmem>>, vector<8x512xf32>,
    %c466_i32_166 = arith.constant 466 : i32
    %207 = tpu.dynamic_rotate %127 by %c466_i32_166 dim 1 : vector<8x512xf32>, i32 -> vector<8x512xf32>
    %c320_167 = arith.constant 320 : index
    %c0_168 = arith.constant 0 : index
    %208 = vector.load %arg10[%c320_167, %c0_168] : memref<392x512xf32, #tpu.memory_space<vmem>>, vector<8x512xf32>
    tpu.vector_store %arg10[%c320_167, %c0_168], %207 {strides = array<i32>} : memref<392x512xf32, #tpu.memory_space<vmem>>, vector<8x512xf32>,
    %c465_i32_169 = arith.constant 465 : i32
    %209 = tpu.dynamic_rotate %127 by %c465_i32_169 dim 1 : vector<8x512xf32>, i32 -> vector<8x512xf32>
    %c328 = arith.constant 328 : index
    %c0_170 = arith.constant 0 : index
    %210 = vector.load %arg10[%c328, %c0_170] : memref<392x512xf32, #tpu.memory_space<vmem>>, vector<8x512xf32>
    tpu.vector_store %arg10[%c328, %c0_170], %209 {strides = array<i32>} : memref<392x512xf32, #tpu.memory_space<vmem>>, vector<8x512xf32>,
    %c449_i32_171 = arith.constant 449 : i32
    %211 = tpu.dynamic_rotate %127 by %c449_i32_171 dim 1 : vector<8x512xf32>, i32 -> vector<8x512xf32>
    %c336_172 = arith.constant 336 : index
    %c0_173 = arith.constant 0 : index
    %212 = vector.load %arg10[%c336_172, %c0_173] : memref<392x512xf32, #tpu.memory_space<vmem>>, vector<8x512xf32>
    tpu.vector_store %arg10[%c336_172, %c0_173], %211 {strides = array<i32>} : memref<392x512xf32, #tpu.memory_space<vmem>>, vector<8x512xf32>,
    %c448_i32_174 = arith.constant 448 : i32
    %213 = tpu.dynamic_rotate %127 by %c448_i32_174 dim 1 : vector<8x512xf32>, i32 -> vector<8x512xf32>
    %c344 = arith.constant 344 : index
    %c0_175 = arith.constant 0 : index
    %214 = vector.load %arg10[%c344, %c0_175] : memref<392x512xf32, #tpu.memory_space<vmem>>, vector<8x512xf32>
    tpu.vector_store %arg10[%c344, %c0_175], %213 {strides = array<i32>} : memref<392x512xf32, #tpu.memory_space<vmem>>, vector<8x512xf32>,
    %c447_i32_176 = arith.constant 447 : i32
    %215 = tpu.dynamic_rotate %127 by %c447_i32_176 dim 1 : vector<8x512xf32>, i32 -> vector<8x512xf32>
    %c352_177 = arith.constant 352 : index
    %c0_178 = arith.constant 0 : index
    %216 = vector.load %arg10[%c352_177, %c0_178] : memref<392x512xf32, #tpu.memory_space<vmem>>, vector<8x512xf32>
    tpu.vector_store %arg10[%c352_177, %c0_178], %215 {strides = array<i32>} : memref<392x512xf32, #tpu.memory_space<vmem>>, vector<8x512xf32>,
    %c446_i32_179 = arith.constant 446 : i32
    %217 = tpu.dynamic_rotate %127 by %c446_i32_179 dim 1 : vector<8x512xf32>, i32 -> vector<8x512xf32>
    %c360 = arith.constant 360 : index
    %c0_180 = arith.constant 0 : index
    %218 = vector.load %arg10[%c360, %c0_180] : memref<392x512xf32, #tpu.memory_space<vmem>>, vector<8x512xf32>
    tpu.vector_store %arg10[%c360, %c0_180], %217 {strides = array<i32>} : memref<392x512xf32, #tpu.memory_space<vmem>>, vector<8x512xf32>,
    %c445_i32_181 = arith.constant 445 : i32
    %219 = tpu.dynamic_rotate %127 by %c445_i32_181 dim 1 : vector<8x512xf32>, i32 -> vector<8x512xf32>
    %c368_182 = arith.constant 368 : index
    %c0_183 = arith.constant 0 : index
    %220 = vector.load %arg10[%c368_182, %c0_183] : memref<392x512xf32, #tpu.memory_space<vmem>>, vector<8x512xf32>
    tpu.vector_store %arg10[%c368_182, %c0_183], %219 {strides = array<i32>} : memref<392x512xf32, #tpu.memory_space<vmem>>, vector<8x512xf32>,
    %c444_i32_184 = arith.constant 444 : i32
    %221 = tpu.dynamic_rotate %127 by %c444_i32_184 dim 1 : vector<8x512xf32>, i32 -> vector<8x512xf32>
    %c376 = arith.constant 376 : index
    %c0_185 = arith.constant 0 : index
    %222 = vector.load %arg10[%c376, %c0_185] : memref<392x512xf32, #tpu.memory_space<vmem>>, vector<8x512xf32>
    tpu.vector_store %arg10[%c376, %c0_185], %221 {strides = array<i32>} : memref<392x512xf32, #tpu.memory_space<vmem>>, vector<8x512xf32>,
    %c443_i32_186 = arith.constant 443 : i32
    %223 = tpu.dynamic_rotate %127 by %c443_i32_186 dim 1 : vector<8x512xf32>, i32 -> vector<8x512xf32>
    %c384_187 = arith.constant 384 : index
    %c0_188 = arith.constant 0 : index
    %224 = vector.load %arg10[%c384_187, %c0_188] : memref<392x512xf32, #tpu.memory_space<vmem>>, vector<8x512xf32>
    tpu.vector_store %arg10[%c384_187, %c0_188], %223 {strides = array<i32>} : memref<392x512xf32, #tpu.memory_space<vmem>>, vector<8x512xf32>,
    %c0_189 = arith.constant 0 : index
    %c0_190 = arith.constant 0 : index
    %225 = vector.load %arg6[%c0_189, %c0_190] : memref<16x392xf32, #tpu.memory_space<vmem>>, vector<16x392xf32>
    %c0_191 = arith.constant 0 : index
    %c0_192 = arith.constant 0 : index
    %226 = vector.load %arg10[%c0_191, %c0_192] : memref<392x512xf32, #tpu.memory_space<vmem>>, vector<392x512xf32>
    %cst_193 = arith.constant dense<0.000000e+00> : vector<16x512xf32>
    %227 = tpu.matmul %225, %226, %cst_193 {dimension_numbers = #tpu.dot_dimension_numbers<[1], [0], [0], [1], [0, 0, 1, 1], [], []>} : vector<16x392xf32>, vector<392x512xf32>, vector<16x512xf32> -> vector<16x512xf32>
    %228 = vector.broadcast %7 : vector<16x1xf32> to vector<16x512xf32>
    %229 = arith.mulf %227, %228 : vector<16x512xf32>
    %230 = vector.broadcast %8 : vector<16x1xf32> to vector<16x512xf32>
    %231 = arith.addf %229, %230 : vector<16x512xf32>
    %cst_194 = arith.constant 0.000000e+00 : f32
    %232 = vector.broadcast %cst_194 : f32 to vector<16x512xf32>
    %233 = arith.subf %232, %231 : vector<16x512xf32>
    %234 = math.exp %233 : vector<16x512xf32>
    %cst_195 = arith.constant 1.000000e+00 : f32
    %235 = vector.broadcast %cst_195 : f32 to vector<16x512xf32>
    %236 = arith.addf %235, %234 : vector<16x512xf32>
    %cst_196 = arith.constant 1.000000e+00 : f32
    %237 = vector.broadcast %cst_196 : f32 to vector<16x512xf32>
    %238 = arith.divf %237, %236 : vector<16x512xf32>
    %239 = arith.mulf %19, %238 : vector<16x512xf32>
    %c0_197 = arith.constant 0 : index
    %c0_198 = arith.constant 0 : index
    %240 = vector.load %arg8[%c0_197, %c0_198] : memref<16x512xf32, #tpu.memory_space<vmem>>, vector<16x512xf32>
    tpu.vector_store %arg8[%c0_197, %c0_198], %239 {strides = array<i32>} : memref<16x512xf32, #tpu.memory_space<vmem>>, vector<16x512xf32>,
    return
  }
  func.func @transform_0(%arg0: i32) -> (i32, i32) {
    %c0_i32 = arith.constant 0 : i32
    %c0_i32_0 = arith.constant 0 : i32
    return %c0_i32, %arg0 : i32, i32
  }
  func.func @transform_1(%arg0: i32) -> (i32, i32) {
    %c0_i32 = arith.constant 0 : i32
    %c0_i32_0 = arith.constant 0 : i32
    %c0_i32_1 = arith.constant 0 : i32
    return %c0_i32, %c0_i32_0 : i32, i32
  }
  func.func @transform_2(%arg0: i32) -> (i32, i32) {
    %c0_i32 = arith.constant 0 : i32
    %c0_i32_0 = arith.constant 0 : i32
    %c0_i32_1 = arith.constant 0 : i32
    return %c0_i32, %c0_i32_0 : i32, i32
  }
  func.func @transform_3(%arg0: i32) -> (i32, i32) {
    %c0_i32 = arith.constant 0 : i32
    %c0_i32_0 = arith.constant 0 : i32
    %c0_i32_1 = arith.constant 0 : i32
    return %c0_i32, %c0_i32_0 : i32, i32
  }
  func.func @transform_4(%arg0: i32) -> (i32, i32) {
    %c0_i32 = arith.constant 0 : i32
    %c0_i32_0 = arith.constant 0 : i32
    %c0_i32_1 = arith.constant 0 : i32
    return %c0_i32, %c0_i32_0 : i32, i32
  }
  func.func @transform_5(%arg0: i32) -> (i32, i32) {
    %c0_i32 = arith.constant 0 : i32
    %c0_i32_0 = arith.constant 0 : i32
    %c0_i32_1 = arith.constant 0 : i32
    return %c0_i32, %c0_i32_0 : i32, i32
  }
  func.func @transform_6(%arg0: i32) -> (i32, i32) {
    %c0_i32 = arith.constant 0 : i32
    %c0_i32_0 = arith.constant 0 : i32
    %c0_i32_1 = arith.constant 0 : i32
    return %c0_i32, %c0_i32_0 : i32, i32
  }
  func.func @transform_7(%arg0: i32) -> (i32, i32) {
    %c0_i32 = arith.constant 0 : i32
    %c0_i32_0 = arith.constant 0 : i32
    return %c0_i32, %arg0 : i32, i32
  }
}

</mosaic_0001>

<bundles_post_ra>
// kernel: tpu_custom_call.1
= control target key start
LH: loop header
LB: loop body
LE: loop exit
PB: predicated region body
PF: predicated region fallthrough
CT: control target
= control target key end

     0   :  { %s11885_s0 = inlined_call_operand.hbm [shape: f32[16,1024], index: 0, kind: input, shape index: {}]   ;;  %s11886_s1 = inlined_call_operand.vmem [shape: f32[1,512], index: 1, kind: input, shape index: {}]   ;;  %s11887_s2 = inlined_call_operand.vmem [shape: f32[4,16], index: 2, kind: input, shape index: {}]   ;;  %s11888_s3 = inlined_call_operand.vmem [shape: f32[16,4], index: 3, kind: input, shape index: {}]   ;;  %s11889_s4 = inlined_call_operand.hbm [shape: f32[8,784], index: 4, kind: input, shape index: {}]   ;;  %s11890_s5 = inlined_call_operand.hbm [shape: f32[16,392], index: 5, kind: input, shape index: {}]   ;;  %s11891_s6 = inlined_call_operand.vmem [shape: f32[16,6], index: 6, kind: input, shape index: {}]   ;;  %s11892_s7 = inlined_call_operand.hbm [shape: f32[16,1024], index: 7, kind: output, shape index: {}]  }
   0x1   :  { %12483 = sst [smem:[#allocation187_spill]] %s11885_s0 }
   0x2   :  { %12484 = sst [smem:[#allocation188_spill]] %s11886_s1 }
   0x3   :  { %12485 = sst [smem:[#allocation189_spill]] %s11887_s2 }
   0x4   :  { %12486 = sst [smem:[#allocation190_spill]] %s11888_s3 }
   0x5   :  { %12487 = sst [smem:[#allocation191_spill]] %s11889_s4 }
   0x6   :  { %12488 = sst [smem:[#allocation192_spill]] %s11890_s5 }
   0x7   :  { %12489 = sst [smem:[#allocation193_spill]] %s11891_s6 }
   0x8   :  { %12490 = sst [smem:[#allocation194_spill]] %s11892_s7 }
   0x9   :  { %12 = vsyncpa [#allocation5], 0 }
   0xa   :  { %14 = vsyncpa [#allocation5 + $0x1], 0 }
   0xb   :  { %15 = vsyncpa [#allocation8], 0 }
   0xc   :  { %16 = vsyncpa [#allocation6], 0 }
   0xd   :  { %18 = vsyncpa [#allocation6 + $0x1], 0  ;;  %s6492_s24 = smov 0   ;;  %s6494_s25 = smov 0  }
   0xe   :  { %s6496_s26 = smov 0   ;;  %s6498_s27 = smov 0  }
   0xf LB: > { %12491 = sst [smem:[#allocation14_spill]] %s6379_s24  ;;  %s6513_s28 = sadd.s32 4294967295, %s6391_s27   ;;  %s6391_s27 = sphi %s6498_s27, %s13912_s27   ;;  %s6387_s26 = sphi %s6496_s26, %s13915_s26   ;;  %s6383_s25 = sphi %s6494_s25, %s13914_s25   ;;  %s6379_s24 = sphi %s6492_s24, %s13913_s24  }
  0x10   : > { %12492 = sst [smem:[#allocation15_spill]] %s6383_s25  ;;  %s4705_s29 = sadd.s32 4294967294, %s6391_s27  }
  0x11   : > { %12493 = sst [smem:[#allocation16_spill]] %s6387_s26  ;;  %s6517_s30 = sadd.s32 1, %s6391_s27  }
  0x12   : > { %12494 = sst [smem:[#allocation17_spill]] %s6391_s27  ;;  %s31_s8 = sadd.s32 1, %s6387_s26 }
  0x13   : > { %12495 = sst [smem:[#allocation18_spill]] %s6513_s28  ;;  %s28_s9 = ssub.s32 %s6391_s27, %s6517_s30 }
  0x14   : > { %12496 = sst [smem:[#allocation19_spill]] %s6517_s30  ;;  %p38_p0 = scmp.ne.s32.totalorder %s6387_s26, %s6383_s25 }
  0x15   : > { %p29_p1 = scmp.eq.s32.totalorder %s28_s9, 0  ;;  %p39_p2 = scmp.eq.s32.totalorder %s6391_s27, 0 }
  0x16   : > { %p44_p3 = scmp.ne.s32.totalorder %s6383_s25, %s6379_s24  ;;  %p45_p4 = scmp.eq.s32.totalorder %s6513_s28, 0 }
  0x17   : > { %s6529_s10 = scalar_select %p29_p1, %s6387_s26, %s31_s8  }
  0x18   : > { %p6531_p5 = por %p39_p2, %p38_p0  ;;  %p6537_p6 = por %p45_p4, %p44_p3 }
  0x19   : > { %12497 = sst [smem:[#allocation20_spill]] %s6529_s10  ;;  %p194_p7 = scmp.eq.s32.totalorder %s6513_s28, 1 }
  0x1a   : > { %p200_p8 = scmp.eq.s32.totalorder %s4705_s29, 1  ;;  %p4706_p9 = scmp.ge.s32.totalorder %s6391_s27, 1 }
  0x1b   : > { %p207_p10 = scmp.lt.s32.totalorder %s6391_s27, 3  ;;  %p6544_p11 = por %p194_p7, %p38_p0 }
  0x1c   : > { %p6548_p12 = por %p200_p8, %p44_p3  ;;  %s12505_s4 = sld [smem:[#allocation191_spill]] }
  0x1d   : > { %s12500_s13 = scalar_select %p6544_p11, 1, 0 }
  0x1e   : > { %s12502_s14 = scalar_select %p6548_p12, 1, 0 }
  0x1f   : > { %12501 = sst [smem:[#allocation21_spill]] %s12500_s13  ;;  %p6552_p13 = pnand %p4706_p9, %p207_p10 }
  0x20   : > { %12503 = sst [smem:[#allocation22_spill]] %s12502_s14  ;;  %s6393_s19 = smov [#allocation7]  }
  0x21   : > { %p4765_p1 = pneg %p6552_p13  ;;  %s230_s20 = sshll.u32 %s6393_s19, 4  ;;  %s231_s20 = int_to_ptr.vmem [resolvable:$true] %s230_s20 }
  0x22   : > { %s228_s18 = sshll.u32 %s12505_s4, 4  ;;  %p4782_p3 = scmp.lt.s32.totalorder %s6391_s27, 2  ;;  %s229_s18 = int_to_ptr.hbm [resolvable:$true] %s228_s18 }
  0x23   : > { %p4766_p2 = pnand %p4765_p1, %p45_p4  ;;  %s12506_s5 = sld [smem:[#allocation192_spill]] }
  0x24   : > { %p6570_p7 = pnand %p4782_p3, %p6531_p5  ;;  %s6394_s8 = smov [#allocation9]  }
  0x25   : > { %4768 = dma.hbm_to_vmem [thread:$0]  (!%p4766_p2), %s229_s18, 896, %s231_s20, [#allocation8]  }
  0x26   : > { %s241_s9 = sshll.u32 %s6394_s8, 4  ;;  %s258_s16 = sand.u32 1, %s6387_s26   ;;  %s242_s9 = int_to_ptr.vmem [resolvable:$true] %s241_s9 }
  0x27   : > { %s11896_s17 = smov 512   ;;  %s6396_s19 = smov 32  }
  0x28   : > { %s4710_s21 = sshll.u32 %s258_s16, 6  ;;  %s4751_s22 = sshll.u32 %s6391_s27, 5 }
  0x29   : > { %s239_s23 = sshll.u32 %s12506_s5, 4  ;;  %s12508_s0 = sld [smem:[#allocation187_spill]]  ;;  %s240_s23 = int_to_ptr.hbm [resolvable:$true] %s239_s23 }
  0x2a   : > { %4771 = dma.hbm_to_vmem [thread:$0]  (!%p4766_p2), %s240_s23, 1024, %s242_s9, [#allocation8], %s11896_s17, %s11896_s17, %s6396_s19  }
  0x2b   : > { %s262_s20 = scalar_lea.vmem [#allocation4], %s4710_s21  ;;  %s259_s8 = scalar_lea.sflag [#allocation5], %s258_s16 }
  0x2c   : > { %s270_s5 = sshll.u32 %s262_s20, 4  ;;  %p6295_p8 = pneg %p6570_p7  ;;  %s271_s5 = int_to_ptr.vmem [resolvable:$true] %s270_s5 }
  0x2f   : > { %s267_s11 = scalar_lea.hbm %s12508_s0, %s4751_s22  ;;  %s6298_s17 = scalar_lea.hbm %s12508_s0, 128 }
  0x30   : > { %s268_s10 = sshll.u32 %s267_s11, 4  ;;  %s269_s10 = int_to_ptr.hbm [resolvable:$true] %s268_s10 }
  0x31   : > { %s6291_s26 = sshra.s32 %s269_s10, 4  ;;  %s6292_s26 = int_to_ptr.hbm [resolvable:$true] %s6291_s26 }
  0x32   : > { %s6293_s30 = scalar_lea.hbm %s6292_s26, 64  ;;  %p6299_p1 = scmp.lt.s32.totalorder %s6292_s26, %s12508_s0 }
  0x33   : > { %p6294_p5 = scmp.ne.s32.totalorder %s6292_s26, %s6293_s30  ;;  %p6300_p2 = scmp.lt.s32.totalorder %s6298_s17, %s6293_s30 }
  0x35   : > { %p6296_p9 = pnand %p6295_p8, %p6294_p5  ;;  %p6301_p3 = por %p6300_p2, %p6299_p1 }
  0x37   : > { %p6297_p10 = pneg %p6296_p9 }
  0x39   : > { %p6302_p0 = pnand %p6301_p3, %p6297_p10 }
  0x3b   : > { %6305 = shalt.err (!%p6302_p0)
}
  0x3c   : > { %s6397_s16 = smov 1024   ;;  %s12509_s21 = smov 512  }
  0x3d   : > { %4775 = dma.hbm_to_vmem [thread:$0]  (!%p6570_p7), %s269_s10, 1024, %s271_s5, %s259_s8, %s6397_s16, %s12509_s21, %s6396_s19  }
  0x3e   : > { %282 = sbr.rel (%p6552_p13) target bundleno = 1809 (0x711), region = 48 }
  0x43   : > { %s6597_s18 = sand.u32 1, %s6383_s25  }
  0x44   : > { %12510 = sst [smem:[#allocation23_spill]] %s6597_s18  ;;  %s11897_s26 = sshll.u32 %s6597_s18, 6 }
  0x45   : > { %s285_s30 = scalar_lea.sflag [#allocation5], %s6597_s18  ;;  %s288_s17 = scalar_lea.vmem [#allocation4], %s11897_s26 }
  0x46   : > { %6366 = dma.done.wait (%p6537_p6), %s285_s30, 1024  }
  0x47   : > { %6368 = vsyncadd (%p6537_p6), %s285_s30, 4294966272 }
  0x48   : > { %6370 = dma.done.wait (%p45_p4), [#allocation8], 1920  }
  0x49   : > { %6372 = vsyncadd (%p45_p4), [#allocation8], 4294965376  ;;  %v6398_v0 = vmov 0   ;;  %v6611_v1 = vld [vmem:[%s288_s17 + $0x20] sm:$0xff]  ;;  %v6613_v2 = vld [vmem:[%s288_s17 + $0x28] sm:$0xff]  ;;  %s12511_s2 = sld [smem:[#allocation189_spill]] }
  0x4a   : > { %4877 = vset.pattern.permute.xlu0 %v6398_v0  ;;  %v6615_v3 = vld [vmem:[%s288_s17 + $0x30] sm:$0xff]  ;;  %367 = vmatpush.msra.mxu0 %v6611_v1  ;;  %v6619_v4 = vld [vmem:[%s288_s17 + $0x38] sm:$0xff]  ;;  %v6621_v5 = vld [vmem:[%s288_s17] sm:$0xff]  ;;  %vm12061_vm0 = vcmask 130048   ;;  %s12512_s6 = sld [smem:[#allocation193_spill]]  ;;  %v6399_v11 = vmov 1  }
  0x4b   : > { %387 = vmatpush.msra.mxu1 %v6613_v2  ;;  %v333_v6 = vld [vmem:[%s288_s17 + $0x8] sm:$0xff]  ;;  %407 = vmatpush.msra.mxu2 %v6615_v3  ;;  %v6625_v7 = vld [vmem:[%s288_s17 + $0x10] sm:$0xff]  ;;  %v6627_v8 = vld [vmem:[%s288_s17 + $0x18] sm:$0xff]  ;;  %vm455_vm1 = vcmask 1043456   ;;  %s12513_s3 = sld [smem:[#allocation190_spill]]  ;;  %vm448_vm2 = vcmask 31744  }
  0x4c   : > { %427 = vmatpush.msra.mxu3 %v6619_v4  ;;  %368 = vmatpush.msra.mxu0 %v6621_v5  ;;  %s12340_s9 = smov 68   ;;  %s12341_s4 = smov 69  }
  0x4d   : > { %388 = vmatpush.msra.mxu1 %v333_v6  ;;  %408 = vmatpush.msra.mxu2 %v6625_v7  ;;  %s12339_s22 = smov 67   ;;  %s12343_s16 = smov 65  }
  0x4e   : > { %428 = vmatpush.msra.mxu3 %v6627_v8  ;;  %4879 = vset.pattern.permute.xlu1 %v6399_v11  ;;  %s11934_s21 = smov 66   ;;  %s12342_s30 = smov 64  }
  0x4f   : > { %v343_v9 = vld [vmem:[%s12511_s2] sm:$0xf]  ;;  %s11926_s17 = smov 47   ;;  %s11920_s5 = smov 63  }
  0x50   : > { %v341_v10 = vld [vmem:[%s12512_s6] sm:$0xff]  ;;  %4718 = vmatmul.msk.f32.vlgmr.msra.gmra.mxu0 %vm12061_vm0, %v343_v9  ;;  %4719 = vmatmul.msk.f32.vlgmr.msra.gmra.mxu1 %vm12061_vm0, %v343_v9  ;;  %v342_v12 = vld [vmem:[%s12512_s6 + $0x8] sm:$0xff]  ;;  %s11932_s10 = smov 46   ;;  %s11918_s12 = smov 44  }
  0x51   : > { %4720 = vmatmul.msk.f32.vlgmr.msra.gmra.mxu2 %vm12061_vm0, %v343_v9  ;;  %4721 = vmatmul.msk.f32.vlgmr.msra.gmra.mxu3 %vm12061_vm0, %v343_v9  ;;  %v437_v20 = vld [vmem:[%s12513_s3] sm:$0xff]  ;;  %v438_v27 = vld [vmem:[%s12513_s3 + $0x8] sm:$0xff]  ;;  %s11916_s15 = smov 45   ;;  %s11924_s29 = smov 43  }
  0x52   : > { %346 = vperm.xlu0 %4877, %v341_v10   ;;  %445 = vperm.xlu1 %4879, %v342_v12   ;;  %s11898_s19 = smov 41   ;;  %s11922_s11 = smov 42  }
  0x53   : > { %s11900_s20 = smov 25   ;;  %s11904_s8 = smov 23  }
  0x54   : > { %s11902_s23 = smov 24   ;;  %s11906_s26 = smov 22  }
  0x55   : > { %s13388_s1 = sld [smem:[#allocation188_spill]]  ;;  %s13399_s0 = smov 106  }
  0x56   : > { %s13401_s2 = smov 108   ;;  %s13402_s3 = smov 62  }
  0x57   : > { %s13403_s25 = smov 61   ;;  %s13404_s27 = smov 81  }
  0x58   : > { %s13405_s14 = smov 109   ;;  %s13406_s24 = smov 107  }
  0x59   : > { %s13407_s13 = smov 127   ;;  %s13408_s7 = smov 126  }
  0x5a   : > { %4878 = vset.pattern.permute.xlu0 %v6399_v11  ;;  %s13409_s28 = smov 125   ;;  %s13410_s18 = smov 84  }
  0x5b   : > { %440 = vperm.xlu0 %4878, %v341_v10  }
  0xc4   : > { %v347_v13 = vpop.permute.xlu0 %346  ;;  %v6666_v32 = vpop.permute.xlu1 %445 }
  0xcd   : > { %v370_v14 = vpop.f32.mrf.mxu0  ;;  %v390_v15 = vpop.f32.mrf.mxu1 }
  0xce   : > { %v371_v16 = vadd.f32 %v370_v14, %v347_v13  ;;  %v391_v17 = vadd.f32 %v390_v15, %v347_v13  ;;  %v6663_v30 = vpop.permute.xlu0 %440 }
  0xd0   : > { %v433_v18 = vmax.f32 %v371_v16, 0.0  ;;  %v434_v19 = vmax.f32 %v391_v17, 0.0 }
  0xd2   : > { %4722 = vmatpush.msk.msrb.mxu0 %vm455_vm1, %v433_v18  ;;  %4725 = vmatpush.msk.msrb.mxu1 %vm455_vm1, %v434_v19 }
  0xd3   : > { %4723 = vmatmul.msk.f32.vlgmr.msrb.gmra.mxu0 %vm448_vm2, %v437_v20  ;;  %4726 = vmatmul.msk.f32.vlgmr.msrb.gmra.mxu1 %vm448_vm2, %v437_v20 }
  0xd4   : > { %v410_v21 = vpop.f32.mrf.mxu2  ;;  %v430_v22 = vpop.f32.mrf.mxu3 }
  0xd5   : > { %v411_v23 = vadd.f32 %v410_v21, %v347_v13  ;;  %v431_v24 = vadd.f32 %v430_v22, %v347_v13 }
  0xd7   : > { %v435_v25 = vmax.f32 %v411_v23, 0.0  ;;  %v436_v26 = vmax.f32 %v431_v24, 0.0 }
  0xd9   : > { %4728 = vmatpush.msk.msrb.mxu2 %vm455_vm1, %v435_v25  ;;  %4731 = vmatpush.msk.msrb.mxu3 %vm455_vm1, %v436_v26 }
  0xda   : > { %4729 = vmatmul.msk.f32.vlgmr.msrb.gmra.mxu2 %vm448_vm2, %v437_v20  ;;  %4732 = vmatmul.msk.f32.vlgmr.msrb.gmra.mxu3 %vm448_vm2, %v437_v20 }
  0xdb   : > { %4724 = vmatmul.msk.f32.gmra.mxu0 %vm448_vm2, %v438_v27  ;;  %4727 = vmatmul.msk.f32.gmra.mxu1 %vm448_vm2, %v438_v27 }
  0xe2   : > { %4730 = vmatmul.msk.f32.gmra.mxu2 %vm448_vm2, %v438_v27  ;;  %4733 = vmatmul.msk.f32.gmra.mxu3 %vm448_vm2, %v438_v27 }
 0x150   : > { %v485_v28 = vpop.f32.mrf.mxu0  ;;  %v508_v29 = vpop.f32.mrf.mxu1 }
 0x151   : > { %v509_v31 = vadd.f32 %v508_v29, %v6663_v30  ;;  %v486_v33 = vadd.f32 %v485_v28, %v6663_v30 }
 0x153   : > { %v6669_v36 = vmul.f32 %v509_v31, %v333_v6  ;;  %v6674_v39 = vmul.f32 %v486_v33, %v6621_v5 }
 0x155   : > { %12514 = vst [vmem:[#allocation24_spill] sm:$0xff] %v6669_v36 }
 0x156   : > { %12515 = vst [vmem:[#allocation25_spill] sm:$0xff] %v6674_v39 }
 0x158   : > { %v488_v34 = vpop.f32.mrf.mxu0  ;;  %v511_v35 = vpop.f32.mrf.mxu1 }
 0x159   : > { %v489_v37 = vadd.f32 %v488_v34, %v6666_v32  ;;  %v512_v38 = vadd.f32 %v511_v35, %v6666_v32 }
 0x15b   : > { %v6677_v40 = vmul.f32 %v489_v37, %v6611_v1  ;;  %v6680_v41 = vmul.f32 %v512_v38, %v6613_v2 }
 0x15d   : > { %12516 = vst [vmem:[#allocation26_spill] sm:$0xff] %v6677_v40  ;;  %v6684_v42 = vpack.i.bf16 %v6680_v41, %v6669_v36  ;;  %v6688_v43 = vpack.i.bf16 %v6677_v40, %v6674_v39  ;;  %v531_v50 = vpop.f32.mrf.mxu2  ;;  %v554_v51 = vpop.f32.mrf.mxu3 }
 0x15e   : > { %12517 = vst [vmem:[#allocation27_spill] sm:$0xff] %v6680_v41  ;;  %v532_v62 = vadd.f32 %v531_v50, %v6663_v30  ;;  %v555_v63 = vadd.f32 %v554_v51, %v6663_v30 }
 0x15f   : > { %4896 = vrot.lane.b32.xlu0 %v6684_v42, %s12340_s9  ;;  %4886 = vrot.lane.b32.xlu2 %v6684_v42, %s12341_s4 }
 0x160   : > { %4881 = vrot.lane.b32.xlu1 %v6688_v43, %s12341_s4  ;;  %v6839_v9 = vmul.f32 %v532_v62, %v6625_v7  ;;  %v6842_v10 = vmul.f32 %v555_v63, %v6627_v8 }
 0x162   : > { %12533 = vst [vmem:[#allocation43_spill] sm:$0xff] %v6839_v9 }
 0x163   : > { %12534 = vst [vmem:[#allocation44_spill] sm:$0xff] %v6842_v10 }
 0x165   : > { %v534_v55 = vpop.f32.mrf.mxu2  ;;  %v557_v58 = vpop.f32.mrf.mxu3 }
 0x166   : > { %v535_v60 = vadd.f32 %v534_v55, %v6666_v32  ;;  %v558_v61 = vadd.f32 %v557_v58, %v6666_v32 }
 0x167   : > { %4901 = vrot.lane.b32.xlu0 %v6688_v43, %s12339_s22  ;;  %4891 = vrot.lane.b32.xlu2 %v6688_v43, %s12340_s9 }
 0x168   : > { %4906 = vrot.lane.b32.xlu1 %v6684_v42, %s12339_s22  ;;  %v6827_v0 = vmul.f32 %v535_v60, %v6615_v3  ;;  %v6830_v1 = vmul.f32 %v558_v61, %v6619_v4 }
 0x16a   : > { %12529 = vst [vmem:[#allocation39_spill] sm:$0xff] %v6827_v0  ;;  %v6846_v11 = vpack.i.bf16 %v6830_v1, %v6842_v10  ;;  %v6850_v3 = vpack.i.bf16 %v6827_v0, %v6839_v9 }
 0x16b   : > { %12530 = vst [vmem:[#allocation40_spill] sm:$0xff] %v6830_v1 }
 0x16f   : > { %4926 = vrot.lane.b32.xlu0 %v6684_v42, %s12343_s16  ;;  %4916 = vrot.lane.b32.xlu2 %v6684_v42, %s11934_s21 }
 0x170   : > { %4911 = vrot.lane.b32.xlu1 %v6688_v43, %s11934_s21 }
 0x177   : > { %4931 = vrot.lane.b32.xlu0 %v6688_v43, %s12342_s30  ;;  %4921 = vrot.lane.b32.xlu2 %v6688_v43, %s12343_s16 }
 0x178   : > { %4936 = vrot.lane.b32.xlu1 %v6684_v42, %s12342_s30 }
 0x17f   : > { %4956 = vrot.lane.b32.xlu0 %v6684_v42, %s11926_s17  ;;  %4946 = vrot.lane.b32.xlu2 %v6684_v42, %s11920_s5 }
 0x180   : > { %4941 = vrot.lane.b32.xlu1 %v6688_v43, %s11920_s5 }
 0x187   : > { %4961 = vrot.lane.b32.xlu0 %v6688_v43, %s11932_s10  ;;  %4951 = vrot.lane.b32.xlu2 %v6688_v43, %s11926_s17 }
 0x188   : > { %4966 = vrot.lane.b32.xlu1 %v6684_v42, %s11932_s10 }
 0x18f   : > { %4986 = vrot.lane.b32.xlu0 %v6684_v42, %s11918_s12  ;;  %4976 = vrot.lane.b32.xlu2 %v6684_v42, %s11916_s15 }
 0x190   : > { %4971 = vrot.lane.b32.xlu1 %v6688_v43, %s11916_s15 }
 0x197   : > { %4991 = vrot.lane.b32.xlu0 %v6688_v43, %s11924_s29  ;;  %4981 = vrot.lane.b32.xlu2 %v6688_v43, %s11918_s12 }
 0x198   : > { %4996 = vrot.lane.b32.xlu1 %v6684_v42, %s11924_s29 }
 0x19f   : > { %5016 = vrot.lane.b32.xlu0 %v6684_v42, %s11898_s19  ;;  %5006 = vrot.lane.b32.xlu2 %v6684_v42, %s11922_s11 }
 0x1a0   : > { %5001 = vrot.lane.b32.xlu1 %v6688_v43, %s11922_s11 }
 0x1a7   : > { %5021 = vrot.lane.b32.xlu0 %v6688_v43, %s11900_s20  ;;  %5011 = vrot.lane.b32.xlu2 %v6688_v43, %s11898_s19  ;;  %s11908_s19 = smov 20  }
 0x1a8   : > { %5026 = vrot.lane.b32.xlu1 %v6684_v42, %s11900_s20  ;;  %s11946_s20 = smov 21  }
 0x1af   : > { %5046 = vrot.lane.b32.xlu0 %v6684_v42, %s11904_s8  ;;  %5036 = vrot.lane.b32.xlu2 %v6684_v42, %s11902_s23 }
 0x1b0   : > { %5031 = vrot.lane.b32.xlu1 %v6688_v43, %s11902_s23  ;;  %s11912_s23 = smov 19  }
 0x1b7   : > { %5051 = vrot.lane.b32.xlu0 %v6688_v43, %s11906_s26  ;;  %5041 = vrot.lane.b32.xlu2 %v6688_v43, %s11904_s8  ;;  %s11914_s8 = smov 2  }
 0x1b8   : > { %5056 = vrot.lane.b32.xlu1 %v6684_v42, %s11906_s26  ;;  %s11910_s26 = smov 3  }
 0x1b9   : > { %v6762_v44 = vpop.permute.xlu2 %4886 }
 0x1ba   : > { %12518 = vst [vmem:[#allocation28_spill] sm:$0xff] %v6762_v44 }
 0x1bf   : > { %5076 = vrot.lane.b32.xlu0 %v6684_v42, %s11908_s19  ;;  %5066 = vrot.lane.b32.xlu2 %v6684_v42, %s11946_s20 }
 0x1c0   : > { %5061 = vrot.lane.b32.xlu1 %v6688_v43, %s11946_s20 }
 0x1c1   : > { %v6770_v45 = vpop.permute.xlu2 %4891 }
 0x1c2   : > { %12519 = vst [vmem:[#allocation29_spill] sm:$0xff] %v6770_v45 }
 0x1c7   : > { %5081 = vrot.lane.b32.xlu0 %v6688_v43, %s11912_s23  ;;  %5071 = vrot.lane.b32.xlu2 %v6688_v43, %s11908_s19  ;;  %s11960_s19 = smov 1  }
 0x1c8   : > { %5086 = vrot.lane.b32.xlu1 %v6684_v42, %s11912_s23  ;;  %s11965_s23 = smov 127  }
 0x1c9   : > { %v6778_v46 = vpop.permute.xlu2 %4916 }
 0x1ca   : > { %12520 = vst [vmem:[#allocation30_spill] sm:$0xff] %v6778_v46 }
 0x1cf   : > { %5106 = vrot.lane.b32.xlu0 %v6684_v42, %s11914_s8  ;;  %5096 = vrot.lane.b32.xlu2 %v6684_v42, %s11910_s26 }
 0x1d0   : > { %5091 = vrot.lane.b32.xlu1 %v6688_v43, %s11910_s26  ;;  %s12005_s26 = smov 126  }
 0x1d1   : > { %v6786_v47 = vpop.permute.xlu0 %4896  ;;  %v6788_v48 = vpop.permute.xlu2 %4921 }
 0x1d2   : > { %12521 = vst [vmem:[#allocation31_spill] sm:$0xff] %v6786_v47  ;;  %v6790_v49 = vpop.permute.xlu1 %4881 }
 0x1d3   : > { %12522 = vst [vmem:[#allocation32_spill] sm:$0xff] %v6788_v48 }
 0x1d4   : > { %12523 = vst [vmem:[#allocation33_spill] sm:$0xff] %v6790_v49 }
 0x1d7   : > { %5111 = vrot.lane.b32.xlu0 %v6688_v43, %s11960_s19  ;;  %5101 = vrot.lane.b32.xlu2 %v6688_v43, %s11914_s8  ;;  %s11977_s8 = smov 125  }
 0x1d8   : > { %5116 = vrot.lane.b32.xlu1 %v6684_v42, %s11960_s19 }
 0x1d9   : > { %v6798_v52 = vpop.permute.xlu0 %4901  ;;  %v6800_v53 = vpop.permute.xlu2 %4946 }
 0x1da   : > { %12524 = vst [vmem:[#allocation34_spill] sm:$0xff] %v6798_v52  ;;  %v6802_v54 = vpop.permute.xlu1 %4906 }
 0x1db   : > { %12525 = vst [vmem:[#allocation35_spill] sm:$0xff] %v6800_v53 }
 0x1dc   : > { %12526 = vst [vmem:[#allocation36_spill] sm:$0xff] %v6802_v54 }
 0x1df   : > { %5136 = vrot.lane.b32.xlu0 %v6684_v42, %s12005_s26  ;;  %5126 = vrot.lane.b32.xlu2 %v6684_v42, %s11965_s23 }
 0x1e0   : > { %5121 = vrot.lane.b32.xlu1 %v6688_v43, %s11965_s23 }
 0x1e1   : > { %v6810_v56 = vpop.permute.xlu0 %4926  ;;  %v6812_v57 = vpop.permute.xlu2 %4951 }
 0x1e2   : > { %12527 = vst [vmem:[#allocation37_spill] sm:$0xff] %v6810_v56  ;;  %v6814_v59 = vpop.permute.xlu1 %4911 }
 0x1e3   : > { %12528 = vst [vmem:[#allocation38_spill] sm:$0xff] %v6814_v59 }
 0x1e7   : > { %5141 = vrot.lane.b32.xlu0 %v6688_v43, %s11977_s8  ;;  %5131 = vrot.lane.b32.xlu2 %v6688_v43, %s12005_s26 }
 0x1e8   : > { %5146 = vrot.lane.b32.xlu1 %v6684_v42, %s11977_s8 }
 0x1e9   : > { %v6832_v2 = vpop.permute.xlu0 %4931  ;;  %v6834_v5 = vpop.permute.xlu2 %4976 }
 0x1ea   : > { %12531 = vst [vmem:[#allocation41_spill] sm:$0xff] %v6834_v5  ;;  %v6836_v6 = vpop.permute.xlu1 %4936 }
 0x1eb   : > { %12532 = vst [vmem:[#allocation42_spill] sm:$0xff] %v6836_v6 }
 0x1ef   : > { %5176 = vrot.lane.b32.xlu0 %v6846_v11, %s12339_s22  ;;  %5151 = vrot.lane.b32.xlu2 %v6850_v3, %s12341_s4 }
 0x1f0   : > { %5156 = vrot.lane.b32.xlu1 %v6846_v11, %s12341_s4 }
 0x1f1   : > { %v6858_v4 = vpop.permute.xlu0 %4956  ;;  %v6860_v7 = vpop.permute.xlu2 %4981 }
 0x1f2   : > { %12535 = vst [vmem:[#allocation45_spill] sm:$0xff] %v6858_v4  ;;  %v6862_v8 = vpop.permute.xlu1 %4941 }
 0x1f3   : > { %12536 = vst [vmem:[#allocation46_spill] sm:$0xff] %v6860_v7 }
 0x1f7   : > { %5181 = vrot.lane.b32.xlu0 %v6850_v3, %s11934_s21  ;;  %5166 = vrot.lane.b32.xlu2 %v6846_v11, %s12340_s9 }
 0x1f8   : > { %5161 = vrot.lane.b32.xlu1 %v6850_v3, %s12340_s9 }
 0x1f9   : > { %v6870_v12 = vpop.permute.xlu0 %4961  ;;  %v6872_v13 = vpop.permute.xlu2 %5006 }
 0x1fa   : > { %12537 = vst [vmem:[#allocation47_spill] sm:$0xff] %v6870_v12  ;;  %v6874_v14 = vpop.permute.xlu1 %4966 }
 0x1fb   : > { %12538 = vst [vmem:[#allocation48_spill] sm:$0xff] %v6872_v13 }
 0x1fc   : > { %12539 = vst [vmem:[#allocation49_spill] sm:$0xff] %v6874_v14 }
 0x1ff   : > { %5206 = vrot.lane.b32.xlu0 %v6846_v11, %s12342_s30  ;;  %5171 = vrot.lane.b32.xlu2 %v6850_v3, %s12339_s22 }
 0x200   : > { %5186 = vrot.lane.b32.xlu1 %v6846_v11, %s11934_s21  ;;  %s12572_s21 = smov 20  }
 0x201   : > { %v6882_v15 = vpop.permute.xlu0 %4986  ;;  %v6884_v16 = vpop.permute.xlu2 %5011 }
 0x202   : > { %12540 = vst [vmem:[#allocation50_spill] sm:$0xff] %v6882_v15  ;;  %v6886_v17 = vpop.permute.xlu1 %4971 }
 0x203   : > { %12541 = vst [vmem:[#allocation51_spill] sm:$0xff] %v6884_v16 }
 0x204   : > { %12542 = vst [vmem:[#allocation52_spill] sm:$0xff] %v6886_v17 }
 0x207   : > { %5211 = vrot.lane.b32.xlu0 %v6850_v3, %s11920_s5  ;;  %5196 = vrot.lane.b32.xlu2 %v6846_v11, %s12343_s16 }
 0x208   : > { %5191 = vrot.lane.b32.xlu1 %v6850_v3, %s12343_s16 }
 0x209   : > { %v6894_v18 = vpop.permute.xlu0 %4991  ;;  %v6896_v19 = vpop.permute.xlu2 %5036 }
 0x20a   : > { %12543 = vst [vmem:[#allocation53_spill] sm:$0xff] %v6894_v18  ;;  %v6898_v20 = vpop.permute.xlu1 %4996 }
 0x20b   : > { %12544 = vst [vmem:[#allocation54_spill] sm:$0xff] %v6896_v19 }
 0x20c   : > { %12545 = vst [vmem:[#allocation55_spill] sm:$0xff] %v6898_v20 }
 0x20f   : > { %5236 = vrot.lane.b32.xlu0 %v6846_v11, %s11932_s10  ;;  %5201 = vrot.lane.b32.xlu2 %v6850_v3, %s12342_s30 }
 0x210   : > { %5216 = vrot.lane.b32.xlu1 %v6846_v11, %s11920_s5  ;;  %s12558_s5 = smov 41  }
 0x211   : > { %v6906_v21 = vpop.permute.xlu0 %5016  ;;  %v6908_v22 = vpop.permute.xlu2 %5041 }
 0x212   : > { %12546 = vst [vmem:[#allocation56_spill] sm:$0xff] %v6906_v21  ;;  %v6910_v23 = vpop.permute.xlu1 %5001  ;;  %v11984_v21 = vunpack.i.l.bf16 %v6862_v8 }
 0x213   : > { %12547 = vst [vmem:[#allocation57_spill] sm:$0xff] %v6910_v23 }
 0x217   : > { %5241 = vrot.lane.b32.xlu0 %v6850_v3, %s11916_s15  ;;  %5226 = vrot.lane.b32.xlu2 %v6846_v11, %s11926_s17 }
 0x218   : > { %5221 = vrot.lane.b32.xlu1 %v6850_v3, %s11926_s17  ;;  %s12567_s17 = smov 19  }
 0x219   : > { %v6918_v24 = vpop.permute.xlu0 %5021  ;;  %v6920_v25 = vpop.permute.xlu2 %5066 }
 0x21a   : > { %12548 = vst [vmem:[#allocation58_spill] sm:$0xff] %v6918_v24  ;;  %v6922_v26 = vpop.permute.xlu1 %5026 }
 0x21b   : > { %12549 = vst [vmem:[#allocation59_spill] sm:$0xff] %v6920_v25 }
 0x21c   : > { %12550 = vst [vmem:[#allocation60_spill] sm:$0xff] %v6922_v26 }
 0x21f   : > { %5266 = vrot.lane.b32.xlu0 %v6846_v11, %s11924_s29  ;;  %5231 = vrot.lane.b32.xlu2 %v6850_v3, %s11932_s10  ;;  %s12571_s10 = smov 3  }
 0x220   : > { %5246 = vrot.lane.b32.xlu1 %v6846_v11, %s11916_s15  ;;  %s12555_s15 = smov 25  }
 0x221   : > { %v6930_v27 = vpop.permute.xlu0 %5046  ;;  %v6932_v28 = vpop.permute.xlu2 %5071 }
 0x222   : > { %12551 = vst [vmem:[#allocation61_spill] sm:$0xff] %v6930_v27  ;;  %v6934_v29 = vpop.permute.xlu1 %5031 }
 0x223   : > { %12552 = vst [vmem:[#allocation62_spill] sm:$0xff] %v6934_v29 }
 0x227   : > { %5271 = vrot.lane.b32.xlu0 %v6850_v3, %s11922_s11  ;;  %5256 = vrot.lane.b32.xlu2 %v6846_v11, %s11918_s12 }
 0x228   : > { %5251 = vrot.lane.b32.xlu1 %v6850_v3, %s11918_s12  ;;  %s12557_s12 = smov 24  }
 0x229   : > { %v6942_v30 = vpop.permute.xlu0 %5051  ;;  %v6944_v31 = vpop.permute.xlu2 %5096 }
 0x22a   : > { %12553 = vst [vmem:[#allocation63_spill] sm:$0xff] %v6944_v31  ;;  %v6946_v32 = vpop.permute.xlu1 %5056 }
 0x22b   : > { %12554 = vst [vmem:[#allocation64_spill] sm:$0xff] %v6946_v32  ;;  %v584_v32 = vlaneseq }
 0x22d   : > { %v7054_v20 = vand.u32 127, %v584_v32  ;;  %v11968_v32 = vunpack.i.l.bf16 %v6812_v57 }
 0x22f   : > { %5296 = vrot.lane.b32.xlu0 %v6846_v11, %s12555_s15  ;;  %5261 = vrot.lane.b32.xlu2 %v6850_v3, %s11924_s29  ;;  %s12564_s29 = smov 23   ;;  %vm12207_vm3 = vcmp.lt.s32.totalorder %v7054_v20, 47  ;;  %vm784_vm4 = vcmp.lt.s32.totalorder %v7054_v20, 63  ;;  %vm751_vm5 = vcmp.lt.s32.totalorder %v7054_v20, 64  ;;  %vm718_vm6 = vcmp.lt.s32.totalorder %v7054_v20, 65 }
 0x230   : > { %5276 = vrot.lane.b32.xlu1 %v6846_v11, %s11922_s11  ;;  %s12561_s11 = smov 22   ;;  %vm12246_vm7 = vcmp.lt.s32.totalorder %v7054_v20, 66  ;;  %vm12094_vm8 = vcmp.lt.s32.totalorder %v7054_v20, 46  ;;  %vm12241_vm9 = vcmp.lt.s32.totalorder %v7054_v20, 67  ;;  %vm12229_vm10 = vcmp.lt.s32.totalorder %v7054_v20, 68 }
 0x231   : > { %v6954_v33 = vpop.permute.xlu0 %5076  ;;  %v6956_v34 = vpop.permute.xlu2 %5101  ;;  %vm12233_vm11 = vcmp.lt.s32.totalorder %v7054_v20, 69  ;;  %vm12080_vm12 = vcmp.lt.s32.totalorder %v7054_v20, 43  ;;  %vm12088_vm13 = vcmp.lt.s32.totalorder %v7054_v20, 45  ;;  %vm12085_vm14 = vcmp.lt.s32.totalorder %v7054_v20, 44 }
 0x232   : > { %12556 = vst [vmem:[#allocation65_spill] sm:$0xff] %v6954_v33  ;;  %v6958_v35 = vpop.permute.xlu1 %5061  ;;  %vm12099_vm15 = vcmp.lt.s32.totalorder %v7054_v20, 25  ;;  %vm12070_vm1 = vcmp.lt.s32.totalorder %v7054_v20, 42  ;;  %vm12100_vm2 = vcmp.lt.s32.totalorder %v7054_v20, 24  ;;  %vm12086_vm0 = vcmp.lt.s32.totalorder %v7054_v20, 41 }
 0x237   : > { %5301 = vrot.lane.b32.xlu0 %v6850_v3, %s12557_s12  ;;  %5286 = vrot.lane.b32.xlu2 %v6846_v11, %s12558_s5 }
 0x238   : > { %5281 = vrot.lane.b32.xlu1 %v6850_v3, %s12558_s5 }
 0x239   : > { %v6966_v37 = vpop.permute.xlu0 %5081  ;;  %v6968_v38 = vpop.permute.xlu2 %5126 }
 0x23a   : > { %12559 = vst [vmem:[#allocation66_spill] sm:$0xff] %v6968_v38  ;;  %v6970_v50 = vpop.permute.xlu1 %5086 }
 0x23b   : > { %12560 = vst [vmem:[#allocation67_spill] sm:$0xff] %v6970_v50 }
 0x23f   : > { %5326 = vrot.lane.b32.xlu0 %v6846_v11, %s12561_s11  ;;  %5291 = vrot.lane.b32.xlu2 %v6850_v3, %s12555_s15 }
 0x240   : > { %5306 = vrot.lane.b32.xlu1 %v6846_v11, %s12557_s12 }
 0x241   : > { %v6978_v51 = vpop.permute.xlu0 %5106  ;;  %v6980_v55 = vpop.permute.xlu2 %5131 }
 0x242   : > { %12562 = vst [vmem:[#allocation68_spill] sm:$0xff] %v6978_v51  ;;  %v6982_v58 = vpop.permute.xlu1 %5091 }
 0x243   : > { %12563 = vst [vmem:[#allocation69_spill] sm:$0xff] %v6980_v55 }
 0x247   : > { %5331 = vrot.lane.b32.xlu0 %v6850_v3, %s11946_s20  ;;  %5316 = vrot.lane.b32.xlu2 %v6846_v11, %s12564_s29 }
 0x248   : > { %5311 = vrot.lane.b32.xlu1 %v6850_v3, %s12564_s29 }
 0x249   : > { %v6990_v60 = vpop.permute.xlu0 %5111  ;;  %v6992_v61 = vpop.permute.xlu2 %5151 }
 0x24a   : > { %12565 = vst [vmem:[#allocation70_spill] sm:$0xff] %v6992_v61  ;;  %v6994_v62 = vpop.permute.xlu1 %5116 }
 0x24b   : > { %12566 = vst [vmem:[#allocation71_spill] sm:$0xff] %v6994_v62 }
 0x24f   : > { %5356 = vrot.lane.b32.xlu0 %v6846_v11, %s12567_s17  ;;  %5321 = vrot.lane.b32.xlu2 %v6850_v3, %s12561_s11 }
 0x250   : > { %5336 = vrot.lane.b32.xlu1 %v6846_v11, %s11946_s20  ;;  %s12579_s20 = smov 2  }
 0x251   : > { %v7002_v63 = vpop.permute.xlu0 %5136  ;;  %v7004_v9 = vpop.permute.xlu2 %5166 }
 0x252   : > { %12568 = vst [vmem:[#allocation72_spill] sm:$0xff] %v7002_v63  ;;  %v7006_v0 = vpop.permute.xlu1 %5121 }
 0x253   : > { %12569 = vst [vmem:[#allocation73_spill] sm:$0xff] %v7004_v9 }
 0x254   : > { %12570 = vst [vmem:[#allocation74_spill] sm:$0xff] %v7006_v0 }
 0x257   : > { %5361 = vrot.lane.b32.xlu0 %v6850_v3, %s12571_s10  ;;  %5346 = vrot.lane.b32.xlu2 %v6846_v11, %s12572_s21 }
 0x258   : > { %5341 = vrot.lane.b32.xlu1 %v6850_v3, %s12572_s21 }
 0x259   : > { %v7014_v61 = vpop.permute.xlu0 %5141  ;;  %v7016_v10 = vpop.permute.xlu2 %5171 }
 0x25a   : > { %12573 = vst [vmem:[#allocation75_spill] sm:$0xff] %v7014_v61  ;;  %v7018_v1 = vpop.permute.xlu1 %5146 }
 0x25b   : > { %12574 = vst [vmem:[#allocation76_spill] sm:$0xff] %v7016_v10 }
 0x25c   : > { %12575 = vst [vmem:[#allocation77_spill] sm:$0xff] %v7018_v1 }
 0x25f   : > { %5386 = vrot.lane.b32.xlu0 %v6846_v11, %s11960_s19  ;;  %5351 = vrot.lane.b32.xlu2 %v6850_v3, %s12567_s17 }
 0x260   : > { %5366 = vrot.lane.b32.xlu1 %v6846_v11, %s12571_s10 }
 0x261   : > { %v7026_v36 = vpop.permute.xlu0 %5176  ;;  %v7028_v41 = vpop.permute.xlu2 %5196 }
 0x262   : > { %12576 = vst [vmem:[#allocation78_spill] sm:$0xff] %v7026_v36  ;;  %v7030_v14 = vpop.permute.xlu1 %5156 }
 0x263   : > { %12577 = vst [vmem:[#allocation79_spill] sm:$0xff] %v7028_v41 }
 0x264   : > { %12578 = vst [vmem:[#allocation80_spill] sm:$0xff] %v7030_v14 }
 0x267   : > { %5391 = vrot.lane.b32.xlu0 %v6850_v3, %s11965_s23  ;;  %5376 = vrot.lane.b32.xlu2 %v6846_v11, %s12579_s20 }
 0x268   : > { %5371 = vrot.lane.b32.xlu1 %v6850_v3, %s12579_s20 }
 0x269   : > { %v7038_v10 = vpop.permute.xlu0 %5181  ;;  %v7040_v27 = vpop.permute.xlu2 %5201 }
 0x26a   : > { %12580 = vst [vmem:[#allocation81_spill] sm:$0xff] %v7038_v10  ;;  %v7042_v5 = vpop.permute.xlu1 %5161  ;;  %v11964_v10 = vunpack.i.h.bf16 %v6812_v57 }
 0x26b   : > { %12581 = vst [vmem:[#allocation82_spill] sm:$0xff] %v7040_v27 }
 0x26c   : > { %12582 = vst [vmem:[#allocation83_spill] sm:$0xff] %v7042_v5 }
 0x26f   : > { %5416 = vrot.lane.b32.xlu0 %v6846_v11, %s11977_s8  ;;  %5381 = vrot.lane.b32.xlu2 %v6850_v3, %s11960_s19  ;;  %s12013_s19 = smov 109  }
 0x270   : > { %5396 = vrot.lane.b32.xlu1 %v6846_v11, %s11965_s23  ;;  %s12052_s23 = smov 108  }
 0x271   : > { %v7050_v25 = vpop.permute.xlu0 %5206  ;;  %v7052_v15 = vpop.permute.xlu2 %5226 }
 0x272   : > { %12583 = vst [vmem:[#allocation84_spill] sm:$0xff] %v7050_v25  ;;  %v11963_v5 = vunpack.i.h.bf16 %v7052_v15  ;;  %v7058_v27 = vpop.permute.xlu1 %5186  ;;  %v11967_v33 = vunpack.i.l.bf16 %v7052_v15  ;;  %v12600_v62 = vunpack.i.l.bf16 %v7050_v25 }
 0x273   : > { %12584 = vst [vmem:[#allocation85_spill] sm:$0xff] %v7052_v15  ;;  %v11980_v15 = vunpack.i.h.bf16 %v6862_v8  ;;  %v12609_v47 = vunpack.i.l.bf16 %v7058_v27 }
 0x274   : > { %12585 = vst [vmem:[#allocation86_spill] sm:$0xff] %v7058_v27  ;;  %v825_v50 = vsel %vm12207_vm3, %v11963_v5, %v11964_v10  ;;  %v824_v31 = vsel %vm12207_vm3, %v11967_v33, %v11968_v32 }
 0x275   : > { %2489 = vmatpush.msra.mxu0 %v825_v50 }
 0x277   : > { %5431 = vrot.lane.b32.xlu0 %v6850_v3, %s12013_s19  ;;  %5406 = vrot.lane.b32.xlu2 %v6846_v11, %s12005_s26 }
 0x278   : > { %2490 = vmatpush.msra.mxu0 %v824_v31  ;;  %5401 = vrot.lane.b32.xlu1 %v6850_v3, %s12005_s26  ;;  %s12126_s26 = smov 106  }
 0x279   : > { %v7081_v5 = vpop.permute.xlu0 %5211  ;;  %v7083_v50 = vpop.permute.xlu2 %5231 }
 0x27a   : > { %12586 = vst [vmem:[#allocation87_spill] sm:$0xff] %v7081_v5  ;;  %v7085_v10 = vpop.permute.xlu1 %5191  ;;  %v12602_v5 = vunpack.i.h.bf16 %v7028_v41 }
 0x27b   : > { %12587 = vst [vmem:[#allocation88_spill] sm:$0xff] %v7083_v50 }
 0x27c   : > { %12588 = vst [vmem:[#allocation89_spill] sm:$0xff] %v7085_v10 }
 0x27f   : > { %5446 = vrot.lane.b32.xlu0 %v6684_v42, %s12052_s23  ;;  %5411 = vrot.lane.b32.xlu2 %v6850_v3, %s11977_s8  ;;  %s12028_s8 = smov 107  }
 0x280   : > { %5421 = vrot.lane.b32.xlu1 %v6688_v43, %s12013_s19 }
 0x281   : > { %v7093_v31 = vpop.permute.xlu0 %5236  ;;  %v7095_v33 = vpop.permute.xlu2 %5256 }
 0x282   : > { %v7097_v32 = vpop.permute.xlu1 %5216 }
 0x283   : > { %12589 = vst [vmem:[#allocation90_spill] sm:$0xff] %v7097_v32  ;;  %v11979_v10 = vunpack.i.h.bf16 %v7097_v32  ;;  %v12591_v26 = vunpack.i.l.bf16 %v7097_v32  ;;  %v12595_v32 = vunpack.i.h.bf16 %v6832_v2 }
 0x285   : > { %v7111_v13 = vsel %vm784_vm4, %v11979_v10, %v11980_v15  ;;  %v7126_v10 = vsel %vm784_vm4, %v12591_v26, %v11984_v21  ;;  %v12596_v26 = vunpack.i.h.bf16 %v7050_v25  ;;  %v11990_v15 = vunpack.i.h.bf16 %v6788_v48 }
 0x286   : > { %12590 = vst [vmem:[#allocation91_spill] sm:$0xff] %v7111_v13  ;;  %2491 = vmatpush.msra.mxu0 %v7111_v13  ;;  %v12608_v25 = vunpack.i.l.bf16 %v6814_v59 }
 0x287   : > { %5461 = vrot.lane.b32.xlu0 %v6688_v43, %s12028_s8  ;;  %5426 = vrot.lane.b32.xlu2 %v6684_v42, %s12013_s19  ;;  %12592 = vst [vmem:[#allocation92_spill] sm:$0xff] %v7126_v10  ;;  %v7144_v21 = vsel %vm751_vm5, %v12596_v26, %v12595_v32  ;;  %v11994_v32 = vunpack.i.l.bf16 %v6788_v48  ;;  %v12604_v26 = vunpack.i.l.bf16 %v7028_v41 }
 0x288   : > { %5436 = vrot.lane.b32.xlu1 %v6846_v11, %s12013_s19  ;;  %2492 = vmatpush.msra.mxu0 %v7126_v10  ;;  %12597 = vst [vmem:[#allocation95_spill] sm:$0xff] %v7144_v21  ;;  %v12599_v10 = vunpack.i.l.bf16 %v6832_v2  ;;  %v692_v54 = vsel %vm12246_vm7, %v12609_v47, %v12608_v25  ;;  %v12012_v25 = vunpack.i.h.bf16 %v7004_v9  ;;  %s12063_s19 = smov 105  }
 0x289   : > { %v7134_v51 = vpop.permute.xlu0 %5241  ;;  %v7136_v13 = vpop.permute.xlu2 %5261 }
 0x28a   : > { %12593 = vst [vmem:[#allocation93_spill] sm:$0xff] %v7134_v51  ;;  %v7146_v19 = vpop.permute.xlu1 %5221  ;;  %2493 = vmatpush.msra.mxu0 %v7144_v21  ;;  %v7157_v44 = vsel %vm751_vm5, %v12600_v62, %v12599_v10  ;;  %v7169_v21 = vsel %vm718_vm6, %v12602_v5, %v11990_v15  ;;  %v7184_v5 = vsel %vm718_vm6, %v12604_v26, %v11994_v32  ;;  %v12606_v26 = vunpack.i.h.bf16 %v6814_v59 }
 0x28b   : > { %12594 = vst [vmem:[#allocation94_spill] sm:$0xff] %v7136_v13  ;;  %v12607_v32 = vunpack.i.h.bf16 %v7058_v27  ;;  %v12002_v15 = vunpack.i.h.bf16 %v7083_v50  ;;  %v12614_v62 = vunpack.i.h.bf16 %v7026_v36 }
 0x28c   : > { %12598 = vst [vmem:[#allocation96_spill] sm:$0xff] %v7146_v19  ;;  %2494 = vmatpush.msra.mxu0 %v7157_v44 }
 0x28d   : > { %12601 = vst [vmem:[#allocation97_spill] sm:$0xff] %v7157_v44  ;;  %v693_v10 = vsel %vm12246_vm7, %v12607_v32, %v12606_v26  ;;  %v12610_v32 = vunpack.i.h.bf16 %v7093_v31  ;;  %v12612_v26 = vunpack.i.l.bf16 %v7093_v31 }
 0x28e   : > { %12603 = vst [vmem:[#allocation98_spill] sm:$0xff] %v7169_v21  ;;  %2495 = vmatpush.msra.mxu0 %v7169_v21  ;;  %v12008_v21 = vunpack.i.h.bf16 %v6798_v52 }
 0x28f   : > { %5476 = vrot.lane.b32.xlu0 %v6846_v11, %s12028_s8  ;;  %5441 = vrot.lane.b32.xlu2 %v6688_v43, %s12052_s23  ;;  %12605 = vst [vmem:[#allocation99_spill] sm:$0xff] %v7184_v5 }
 0x290   : > { %5451 = vrot.lane.b32.xlu1 %v6850_v3, %s12052_s23  ;;  %2496 = vmatpush.msra.mxu0 %v7184_v5  ;;  %v12007_v5 = vunpack.i.l.bf16 %v7083_v50 }
 0x291   : > { %v7194_v44 = vpop.permute.xlu0 %5266  ;;  %v7196_v19 = vpop.permute.xlu2 %5286 }
 0x292   : > { %v7206_v41 = vpop.permute.xlu1 %5246  ;;  %2497 = vmatpush.msra.mxu0 %v693_v10  ;;  %v7224_v10 = vsel %vm12094_vm8, %v12002_v15, %v12610_v32  ;;  %v7232_v47 = vsel %vm12094_vm8, %v12007_v5, %v12612_v26  ;;  %v660_v32 = vsel %vm12241_vm9, %v12614_v62, %v12008_v21  ;;  %v12016_v15 = vunpack.i.h.bf16 %v6770_v45 }
 0x293   : > { %12611 = vst [vmem:[#allocation100_spill] sm:$0xff] %v7224_v10  ;;  %v12615_v26 = vunpack.i.l.bf16 %v7026_v36  ;;  %v12019_v62 = vunpack.i.l.bf16 %v7030_v14  ;;  %v12620_v36 = vunpack.i.l.bf16 %v7004_v9  ;;  %v12020_v10 = vunpack.i.l.bf16 %v6790_v49 }
 0x294   : > { %2498 = vmatpush.msra.mxu0 %v692_v54  ;;  %12613 = vst [vmem:[#allocation101_spill] sm:$0xff] %v7232_v47  ;;  %v12009_v54 = vunpack.i.l.bf16 %v6798_v52  ;;  %v12627_v9 = vunpack.i.h.bf16 %v7134_v51 }
 0x296   : > { %2499 = vmatpush.msra.mxu0 %v660_v32  ;;  %v659_v5 = vsel %vm12241_vm9, %v12615_v26, %v12009_v54  ;;  %v627_v26 = vsel %vm12229_vm10, %v12012_v25, %v12016_v15  ;;  %v12619_v32 = vunpack.i.l.bf16 %v6770_v45 }
 0x297   : > { %5491 = vrot.lane.b32.xlu0 %v6850_v3, %s12126_s26  ;;  %5456 = vrot.lane.b32.xlu2 %v6846_v11, %s12052_s23  ;;  %s12092_s23 = smov 103  }
 0x298   : > { %5466 = vrot.lane.b32.xlu1 %v6684_v42, %s12028_s8  ;;  %2500 = vmatpush.msra.mxu0 %v659_v5  ;;  %v12015_v5 = vunpack.i.h.bf16 %v6790_v49  ;;  %v626_v47 = vsel %vm12229_vm10, %v12620_v36, %v12619_v32  ;;  %v593_v36 = vsel %vm12233_vm11, %v12019_v62, %v12020_v10  ;;  %v12030_v62 = vunpack.i.l.bf16 %v7136_v13 }
 0x299   : > { %v7259_v21 = vpop.permute.xlu0 %5271  ;;  %v7261_v27 = vpop.permute.xlu2 %5291  ;;  %v12629_v49 = vunpack.i.l.bf16 %v7206_v41 }
 0x29a   : > { %12616 = vst [vmem:[#allocation102_spill] sm:$0xff] %v7259_v21  ;;  %v7269_v54 = vpop.permute.xlu1 %5251  ;;  %2501 = vmatpush.msra.mxu0 %v627_v26  ;;  %v12621_v26 = vunpack.i.h.bf16 %v7030_v14  ;;  %v12027_v14 = vunpack.i.h.bf16 %v7136_v13  ;;  %v12637_v13 = vunpack.i.h.bf16 %v7259_v21  ;;  %v12640_v46 = vunpack.i.l.bf16 %v7259_v21 }
 0x29b   : > { %12617 = vst [vmem:[#allocation103_spill] sm:$0xff] %v7261_v27  ;;  %v12646_v21 = vunpack.i.l.bf16 %v6918_v24 }
 0x29c   : > { %12618 = vst [vmem:[#allocation104_spill] sm:$0xff] %v7269_v54  ;;  %2502 = vmatpush.msra.mxu0 %v626_v47  ;;  %v594_v25 = vsel %vm12233_vm11, %v12621_v26, %v12015_v5  ;;  %v12626_v47 = vunpack.i.h.bf16 %v7206_v41 }
 0x29e   : > { %2503 = vmatpush.msra.mxu0 %v594_v25  ;;  %v12624_v25 = vunpack.i.l.bf16 %v7194_v44  ;;  %v7337_v50 = vsel %vm12088_vm13, %v12627_v9, %v12626_v47 }
 0x29f   : > { %5506 = vrot.lane.b32.xlu0 %v6684_v42, %s12063_s19  ;;  %5471 = vrot.lane.b32.xlu2 %v6850_v3, %s12028_s8  ;;  %12628 = vst [vmem:[#allocation107_spill] sm:$0xff] %v7337_v50  ;;  %s12073_s8 = smov 104  }
 0x2a0   : > { %5481 = vrot.lane.b32.xlu1 %v6688_v43, %s12126_s26  ;;  %2504 = vmatpush.msra.mxu0 %v593_v36  ;;  %v12622_v36 = vunpack.i.h.bf16 %v7194_v44  ;;  %v7329_v32 = vsel %vm12080_vm12, %v12030_v62, %v12624_v25  ;;  %v12033_v25 = vunpack.i.h.bf16 %v7269_v54  ;;  %v12035_v62 = vunpack.i.l.bf16 %v7269_v54 }
 0x2a1   : > { %v7303_v5 = vpop.permute.xlu0 %5296  ;;  %v7305_v15 = vpop.permute.xlu2 %5316  ;;  %12625 = vst [vmem:[#allocation106_spill] sm:$0xff] %v7329_v32  ;;  %v12051_v54 = vunpack.i.l.bf16 %v7261_v27 }
 0x2a2   : > { %v7309_v10 = vpop.permute.xlu1 %5276  ;;  %v7321_v26 = vsel %vm12080_vm12, %v12027_v14, %v12622_v36  ;;  %v12630_v36 = vunpack.i.l.bf16 %v7134_v51  ;;  %v5298_v51 = vunpack.i.l.bf16 %v7303_v5 }
 0x2a3   : > { %12623 = vst [vmem:[#allocation105_spill] sm:$0xff] %v7321_v26  ;;  %v5299_v26 = vunpack.i.h.bf16 %v7303_v5  ;;  %v12048_v5 = vunpack.i.h.bf16 %v7261_v27  ;;  %v12642_v27 = vunpack.i.h.bf16 %v6934_v29 }
 0x2a4   : > { %v7345_v14 = vsel %vm12088_vm13, %v12630_v36, %v12629_v49  ;;  %v12034_v36 = vunpack.i.h.bf16 %v7095_v33  ;;  %v1055_v48 = vsel %vm12099_vm15, %v5298_v51, %v12646_v21  ;;  %v12069_v21 = vunpack.i.h.bf16 %v6910_v23 }
 0x2a5   : > { %12631 = vst [vmem:[#allocation108_spill] sm:$0xff] %v7345_v14  ;;  %v12036_v14 = vunpack.i.l.bf16 %v7095_v33 }
 0x2a6   : > { %v7370_v50 = vsel %vm12085_vm14, %v12033_v25, %v12034_v36  ;;  %v5279_v25 = vunpack.i.h.bf16 %v7309_v10 }
 0x2a7   : > { %5521 = vrot.lane.b32.xlu0 %v6688_v43, %s12073_s8  ;;  %5486 = vrot.lane.b32.xlu2 %v6684_v42, %s12126_s26  ;;  %12633 = vst [vmem:[#allocation110_spill] sm:$0xff] %v7370_v50  ;;  %v7378_v32 = vsel %vm12085_vm14, %v12035_v62, %v12036_v14  ;;  %v7410_v14 = vsel %vm12099_vm15, %v12048_v5, %v5299_v26 }
 0x2a8   : > { %5496 = vrot.lane.b32.xlu1 %v6846_v11, %s12126_s26  ;;  %12634 = vst [vmem:[#allocation111_spill] sm:$0xff] %v7378_v32  ;;  %v7416_v32 = vsel %vm12099_vm15, %v12051_v54, %v5298_v51  ;;  %v7422_v59 = vsel %vm12070_vm1, %v12637_v13, %v5279_v25  ;;  %v5288_v13 = vunpack.i.l.bf16 %v7196_v19  ;;  %s12169_s26 = smov 81  }
 0x2a9   : > { %v7353_v9 = vpop.permute.xlu0 %5301  ;;  %v7355_v47 = vpop.permute.xlu2 %5321  ;;  %12635 = vst [vmem:[#allocation112_spill] sm:$0xff] %v7410_v14  ;;  %v12054_v14 = vunpack.i.l.bf16 %v6934_v29 }
 0x2aa   : > { %12632 = vst [vmem:[#allocation109_spill] sm:$0xff] %v7355_v47  ;;  %v7359_v49 = vpop.permute.xlu1 %5281 }
 0x2ab   : > { %12636 = vst [vmem:[#allocation113_spill] sm:$0xff] %v7416_v32  ;;  %v12062_v32 = vunpack.i.h.bf16 %v6918_v24 }
 0x2ac   : > { %12638 = vst [vmem:[#allocation114_spill] sm:$0xff] %v7422_v59  ;;  %v12067_v59 = vunpack.i.h.bf16 %v7359_v49 }
 0x2af   : > { %5536 = vrot.lane.b32.xlu0 %v6846_v11, %s12073_s8  ;;  %5501 = vrot.lane.b32.xlu2 %v6688_v43, %s12063_s19 }
 0x2b0   : > { %5511 = vrot.lane.b32.xlu1 %v6850_v3, %s12063_s19 }
 0x2b1   : > { %v7390_v50 = vpop.permute.xlu0 %5326  ;;  %v7392_v62 = vpop.permute.xlu2 %5346 }
 0x2b2   : > { %v7400_v36 = vpop.permute.xlu1 %5306 }
 0x2b3   : > { %v5309_v45 = vunpack.i.h.bf16 %v7400_v36  ;;  %v5308_v52 = vunpack.i.l.bf16 %v7400_v36  ;;  %v12639_v36 = vunpack.i.l.bf16 %v7309_v10 }
 0x2b5   : > { %v7430_v5 = vsel %vm12070_vm1, %v12640_v46, %v12639_v36  ;;  %v1089_v54 = vsel %vm12100_vm2, %v5309_v45, %v12642_v27  ;;  %v1088_v46 = vsel %vm12100_vm2, %v5308_v52, %v12054_v14  ;;  %v5289_v27 = vunpack.i.h.bf16 %v7196_v19 }
 0x2b6   : > { %12641 = vst [vmem:[#allocation115_spill] sm:$0xff] %v7430_v5  ;;  %2509 = vmatpush.msra.mxu1 %v1089_v54  ;;  %v1056_v5 = vsel %vm12099_vm15, %v5299_v26, %v12062_v32  ;;  %v12066_v14 = vunpack.i.l.bf16 %v7359_v49  ;;  %v12068_v26 = vunpack.i.l.bf16 %v6884_v16  ;;  %vm1279_vm15 = vcmp.lt.s32.totalorder %v7054_v20, 3 }
 0x2b7   : > { %5551 = vrot.lane.b32.xlu0 %v6850_v3, %s12092_s23  ;;  %5516 = vrot.lane.b32.xlu2 %v6846_v11, %s12063_s19  ;;  %v7478_v19 = vsel %vm12086_vm0, %v12067_v59, %v5289_v27  ;;  %s12102_s19 = smov 87   ;;  %v990_v59 = vsel %vm12070_vm1, %v5279_v25, %v12069_v21  ;;  %v12076_v25 = vunpack.i.l.bf16 %v7355_v47  ;;  %v12079_v21 = vunpack.i.l.bf16 %v6894_v18 }
 0x2b8   : > { %5526 = vrot.lane.b32.xlu1 %v6684_v42, %s12073_s8  ;;  %2510 = vmatpush.msra.mxu1 %v1088_v46  ;;  %v12065_v46 = vunpack.i.h.bf16 %v6884_v16  ;;  %12647 = vst [vmem:[#allocation119_spill] sm:$0xff] %v7478_v19  ;;  %v1022_v51 = vsel %vm12086_vm0, %v5288_v13, %v12068_v26  ;;  %v12075_v19 = vunpack.i.h.bf16 %v7355_v47 }
 0x2b9   : > { %v7450_v54 = vpop.permute.xlu0 %5331  ;;  %v7452_v36 = vpop.permute.xlu2 %5351 }
 0x2ba   : > { %12643 = vst [vmem:[#allocation116_spill] sm:$0xff] %v7450_v54  ;;  %v7460_v29 = vpop.permute.xlu1 %5311  ;;  %2511 = vmatpush.msra.mxu1 %v1056_v5  ;;  %v1023_v32 = vsel %vm12086_vm0, %v5289_v27, %v12065_v46  ;;  %v12078_v5 = vunpack.i.h.bf16 %v7353_v9 }
 0x2bb   : > { %12644 = vst [vmem:[#allocation117_spill] sm:$0xff] %v7452_v36 }
 0x2bc   : > { %12645 = vst [vmem:[#allocation118_spill] sm:$0xff] %v7460_v29  ;;  %2512 = vmatpush.msra.mxu1 %v1055_v48  ;;  %v7484_v48 = vsel %vm12086_vm0, %v12066_v14, %v5288_v13  ;;  %v12072_v13 = vunpack.i.h.bf16 %v6894_v18  ;;  %vm1246_vm0 = vcmp.lt.s32.totalorder %v7054_v20, 19  ;;  %v12781_v18 = vld [vmem:[#allocation34_spill] sm:$0xff] }
 0x2bd   : > { %12648 = vst [vmem:[#allocation120_spill] sm:$0xff] %v7484_v48  ;;  %v12077_v48 = vunpack.i.l.bf16 %v7353_v9 }
 0x2be   : > { %2513 = vmatpush.msra.mxu1 %v1023_v32  ;;  %v12071_v32 = vunpack.i.l.bf16 %v6910_v23 }
 0x2bf   : > { %5566 = vrot.lane.b32.xlu0 %v6684_v42, %s12102_s19  ;;  %5531 = vrot.lane.b32.xlu2 %v6850_v3, %s12073_s8  ;;  %s12114_s8 = smov 86  }
 0x2c0   : > { %5541 = vrot.lane.b32.xlu1 %v6688_v43, %s12092_s23  ;;  %2514 = vmatpush.msra.mxu1 %v1022_v51  ;;  %v12649_v51 = vunpack.i.l.bf16 %v7309_v10 }
 0x2c1   : > { %v7500_v46 = vpop.permute.xlu0 %5356  ;;  %v7502_v14 = vpop.permute.xlu2 %5376 }
 0x2c2   : > { %v7509_v26 = vpop.permute.xlu1 %5336  ;;  %2515 = vmatpush.msra.mxu1 %v990_v59  ;;  %v989_v27 = vsel %vm12070_vm1, %v12649_v51, %v12071_v32  ;;  %v12650_v59 = vunpack.i.h.bf16 %v7194_v44  ;;  %vm12143_vm1 = vcmp.lt.s32.totalorder %v7054_v20, 22  ;;  %v7533_v51 = vsel %vm12100_vm2, %v12078_v5, %v5309_v45 }
 0x2c3   : > { %12651 = vst [vmem:[#allocation121_spill] sm:$0xff] %v7533_v51  ;;  %v12653_v32 = vunpack.i.h.bf16 %v7390_v50  ;;  %v12675_v51 = vunpack.i.l.bf16 %v7093_v31  ;;  %v12702_v47 = vunpack.i.l.bf16 %v7500_v46 }
 0x2c4   : > { %2516 = vmatpush.msra.mxu1 %v989_v27  ;;  %v957_v10 = vsel %vm12080_vm12, %v12650_v59, %v12072_v13  ;;  %v7539_v27 = vsel %vm12100_vm2, %v12077_v48, %v5308_v52  ;;  %v12655_v13 = vunpack.i.l.bf16 %v7390_v50  ;;  %v12081_v52 = vunpack.i.h.bf16 %v6860_v7 }
 0x2c5   : > { %12652 = vst [vmem:[#allocation122_spill] sm:$0xff] %v7539_v27  ;;  %v7547_v59 = vsel %vm12143_vm1, %v12075_v19, %v12653_v32  ;;  %v12657_v32 = vunpack.i.l.bf16 %v7194_v44  ;;  %v12660_v44 = vunpack.i.h.bf16 %v7095_v33  ;;  %v12674_v27 = vunpack.i.l.bf16 %v6870_v12 }
 0x2c6   : > { %12654 = vst [vmem:[#allocation123_spill] sm:$0xff] %v7547_v59  ;;  %v7555_v45 = vsel %vm12143_vm1, %v12076_v25, %v12655_v13  ;;  %2517 = vmatpush.msra.mxu1 %v957_v10  ;;  %v12082_v13 = vunpack.i.l.bf16 %v6860_v7  ;;  %v12084_v10 = vunpack.i.h.bf16 %v7305_v15  ;;  %v12664_v25 = vunpack.i.h.bf16 %v7460_v29 }
 0x2c7   : > { %12656 = vst [vmem:[#allocation124_spill] sm:$0xff] %v7555_v45  ;;  %5581 = vrot.lane.b32.xlu0 %v6688_v43, %s12114_s8  ;;  %5546 = vrot.lane.b32.xlu2 %v6684_v42, %s12092_s23  ;;  %v956_v19 = vsel %vm12080_vm12, %v12657_v32, %v12079_v21  ;;  %v924_v32 = vsel %vm12085_vm14, %v12660_v44, %v12081_v52  ;;  %v12662_v45 = vunpack.i.l.bf16 %v7095_v33  ;;  %vm12133_vm12 = vcmp.lt.s32.totalorder %v7054_v20, 23 }
 0x2c8   : > { %5556 = vrot.lane.b32.xlu1 %v6846_v11, %s12092_s23  ;;  %2518 = vmatpush.msra.mxu1 %v956_v19  ;;  %v12083_v19 = vunpack.i.h.bf16 %v6886_v17  ;;  %v7608_v33 = vsel %vm12133_vm12, %v12664_v25, %v12084_v10  ;;  %v12669_v25 = vunpack.i.l.bf16 %v6886_v17  ;;  %s12123_s23 = smov 85   ;;  %vm1213_vm2 = vcmp.lt.s32.totalorder %v7054_v20, 20 }
 0x2c9   : > { %v7573_v48 = vpop.permute.xlu0 %5361  ;;  %v7575_v5 = vpop.permute.xlu2 %5381  ;;  %v923_v59 = vsel %vm12085_vm14, %v12662_v45, %v12082_v13  ;;  %12665 = vst [vmem:[#allocation128_spill] sm:$0xff] %v7608_v33  ;;  %v12667_v45 = vunpack.i.l.bf16 %v7460_v29  ;;  %vm12171_vm14 = vcmp.lt.s32.totalorder %v7054_v20, 21  ;;  %v12095_v33 = vunpack.i.h.bf16 %v7450_v54 }
 0x2ca   : > { %12658 = vst [vmem:[#allocation125_spill] sm:$0xff] %v7573_v48  ;;  %v7583_v21 = vpop.permute.xlu1 %5341  ;;  %2519 = vmatpush.msra.mxu1 %v924_v32  ;;  %v12663_v32 = vunpack.i.h.bf16 %v7206_v41  ;;  %v12693_v29 = vunpack.i.l.bf16 %v7502_v14 }
 0x2cb   : > { %12659 = vst [vmem:[#allocation126_spill] sm:$0xff] %v7575_v5 }
 0x2cc   : > { %12661 = vst [vmem:[#allocation127_spill] sm:$0xff] %v7583_v21  ;;  %2520 = vmatpush.msra.mxu1 %v923_v59  ;;  %v891_v52 = vsel %vm12088_vm13, %v12663_v32, %v12083_v19  ;;  %v12666_v59 = vunpack.i.l.bf16 %v7305_v15  ;;  %v12670_v19 = vunpack.i.l.bf16 %v7206_v41  ;;  %v12676_v41 = vunpack.i.h.bf16 %v6990_v60 }
 0x2ce   : > { %v7616_v13 = vsel %vm12133_vm12, %v12667_v45, %v12666_v59  ;;  %2521 = vmatpush.msra.mxu1 %v891_v52  ;;  %v890_v10 = vsel %vm12088_vm13, %v12670_v19, %v12669_v25  ;;  %v12672_v59 = vunpack.i.h.bf16 %v6870_v12  ;;  %v12673_v45 = vunpack.i.h.bf16 %v7093_v31 }
 0x2cf   : > { %12668 = vst [vmem:[#allocation129_spill] sm:$0xff] %v7616_v13  ;;  %5596 = vrot.lane.b32.xlu0 %v6846_v11, %s12114_s8  ;;  %5561 = vrot.lane.b32.xlu2 %v6688_v43, %s12102_s19  ;;  %v12091_v13 = vunpack.i.l.bf16 %v7452_v36  ;;  %vm12308_vm13 = vcmp.lt.s32.totalorder %v7054_v20, 1 }
 0x2d0   : > { %5571 = vrot.lane.b32.xlu1 %v6850_v3, %s12102_s19  ;;  %2522 = vmatpush.msra.mxu1 %v890_v10  ;;  %v858_v52 = vsel %vm12094_vm8, %v12673_v45, %v12672_v59  ;;  %v12089_v10 = vunpack.i.h.bf16 %v7452_v36  ;;  %v857_v59 = vsel %vm12094_vm8, %v12675_v51, %v12674_v27  ;;  %v12679_v51 = vunpack.i.l.bf16 %v7500_v46  ;;  %v12788_v36 = vld [vmem:[#allocation28_spill] sm:$0xff] }
 0x2d1   : > { %v7640_v25 = vpop.permute.xlu0 %5386  ;;  %v7642_v44 = vpop.permute.xlu2 %5406  ;;  %vm12309_vm8 = vcmp.lt.s32.totalorder %v7054_v20, 2 }
 0x2d2   : > { %12671 = vst [vmem:[#allocation130_spill] sm:$0xff] %v7642_v44  ;;  %v12090_v32 = vunpack.i.h.bf16 %v7640_v25  ;;  %v7654_v19 = vpop.permute.xlu1 %5366  ;;  %2523 = vmatpush.msra.mxu1 %v858_v52  ;;  %v12677_v44 = vunpack.i.h.bf16 %v7500_v46  ;;  %v7686_v27 = vsel %vm1246_vm0, %v12091_v13, %v12679_v51  ;;  %v12098_v51 = vunpack.i.h.bf16 %v6956_v34 }
 0x2d3   : > { %12680 = vst [vmem:[#allocation132_spill] sm:$0xff] %v7686_v27  ;;  %v12686_v13 = vunpack.i.l.bf16 %v6990_v60  ;;  %v12687_v45 = vunpack.i.l.bf16 %v7640_v25 }
 0x2d4   : > { %2524 = vmatpush.msra.mxu1 %v857_v59  ;;  %v1353_v52 = vsel %vm12308_vm13, %v12090_v32, %v12676_v41  ;;  %v7678_v31 = vsel %vm1246_vm0, %v12089_v10, %v12677_v44  ;;  %v12681_v59 = vunpack.i.h.bf16 %v7509_v26  ;;  %v12683_v44 = vunpack.i.l.bf16 %v7509_v26 }
 0x2d5   : > { %12678 = vst [vmem:[#allocation131_spill] sm:$0xff] %v7678_v31  ;;  %2529 = vmatpush.msra.mxu2 %v1353_v52  ;;  %v12684_v10 = vunpack.i.l.bf16 %v7450_v54  ;;  %v12692_v31 = vunpack.i.l.bf16 %v6956_v34 }
 0x2d6   : > { %v7694_v41 = vsel %vm12171_vm14, %v12095_v33, %v12681_v59  ;;  %v1352_v59 = vsel %vm12308_vm13, %v12687_v45, %v12686_v13  ;;  %v12688_v13 = vunpack.i.h.bf16 %v7502_v14  ;;  %v5348_v33 = vunpack.i.l.bf16 %v7392_v62 }
 0x2d7   : > { %12682 = vst [vmem:[#allocation133_spill] sm:$0xff] %v7694_v41  ;;  %v7702_v32 = vsel %vm12171_vm14, %v12684_v10, %v12683_v44  ;;  %5611 = vrot.lane.b32.xlu0 %v6850_v3, %s12123_s23  ;;  %2530 = vmatpush.msra.mxu2 %v1352_v59  ;;  %v5369_v44 = vunpack.i.h.bf16 %v7654_v19  ;;  %v12104_v59 = vunpack.i.h.bf16 %v7583_v21  ;;  %v5368_v41 = vunpack.i.l.bf16 %v7654_v19 }
 0x2d8   : > { %12685 = vst [vmem:[#allocation134_spill] sm:$0xff] %v7702_v32  ;;  %5576 = vrot.lane.b32.xlu2 %v6846_v11, %s12102_s19  ;;  %5586 = vrot.lane.b32.xlu1 %v6684_v42, %s12114_s8  ;;  %v1320_v45 = vsel %vm12309_vm8, %v12688_v13, %v12098_v51  ;;  %v12101_v32 = vunpack.i.h.bf16 %v6982_v58  ;;  %v1319_v13 = vsel %vm12309_vm8, %v12693_v29, %v12692_v31  ;;  %v5349_v51 = vunpack.i.h.bf16 %v7392_v62  ;;  %s12128_s19 = smov 84  }
 0x2d9   : > { %v7729_v52 = vpop.permute.xlu0 %5391  ;;  %v7731_v10 = vpop.permute.xlu2 %5411  ;;  %2531 = vmatpush.msra.mxu2 %v1320_v45  ;;  %v12105_v45 = vunpack.i.l.bf16 %v6982_v58  ;;  %v12695_v62 = vunpack.i.l.bf16 %v7583_v21 }
 0x2da   : > { %12689 = vst [vmem:[#allocation135_spill] sm:$0xff] %v7729_v52  ;;  %v7735_v27 = vpop.permute.xlu1 %5371  ;;  %v1287_v19 = vsel %vm1279_vm15, %v5369_v44, %v12101_v32  ;;  %v7756_v29 = vsel %vm1213_vm2, %v12104_v59, %v5349_v51  ;;  %v12701_v52 = vunpack.i.l.bf16 %v6966_v37 }
 0x2db   : > { %12690 = vst [vmem:[#allocation136_spill] sm:$0xff] %v7731_v10  ;;  %2532 = vmatpush.msra.mxu2 %v1319_v13  ;;  %v7762_v31 = vsel %vm1213_vm2, %v12695_v62, %v5348_v33  ;;  %v12111_v13 = vunpack.i.h.bf16 %v6966_v37  ;;  %v1286_v32 = vsel %vm1279_vm15, %v5368_v41, %v12105_v45  ;;  %v12697_v62 = vunpack.i.h.bf16 %v7500_v46 }
 0x2dc   : > { %12691 = vst [vmem:[#allocation137_spill] sm:$0xff] %v7735_v27  ;;  %v12782_v10 = vunpack.i.h.bf16 %v12781_v18 }
 0x2dd   : > { %2533 = vmatpush.msra.mxu2 %v1287_v19  ;;  %12694 = vst [vmem:[#allocation138_spill] sm:$0xff] %v7756_v29  ;;  %v1254_v59 = vsel %vm1246_vm0, %v12697_v62, %v12111_v13  ;;  %v1253_v62 = vsel %vm1246_vm0, %v12702_v47, %v12701_v52  ;;  %v12117_v13 = vunpack.i.h.bf16 %v7573_v48  ;;  %v12703_v19 = vunpack.i.h.bf16 %v7640_v25 }
 0x2de   : > { %12696 = vst [vmem:[#allocation139_spill] sm:$0xff] %v7762_v31  ;;  %v12706_v47 = vunpack.i.l.bf16 %v7640_v25  ;;  %v12707_v52 = vunpack.i.l.bf16 %v7575_v5  ;;  %v12119_v25 = vunpack.i.h.bf16 %v6958_v35 }
 0x2df   : > { %5626 = vrot.lane.b32.xlu0 %v6684_v42, %s12128_s19  ;;  %2534 = vmatpush.msra.mxu2 %v1286_v32  ;;  %v12120_v32 = vunpack.i.h.bf16 %v6932_v28 }
 0x2e0   : > { %5591 = vrot.lane.b32.xlu2 %v6850_v3, %s12114_s8  ;;  %5601 = vrot.lane.b32.xlu1 %v6688_v43, %s12123_s23  ;;  %s12156_s8 = smov 83  }
 0x2e1   : > { %v7782_v45 = vpop.permute.xlu0 %5416  ;;  %v7784_v31 = vpop.permute.xlu2 %5426  ;;  %2535 = vmatpush.msra.mxu2 %v1254_v59  ;;  %v12118_v59 = vunpack.i.l.bf16 %v6932_v28  ;;  %v1221_v29 = vsel %vm1213_vm2, %v5349_v51, %v12120_v32  ;;  %v7824_v51 = vsel %vm1279_vm15, %v12117_v13, %v5369_v44  ;;  %v12121_v44 = vunpack.i.l.bf16 %v6958_v35 }
 0x2e2   : > { %12698 = vst [vmem:[#allocation140_spill] sm:$0xff] %v7782_v45  ;;  %v7789_v12 = vpop.permute.xlu1 %5396  ;;  %v12116_v45 = vunpack.i.l.bf16 %v7573_v48  ;;  %v12716_v32 = vunpack.i.h.bf16 %v7390_v50 }
 0x2e3   : > { %12699 = vst [vmem:[#allocation141_spill] sm:$0xff] %v7784_v31  ;;  %2536 = vmatpush.msra.mxu2 %v1253_v62  ;;  %v7818_v62 = vsel %vm12308_vm13, %v12707_v52, %v12706_v47  ;;  %v12717_v47 = vunpack.i.h.bf16 %v7502_v14 }
 0x2e4   : > { %12700 = vst [vmem:[#allocation142_spill] sm:$0xff] %v7789_v12  ;;  %v12704_v12 = vunpack.i.h.bf16 %v7575_v5 }
 0x2e5   : > { %12708 = vst [vmem:[#allocation144_spill] sm:$0xff] %v7818_v62  ;;  %2537 = vmatpush.msra.mxu2 %v1221_v29  ;;  %v12125_v29 = vunpack.i.h.bf16 %v7735_v27 }
 0x2e6   : > { %v7810_v46 = vsel %vm12308_vm13, %v12704_v12, %v12703_v19  ;;  %12709 = vst [vmem:[#allocation145_spill] sm:$0xff] %v7824_v51  ;;  %v7830_v12 = vsel %vm1279_vm15, %v12116_v45, %v5368_v41  ;;  %v1220_v19 = vsel %vm1213_vm2, %v5348_v33, %v12118_v59  ;;  %v12711_v41 = vunpack.i.h.bf16 %v7509_v26 }
 0x2e7   : > { %12705 = vst [vmem:[#allocation143_spill] sm:$0xff] %v7810_v46  ;;  %5641 = vrot.lane.b32.xlu0 %v6688_v43, %s12156_s8  ;;  %2538 = vmatpush.msra.mxu2 %v1220_v19  ;;  %v12122_v45 = vunpack.i.h.bf16 %v6942_v30  ;;  %v12715_v59 = vunpack.i.l.bf16 %v7509_v26  ;;  %v7878_v26 = vsel %vm12309_vm8, %v12125_v29, %v12717_v47  ;;  %v12724_v47 = vunpack.i.h.bf16 %v7305_v15 }
 0x2e8   : > { %12710 = vst [vmem:[#allocation146_spill] sm:$0xff] %v7830_v12  ;;  %5606 = vrot.lane.b32.xlu2 %v6684_v42, %s12123_s23  ;;  %5616 = vrot.lane.b32.xlu1 %v6846_v11, %s12123_s23  ;;  %v1188_v33 = vsel %vm12171_vm14, %v12711_v41, %v12119_v25  ;;  %v12131_v25 = vunpack.i.h.bf16 %v6908_v22  ;;  %s12137_s23 = smov 82  }
 0x2e9   : > { %v7852_v52 = vpop.permute.xlu0 %5431  ;;  %v7854_v19 = vpop.permute.xlu2 %5441  ;;  %2539 = vmatpush.msra.mxu2 %v1188_v33  ;;  %v1187_v41 = vsel %vm12171_vm14, %v12715_v59, %v12121_v44  ;;  %v1155_v33 = vsel %vm12143_vm1, %v12716_v32, %v12122_v45  ;;  %12718 = vst [vmem:[#allocation150_spill] sm:$0xff] %v7878_v26  ;;  %v12719_v59 = vunpack.i.l.bf16 %v7502_v14  ;;  %v12722_v32 = vunpack.i.l.bf16 %v6942_v30 }
 0x2ea   : > { %12712 = vst [vmem:[#allocation147_spill] sm:$0xff] %v7852_v52  ;;  %v7857_v13 = vpop.permute.xlu1 %5401  ;;  %v12130_v14 = vunpack.i.l.bf16 %v6908_v22  ;;  %vm12302_vm14 = vcmp.lt.s32.totalorder %v7054_v20, 126 }
 0x2eb   : > { %12713 = vst [vmem:[#allocation148_spill] sm:$0xff] %v7854_v19  ;;  %2540 = vmatpush.msra.mxu2 %v1187_v41  ;;  %v12720_v41 = vunpack.i.l.bf16 %v7735_v27 }
 0x2ec   : > { %12714 = vst [vmem:[#allocation149_spill] sm:$0xff] %v7857_v13  ;;  %v12164_v13 = vunpack.i.l.bf16 %v7854_v19 }
 0x2ed   : > { %2541 = vmatpush.msra.mxu2 %v1155_v33  ;;  %v7886_v44 = vsel %vm12309_vm8, %v12720_v41, %v12719_v59  ;;  %v12723_v33 = vunpack.i.l.bf16 %v7390_v50  ;;  %v1122_v50 = vsel %vm12133_vm12, %v12724_v47, %v12131_v25 }
 0x2ee   : > { %12721 = vst [vmem:[#allocation151_spill] sm:$0xff] %v7886_v44 }
 0x2ef   : > { %v1154_v45 = vsel %vm12143_vm1, %v12723_v33, %v12722_v32  ;;  %5656 = vrot.lane.b32.xlu0 %v6846_v11, %s12156_s8  ;;  %v12728_v32 = vunpack.i.l.bf16 %v7305_v15  ;;  %vm12158_vm1 = vcmp.lt.s32.totalorder %v7054_v20, 107 }
 0x2f0   : > { %2542 = vmatpush.msra.mxu2 %v1154_v45  ;;  %5621 = vrot.lane.b32.xlu2 %v6688_v43, %s12128_s19 }
 0x2f1   : > { %5631 = vrot.lane.b32.xlu1 %v6850_v3, %s12128_s19  ;;  %v7908_v59 = vpop.permute.xlu0 %5446  ;;  %v7910_v41 = vpop.permute.xlu2 %5456  ;;  %v1121_v33 = vsel %vm12133_vm12, %v12728_v32, %v12130_v14  ;;  %vm12150_vm12 = vcmp.lt.s32.totalorder %v7054_v20, 106 }
 0x2f2   : > { %12725 = vst [vmem:[#allocation152_spill] sm:$0xff] %v7908_v59  ;;  %2543 = vmatpush.msra.mxu2 %v1122_v50  ;;  %v7912_v45 = vpop.permute.xlu1 %5421 }
 0x2f3   : > { %12726 = vst [vmem:[#allocation153_spill] sm:$0xff] %v7910_v41 }
 0x2f4   : > { %12727 = vst [vmem:[#allocation154_spill] sm:$0xff] %v7912_v45  ;;  %2544 = vmatpush.msra.mxu2 %v1121_v33 }
 0x2f7   : > { %5671 = vrot.lane.b32.xlu0 %v6850_v3, %s12137_s23 }
 0x2f8   : > { %5636 = vrot.lane.b32.xlu2 %v6846_v11, %s12128_s19  ;;  %s12337_s19 = smov 62  }
 0x2f9   : > { %5646 = vrot.lane.b32.xlu1 %v6684_v42, %s12156_s8  ;;  %v7926_v47 = vpop.permute.xlu0 %5461  ;;  %v7928_v50 = vpop.permute.xlu2 %5471 }
 0x2fa   : > { %12729 = vst [vmem:[#allocation155_spill] sm:$0xff] %v7926_v47  ;;  %v7930_v29 = vpop.permute.xlu1 %5436 }
 0x2fb   : > { %12730 = vst [vmem:[#allocation156_spill] sm:$0xff] %v7928_v50  ;;  %v2087_v50 = vld [vmem:[#allocation7] sm:$0xff] }
 0x2fc   : > { %12731 = vst [vmem:[#allocation157_spill] sm:$0xff] %v7930_v29  ;;  %v12160_v29 = vunpack.i.l.bf16 %v7926_v47  ;;  %2505 = vmatmul.f32.vlgmr.msra.gmra.mxu0 %v2087_v50 }
 0x2ff   : > { %5686 = vrot.lane.b32.xlu0 %v6684_v42, %s12169_s26 }
 0x300   : > { %5651 = vrot.lane.b32.xlu2 %v6850_v3, %s12156_s8  ;;  %s12344_s8 = smov 60  }
 0x301   : > { %5661 = vrot.lane.b32.xlu1 %v6688_v43, %s12137_s23  ;;  %v7938_v15 = vpop.permute.xlu0 %5476  ;;  %v7940_v32 = vpop.permute.xlu2 %5486 }
 0x302   : > { %12732 = vst [vmem:[#allocation158_spill] sm:$0xff] %v7938_v15  ;;  %v7942_v33 = vpop.permute.xlu1 %5451  ;;  %v12142_v62 = vunpack.i.h.bf16 %v7940_v32  ;;  %v12151_v15 = vunpack.i.l.bf16 %v7940_v32 }
 0x303   : > { %12733 = vst [vmem:[#allocation159_spill] sm:$0xff] %v7940_v32 }
 0x304   : > { %12734 = vst [vmem:[#allocation160_spill] sm:$0xff] %v7942_v33 }
 0x307   : > { %5701 = vrot.lane.b32.xlu0 %v6688_v43, %s12337_s19 }
 0x308   : > { %5666 = vrot.lane.b32.xlu2 %v6684_v42, %s12137_s23 }
 0x309   : > { %5676 = vrot.lane.b32.xlu1 %v6846_v11, %s12137_s23  ;;  %v7950_v14 = vpop.permute.xlu0 %5491  ;;  %v7952_v25 = vpop.permute.xlu2 %5501  ;;  %s12322_s23 = smov 61  }
 0x30a   : > { %12735 = vst [vmem:[#allocation161_spill] sm:$0xff] %v7952_v25  ;;  %v7954_v12 = vpop.permute.xlu1 %5466 }
 0x30b   : > { %12736 = vst [vmem:[#allocation162_spill] sm:$0xff] %v7954_v12  ;;  %v12743_v7 = vunpack.i.h.bf16 %v7954_v12  ;;  %v12745_v17 = vunpack.i.l.bf16 %v7954_v12 }
 0x30f   : > { %5716 = vrot.lane.b32.xlu0 %v6846_v11, %s12337_s19 }
 0x310   : > { %5681 = vrot.lane.b32.xlu2 %v6688_v43, %s12169_s26 }
 0x311   : > { %5691 = vrot.lane.b32.xlu1 %v6850_v3, %s12169_s26  ;;  %v7962_v51 = vpop.permute.xlu0 %5506  ;;  %v7964_v44 = vpop.permute.xlu2 %5516 }
 0x312   : > { %12737 = vst [vmem:[#allocation163_spill] sm:$0xff] %v7964_v44  ;;  %v7966_v26 = vpop.permute.xlu1 %5481 }
 0x313   : > { %12738 = vst [vmem:[#allocation164_spill] sm:$0xff] %v7966_v26  ;;  %v12141_v46 = vunpack.i.h.bf16 %v7966_v26 }
 0x315   : > { %v1590_v41 = vsel %vm12150_vm12, %v12141_v46, %v12142_v62  ;;  %v12739_v46 = vunpack.i.l.bf16 %v7966_v26  ;;  %v12744_v26 = vunpack.i.h.bf16 %v7926_v47  ;;  %v12751_v47 = vunpack.i.h.bf16 %v7018_v1 }
 0x316   : > { %2549 = vmatpush.msra.mxu3 %v1590_v41 }
 0x317   : > { %5731 = vrot.lane.b32.xlu0 %v6850_v3, %s12322_s23  ;;  %v1589_v41 = vsel %vm12150_vm12, %v12739_v46, %v12151_v15  ;;  %v1557_v46 = vsel %vm12158_vm1, %v12744_v26, %v12743_v7  ;;  %vm12163_vm12 = vcmp.lt.s32.totalorder %v7054_v20, 108  ;;  %v12165_v15 = vunpack.i.l.bf16 %v7908_v59 }
 0x318   : > { %5696 = vrot.lane.b32.xlu2 %v6846_v11, %s12169_s26  ;;  %2550 = vmatpush.msra.mxu3 %v1589_v41  ;;  %v12159_v41 = vunpack.i.h.bf16 %v7854_v19  ;;  %v12746_v7 = vunpack.i.h.bf16 %v7908_v59  ;;  %v12749_v19 = vunpack.i.h.bf16 %v7912_v45  ;;  %s12320_s26 = smov 59  }
 0x319   : > { %5706 = vrot.lane.b32.xlu1 %v6684_v42, %s12337_s19  ;;  %v7994_v62 = vpop.permute.xlu0 %5521  ;;  %v7996_v44 = vpop.permute.xlu2 %5531 }
 0x31a   : > { %12740 = vst [vmem:[#allocation165_spill] sm:$0xff] %v7994_v62  ;;  %v8001_v54 = vpop.permute.xlu1 %5496  ;;  %2551 = vmatpush.msra.mxu3 %v1557_v46  ;;  %v1524_v26 = vsel %vm12163_vm12, %v12159_v41, %v12746_v7  ;;  %v12172_v46 = vunpack.i.h.bf16 %v7784_v31  ;;  %v12750_v41 = vunpack.i.l.bf16 %v7912_v45  ;;  %v12185_v45 = vunpack.i.l.bf16 %v6968_v38 }
 0x31b   : > { %12741 = vst [vmem:[#allocation166_spill] sm:$0xff] %v7996_v44 }
 0x31c   : > { %12742 = vst [vmem:[#allocation167_spill] sm:$0xff] %v8001_v54  ;;  %v1556_v54 = vsel %vm12158_vm1, %v12160_v29, %v12745_v17  ;;  %vm1485_vm1 = vcmp.lt.s32.totalorder %v7054_v20, 109  ;;  %v12173_v17 = vunpack.i.l.bf16 %v7784_v31 }
 0x31d   : > { %2552 = vmatpush.msra.mxu3 %v1556_v54  ;;  %v1523_v54 = vsel %vm12163_vm12, %v12164_v13, %v12165_v15  ;;  %vm12176_vm12 = vcmp.lt.s32.totalorder %v7054_v20, 125  ;;  %v12177_v13 = vunpack.i.l.bf16 %v7014_v61  ;;  %v12178_v15 = vunpack.i.l.bf16 %v7018_v1 }
 0x31e   : > { %v1490_v29 = vsel %vm1485_vm1, %v12750_v41, %v12173_v17 }
 0x31f   : > { %2553 = vmatpush.msra.mxu3 %v1524_v26  ;;  %5746 = vrot.lane.b32.xlu0 %v6684_v42, %s12344_s8 }
 0x320   : > { %5711 = vrot.lane.b32.xlu2 %v6850_v3, %s12337_s19  ;;  %s13392_s19 = smov 47  }
 0x321   : > { %5721 = vrot.lane.b32.xlu1 %v6688_v43, %s12322_s23  ;;  %2554 = vmatpush.msra.mxu3 %v1523_v54  ;;  %v8040_v7 = vpop.permute.xlu0 %5536  ;;  %v8042_v26 = vpop.permute.xlu2 %5546  ;;  %v1491_v54 = vsel %vm1485_vm1, %v12749_v19, %v12172_v46  ;;  %v12752_v19 = vunpack.i.h.bf16 %v7014_v61  ;;  %v12181_v46 = vunpack.i.h.bf16 %v6980_v55 }
 0x322   : > { %12747 = vst [vmem:[#allocation168_spill] sm:$0xff] %v8040_v7  ;;  %v8048_v21 = vpop.permute.xlu1 %5511  ;;  %v12186_v7 = vunpack.i.h.bf16 %v7002_v63 }
 0x323   : > { %12748 = vst [vmem:[#allocation169_spill] sm:$0xff] %v8048_v21  ;;  %2555 = vmatpush.msra.mxu3 %v1491_v54  ;;  %v1458_v54 = vsel %vm12176_vm12, %v12752_v19, %v12751_v47  ;;  %v1457_v47 = vsel %vm12176_vm12, %v12177_v13, %v12178_v15  ;;  %vm12296_vm12 = vcmp.lt.s32.totalorder %v7054_v20, 127  ;;  %v12184_v13 = vunpack.i.l.bf16 %v7006_v0 }
 0x324   : > { %v1425_v61 = vsel %vm12302_vm14, %v12181_v46, %v12186_v7  ;;  %v12754_v15 = vunpack.i.l.bf16 %v7002_v63  ;;  %v12771_v63 = vld [vmem:[#allocation38_spill] sm:$0xff] }
 0x325   : > { %2556 = vmatpush.msra.mxu3 %v1490_v29  ;;  %v12778_v31 = vunpack.i.l.bf16 %v12771_v63 }
 0x327   : > { %2557 = vmatpush.msra.mxu3 %v1458_v54  ;;  %5761 = vrot.lane.b32.xlu0 %v6688_v43, %s12320_s26  ;;  %v12182_v54 = vunpack.i.l.bf16 %v6980_v55 }
 0x328   : > { %5726 = vrot.lane.b32.xlu2 %v6684_v42, %s12322_s23 }
 0x329   : > { %5736 = vrot.lane.b32.xlu1 %v6846_v11, %s12322_s23  ;;  %2558 = vmatpush.msra.mxu3 %v1457_v47  ;;  %v8087_v41 = vpop.permute.xlu0 %5551  ;;  %v8089_v19 = vpop.permute.xlu2 %5561  ;;  %v12183_v47 = vunpack.i.h.bf16 %v6968_v38  ;;  %v1424_v17 = vsel %vm12302_vm14, %v12182_v54, %v12754_v15  ;;  %v1391_v15 = vsel %vm12296_vm12, %v12184_v13, %v12185_v45  ;;  %v12758_v45 = vunpack.i.l.bf16 %v6812_v57  ;;  %v12769_v38 = vld [vmem:[#allocation36_spill] sm:$0xff]  ;;  %s13391_s23 = smov 46  }
 0x32a   : > { %12753 = vst [vmem:[#allocation170_spill] sm:$0xff] %v8087_v41  ;;  %v8093_v29 = vpop.permute.xlu1 %5526  ;;  %vm12911_vm14 = vcmp.lt.s32.totalorder %v7054_v20, 44 }
 0x32b   : > { %2559 = vmatpush.msra.mxu3 %v1425_v61  ;;  %v12755_v61 = vunpack.i.h.bf16 %v7006_v0 }
 0x32d   : > { %2560 = vmatpush.msra.mxu3 %v1424_v17  ;;  %v1392_v46 = vsel %vm12296_vm12, %v12755_v61, %v12183_v47  ;;  %v12191_v17 = vunpack.i.h.bf16 %v6858_v4  ;;  %v12757_v47 = vunpack.i.h.bf16 %v6812_v57  ;;  %vm2004_vm12 = vcmp.lt.s32.totalorder %v7054_v20, 61 }
 0x32f   : > { %2561 = vmatpush.msra.mxu3 %v1392_v46  ;;  %5776 = vrot.lane.b32.xlu0 %v6846_v11, %s12320_s26  ;;  %v823_v13 = vsel %vm12207_vm3, %v12757_v47, %v12191_v17  ;;  %v12197_v47 = vunpack.i.l.bf16 %v6836_v6 }
 0x330   : > { %5741 = vrot.lane.b32.xlu2 %v6688_v43, %s12344_s8  ;;  %v12189_v43 = vunpack.i.l.bf16 %v6858_v4 }
 0x331   : > { %5751 = vrot.lane.b32.xlu1 %v6850_v3, %s12344_s8  ;;  %2562 = vmatpush.msra.mxu3 %v1391_v15  ;;  %v8130_v46 = vpop.permute.xlu0 %5566  ;;  %v12190_v15 = vunpack.i.h.bf16 %v6800_v53 }
 0x332   : > { %v8132_v61 = vpop.permute.xlu2 %5576  ;;  %v8134_v54 = vpop.permute.xlu1 %5541  ;;  %v822_v7 = vsel %vm12207_vm3, %v12758_v45, %v12189_v43  ;;  %vm12266_vm3 = vcmp.lt.s32.totalorder %v7054_v20, 87 }
 0x333   : > { %12756 = vst [vmem:[#allocation171_spill] sm:$0xff] %v8134_v54  ;;  %2563 = vmatpush.msra.mxu3 %v6677_v40  ;;  %v12192_v40 = vunpack.i.l.bf16 %v6800_v53  ;;  %v12767_v53 = vunpack.i.l.bf16 %v6810_v56 }
 0x335   : > { %2564 = vmatpush.msra.mxu3 %v6674_v39  ;;  %v12193_v39 = vunpack.i.h.bf16 %v6836_v6 }
 0x337   : > { %2629 = vmatpush.msrb.mxu3 %v823_v13  ;;  %v12759_v13 = vunpack.i.h.bf16 %v6862_v8 }
 0x338   : > { %5756 = vrot.lane.b32.xlu2 %v6846_v11, %s12344_s8  ;;  %s13398_s8 = smov 21  }
 0x339   : > { %2630 = vmatpush.msrb.mxu3 %v822_v7  ;;  %5766 = vrot.lane.b32.xlu1 %v6684_v42, %s12320_s26  ;;  %v8164_v57 = vsel %vm784_vm4, %v12759_v13, %v12190_v15  ;;  %v8166_v45 = vpop.permute.xlu0 %5581  ;;  %v12761_v42 = vunpack.i.l.bf16 %v6862_v8  ;;  %v12206_v13 = vunpack.i.h.bf16 %v6810_v56  ;;  %v12762_v15 = vunpack.i.h.bf16 %v6832_v2  ;;  %v12764_v8 = vld [vmem:[#allocation32_spill] sm:$0xff] }
 0x33a   : > { %v8169_v11 = vpop.permute.xlu2 %5591  ;;  %v8171_v7 = vpop.permute.xlu1 %5556  ;;  %v12768_v4 = vunpack.i.l.bf16 %v12764_v8 }
 0x33b   : > { %2631 = vmatpush.msrb.mxu3 %v8164_v57  ;;  %12760 = vst [vmem:[#allocation172_spill] sm:$0xff] %v8171_v7  ;;  %v8180_v43 = vsel %vm784_vm4, %v12761_v42, %v12192_v40  ;;  %v8190_v17 = vsel %vm751_vm5, %v12762_v15, %v12193_v39  ;;  %v12763_v42 = vunpack.i.l.bf16 %v6832_v2  ;;  %v5579_v15 = vunpack.i.h.bf16 %v8132_v61 }
 0x33c   : > { %v5578_v39 = vunpack.i.l.bf16 %v8132_v61  ;;  %v12765_v7 = vunpack.i.h.bf16 %v12764_v8  ;;  %v12772_v61 = vunpack.i.h.bf16 %v12771_v63  ;;  %v12773_v8 = vunpack.i.h.bf16 %v8089_v19 }
 0x33d   : > { %2632 = vmatpush.msrb.mxu3 %v8180_v43  ;;  %v8200_v40 = vsel %vm751_vm5, %v12763_v42, %v12197_v47  ;;  %v12228_v63 = vunpack.i.h.bf16 %v12788_v36 }
 0x33e   : > { %v8213_v2 = vsel %vm718_vm6, %v12765_v7, %v12206_v13  ;;  %v8229_v7 = vsel %vm718_vm6, %v12768_v4, %v12767_v53  ;;  %v8245_v53 = vsel %vm12266_vm3, %v5579_v15, %v12773_v8  ;;  %v12775_v4 = vunpack.i.l.bf16 %v8089_v19  ;;  %v2090_v8 = vld [vmem:[#allocation7 + $0x18] sm:$0xff] }
 0x33f   : > { %2633 = vmatpush.msrb.mxu3 %v8190_v17  ;;  %12774 = vst [vmem:[#allocation32_spill] sm:$0xff] %v8245_v53  ;;  %v12780_v53 = vunpack.i.h.bf16 %v12769_v38 }
 0x340   : > { %5771 = vrot.lane.b32.xlu2 %v6850_v3, %s12320_s26  ;;  %v12766_v3 = vld [vmem:[#allocation30_spill] sm:$0xff]  ;;  %v8251_v13 = vsel %vm12266_vm3, %v5578_v39, %v12775_v4  ;;  %2565 = vmatmul.f32.vlgmr.msra.gmra.mxu3 %v2090_v8  ;;  %s13390_s26 = smov 66  }
 0x341   : > { %2634 = vmatpush.msrb.mxu3 %v8200_v40  ;;  %v5597_v0 = vpop.permute.xlu0 %5596  ;;  %v12770_v6 = vunpack.i.h.bf16 %v12766_v3  ;;  %12776 = vst [vmem:[#allocation38_spill] sm:$0xff] %v8251_v13  ;;  %v12777_v1 = vunpack.i.l.bf16 %v12766_v3  ;;  %v658_v4 = vsel %vm12241_vm9, %v12782_v10, %v12780_v53  ;;  %v12786_v53 = vld [vmem:[#allocation29_spill] sm:$0xff] }
 0x342   : > { %v8216_v42 = vpop.permute.xlu2 %5606  ;;  %v8218_v47 = vpop.permute.xlu1 %5571  ;;  %v12787_v3 = vunpack.i.h.bf16 %v12786_v53 }
 0x343   : > { %2635 = vmatpush.msrb.mxu3 %v8213_v2  ;;  %v691_v56 = vsel %vm12246_vm7, %v12772_v61, %v12770_v6  ;;  %v690_v6 = vsel %vm12246_vm7, %v12778_v31, %v12777_v1  ;;  %v12779_v61 = vld [vmem:[#allocation31_spill] sm:$0xff]  ;;  %v12783_v1 = vunpack.i.l.bf16 %v12769_v38  ;;  %v12784_v31 = vunpack.i.l.bf16 %v12781_v18 }
 0x344   : > { %v12785_v10 = vunpack.i.h.bf16 %v12779_v61  ;;  %v12789_v38 = vunpack.i.l.bf16 %v12779_v61  ;;  %v12790_v18 = vunpack.i.l.bf16 %v12786_v53  ;;  %vm12259_vm7 = vcmp.lt.s32.totalorder %v7054_v20, 85 }
 0x345   : > { %2636 = vmatpush.msrb.mxu3 %v8229_v7 }
 0x347   : > { %2637 = vmatpush.msrb.mxu3 %v691_v56 }
 0x349   : > { %2638 = vmatpush.msrb.mxu3 %v690_v6  ;;  %v8267_v56 = vpop.permute.xlu0 %5611  ;;  %v657_v6 = vsel %vm12241_vm9, %v12784_v31, %v12783_v1  ;;  %v624_v1 = vsel %vm12229_vm10, %v12790_v18, %v12789_v38  ;;  %v12230_v31 = vunpack.i.l.bf16 %v12788_v36  ;;  %vm12270_vm9 = vcmp.lt.s32.totalorder %v7054_v20, 83 }
 0x34a   : > { %v8269_v55 = vpop.permute.xlu2 %5621  ;;  %v8271_v13 = vpop.permute.xlu1 %5586  ;;  %v5614_v23 = vunpack.i.h.bf16 %v8267_v56 }
 0x34b   : > { %2639 = vmatpush.msrb.mxu3 %v658_v4  ;;  %v625_v4 = vsel %vm12229_vm10, %v12787_v3, %v12785_v10  ;;  %v5599_v10 = vunpack.i.h.bf16 %v5597_v0  ;;  %vm12260_vm10 = vcmp.lt.s32.totalorder %v7054_v20, 86 }
 0x34d   : > { %2640 = vmatpush.msrb.mxu3 %v657_v6  ;;  %v12791_v6 = vld [vmem:[#allocation33_spill] sm:$0xff] }
 0x34e   : > { %v12792_v59 = vunpack.i.h.bf16 %v12791_v6 }
 0x34f   : > { %2641 = vmatpush.msrb.mxu3 %v625_v4  ;;  %v5598_v4 = vunpack.i.l.bf16 %v5597_v0  ;;  %v12232_v0 = vunpack.i.l.bf16 %v8169_v11 }
 0x350   : > { %v592_v3 = vsel %vm12233_vm11, %v12792_v59, %v12228_v63  ;;  %v12231_v63 = vunpack.i.h.bf16 %v8169_v11 }
 0x351   : > { %2642 = vmatpush.msrb.mxu3 %v624_v1  ;;  %v8300_v8 = vpop.permute.xlu0 %5626  ;;  %v12793_v1 = vunpack.i.l.bf16 %v12791_v6  ;;  %v8329_v6 = vsel %vm12260_vm10, %v12232_v0, %v5598_v4  ;;  %v12801_v0 = vunpack.i.l.bf16 %v8166_v45 }
 0x352   : > { %v8302_v61 = vpop.permute.xlu2 %5636  ;;  %v8304_v53 = vpop.permute.xlu1 %5601  ;;  %v8323_v18 = vsel %vm12260_vm10, %v12231_v63, %v5599_v10  ;;  %12795 = vst [vmem:[#allocation29_spill] sm:$0xff] %v8329_v6  ;;  %v5629_v52 = vunpack.i.h.bf16 %v8300_v8 }
 0x353   : > { %2643 = vmatpush.msrb.mxu3 %v592_v3  ;;  %v591_v59 = vsel %vm12233_vm11, %v12793_v1, %v12230_v31  ;;  %v12234_v3 = vunpack.i.h.bf16 %v8166_v45  ;;  %12794 = vst [vmem:[#allocation34_spill] sm:$0xff] %v8323_v18  ;;  %v12796_v1 = vunpack.i.h.bf16 %v8218_v47  ;;  %v12798_v31 = vunpack.i.l.bf16 %v8218_v47 }
 0x354   : > { %v8353_v6 = vsel %vm12260_vm10, %v5598_v4, %v12801_v0  ;;  %vm12267_vm11 = vcmp.lt.s32.totalorder %v7054_v20, 84 }
 0x355   : > { %2644 = vmatpush.msrb.mxu3 %v591_v59  ;;  %v8335_v59 = vsel %vm12266_vm3, %v12796_v1, %v5579_v15  ;;  %v8341_v38 = vsel %vm12266_vm3, %v12798_v31, %v5578_v39  ;;  %v8347_v63 = vsel %vm12260_vm10, %v5599_v10, %v12234_v3  ;;  %12802 = vst [vmem:[#allocation175_spill] sm:$0xff] %v8353_v6  ;;  %v12242_v39 = vunpack.i.h.bf16 %v8302_v61 }
 0x356   : > { %12797 = vst [vmem:[#allocation33_spill] sm:$0xff] %v8335_v59  ;;  %v12245_v31 = vunpack.i.l.bf16 %v8302_v61  ;;  %v5624_v10 = vunpack.i.h.bf16 %v8269_v55  ;;  %v5623_v3 = vunpack.i.l.bf16 %v8269_v55  ;;  %v5613_v55 = vunpack.i.l.bf16 %v8267_v56  ;;  %2645 = vmatmul.f32.vlgmr.msrb.gmra.mxu3 %v2087_v50 }
 0x357   : > { %12799 = vst [vmem:[#allocation173_spill] sm:$0xff] %v8341_v38  ;;  %v5608_v50 = vunpack.i.l.bf16 %v8216_v42 }
 0x358   : > { %12800 = vst [vmem:[#allocation174_spill] sm:$0xff] %v8347_v63  ;;  %v8372_v0 = vsel %vm12267_vm11, %v12242_v39, %v5624_v10  ;;  %v8378_v6 = vsel %vm12267_vm11, %v12245_v31, %v5623_v3  ;;  %v5604_v39 = vunpack.i.h.bf16 %v8304_v53 }
 0x359   : > { %v8355_v15 = vpop.permute.xlu0 %5641  ;;  %12803 = vst [vmem:[#allocation176_spill] sm:$0xff] %v8372_v0  ;;  %v5603_v0 = vunpack.i.l.bf16 %v8304_v53 }
 0x35a   : > { %v8357_v1 = vpop.permute.xlu2 %5651  ;;  %v5617_v59 = vpop.permute.xlu1 %5616  ;;  %12804 = vst [vmem:[#allocation177_spill] sm:$0xff] %v8378_v6  ;;  %v5644_v16 = vunpack.i.h.bf16 %v8355_v15 }
 0x35b   : > { %v5619_v18 = vunpack.i.h.bf16 %v5617_v59  ;;  %v5618_v36 = vunpack.i.l.bf16 %v5617_v59  ;;  %v5643_v59 = vunpack.i.l.bf16 %v8355_v15  ;;  %v5654_v56 = vunpack.i.h.bf16 %v8357_v1 }
 0x35c   : > { %v5653_v24 = vunpack.i.l.bf16 %v8357_v1 }
 0x35d   : > { %v8396_v27 = vsel %vm12259_vm7, %v5614_v23, %v5619_v18  ;;  %v8400_v53 = vsel %vm12259_vm7, %v5613_v55, %v5618_v36  ;;  %v8404_v32 = vsel %vm12259_vm7, %v5619_v18, %v5604_v39  ;;  %v8408_v15 = vsel %vm12259_vm7, %v5618_v36, %v5603_v0 }
 0x35e   : > { %12805 = vst [vmem:[#allocation178_spill] sm:$0xff] %v8396_v27 }
 0x35f   : > { %12806 = vst [vmem:[#allocation179_spill] sm:$0xff] %v8400_v53  ;;  %v5628_v53 = vunpack.i.l.bf16 %v8300_v8 }
 0x360   : > { %12807 = vst [vmem:[#allocation180_spill] sm:$0xff] %v8404_v32 }
 0x361   : > { %v8361_v38 = vpop.permute.xlu0 %5656  ;;  %12808 = vst [vmem:[#allocation181_spill] sm:$0xff] %v8408_v15 }
 0x362   : > { %v8366_v63 = vpop.permute.xlu2 %5666  ;;  %v5659_v1 = vunpack.i.h.bf16 %v8361_v38  ;;  %v5658_v15 = vunpack.i.l.bf16 %v8361_v38 }
 0x363   : > { %v5632_v4 = vpop.permute.xlu1 %5631 }
 0x364   : > { %v5633_v18 = vunpack.i.l.bf16 %v5632_v4 }
 0x366   : > { %v1818_v38 = vsel %vm12267_vm11, %v5628_v53, %v5633_v18 }
 0x369   : > { %v8383_v48 = vpop.permute.xlu0 %5671 }
 0x36a   : > { %v8389_v31 = vpop.permute.xlu2 %5681 }
 0x36b   : > { %v5647_v6 = vpop.permute.xlu1 %5646 }
 0x36c   : > { %v5649_v33 = vunpack.i.h.bf16 %v5647_v6  ;;  %v5648_v12 = vunpack.i.l.bf16 %v5647_v6  ;;  %v5634_v6 = vunpack.i.h.bf16 %v5632_v4 }
 0x36e   : > { %v1854_v5 = vsel %vm12270_vm9, %v5644_v16, %v5649_v33  ;;  %v1852_v27 = vsel %vm12270_vm9, %v5649_v33, %v5654_v56  ;;  %v1853_v32 = vsel %vm12270_vm9, %v5643_v59, %v5648_v12  ;;  %v1851_v36 = vsel %vm12270_vm9, %v5648_v12, %v5653_v24 }
 0x36f   : > { %2569 = vmatpush.msrb.mxu0 %v1854_v5  ;;  %2709 = vmatpush.msra.mxu3 %v1852_v27  ;;  %v5609_v33 = vunpack.i.h.bf16 %v8216_v42  ;;  %v1821_v27 = vsel %vm12267_vm11, %v5624_v10, %v5629_v52  ;;  %v1819_v8 = vsel %vm12267_vm11, %v5629_v52, %v5634_v6  ;;  %v8443_v52 = vsel %vm12270_vm9, %v5654_v56, %v5659_v1 }
 0x370   : > { %v8447_v42 = vsel %vm12270_vm9, %v5653_v24, %v5658_v15  ;;  %v8465_v56 = vsel %vm12270_vm9, %v5659_v1, %v5644_v16  ;;  %v8469_v24 = vsel %vm12270_vm9, %v5658_v15, %v5643_v59  ;;  %v12277_v16 = vunpack.i.h.bf16 %v8383_v48 }
 0x371   : > { %2570 = vmatpush.msrb.mxu0 %v1853_v32  ;;  %2710 = vmatpush.msra.mxu3 %v1851_v36  ;;  %v8423_v5 = vpop.permute.xlu0 %5686  ;;  %v1820_v32 = vsel %vm12267_vm11, %v5623_v3, %v5628_v53  ;;  %v1788_v10 = vsel %vm12259_vm7, %v5604_v39, %v5609_v33  ;;  %v5589_v36 = vunpack.i.h.bf16 %v8271_v13  ;;  %v12809_v3 = vunpack.i.h.bf16 %v8302_v61  ;;  %12812 = vst [vmem:[#allocation183_spill] sm:$0xff] %v8465_v56 }
 0x372   : > { %v8429_v4 = vpop.permute.xlu2 %5696  ;;  %v1786_v39 = vsel %vm12259_vm7, %v5609_v33, %v5614_v23  ;;  %12813 = vst [vmem:[#allocation184_spill] sm:$0xff] %v8469_v24  ;;  %v1787_v23 = vsel %vm12259_vm7, %v5603_v0, %v5608_v50  ;;  %v12265_v1 = vunpack.i.l.bf16 %v8383_v48  ;;  %v12814_v15 = vunpack.i.h.bf16 %v8166_v45 }
 0x373   : > { %v8431_v12 = vpop.permute.xlu1 %5661  ;;  %2571 = vmatpush.msrb.mxu0 %v1821_v27  ;;  %2711 = vmatpush.msra.mxu3 %v1819_v8  ;;  %v8453_v53 = vsel %vm12267_vm11, %v5634_v6, %v12809_v3  ;;  %v12810_v27 = vunpack.i.l.bf16 %v8302_v61  ;;  %v5588_v6 = vunpack.i.l.bf16 %v8271_v13  ;;  %v1785_v61 = vsel %vm12259_vm7, %v5608_v50, %v5613_v55 }
 0x374   : > { %v1755_v13 = vsel %vm12260_vm10, %v12814_v15, %v5589_v36  ;;  %v12815_v0 = vunpack.i.h.bf16 %v8169_v11  ;;  %v5568_v33 = vunpack.i.l.bf16 %v8130_v46  ;;  %v12816_v3 = vunpack.i.l.bf16 %v8166_v45 }
 0x375   : > { %2572 = vmatpush.msrb.mxu0 %v1820_v32  ;;  %2712 = vmatpush.msra.mxu3 %v1818_v38  ;;  %v8461_v8 = vsel %vm12267_vm11, %v5633_v18, %v12810_v27  ;;  %v5569_v18 = vunpack.i.h.bf16 %v8130_v46  ;;  %v12262_v32 = vunpack.i.h.bf16 %v8366_v63  ;;  %v12261_v38 = vunpack.i.l.bf16 %v8366_v63 }
 0x376   : > { %12811 = vst [vmem:[#allocation182_spill] sm:$0xff] %v8461_v8  ;;  %v1753_v55 = vsel %vm12260_vm10, %v5589_v36, %v12815_v0  ;;  %v12817_v27 = vunpack.i.l.bf16 %v8169_v11  ;;  %v12264_v36 = vunpack.i.h.bf16 %v8087_v41  ;;  %vm12396_vm7 = vcmp.lt.s32.totalorder %v7054_v20, 82 }
 0x377   : > { %2573 = vmatpush.msrb.mxu0 %v1788_v10  ;;  %2713 = vmatpush.msra.mxu3 %v1786_v39  ;;  %v1754_v39 = vsel %vm12260_vm10, %v12816_v3, %v5588_v6  ;;  %v12819_v15 = vunpack.i.h.bf16 %v8218_v47  ;;  %v5549_v0 = vunpack.i.h.bf16 %v8042_v26  ;;  %v12820_v3 = vunpack.i.l.bf16 %v8089_v19 }
 0x378   : > { %v1752_v46 = vsel %vm12260_vm10, %v5588_v6, %v12817_v27  ;;  %v8521_v6 = vsel %vm12396_vm7, %v12262_v32, %v12277_v16  ;;  %vm12292_vm10 = vcmp.lt.s32.totalorder %v7054_v20, 103  ;;  %v12821_v27 = vunpack.i.l.bf16 %v8218_v47 }
 0x379   : > { %2574 = vmatpush.msrb.mxu0 %v1787_v23  ;;  %2714 = vmatpush.msra.mxu3 %v1785_v61  ;;  %v8479_v59 = vpop.permute.xlu0 %5701  ;;  %v12263_v23 = vunpack.i.h.bf16 %v8134_v54  ;;  %v12818_v61 = vunpack.i.h.bf16 %v8089_v19  ;;  %v1720_v11 = vsel %vm12266_vm3, %v5569_v18, %v12819_v15  ;;  %v5529_v15 = vunpack.i.h.bf16 %v8093_v29 }
 0x37a   : > { %v8494_v10 = vpop.permute.xlu2 %5711  ;;  %v12276_v19 = vunpack.i.l.bf16 %v8429_v4  ;;  %v12275_v32 = vunpack.i.h.bf16 %v8389_v31  ;;  %vm1914_vm11 = vcmp.lt.s32.totalorder %v7054_v20, 81  ;;  %vm12291_vm9 = vcmp.lt.s32.totalorder %v7054_v20, 105 }
 0x37b   : > { %v8490_v50 = vpop.permute.xlu1 %5676  ;;  %2575 = vmatpush.msrb.mxu0 %v1755_v13  ;;  %2715 = vmatpush.msra.mxu3 %v1753_v55  ;;  %v1722_v45 = vsel %vm12266_vm3, %v12818_v61, %v5569_v18  ;;  %v8529_v13 = vsel %vm12396_vm7, %v12261_v38, %v12265_v1  ;;  %v12272_v18 = vunpack.i.l.bf16 %v8087_v41  ;;  %v12269_v55 = vunpack.i.l.bf16 %v8134_v54 }
 0x37c   : > { %v5509_v61 = vunpack.i.h.bf16 %v7962_v51  ;;  %v1689_v47 = vsel %vm12292_vm10, %v12263_v23, %v5549_v0  ;;  %v12274_v23 = vunpack.i.l.bf16 %v8389_v31  ;;  %v12281_v1 = vunpack.i.h.bf16 %v8048_v21 }
 0x37d   : > { %2576 = vmatpush.msrb.mxu0 %v1754_v39  ;;  %2716 = vmatpush.msra.mxu3 %v1752_v46  ;;  %v1721_v39 = vsel %vm12266_vm3, %v12820_v3, %v5568_v33  ;;  %v1719_v46 = vsel %vm12266_vm3, %v5568_v33, %v12821_v27  ;;  %v12268_v33 = vunpack.i.h.bf16 %v7994_v62  ;;  %v12278_v3 = vunpack.i.l.bf16 %v7994_v62  ;;  %v12845_v62 = vld [vmem:[#allocation63_spill] sm:$0xff] }
 0x37e   : > { %v5528_v27 = vunpack.i.l.bf16 %v8093_v29  ;;  %v12279_v29 = vunpack.i.l.bf16 %v7996_v44  ;;  %vm12282_vm3 = vcmp.lt.s32.totalorder %v7054_v20, 104 }
 0x37f   : > { %2577 = vmatpush.msrb.mxu0 %v1722_v45  ;;  %2717 = vmatpush.msra.mxu3 %v1720_v11  ;;  %v5548_v45 = vunpack.i.l.bf16 %v8042_v26  ;;  %v12273_v11 = vunpack.i.h.bf16 %v8429_v4  ;;  %v1687_v26 = vsel %vm12292_vm10, %v5549_v0, %v12264_v36 }
 0x381   : > { %2578 = vmatpush.msrb.mxu0 %v1721_v39  ;;  %2718 = vmatpush.msra.mxu3 %v1719_v46  ;;  %v8548_v38 = vpop.permute.xlu0 %5716  ;;  %v12271_v39 = vunpack.i.h.bf16 %v7996_v44  ;;  %v1688_v0 = vsel %vm12292_vm10, %v12269_v55, %v5548_v45  ;;  %v1686_v36 = vsel %vm12292_vm10, %v5548_v45, %v12272_v18  ;;  %v12839_v18 = vld [vmem:[#allocation60_spill] sm:$0xff]  ;;  %vm12862_vm10 = vcmp.lt.s32.totalorder %v7054_v20, 41 }
 0x382   : > { %v12856_v56 = vunpack.i.l.bf16 %v12839_v18 }
 0x383   : > { %v8562_v46 = vpop.permute.xlu1 %5691  ;;  %2579 = vmatpush.msrb.mxu0 %v1689_v47  ;;  %2719 = vmatpush.msra.mxu3 %v1687_v26  ;;  %v8578_v47 = vpop.permute.xlu2 %5726  ;;  %v1656_v26 = vsel %vm12282_vm3, %v12268_v33, %v5529_v15  ;;  %v1654_v45 = vsel %vm12282_vm3, %v5529_v15, %v12271_v39  ;;  %v12824_v33 = vld [vmem:[#allocation71_spill] sm:$0xff]  ;;  %v12280_v15 = vunpack.i.h.bf16 %v7952_v25  ;;  %v5508_v39 = vunpack.i.l.bf16 %v7962_v51 }
 0x384   : > { %v12283_v55 = vunpack.i.h.bf16 %v12824_v33  ;;  %v12826_v51 = vunpack.i.h.bf16 %v6990_v60  ;;  %v12840_v54 = vunpack.i.l.bf16 %v12824_v33 }
 0x385   : > { %2580 = vmatpush.msrb.mxu0 %v1688_v0  ;;  %2720 = vmatpush.msra.mxu3 %v1686_v36  ;;  %v8594_v36 = vsel %vm1914_vm11, %v12273_v11, %v12275_v32  ;;  %v8602_v0 = vsel %vm1914_vm11, %v12276_v19, %v12274_v23  ;;  %v1655_v11 = vsel %vm12282_vm3, %v12278_v3, %v5528_v27  ;;  %v5679_v32 = vunpack.i.h.bf16 %v8490_v50 }
 0x386   : > { %12822 = vst [vmem:[#allocation185_spill] sm:$0xff] %v8594_v36  ;;  %v1653_v23 = vsel %vm12282_vm3, %v5528_v27, %v12279_v29  ;;  %v12284_v19 = vunpack.i.l.bf16 %v7952_v25  ;;  %v1623_v3 = vsel %vm12291_vm9, %v12280_v15, %v5509_v61  ;;  %v1621_v27 = vsel %vm12291_vm9, %v5509_v61, %v12281_v1 }
 0x387   : > { %12823 = vst [vmem:[#allocation186_spill] sm:$0xff] %v8602_v0  ;;  %2581 = vmatpush.msrb.mxu0 %v1656_v26  ;;  %2721 = vmatpush.msra.mxu3 %v1654_v45  ;;  %v5678_v26 = vunpack.i.l.bf16 %v8490_v50  ;;  %v12825_v45 = vld [vmem:[#allocation54_spill] sm:$0xff]  ;;  %v1351_v15 = vsel %vm12308_vm13, %v12826_v51, %v12283_v55  ;;  %v12827_v1 = vunpack.i.l.bf16 %v8048_v21  ;;  %vm12830_vm3 = vcmp.lt.s32.totalorder %v7054_v20, 24  ;;  %v2091_v51 = vld [vmem:[#allocation7 + $0x20] sm:$0xff]  ;;  %v12831_v55 = vld [vmem:[#allocation68_spill] sm:$0xff] }
 0x388   : > { %v1622_v61 = vsel %vm12291_vm9, %v12284_v19, %v5508_v39  ;;  %v12829_v50 = vunpack.i.h.bf16 %v12825_v45  ;;  %v12834_v25 = vunpack.i.h.bf16 %v8431_v12  ;;  %v12866_v0 = vunpack.i.l.bf16 %v6982_v58  ;;  %v12879_v21 = vld [vmem:[#allocation102_spill] sm:$0xff] }
 0x389   : > { %2582 = vmatpush.msrb.mxu0 %v1655_v11  ;;  %2722 = vmatpush.msra.mxu3 %v1653_v23  ;;  %v8621_v16 = vpop.permute.xlu0 %5731  ;;  %v12832_v11 = vunpack.i.h.bf16 %v8383_v48 }
 0x38b   : > { %v8634_v29 = vpop.permute.xlu1 %5706  ;;  %2583 = vmatpush.msrb.mxu0 %v1623_v3  ;;  %2723 = vmatpush.msra.mxu3 %v1621_v27  ;;  %v1620_v3 = vsel %vm12291_vm9, %v5508_v39, %v12827_v1  ;;  %v12828_v27 = vunpack.i.h.bf16 %v7353_v9  ;;  %v8662_v19 = vsel %vm12396_vm7, %v12832_v11, %v5679_v32  ;;  %v12833_v1 = vunpack.i.l.bf16 %v8383_v48  ;;  %v8702_v24 = vpop.permute.xlu2 %5741 }
 0x38c   : > { %v12837_v11 = vunpack.i.l.bf16 %v8431_v12 }
 0x38d   : > { %v1085_v23 = vsel %vm12830_vm3, %v12829_v50, %v12828_v27  ;;  %2584 = vmatpush.msrb.mxu0 %v1622_v61  ;;  %2724 = vmatpush.msra.mxu3 %v1620_v3  ;;  %v8668_v39 = vsel %vm12396_vm7, %v12833_v1, %v5678_v26  ;;  %v8674_v50 = vsel %vm12396_vm7, %v5679_v32, %v12834_v25  ;;  %v12836_v61 = vld [vmem:[#allocation48_spill] sm:$0xff]  ;;  %v12841_v25 = vunpack.i.l.bf16 %v6990_v60  ;;  %v12849_v1 = vld [vmem:[#allocation103_spill] sm:$0xff] }
 0x38e   : > { %12835 = vst [vmem:[#allocation71_spill] sm:$0xff] %v8674_v50  ;;  %v8682_v48 = vsel %vm12396_vm7, %v5678_v26, %v12837_v11  ;;  %2585 = vmatmul.f32.vlgmr.msrb.gmra.mxu0 %v2091_v51  ;;  %2725 = vmatmul.f32.vlgmr.msra.gmra.mxu3 %v2091_v51  ;;  %v12844_v26 = vld [vmem:[#allocation56_spill] sm:$0xff]  ;;  %v12848_v51 = vunpack.i.h.bf16 %v6956_v34  ;;  %v12850_v11 = vunpack.i.h.bf16 %v12849_v1  ;;  %v12851_v27 = vunpack.i.h.bf16 %v12839_v18 }
 0x38f   : > { %2669 = vmatpush.msra.mxu0 %v1351_v15  ;;  %2789 = vmatpush.msrb.mxu3 %v1085_v23  ;;  %12838 = vst [vmem:[#allocation54_spill] sm:$0xff] %v8682_v48  ;;  %v1350_v32 = vsel %vm12308_vm13, %v12841_v25, %v12840_v54  ;;  %v12842_v15 = vunpack.i.l.bf16 %v7353_v9  ;;  %v12843_v23 = vunpack.i.l.bf16 %v12825_v45  ;;  %v12846_v54 = vld [vmem:[#allocation67_spill] sm:$0xff]  ;;  %v12853_v25 = vunpack.i.l.bf16 %v12831_v55 }
 0x390   : > { %v12854_v9 = vunpack.i.l.bf16 %v6956_v34  ;;  %v12860_v48 = vunpack.i.h.bf16 %v7359_v49  ;;  %v12295_v34 = vunpack.i.l.bf16 %v8702_v24  ;;  %v12865_v50 = vunpack.i.l.bf16 %v12845_v62 }
 0x391   : > { %v1084_v3 = vsel %vm12830_vm3, %v12843_v23, %v12842_v15  ;;  %2670 = vmatpush.msra.mxu0 %v1350_v32  ;;  %v12847_v15 = vunpack.i.h.bf16 %v12831_v55  ;;  %vm12852_vm3 = vcmp.lt.s32.totalorder %v7054_v20, 25  ;;  %v8719_v32 = vpop.permute.xlu0 %5746 }
 0x392   : > { %2790 = vmatpush.msrb.mxu3 %v1084_v3  ;;  %v1052_v60 = vsel %vm12852_vm3, %v12851_v27, %v12850_v11  ;;  %vm12857_vm9 = vmmov %vm12852_vm3  ;;  %vm2037_vm3 = vcmp.lt.s32.totalorder %v7054_v20, 60  ;;  %v8734_v11 = vld [vmem:[#allocation7 + $0x10] sm:$0xff]  ;;  %v5704_v3 = vunpack.i.h.bf16 %v8479_v59 }
 0x393   : > { %v1318_v23 = vsel %vm12309_vm8, %v12848_v51, %v12847_v15  ;;  %v1317_v15 = vsel %vm12309_vm8, %v12854_v9, %v12853_v25  ;;  %v12855_v51 = vunpack.i.l.bf16 %v12849_v1  ;;  %v8740_v9 = vpop.permute.xlu1 %5721  ;;  %2545 = vmatmul.f32.vlgmr.msra.gmra.mxu2 %v8734_v11  ;;  %v12858_v25 = vunpack.i.h.bf16 %v12845_v62 }
 0x394   : > { %2671 = vmatpush.msra.mxu0 %v1318_v23  ;;  %2791 = vmatpush.msrb.mxu3 %v1052_v60  ;;  %v5693_v23 = vunpack.i.l.bf16 %v8562_v46  ;;  %v12861_v1 = vunpack.i.h.bf16 %v12844_v26  ;;  %v12884_v44 = vunpack.i.h.bf16 %v8740_v9  ;;  %v12891_v41 = vunpack.i.l.bf16 %v8740_v9 }
 0x395   : > { %v1051_v27 = vsel %vm12857_vm9, %v12856_v56, %v12855_v51  ;;  %v12859_v51 = vunpack.i.h.bf16 %v6982_v58  ;;  %vm1971_vm9 = vcmp.lt.s32.totalorder %v7054_v20, 62  ;;  %v12864_v56 = vunpack.i.h.bf16 %v8702_v24 }
 0x396   : > { %2672 = vmatpush.msra.mxu0 %v1317_v15  ;;  %2792 = vmatpush.msrb.mxu3 %v1051_v27  ;;  %v1019_v15 = vsel %vm12862_vm10, %v12861_v1, %v12860_v48  ;;  %v12863_v27 = vunpack.i.h.bf16 %v8719_v32  ;;  %v1284_v48 = vsel %vm1279_vm15, %v12866_v0, %v12865_v50  ;;  %v12867_v1 = vunpack.i.l.bf16 %v7359_v49 }
 0x397   : > { %v1285_v60 = vsel %vm1279_vm15, %v12859_v51, %v12858_v25  ;;  %v5703_v51 = vunpack.i.l.bf16 %v8479_v59  ;;  %v12871_v0 = vunpack.i.h.bf16 %v8548_v38  ;;  %v12880_v50 = vunpack.i.h.bf16 %v12879_v21 }
 0x398   : > { %v2043_v25 = vsel %vm2037_vm3, %v12864_v56, %v12863_v27  ;;  %2673 = vmatpush.msra.mxu0 %v1285_v60  ;;  %2793 = vmatpush.msrb.mxu3 %v1019_v15  ;;  %v12868_v56 = vunpack.i.l.bf16 %v12844_v26  ;;  %v12869_v27 = vunpack.i.l.bf16 %v8429_v4  ;;  %v12870_v15 = vunpack.i.l.bf16 %v8423_v5 }
 0x399   : > { %2589 = vmatpush.msrb.mxu1 %v2043_v25  ;;  %v8797_v49 = vsel %vm1971_vm9, %v12871_v0, %v5704_v3  ;;  %v12877_v25 = vunpack.i.h.bf16 %v12846_v54  ;;  %v12883_v0 = vunpack.i.h.bf16 %v8578_v47 }
 0x39a   : > { %v1018_v59 = vsel %vm12862_vm10, %v12868_v56, %v12867_v1  ;;  %v8785_v60 = vsel %vm1914_vm11, %v5693_v23, %v12869_v27  ;;  %v8791_v58 = vsel %vm1914_vm11, %v12870_v15, %v5693_v23  ;;  %12872 = vst [vmem:[#allocation68_spill] sm:$0xff] %v8797_v49  ;;  %2674 = vmatpush.msra.mxu0 %v1284_v48  ;;  %v12873_v1 = vunpack.i.l.bf16 %v8719_v32  ;;  %v12876_v15 = vld [vmem:[#allocation65_spill] sm:$0xff] }
 0x39b   : > { %2794 = vmatpush.msrb.mxu3 %v1018_v59  ;;  %v12874_v56 = vunpack.i.l.bf16 %v8548_v38  ;;  %v12878_v48 = vunpack.i.h.bf16 %v6966_v37  ;;  %vm12882_vm10 = vcmp.lt.s32.totalorder %v7054_v20, 42  ;;  %v12901_v49 = vunpack.i.l.bf16 %v6932_v28 }
 0x39c   : > { %v2042_v23 = vsel %vm2037_vm3, %v12295_v34, %v12873_v1  ;;  %v12881_v1 = vunpack.i.h.bf16 %v12836_v61 }
 0x39d   : > { %v8811_v27 = vsel %vm1971_vm9, %v12874_v56, %v5703_v51  ;;  %2590 = vmatpush.msrb.mxu1 %v2042_v23  ;;  %v1252_v59 = vsel %vm1246_vm0, %v12878_v48, %v12877_v25  ;;  %v2010_v25 = vsel %vm2004_vm12, %v12884_v44, %v12883_v0  ;;  %v12885_v48 = vld [vmem:[#allocation55_spill] sm:$0xff]  ;;  %v12887_v23 = vunpack.i.l.bf16 %v6966_v37  ;;  %v8871_v0 = vpop.permute.xlu2 %5756 }
 0x39e   : > { %12875 = vst [vmem:[#allocation48_spill] sm:$0xff] %v8811_v27  ;;  %v986_v34 = vsel %vm12882_vm10, %v12881_v1, %v12880_v50  ;;  %2675 = vmatpush.msra.mxu0 %v1252_v59  ;;  %v12301_v36 = vunpack.i.h.bf16 %v12885_v48  ;;  %v8837_v50 = vpop.permute.xlu1 %5736  ;;  %v12886_v1 = vunpack.i.l.bf16 %v12846_v54  ;;  %v12888_v59 = vunpack.i.l.bf16 %v12879_v21  ;;  %v12899_v27 = vld [vmem:[#allocation59_spill] sm:$0xff] }
 0x39f   : > { %2795 = vmatpush.msrb.mxu3 %v986_v34  ;;  %2591 = vmatpush.msrb.mxu1 %v2010_v25  ;;  %v12889_v56 = vunpack.i.l.bf16 %v12836_v61  ;;  %v12890_v25 = vunpack.i.l.bf16 %v8578_v47  ;;  %v12892_v21 = vunpack.i.h.bf16 %v12876_v15 }
 0x3a0   : > { %v1251_v34 = vsel %vm1246_vm0, %v12887_v23, %v12886_v1  ;;  %v12893_v1 = vunpack.i.h.bf16 %v6932_v28  ;;  %v12904_v23 = vld [vmem:[#allocation64_spill] sm:$0xff]  ;;  %v12905_v28 = vunpack.i.l.bf16 %v8634_v29 }
 0x3a1   : > { %v985_v44 = vsel %vm12882_vm10, %v12889_v56, %v12888_v59  ;;  %2676 = vmatpush.msra.mxu0 %v1251_v34  ;;  %v2009_v37 = vsel %vm2004_vm12, %v12891_v41, %v12890_v25  ;;  %v12894_v59 = vld [vmem:[#allocation94_spill] sm:$0xff]  ;;  %vm12896_vm10 = vcmp.lt.s32.totalorder %v7054_v20, 43  ;;  %v12897_v41 = vunpack.i.h.bf16 %v8634_v29 }
 0x3a2   : > { %2796 = vmatpush.msrb.mxu3 %v985_v44  ;;  %2592 = vmatpush.msrb.mxu1 %v2009_v37  ;;  %v1219_v56 = vsel %vm1213_vm2, %v12893_v1, %v12892_v21  ;;  %v12895_v34 = vunpack.i.h.bf16 %v12894_v59  ;;  %v12898_v37 = vld [vmem:[#allocation50_spill] sm:$0xff]  ;;  %v12303_v21 = vunpack.i.h.bf16 %v12899_v27  ;;  %v12900_v1 = vunpack.i.l.bf16 %v12876_v15 }
 0x3a3   : > { %2677 = vmatpush.msra.mxu0 %v1219_v56  ;;  %v1977_v25 = vsel %vm1971_vm9, %v5704_v3, %v12897_v41  ;;  %v12902_v56 = vunpack.i.l.bf16 %v12894_v59  ;;  %v12304_v41 = vunpack.i.l.bf16 %v12899_v27  ;;  %v5759_v59 = vunpack.i.h.bf16 %v8871_v0 }
 0x3a4   : > { %v953_v44 = vsel %vm12896_vm10, %v12301_v36, %v12895_v34  ;;  %2593 = vmatpush.msrb.mxu1 %v1977_v25  ;;  %v1218_v34 = vsel %vm1213_vm2, %v12901_v49, %v12900_v1  ;;  %v1976_v49 = vsel %vm1971_vm9, %v5703_v51, %v12905_v28  ;;  %v5758_v1 = vunpack.i.l.bf16 %v8871_v0  ;;  %v12908_v25 = vld [vmem:[#allocation104_spill] sm:$0xff]  ;;  %v12912_v51 = vld [vmem:[#allocation41_spill] sm:$0xff] }
 0x3a5   : > { %2797 = vmatpush.msrb.mxu3 %v953_v44  ;;  %v12903_v44 = vunpack.i.l.bf16 %v12885_v48  ;;  %2678 = vmatpush.msra.mxu0 %v1218_v34  ;;  %v12909_v34 = vunpack.i.h.bf16 %v12908_v25  ;;  %v12914_v8 = vunpack.i.l.bf16 %v12908_v25 }
 0x3a6   : > { %2594 = vmatpush.msrb.mxu1 %v1976_v49  ;;  %v8914_v49 = vpop.permute.xlu1 %5751 }
 0x3a7   : > { %v952_v36 = vsel %vm12896_vm10, %v12903_v44, %v12902_v56  ;;  %v12906_v56 = vunpack.i.h.bf16 %v6958_v35  ;;  %vm12907_vm10 = vcmp.lt.s32.totalorder %v7054_v20, 21 }
 0x3a8   : > { %2798 = vmatpush.msrb.mxu3 %v952_v36  ;;  %v12910_v36 = vunpack.i.h.bf16 %v12898_v37  ;;  %2595 = vmatpush.msrb.mxu1 %v8164_v57  ;;  %v8931_v57 = vpop.permute.xlu0 %5761 }
 0x3a9   : > { %v1186_v44 = vsel %vm12907_vm10, %v12906_v56, %v12303_v21  ;;  %v12913_v56 = vunpack.i.l.bf16 %v6958_v35  ;;  %v12917_v35 = vunpack.i.h.bf16 %v12904_v23 }
 0x3aa   : > { %v920_v3 = vsel %vm12911_vm14, %v12910_v36, %v12909_v34  ;;  %2679 = vmatpush.msra.mxu0 %v1186_v44  ;;  %v12915_v44 = vunpack.i.l.bf16 %v12898_v37  ;;  %v12916_v36 = vld [vmem:[#allocation61_spill] sm:$0xff]  ;;  %2596 = vmatpush.msrb.mxu1 %v8180_v43  ;;  %v12925_v43 = vunpack.i.l.bf16 %v8702_v24 }
 0x3ab   : > { %2799 = vmatpush.msrb.mxu3 %v920_v3  ;;  %v1185_v21 = vsel %vm12907_vm10, %v12913_v56, %v12304_v41  ;;  %v12918_v56 = vunpack.i.h.bf16 %v6942_v30  ;;  %vm12919_vm10 = vcmp.lt.s32.totalorder %v7054_v20, 22  ;;  %v12920_v41 = vld [vmem:[#allocation93_spill] sm:$0xff]  ;;  %v12937_v34 = vunpack.i.l.bf16 %v12916_v36 }
 0x3ac   : > { %v919_v3 = vsel %vm12911_vm14, %v12915_v44, %v12914_v8  ;;  %2680 = vmatpush.msra.mxu0 %v1185_v21  ;;  %v12921_v28 = vunpack.i.h.bf16 %v12920_v41  ;;  %v12922_v8 = vunpack.i.h.bf16 %v12912_v51  ;;  %vm12923_vm14 = vcmp.lt.s32.totalorder %v7054_v20, 45  ;;  %2597 = vmatpush.msrb.mxu1 %v8190_v17 }
 0x3ad   : > { %2800 = vmatpush.msrb.mxu3 %v919_v3  ;;  %v1153_v25 = vsel %vm12919_vm10, %v12918_v56, %v12917_v35  ;;  %v12924_v21 = vunpack.i.h.bf16 %v8702_v24  ;;  %v8956_v0 = vsel %vm2037_vm3, %v5758_v1, %v12925_v43  ;;  %v12926_v35 = vld [vmem:[#allocation49_spill] sm:$0xff]  ;;  %v12929_v24 = vunpack.i.l.bf16 %v12920_v41 }
 0x3ae   : > { %v887_v44 = vsel %vm12923_vm14, %v12922_v8, %v12921_v28  ;;  %2681 = vmatpush.msra.mxu0 %v1153_v25  ;;  %v12305_v56 = vunpack.i.h.bf16 %v12926_v35  ;;  %v12927_v28 = vunpack.i.l.bf16 %v12904_v23  ;;  %v12928_v8 = vunpack.i.l.bf16 %v6942_v30  ;;  %2598 = vmatpush.msrb.mxu1 %v8200_v40 }
 0x3af   : > { %v8950_v3 = vsel %vm2037_vm3, %v5759_v59, %v12924_v21  ;;  %2801 = vmatpush.msrb.mxu3 %v887_v44  ;;  %v12930_v43 = vunpack.i.l.bf16 %v12912_v51  ;;  %v5739_v30 = vunpack.i.h.bf16 %v8837_v50  ;;  %v12932_v41 = vunpack.i.h.bf16 %v6908_v22 }
 0x3b0   : > { %v1152_v21 = vsel %vm12919_vm10, %v12928_v8, %v12927_v28  ;;  %v12931_v28 = vunpack.i.h.bf16 %v12916_v36  ;;  %vm12933_vm10 = vcmp.lt.s32.totalorder %v7054_v20, 23  ;;  %v5738_v44 = vunpack.i.l.bf16 %v8837_v50  ;;  %2599 = vmatpush.msrb.mxu1 %v8213_v2 }
 0x3b1   : > { %v886_v25 = vsel %vm12923_vm14, %v12930_v43, %v12929_v24  ;;  %2682 = vmatpush.msra.mxu0 %v1152_v21  ;;  %v12934_v24 = vld [vmem:[#allocation88_spill] sm:$0xff]  ;;  %vm12936_vm14 = vcmp.lt.s32.totalorder %v7054_v20, 46  ;;  %v12941_v2 = vunpack.i.h.bf16 %v8914_v49 }
 0x3b2   : > { %2802 = vmatpush.msrb.mxu3 %v886_v25  ;;  %v1120_v8 = vsel %vm12933_vm10, %v12932_v41, %v12931_v28  ;;  %v12935_v43 = vunpack.i.h.bf16 %v12934_v24  ;;  %v8990_v25 = vpop.permute.xlu2 %5771  ;;  %v12938_v28 = vunpack.i.l.bf16 %v6908_v22  ;;  %v12939_v17 = vunpack.i.l.bf16 %v12934_v24  ;;  %2600 = vmatpush.msrb.mxu1 %v8229_v7 }
 0x3b3   : > { %2683 = vmatpush.msra.mxu0 %v1120_v8  ;;  %v5764_v8 = vunpack.i.h.bf16 %v8931_v57  ;;  %v2039_v22 = vsel %vm2037_vm3, %v12941_v2, %v5759_v59  ;;  %v12943_v24 = vunpack.i.h.bf16 %v8389_v31  ;;  %v12306_v59 = vunpack.i.h.bf16 %v8621_v16 }
 0x3b4   : > { %v854_v21 = vsel %vm12936_vm14, %v12305_v56, %v12935_v43  ;;  %v1119_v41 = vsel %vm12933_vm10, %v12938_v28, %v12937_v34  ;;  %v12940_v43 = vunpack.i.l.bf16 %v12926_v35  ;;  %v9007_v56 = vld [vmem:[#allocation7 + $0x8] sm:$0xff]  ;;  %v12942_v34 = vunpack.i.h.bf16 %v8423_v5 }
 0x3b5   : > { %2803 = vmatpush.msrb.mxu3 %v854_v21  ;;  %v5767_v21 = vpop.permute.xlu1 %5766  ;;  %2684 = vmatpush.msra.mxu0 %v1119_v41  ;;  %v12944_v41 = vunpack.i.h.bf16 %v8740_v9  ;;  %vm12424_vm10 = vcmp.lt.s32.totalorder %v7054_v20, 59  ;;  %v12945_v2 = vunpack.i.l.bf16 %v8914_v49  ;;  %v12946_v7 = vunpack.i.l.bf16 %v8740_v9 }
 0x3b6   : > { %v853_v50 = vsel %vm12936_vm14, %v12940_v43, %v12939_v17  ;;  %v1920_v28 = vsel %vm1914_vm11, %v12943_v24, %v12942_v34  ;;  %v12307_v17 = vunpack.i.h.bf16 %v8990_v25  ;;  %v5769_v43 = vunpack.i.h.bf16 %v5767_v21  ;;  %2685 = vmatmul.f32.vlgmr.msra.gmra.mxu0 %v8734_v11  ;;  %2525 = vmatmul.f32.vlgmr.msra.gmra.mxu1 %v9007_v56 }
 0x3b7   : > { %2804 = vmatpush.msrb.mxu3 %v853_v50  ;;  %v5768_v40 = vunpack.i.l.bf16 %v5767_v21  ;;  %v9026_v50 = vsel %vm2004_vm12, %v5739_v30, %v12944_v41  ;;  %v2038_v34 = vsel %vm2037_vm3, %v12945_v2, %v5758_v1  ;;  %v9040_v21 = vsel %vm2004_vm12, %v5738_v44, %v12946_v7  ;;  %v9044_v41 = vpop.permute.xlu0 %5776  ;;  %2601 = vmatpush.msrb.mxu1 %v1920_v28 }
 0x3b8   : > { %v2076_v1 = vsel %vm12424_vm10, %v5764_v8, %v5769_v43  ;;  %v2074_v2 = vsel %vm12424_vm10, %v5769_v43, %v12307_v17  ;;  %v12947_v9 = vunpack.i.l.bf16 %v8423_v5  ;;  %v2006_v28 = vsel %vm2004_vm12, %v12306_v59, %v5739_v30  ;;  %v12954_v17 = vld [vmem:[#allocation126_spill] sm:$0xff]  ;;  %2805 = vmatmul.f32.vlgmr.msrb.gmra.mxu3 %v9007_v56 }
 0x3b9   : > { %2869 = vmatpush.msra.mxu3 %v2039_v22  ;;  %v5763_v22 = vunpack.i.l.bf16 %v8931_v57  ;;  %2623 = vmatpush.msrb.mxu2 %v2076_v1  ;;  %v12948_v57 = vunpack.i.l.bf16 %v8389_v31  ;;  %v12950_v31 = vunpack.i.h.bf16 %v12825_v45  ;;  %vm12953_vm14 = vcmp.lt.s32.totalorder %v7054_v20, 24 }
 0x3ba   : > { %2763 = vmatpush.msrb.mxu0 %v2074_v2  ;;  %v12951_v2 = vld [vmem:[#allocation62_spill] sm:$0xff]  ;;  %v12311_v30 = vunpack.i.h.bf16 %v7950_v14  ;;  %v12955_v24 = vunpack.i.h.bf16 %v12954_v17 }
 0x3bb   : > { %2870 = vmatpush.msra.mxu3 %v2038_v34  ;;  %v1919_v7 = vsel %vm1914_vm11, %v12948_v57, %v12947_v9  ;;  %v2075_v43 = vsel %vm12424_vm10, %v5763_v22, %v5768_v40  ;;  %v12949_v34 = vunpack.i.l.bf16 %v8990_v25  ;;  %v12952_v9 = vunpack.i.h.bf16 %v12951_v2 }
 0x3bc   : > { %2602 = vmatpush.msrb.mxu1 %v1919_v7  ;;  %2624 = vmatpush.msrb.mxu2 %v2075_v43  ;;  %v12959_v43 = vunpack.i.l.bf16 %v8621_v16  ;;  %v12310_v7 = vunpack.i.l.bf16 %v7950_v14 }
 0x3bd   : > { %v2073_v1 = vsel %vm12424_vm10, %v5768_v40, %v12949_v34  ;;  %2871 = vmatpush.msra.mxu3 %v2006_v28  ;;  %v1087_v57 = vsel %vm12953_vm14, %v12952_v9, %v12950_v31  ;;  %v12956_v40 = vunpack.i.h.bf16 %v12824_v33  ;;  %v12315_v34 = vunpack.i.h.bf16 %v8494_v10 }
 0x3be   : > { %2764 = vmatpush.msrb.mxu0 %v2073_v1  ;;  %2649 = vmatpush.msra.mxu2 %v1087_v57  ;;  %v12957_v31 = vunpack.i.h.bf16 %v8366_v63  ;;  %v12958_v9 = vunpack.i.h.bf16 %v8431_v12  ;;  %v2005_v1 = vsel %vm2004_vm12, %v12959_v43, %v5738_v44  ;;  %v12961_v57 = vunpack.i.l.bf16 %v12951_v2 }
 0x3bf   : > { %v1349_v28 = vsel %vm12308_vm13, %v12956_v40, %v12955_v24  ;;  %2872 = vmatpush.msra.mxu3 %v2005_v1  ;;  %v12960_v24 = vunpack.i.l.bf16 %v12825_v45  ;;  %v12312_v44 = vunpack.i.l.bf16 %v8494_v10  ;;  %v12965_v45 = vunpack.i.l.bf16 %v8431_v12  ;;  %v12968_v1 = vld [vmem:[#allocation58_spill] sm:$0xff] }
 0x3c0   : > { %2809 = vmatpush.msra.mxu0 %v1349_v28  ;;  %v1887_v59 = vsel %vm12396_vm7, %v12958_v9, %v12957_v31  ;;  %v12962_v28 = vunpack.i.l.bf16 %v12954_v17  ;;  %v12963_v31 = vunpack.i.l.bf16 %v12824_v33  ;;  %v12966_v43 = vunpack.i.h.bf16 %v8548_v38 }
 0x3c1   : > { %2603 = vmatpush.msrb.mxu1 %v1887_v59  ;;  %v1086_v40 = vsel %vm12953_vm14, %v12961_v57, %v12960_v24  ;;  %v12964_v59 = vunpack.i.l.bf16 %v8366_v63  ;;  %v12967_v17 = vunpack.i.h.bf16 %v12839_v18  ;;  %v12969_v24 = vunpack.i.h.bf16 %v12968_v1  ;;  %v12971_v63 = vld [vmem:[#allocation159_spill] sm:$0xff] }
 0x3c2   : > { %v1348_v9 = vsel %vm12308_vm13, %v12963_v31, %v12962_v28  ;;  %2650 = vmatpush.msra.mxu2 %v1086_v40  ;;  %v1973_v33 = vsel %vm1971_vm9, %v12315_v34, %v12966_v43  ;;  %vm12970_vm14 = vcmp.lt.s32.totalorder %v7054_v20, 25  ;;  %v12972_v12 = vunpack.i.h.bf16 %v12971_v63  ;;  %v12979_v43 = vld [vmem:[#allocation137_spill] sm:$0xff] }
 0x3c3   : > { %2810 = vmatpush.msra.mxu0 %v1348_v9  ;;  %v1886_v2 = vsel %vm12396_vm7, %v12965_v45, %v12964_v59  ;;  %v1054_v57 = vsel %vm12970_vm14, %v12969_v24, %v12967_v17  ;;  %2873 = vmatpush.msra.mxu3 %v1973_v33  ;;  %vm12973_vm13 = vcmp.lt.s32.totalorder %v7054_v20, 106  ;;  %v12974_v28 = vunpack.i.h.bf16 %v9044_v41  ;;  %v12978_v45 = vld [vmem:[#allocation87_spill] sm:$0xff] }
 0x3c4   : > { %2604 = vmatpush.msrb.mxu1 %v1886_v2  ;;  %v1588_v40 = vsel %vm12973_vm13, %v12972_v12, %v12311_v30  ;;  %v12976_v9 = vunpack.i.l.bf16 %v9044_v41  ;;  %v12314_v2 = vunpack.i.h.bf16 %v12978_v45  ;;  %2651 = vmatpush.msra.mxu2 %v1054_v57  ;;  %v12980_v33 = vunpack.i.h.bf16 %v12979_v43  ;;  %vm12986_vm13 = vmmov %vm12970_vm14 }
 0x3c5   : > { %v9137_v31 = vsel %vm12424_vm10, %v12974_v28, %v5764_v8  ;;  %v12981_v17 = vunpack.i.h.bf16 %v12831_v55  ;;  %v12982_v8 = vunpack.i.l.bf16 %v8548_v38  ;;  %v12984_v57 = vunpack.i.l.bf16 %v12839_v18 }
 0x3c6   : > { %12975 = vst [vmem:[#allocation60_spill] sm:$0xff] %v9137_v31  ;;  %v9143_v59 = vsel %vm12424_vm10, %v12976_v9, %v5763_v22  ;;  %2689 = vmatpush.msra.mxu1 %v1588_v40  ;;  %v12983_v22 = vld [vmem:[#allocation156_spill] sm:$0xff]  ;;  %v12985_v40 = vunpack.i.l.bf16 %v12968_v1  ;;  %v12987_v38 = vunpack.i.l.bf16 %v12971_v63  ;;  %vm12988_vm14 = vcmp.lt.s32.totalorder %v7054_v20, 106 }
 0x3c7   : > { %12977 = vst [vmem:[#allocation56_spill] sm:$0xff] %v9143_v59  ;;  %v1316_v24 = vsel %vm12309_vm8, %v12981_v17, %v12980_v33  ;;  %v1972_v12 = vsel %vm1971_vm9, %v12312_v44, %v12982_v8  ;;  %v12313_v28 = vunpack.i.h.bf16 %v12983_v22  ;;  %v9171_v17 = vld [vmem:[#allocation7 + $0x30] sm:$0xff]  ;;  %v12990_v18 = vunpack.i.l.bf16 %v12831_v55  ;;  %v12991_v8 = vld [vmem:[#allocation90_spill] sm:$0xff] }
 0x3c8   : > { %2811 = vmatpush.msra.mxu0 %v1316_v24  ;;  %2874 = vmatpush.msra.mxu3 %v1972_v12  ;;  %v1053_v9 = vsel %vm12986_vm13, %v12985_v40, %v12984_v57  ;;  %v1587_v33 = vsel %vm12988_vm14, %v12987_v38, %v12310_v7  ;;  %v12989_v24 = vunpack.i.l.bf16 %v12979_v43  ;;  %v12992_v12 = vunpack.i.h.bf16 %v12991_v8  ;;  %v12993_v55 = vld [vmem:[#allocation162_spill] sm:$0xff]  ;;  %v12996_v38 = vld [vmem:[#allocation160_spill] sm:$0xff]  ;;  %v13002_v7 = vld [vmem:[#allocation125_spill] sm:$0xff] }
 0x3c9   : > { %2652 = vmatpush.msra.mxu2 %v1053_v9  ;;  %2690 = vmatpush.msra.mxu1 %v1587_v33  ;;  %v12317_v57 = vunpack.i.l.bf16 %v12978_v45  ;;  %v12316_v40 = vunpack.i.l.bf16 %v12983_v22  ;;  %v12994_v43 = vunpack.i.h.bf16 %v12993_v55  ;;  %vm12995_vm13 = vcmp.lt.s32.totalorder %v7054_v20, 107 }
 0x3ca   : > { %v1315_v1 = vsel %vm12309_vm8, %v12990_v18, %v12989_v24  ;;  %v9185_v63 = vsel %vm784_vm4, %v12314_v2, %v12992_v12  ;;  %vm12997_vm14 = vcmask 130048   ;;  %v12998_v24 = vunpack.i.h.bf16 %v12844_v26  ;;  %v12999_v18 = vld [vmem:[#allocation51_spill] sm:$0xff] }
 0x3cb   : > { %2812 = vmatpush.msra.mxu0 %v1315_v1  ;;  %2875 = vmatpush.msra.mxu3 %v9185_v63  ;;  %v1555_v9 = vsel %vm12995_vm13, %v12994_v43, %v12313_v28  ;;  %v13000_v12 = vunpack.i.h.bf16 %v12999_v18  ;;  %vm13001_vm8 = vcmp.lt.s32.totalorder %v7054_v20, 41  ;;  %v13003_v30 = vunpack.i.h.bf16 %v13002_v7  ;;  %v13005_v28 = vld [vmem:[#allocation82_spill] sm:$0xff] }
 0x3cc   : > { %4734 = vmatmul.msk.f32.vlgmr.msrb.gmra.mxu2 %vm12997_vm14, %v9171_v17  ;;  %2691 = vmatpush.msra.mxu1 %v1555_v9  ;;  %v13004_v44 = vunpack.i.h.bf16 %v12845_v62  ;;  %v12318_v2 = vunpack.i.h.bf16 %v13005_v28  ;;  %v13006_v34 = vunpack.i.l.bf16 %v12991_v8  ;;  %v13007_v9 = vunpack.i.l.bf16 %v12993_v55 }
 0x3cd   : > { %v1021_v1 = vsel %vm13001_vm8, %v13000_v12, %v12998_v24  ;;  %vm13008_vm8 = vmmov %vm12995_vm13  ;;  %v13009_v8 = vunpack.i.l.bf16 %v12844_v26  ;;  %v13010_v12 = vunpack.i.l.bf16 %v12999_v18  ;;  %vm13011_vm13 = vcmp.lt.s32.totalorder %v7054_v20, 41  ;;  %v13015_v26 = vld [vmem:[#allocation84_spill] sm:$0xff] }
 0x3ce   : > { %v1283_v43 = vsel %vm1279_vm15, %v13004_v44, %v13003_v30  ;;  %2653 = vmatpush.msra.mxu2 %v1021_v1  ;;  %v9218_v33 = vsel %vm784_vm4, %v12317_v57, %v13006_v34  ;;  %v1554_v24 = vsel %vm13008_vm8, %v13007_v9, %v12316_v40  ;;  %v9226_v30 = vld [vmem:[#allocation7 + $0x28] sm:$0xff]  ;;  %v13012_v1 = vunpack.i.l.bf16 %v13002_v7  ;;  %v13014_v40 = vld [vmem:[#allocation89_spill] sm:$0xff]  ;;  %v13017_v7 = vld [vmem:[#allocation147_spill] sm:$0xff] }
 0x3cf   : > { %2813 = vmatpush.msra.mxu0 %v1283_v43  ;;  %2876 = vmatpush.msra.mxu3 %v9218_v33  ;;  %v1020_v34 = vsel %vm13011_vm13, %v13010_v12, %v13009_v8  ;;  %v13013_v55 = vunpack.i.l.bf16 %v12845_v62  ;;  %v13016_v44 = vunpack.i.h.bf16 %v13015_v26  ;;  %v13018_v62 = vunpack.i.h.bf16 %v12836_v61  ;;  %v13019_v8 = vld [vmem:[#allocation57_spill] sm:$0xff] }
 0x3d0   : > { %2692 = vmatpush.msra.mxu1 %v1554_v24  ;;  %2654 = vmatpush.msra.mxu2 %v1020_v34  ;;  %v13020_v12 = vunpack.i.h.bf16 %v13019_v8  ;;  %vm13021_vm14 = vcmp.lt.s32.totalorder %v7054_v20, 42  ;;  %vm13025_vm8 = vcmp.lt.s32.totalorder %v7054_v20, 108  ;;  %v13026_v24 = vld [vmem:[#allocation117_spill] sm:$0xff]  ;;  %v13028_v9 = vunpack.i.h.bf16 %v12846_v54 }
 0x3d1   : > { %v1282_v43 = vsel %vm1279_vm15, %v13013_v55, %v13012_v1  ;;  %v9250_v18 = vsel %vm751_vm5, %v12318_v2, %v13016_v44  ;;  %2605 = vmatmul.f32.vlgmr.msrb.gmra.mxu1 %v9226_v30  ;;  %v13022_v1 = vunpack.i.h.bf16 %v12996_v38  ;;  %v13023_v55 = vld [vmem:[#allocation152_spill] sm:$0xff]  ;;  %v13027_v57 = vunpack.i.h.bf16 %v13026_v24  ;;  %vm13033_vm13 = vmmov %vm13021_vm14 }
 0x3d2   : > { %2814 = vmatpush.msra.mxu0 %v1282_v43  ;;  %2877 = vmatpush.msra.mxu3 %v9250_v18  ;;  %v988_v34 = vsel %vm13021_vm14, %v13020_v12, %v13018_v62  ;;  %v13024_v43 = vunpack.i.h.bf16 %v13023_v55  ;;  %v13029_v62 = vunpack.i.l.bf16 %v13015_v26  ;;  %v13030_v12 = vunpack.i.l.bf16 %v13005_v28  ;;  %vm13036_vm14 = vmmov %vm13025_vm8 }
 0x3d3   : > { %2655 = vmatpush.msra.mxu2 %v988_v34  ;;  %v1250_v59 = vsel %vm1246_vm0, %v13028_v9, %v13027_v57  ;;  %v13031_v34 = vunpack.i.l.bf16 %v12836_v61  ;;  %v13034_v9 = vunpack.i.l.bf16 %v12996_v38  ;;  %v13035_v26 = vunpack.i.l.bf16 %v13023_v55 }
 0x3d4   : > { %v1522_v44 = vsel %vm13025_vm8, %v13024_v43, %v13022_v1  ;;  %v9280_v31 = vsel %vm751_vm5, %v13030_v12, %v13029_v62  ;;  %2815 = vmatpush.msra.mxu0 %v1250_v59  ;;  %v13032_v43 = vunpack.i.l.bf16 %v13019_v8  ;;  %v13037_v59 = vunpack.i.l.bf16 %v13026_v24  ;;  %v13039_v12 = vld [vmem:[#allocation79_spill] sm:$0xff] }
 0x3d5   : > { %2693 = vmatpush.msra.mxu1 %v1522_v44  ;;  %2878 = vmatpush.msra.mxu3 %v9280_v31  ;;  %v1521_v44 = vsel %vm13036_vm14, %v13035_v26, %v13034_v9  ;;  %v13038_v61 = vunpack.i.l.bf16 %v12846_v54  ;;  %v13043_v9 = vld [vmem:[#allocation136_spill] sm:$0xff]  ;;  %v13044_v24 = vunpack.i.h.bf16 %v12885_v48  ;;  %vm13047_vm8 = vcmp.lt.s32.totalorder %v7054_v20, 43 }
 0x3d6   : > { %v987_v57 = vsel %vm13033_vm13, %v13032_v43, %v13031_v34  ;;  %v13040_v34 = vunpack.i.h.bf16 %v13039_v12  ;;  %v13041_v43 = vunpack.i.h.bf16 %v13014_v40  ;;  %v13053_v26 = vunpack.i.h.bf16 %v12876_v15  ;;  %vm13058_vm13 = vmmov %vm13047_vm8 }
 0x3d7   : > { %2656 = vmatpush.msra.mxu2 %v987_v57  ;;  %2694 = vmatpush.msra.mxu1 %v1521_v44  ;;  %v1249_v8 = vsel %vm1246_vm0, %v13038_v61, %v13037_v59  ;;  %v13045_v57 = vld [vmem:[#allocation53_spill] sm:$0xff]  ;;  %v13048_v59 = vunpack.i.h.bf16 %v13017_v7  ;;  %v13054_v2 = vunpack.i.l.bf16 %v13039_v12  ;;  %v13059_v12 = vunpack.i.l.bf16 %v13017_v7 }
 0x3d8   : > { %v9309_v55 = vsel %vm718_vm6, %v13041_v43, %v13040_v34  ;;  %2816 = vmatpush.msra.mxu0 %v1249_v8  ;;  %v13046_v54 = vunpack.i.h.bf16 %v13045_v57  ;;  %v13049_v61 = vld [vmem:[#allocation141_spill] sm:$0xff]  ;;  %v13051_v43 = vld [vmem:[#allocation127_spill] sm:$0xff]  ;;  %vm13069_vm14 = vcmp.lt.s32.totalorder %v7054_v20, 44 }
 0x3d9   : > { %13042 = vst [vmem:[#allocation63_spill] sm:$0xff] %v9309_v55  ;;  %2879 = vmatpush.msra.mxu3 %v9309_v55  ;;  %v13050_v62 = vunpack.i.h.bf16 %v13049_v61  ;;  %v13052_v8 = vunpack.i.h.bf16 %v13051_v43  ;;  %v12330_v55 = vunpack.i.l.bf16 %v13043_v9 }
 0x3da   : > { %v955_v44 = vsel %vm13047_vm8, %v13046_v54, %v13044_v24  ;;  %v13055_v24 = vunpack.i.l.bf16 %v13014_v40  ;;  %vm13073_vm8 = vcmp.lt.s32.totalorder %v7054_v20, 125 }
 0x3db   : > { %v1489_v34 = vsel %vm1485_vm1, %v13050_v62, %v13048_v59  ;;  %2657 = vmatpush.msra.mxu2 %v955_v44  ;;  %v1217_v1 = vsel %vm1213_vm2, %v13053_v26, %v13052_v8  ;;  %v13056_v62 = vunpack.i.l.bf16 %v12885_v48  ;;  %v13057_v44 = vunpack.i.l.bf16 %v13045_v57 }
 0x3dc   : > { %2695 = vmatpush.msra.mxu1 %v1489_v34  ;;  %v9337_v54 = vsel %vm718_vm6, %v13055_v24, %v13054_v2  ;;  %2817 = vmatpush.msra.mxu0 %v1217_v1  ;;  %v13060_v59 = vunpack.i.l.bf16 %v13049_v61  ;;  %v13061_v1 = vunpack.i.l.bf16 %v13051_v43  ;;  %v13062_v34 = vunpack.i.l.bf16 %v12876_v15  ;;  %v13065_v61 = vld [vmem:[#allocation149_spill] sm:$0xff] }
 0x3dd   : > { %2880 = vmatpush.msra.mxu3 %v9337_v54  ;;  %v954_v26 = vsel %vm13058_vm13, %v13057_v44, %v13056_v62  ;;  %v13063_v57 = vunpack.i.h.bf16 %v8429_v4  ;;  %v13064_v8 = vunpack.i.h.bf16 %v8562_v46  ;;  %v12325_v62 = vunpack.i.h.bf16 %v13065_v61 }
 0x3de   : > { %v1488_v2 = vsel %vm1485_vm1, %v13060_v59, %v13059_v12  ;;  %2658 = vmatpush.msra.mxu2 %v954_v26  ;;  %v1216_v48 = vsel %vm1213_vm2, %v13062_v34, %v13061_v1  ;;  %v13066_v44 = vunpack.i.h.bf16 %v12898_v37  ;;  %v13067_v26 = vld [vmem:[#allocation46_spill] sm:$0xff]  ;;  %v13070_v12 = vunpack.i.h.bf16 %v13043_v9  ;;  %v13071_v59 = vld [vmem:[#allocation77_spill] sm:$0xff]  ;;  %v13074_v1 = vld [vmem:[#allocation116_spill] sm:$0xff] }
 0x3df   : > { %2696 = vmatpush.msra.mxu1 %v1488_v2  ;;  %v1916_v24 = vsel %vm1914_vm11, %v13064_v8, %v13063_v57  ;;  %2818 = vmatpush.msra.mxu0 %v1216_v48  ;;  %v13068_v43 = vunpack.i.h.bf16 %v13067_v26  ;;  %v13072_v4 = vunpack.i.h.bf16 %v13071_v59  ;;  %v13075_v34 = vunpack.i.h.bf16 %v13074_v1 }
 0x3e0   : > { %2881 = vmatpush.msra.mxu3 %v1916_v24  ;;  %v13076_v48 = vunpack.i.h.bf16 %v12899_v27  ;;  %vm13077_vm13 = vcmp.lt.s32.totalorder %v7054_v20, 21  ;;  %v13078_v8 = vunpack.i.l.bf16 %v12898_v37  ;;  %v13079_v24 = vunpack.i.l.bf16 %v13067_v26 }
 0x3e1   : > { %v922_v15 = vsel %vm13069_vm14, %v13068_v43, %v13066_v44  ;;  %v1456_v2 = vsel %vm13073_vm8, %v13072_v4, %v13070_v12  ;;  %v13080_v43 = vunpack.i.l.bf16 %v13071_v59  ;;  %v12324_v12 = vunpack.i.l.bf16 %v13065_v61  ;;  %v13084_v59 = vld [vmem:[#allocation52_spill] sm:$0xff] }
 0x3e2   : > { %2659 = vmatpush.msra.mxu2 %v922_v15  ;;  %2697 = vmatpush.msra.mxu1 %v1456_v2  ;;  %v1184_v57 = vsel %vm13077_vm13, %v13076_v48, %v13075_v34  ;;  %v921_v44 = vsel %vm13069_vm14, %v13079_v24, %v13078_v8  ;;  %v13082_v37 = vunpack.i.l.bf16 %v12899_v27  ;;  %v13083_v4 = vunpack.i.h.bf16 %v12912_v51  ;;  %v13087_v48 = vld [vmem:[#allocation72_spill] sm:$0xff]  ;;  %v13091_v24 = vld [vmem:[#allocation109_spill] sm:$0xff] }
 0x3e3   : > { %2819 = vmatpush.msra.mxu0 %v1184_v57  ;;  %2882 = vmatpush.msra.mxu3 %v8785_v60  ;;  %v1455_v15 = vsel %vm13073_vm8, %v13080_v43, %v12330_v55  ;;  %v13081_v60 = vunpack.i.l.bf16 %v13074_v1  ;;  %v13085_v2 = vunpack.i.h.bf16 %v13084_v59  ;;  %vm13086_vm14 = vcmp.lt.s32.totalorder %v7054_v20, 45  ;;  %v13090_v1 = vld [vmem:[#allocation167_spill] sm:$0xff]  ;;  %v13177_v55 = vld [vmem:[#allocation130_spill] sm:$0xff] }
 0x3e4   : > { %2660 = vmatpush.msra.mxu2 %v921_v44  ;;  %2698 = vmatpush.msra.mxu1 %v1455_v15  ;;  %v13088_v57 = vunpack.i.h.bf16 %v13087_v48  ;;  %vm13089_vm8 = vcmp.lt.s32.totalorder %v7054_v20, 126  ;;  %v5499_v8 = vunpack.i.h.bf16 %v13090_v1  ;;  %v13093_v44 = vunpack.i.h.bf16 %v12904_v23  ;;  %v13095_v15 = vld [vmem:[#allocation135_spill] sm:$0xff] }
 0x3e5   : > { %v1183_v26 = vsel %vm13077_vm13, %v13082_v37, %v13081_v60  ;;  %2883 = vmatpush.msra.mxu3 %v8662_v19  ;;  %v889_v34 = vsel %vm13086_vm14, %v13085_v2, %v13083_v4  ;;  %v13092_v19 = vunpack.i.h.bf16 %v13091_v24  ;;  %vm13094_vm13 = vcmp.lt.s32.totalorder %v7054_v20, 22 }
 0x3e6   : > { %2820 = vmatpush.msra.mxu0 %v1183_v26  ;;  %v1423_v27 = vsel %vm13089_vm8, %v13088_v57, %v12325_v62  ;;  %2661 = vmatpush.msra.mxu2 %v889_v34  ;;  %v12327_v60 = vunpack.i.h.bf16 %v13095_v15  ;;  %v13096_v37 = vunpack.i.l.bf16 %v12912_v51  ;;  %v13097_v26 = vunpack.i.l.bf16 %v13084_v59 }
 0x3e7   : > { %2699 = vmatpush.msra.mxu1 %v1423_v27  ;;  %v1151_v43 = vsel %vm13094_vm13, %v13093_v44, %v13092_v19  ;;  %2884 = vmatpush.msra.mxu3 %v8668_v39  ;;  %v5498_v2 = vunpack.i.l.bf16 %v13090_v1  ;;  %v6445_v34 = vmov 2   ;;  %v13098_v57 = vunpack.i.l.bf16 %v13087_v48  ;;  %v13103_v44 = vld [vmem:[#allocation158_spill] sm:$0xff]  ;;  %v13104_v48 = vld [vmem:[#allocation164_spill] sm:$0xff] }
 0x3e8   : > { %2821 = vmatpush.msra.mxu0 %v1151_v43  ;;  %v888_v4 = vsel %vm13086_vm14, %v13097_v26, %v13096_v37  ;;  %5780 = vset.pattern.permute.xlu1 %v6445_v34  ;;  %v12326_v39 = vunpack.i.l.bf16 %v13095_v15  ;;  %vm13099_vm13 = vcmask 130048   ;;  %v13100_v51 = vunpack.i.l.bf16 %v13091_v24 }
 0x3e9   : > { %2662 = vmatpush.msra.mxu2 %v888_v4  ;;  %v1422_v27 = vsel %vm13089_vm8, %v13098_v57, %v12324_v12  ;;  %4735 = vmatmul.msk.f32.vlgmr.msrb.gmra.mxu0 %vm13099_vm13, %v9171_v17  ;;  %v13101_v59 = vunpack.i.l.bf16 %v12904_v23  ;;  %vm13102_vm14 = vcmp.lt.s32.totalorder %v7054_v20, 22  ;;  %v5479_v43 = vunpack.i.h.bf16 %v13103_v44  ;;  %v9459_v23 = vld [vmem:[%s12512_s6] sm:$0xff]  ;;  %v13108_v4 = vld [vmem:[#allocation47_spill] sm:$0xff]  ;;  %s13411_s6 = smov 83  }
 0x3ea   : > { %2700 = vmatpush.msra.mxu1 %v1422_v27  ;;  %v13105_v37 = vunpack.i.h.bf16 %v13104_v48  ;;  %vm13106_vm8 = vcmp.lt.s32.totalorder %v7054_v20, 106  ;;  %3050 = vperm.xlu1 %5780, %v9459_v23   ;;  %v13107_v24 = vunpack.i.h.bf16 %v12926_v35  ;;  %v13109_v34 = vunpack.i.h.bf16 %v13108_v4  ;;  %v13111_v27 = vld [vmem:[#allocation66_spill] sm:$0xff] }
 0x3eb   : > { %v1150_v19 = vsel %vm13102_vm14, %v13101_v59, %v13100_v51  ;;  %vm13110_vm13 = vcmp.lt.s32.totalorder %v7054_v20, 46  ;;  %v13112_v51 = vunpack.i.h.bf16 %v13111_v27  ;;  %vm13113_vm14 = vcmp.lt.s32.totalorder %v7054_v20, 127  ;;  %2885 = vmatmul.f32.vlgmr.msra.gmra.mxu3 %v9226_v30 }
 0x3ec   : > { %2822 = vmatpush.msra.mxu0 %v1150_v19  ;;  %v1592_v26 = vsel %vm13106_vm8, %v5499_v8, %v13105_v37  ;;  %v856_v57 = vsel %vm13110_vm13, %v13109_v34, %v13107_v24  ;;  %v5478_v19 = vunpack.i.l.bf16 %v13103_v44  ;;  %v13114_v37 = vld [vmem:[#allocation118_spill] sm:$0xff]  ;;  %v13116_v12 = vunpack.i.h.bf16 %v12916_v36  ;;  %v13258_v44 = vld [vmem:[#allocation68_spill] sm:$0xff] }
 0x3ed   : > { %2969 = vmatpush.msrb.mxu3 %v1592_v26  ;;  %v1390_v59 = vsel %vm13113_vm14, %v13112_v51, %v12327_v60  ;;  %2663 = vmatpush.msra.mxu2 %v856_v57  ;;  %v13115_v26 = vunpack.i.h.bf16 %v13114_v37  ;;  %vm13117_vm8 = vcmp.lt.s32.totalorder %v7054_v20, 23  ;;  %v13118_v24 = vunpack.i.l.bf16 %v13104_v48  ;;  %v13145_v60 = vld [vmem:[#allocation24_spill] sm:$0xff] }
 0x3ee   : > { %2701 = vmatpush.msra.mxu1 %v1390_v59  ;;  %vm13119_vm13 = vcmp.lt.s32.totalorder %v7054_v20, 106  ;;  %v13120_v51 = vunpack.i.l.bf16 %v12926_v35  ;;  %v13121_v57 = vunpack.i.l.bf16 %v13108_v4  ;;  %vm13122_vm14 = vcmp.lt.s32.totalorder %v7054_v20, 46  ;;  %v13128_v4 = vld [vmem:[#allocation155_spill] sm:$0xff] }
 0x3ef   : > { %v1118_v62 = vsel %vm13117_vm8, %v13116_v12, %v13115_v26  ;;  %v1591_v34 = vsel %vm13119_vm13, %v5498_v2, %v13118_v24  ;;  %v13123_v12 = vunpack.i.l.bf16 %v13111_v27  ;;  %vm13124_vm8 = vcmp.lt.s32.totalorder %v7054_v20, 127  ;;  %v13131_v27 = vld [vmem:[#allocation153_spill] sm:$0xff] }
 0x3f0   : > { %2823 = vmatpush.msra.mxu0 %v1118_v62  ;;  %2970 = vmatpush.msrb.mxu3 %v1591_v34  ;;  %v855_v59 = vsel %vm13122_vm14, %v13121_v57, %v13120_v51  ;;  %v13125_v26 = vunpack.i.l.bf16 %v13114_v37  ;;  %v13126_v62 = vunpack.i.l.bf16 %v12916_v36  ;;  %vm13127_vm13 = vcmp.lt.s32.totalorder %v7054_v20, 23 }
 0x3f1   : > { %v1389_v48 = vsel %vm13124_vm8, %v13123_v12, %v12326_v39  ;;  %2664 = vmatpush.msra.mxu2 %v855_v59  ;;  %v13129_v24 = vunpack.i.h.bf16 %v13128_v4  ;;  %vm13130_vm14 = vcmp.lt.s32.totalorder %v7054_v20, 107  ;;  %v5459_v51 = vunpack.i.h.bf16 %v13131_v27  ;;  %v13144_v39 = vld [vmem:[#allocation157_spill] sm:$0xff] }
 0x3f2   : > { %2702 = vmatpush.msra.mxu1 %v1389_v48  ;;  %v1117_v35 = vsel %vm13127_vm13, %v13126_v62, %v13125_v26  ;;  %v13132_v57 = vunpack.i.h.bf16 %v8914_v49  ;;  %v13133_v37 = vunpack.i.h.bf16 %v8719_v32  ;;  %v13134_v59 = vunpack.i.h.bf16 %v9044_v41  ;;  %v13136_v26 = vld [vmem:[#allocation96_spill] sm:$0xff]  ;;  %vm13138_vm8 = vmmov %vm13130_vm14  ;;  %2665 = vmatmul.f32.vlgmr.msra.gmra.mxu2 %v9007_v56 }
 0x3f3   : > { %v1559_v34 = vsel %vm13130_vm14, %v5479_v43, %v13129_v24  ;;  %2824 = vmatpush.msra.mxu0 %v1117_v35  ;;  %v13135_v12 = vunpack.i.h.bf16 %v8990_v25  ;;  %v12328_v62 = vunpack.i.h.bf16 %v13136_v26  ;;  %v13137_v35 = vunpack.i.l.bf16 %v13128_v4 }
 0x3f4   : > { %2971 = vmatpush.msrb.mxu3 %v1559_v34  ;;  %v2041_v36 = vsel %vm2037_vm3, %v13133_v37, %v13132_v57  ;;  %v5458_v34 = vunpack.i.l.bf16 %v13131_v27  ;;  %v13139_v57 = vld [vmem:[#allocation27_spill] sm:$0xff]  ;;  %v13140_v37 = vunpack.i.l.bf16 %v8914_v49  ;;  %v13143_v4 = vunpack.i.l.bf16 %v8990_v25  ;;  %2825 = vmatmul.f32.vlgmr.msra.gmra.mxu0 %v8734_v11  ;;  %v13152_v11 = vld [vmem:[#allocation45_spill] sm:$0xff] }
 0x3f5   : > { %v2072_v48 = vsel %vm12424_vm10, %v13135_v12, %v13134_v59  ;;  %2729 = vmatpush.msrb.mxu2 %v2041_v36  ;;  %v1558_v24 = vsel %vm13138_vm8, %v5478_v19, %v13137_v35  ;;  %2703 = vmatpush.msra.mxu1 %v13139_v57  ;;  %v13141_v59 = vunpack.i.l.bf16 %v8719_v32  ;;  %v13142_v12 = vunpack.i.l.bf16 %v9044_v41  ;;  %v13146_v32 = vld [vmem:[#allocation148_spill] sm:$0xff]  ;;  %v13149_v41 = vld [vmem:[#allocation121_spill] sm:$0xff] }
 0x3f6   : > { %2903 = vmatpush.msrb.mxu0 %v2072_v48  ;;  %2972 = vmatpush.msrb.mxu3 %v1558_v24  ;;  %v12329_v35 = vunpack.i.l.bf16 %v13136_v26  ;;  %v12331_v24 = vunpack.i.h.bf16 %v13144_v39  ;;  %v13147_v49 = vunpack.i.h.bf16 %v13146_v32  ;;  %vm13148_vm13 = vcmp.lt.s32.totalorder %v7054_v20, 108 }
 0x3f7   : > { %v2040_v36 = vsel %vm2037_vm3, %v13141_v59, %v13140_v37  ;;  %v2071_v48 = vsel %vm12424_vm10, %v13143_v4, %v13142_v12  ;;  %2704 = vmatpush.msra.mxu1 %v13145_v60  ;;  %v13150_v37 = vunpack.i.h.bf16 %v8621_v16  ;;  %v13151_v59 = vunpack.i.h.bf16 %v8578_v47  ;;  %vm13156_vm8 = vmmov %vm13148_vm13 }
 0x3f8   : > { %2730 = vmatpush.msrb.mxu2 %v2040_v36  ;;  %2904 = vmatpush.msrb.mxu0 %v2071_v48  ;;  %v1526_v25 = vsel %vm13148_vm13, %v5459_v51, %v13147_v49  ;;  %v13153_v12 = vunpack.i.h.bf16 %v13152_v11  ;;  %vm13154_vm14 = vcmp.lt.s32.totalorder %v7054_v20, 47  ;;  %v5438_v48 = vunpack.i.l.bf16 %v13144_v39 }
 0x3f9   : > { %2973 = vmatpush.msrb.mxu3 %v1526_v25  ;;  %v2008_v36 = vsel %vm2004_vm12, %v13151_v59, %v13150_v37  ;;  %v13155_v49 = vunpack.i.l.bf16 %v13146_v32  ;;  %v13158_v37 = vunpack.i.l.bf16 %v8621_v16  ;;  %v13159_v59 = vunpack.i.l.bf16 %v8578_v47  ;;  %vm13161_vm13 = vmmov %vm13154_vm14  ;;  %v13165_v47 = vld [vmem:[#allocation112_spill] sm:$0xff] }
 0x3fa   : > { %2929 = vmatpush.msra.mxu0 %v13149_v41  ;;  %v821_v4 = vsel %vm13154_vm14, %v13153_v12, %v12328_v62  ;;  %2731 = vmatpush.msrb.mxu2 %v2008_v36  ;;  %v13157_v41 = vld [vmem:[#allocation122_spill] sm:$0xff]  ;;  %v13160_v36 = vunpack.i.l.bf16 %v13152_v11  ;;  %v13167_v11 = vunpack.i.h.bf16 %v8634_v29  ;;  %vm13180_vm14 = vcmp.lt.s32.totalorder %v7054_v20, 125 }
 0x3fb   : > { %2769 = vmatpush.msrb.mxu1 %v821_v4  ;;  %v1525_v25 = vsel %vm13156_vm8, %v5458_v34, %v13155_v49  ;;  %v2007_v12 = vsel %vm2004_vm12, %v13159_v59, %v13158_v37  ;;  %v13162_v4 = vld [vmem:[#allocation140_spill] sm:$0xff]  ;;  %v13163_v49 = vld [vmem:[#allocation154_spill] sm:$0xff]  ;;  %v13168_v59 = vunpack.i.h.bf16 %v12978_v45  ;;  %vm13186_vm8 = vmmov %vm13180_vm14  ;;  %v13263_v27 = vunpack.i.l.bf16 %v13017_v7 }
 0x3fc   : > { %2930 = vmatpush.msra.mxu0 %v13157_v41  ;;  %2974 = vmatpush.msrb.mxu3 %v1525_v25  ;;  %v820_v32 = vsel %vm13161_vm13, %v13160_v36, %v12329_v35  ;;  %v12334_v62 = vunpack.i.h.bf16 %v13162_v4  ;;  %v13164_v25 = vunpack.i.h.bf16 %v13163_v49  ;;  %v13166_v41 = vunpack.i.h.bf16 %v8494_v10 }
 0x3fd   : > { %2732 = vmatpush.msrb.mxu2 %v2007_v12  ;;  %2770 = vmatpush.msrb.mxu1 %v820_v32  ;;  %v13169_v12 = vld [vmem:[#allocation35_spill] sm:$0xff]  ;;  %v12332_v35 = vunpack.i.l.bf16 %v13162_v4  ;;  %vm13193_vm13 = vcmp.lt.s32.totalorder %v7054_v20, 126 }
 0x3fe   : > { %v1493_v16 = vsel %vm1485_vm1, %v12331_v24, %v13164_v25  ;;  %2931 = vmatpush.msra.mxu0 %v13165_v47  ;;  %v1975_v37 = vsel %vm1971_vm9, %v13167_v11, %v13166_v41  ;;  %v13170_v36 = vunpack.i.h.bf16 %v13169_v12  ;;  %v13171_v25 = vunpack.i.l.bf16 %v13163_v49  ;;  %v13172_v47 = vld [vmem:[#allocation113_spill] sm:$0xff] }
 0x3ff   : > { %2975 = vmatpush.msrb.mxu3 %v1493_v16  ;;  %2733 = vmatpush.msrb.mxu2 %v1975_v37  ;;  %v13173_v41 = vunpack.i.l.bf16 %v8494_v10  ;;  %v13174_v11 = vunpack.i.l.bf16 %v8634_v29  ;;  %v13175_v37 = vunpack.i.l.bf16 %v12978_v45  ;;  %v12333_v24 = vunpack.i.h.bf16 %v13177_v55  ;;  %v13181_v29 = vld [vmem:[#allocation119_spill] sm:$0xff] }
 0x400   : > { %v788_v32 = vsel %vm784_vm4, %v13170_v36, %v13168_v59  ;;  %v1492_v16 = vsel %vm1485_vm1, %v5438_v48, %v13171_v25  ;;  %2932 = vmatpush.msra.mxu0 %v13172_v47  ;;  %v13176_v36 = vunpack.i.l.bf16 %v13169_v12  ;;  %v13178_v25 = vld [vmem:[#allocation75_spill] sm:$0xff]  ;;  %v13182_v45 = vunpack.i.h.bf16 %v13005_v28  ;;  %v13183_v12 = vld [vmem:[#allocation42_spill] sm:$0xff] }
 0x401   : > { %2771 = vmatpush.msrb.mxu1 %v788_v32  ;;  %2976 = vmatpush.msrb.mxu3 %v1492_v16  ;;  %v1974_v59 = vsel %vm1971_vm9, %v13174_v11, %v13173_v41  ;;  %v13179_v16 = vunpack.i.h.bf16 %v13178_v25  ;;  %v13184_v47 = vunpack.i.h.bf16 %v13183_v12  ;;  %v5408_v11 = vunpack.i.l.bf16 %v13177_v55 }
 0x402   : > { %v787_v49 = vsel %vm784_vm4, %v13176_v36, %v13175_v37  ;;  %2734 = vmatpush.msrb.mxu2 %v1974_v59  ;;  %2933 = vmatpush.msra.mxu0 %v13181_v29  ;;  %v13185_v59 = vunpack.i.l.bf16 %v13178_v25  ;;  %v13187_v36 = vld [vmem:[#allocation120_spill] sm:$0xff]  ;;  %v13191_v25 = vld [vmem:[#allocation69_spill] sm:$0xff] }
 0x403   : > { %2772 = vmatpush.msrb.mxu1 %v787_v49  ;;  %v1460_v10 = vsel %vm13180_vm14, %v12334_v62, %v13179_v16  ;;  %v755_v41 = vsel %vm751_vm5, %v13184_v47, %v13182_v45  ;;  %v13188_v16 = vunpack.i.l.bf16 %v13005_v28  ;;  %v13190_v45 = vld [vmem:[#allocation142_spill] sm:$0xff]  ;;  %v13192_v47 = vunpack.i.h.bf16 %v13191_v25  ;;  %vm13200_vm14 = vmmov %vm13193_vm13 }
 0x404   : > { %2977 = vmatpush.msrb.mxu3 %v1460_v10  ;;  %2735 = vmatpush.msrb.mxu2 %v788_v32  ;;  %v1459_v37 = vsel %vm13186_vm8, %v12332_v35, %v13185_v59  ;;  %v13189_v10 = vunpack.i.l.bf16 %v13183_v12  ;;  %v5399_v32 = vunpack.i.h.bf16 %v13190_v45  ;;  %v13195_v35 = vld [vmem:[#allocation114_spill] sm:$0xff]  ;;  %v13196_v28 = vunpack.i.h.bf16 %v13014_v40  ;;  %v13197_v12 = vld [vmem:[#allocation37_spill] sm:$0xff] }
 0x405   : > { %2773 = vmatpush.msrb.mxu1 %v755_v41  ;;  %2934 = vmatpush.msra.mxu0 %v13187_v36  ;;  %v1427_v59 = vsel %vm13193_vm13, %v12333_v24, %v13192_v47  ;;  %v13194_v36 = vld [vmem:[#allocation81_spill] sm:$0xff]  ;;  %v5398_v24 = vunpack.i.l.bf16 %v13190_v45  ;;  %v13203_v62 = vunpack.i.l.bf16 %v13197_v12  ;;  %vm13206_vm8 = vcmp.lt.s32.totalorder %v7054_v20, 127 }
 0x406   : > { %2978 = vmatpush.msrb.mxu3 %v1459_v37  ;;  %v754_v29 = vsel %vm751_vm5, %v13189_v10, %v13188_v16  ;;  %2736 = vmatpush.msrb.mxu2 %v787_v49  ;;  %v12335_v37 = vunpack.i.h.bf16 %v13194_v36  ;;  %v13198_v16 = vunpack.i.h.bf16 %v13197_v12  ;;  %v13199_v10 = vunpack.i.l.bf16 %v13191_v25  ;;  %v13204_v25 = vld [vmem:[#allocation74_spill] sm:$0xff] }
 0x407   : > { %2774 = vmatpush.msrb.mxu1 %v754_v29  ;;  %2935 = vmatpush.msra.mxu0 %v13195_v35  ;;  %v13201_v35 = vld [vmem:[#allocation115_spill] sm:$0xff]  ;;  %vm13210_vm13 = vcmp.lt.s32.totalorder %v7054_v20, 66 }
 0x408   : > { %2979 = vmatpush.msrb.mxu3 %v1427_v59  ;;  %v722_v49 = vsel %vm718_vm6, %v13198_v16, %v13196_v28  ;;  %2737 = vmatpush.msrb.mxu2 %v755_v41  ;;  %v1426_v47 = vsel %vm13200_vm14, %v5408_v11, %v13199_v10  ;;  %v13202_v59 = vunpack.i.l.bf16 %v13014_v40  ;;  %v13205_v28 = vunpack.i.h.bf16 %v13204_v25  ;;  %v13208_v40 = vld [vmem:[#allocation30_spill] sm:$0xff]  ;;  %vm13213_vm14 = vmmov %vm13206_vm8 }
 0x409   : > { %2775 = vmatpush.msrb.mxu1 %v722_v49  ;;  %2936 = vmatpush.msra.mxu0 %v13201_v35  ;;  %v5183_v10 = vunpack.i.l.bf16 %v13194_v36  ;;  %v13207_v35 = vld [vmem:[#allocation105_spill] sm:$0xff]  ;;  %v13209_v12 = vunpack.i.h.bf16 %v13208_v40 }
 0x40a   : > { %2980 = vmatpush.msrb.mxu3 %v1426_v47  ;;  %v721_v41 = vsel %vm718_vm6, %v13203_v62, %v13202_v59  ;;  %2738 = vmatpush.msrb.mxu2 %v754_v29  ;;  %v1394_v16 = vsel %vm13206_vm8, %v5399_v32, %v13205_v28  ;;  %v13211_v29 = vld [vmem:[#allocation76_spill] sm:$0xff]  ;;  %v6446_v59 = vmov 3   ;;  %v13212_v28 = vunpack.i.l.bf16 %v13204_v25  ;;  %vm13216_vm8 = vmmov %vm13210_vm13 }
 0x40b   : > { %2776 = vmatpush.msrb.mxu1 %v721_v41  ;;  %2937 = vmatpush.msra.mxu0 %v13207_v35  ;;  %v689_v62 = vsel %vm13210_vm13, %v13209_v12, %v12335_v37  ;;  %v12336_v47 = vunpack.i.h.bf16 %v13211_v29  ;;  %v13214_v35 = vld [vmem:[#allocation106_spill] sm:$0xff]  ;;  %v5173_v12 = vunpack.i.l.bf16 %v13211_v29  ;;  %vm13224_vm13 = vcmp.lt.s32.totalorder %v7054_v20, 67 }
 0x40c   : > { %2981 = vmatpush.msrb.mxu3 %v1394_v16  ;;  %2739 = vmatpush.msrb.mxu2 %v722_v49  ;;  %v1393_v16 = vsel %vm13213_vm14, %v5398_v24, %v13212_v28  ;;  %v13215_v49 = vunpack.i.l.bf16 %v13208_v40  ;;  %v13219_v28 = vunpack.i.h.bf16 %v8423_v5  ;;  %v13222_v40 = vld [vmem:[#allocation36_spill] sm:$0xff]  ;;  %vm13228_vm14 = vmmov %vm13224_vm13 }
 0x40d   : > { %2777 = vmatpush.msrb.mxu1 %v689_v62  ;;  %5781 = vset.pattern.permute.xlu2 %v6446_v59  ;;  %v13217_v62 = vld [vmem:[#allocation110_spill] sm:$0xff]  ;;  %v13218_v59 = vunpack.i.h.bf16 %v8562_v46  ;;  %v13223_v37 = vunpack.i.h.bf16 %v13222_v40  ;;  %v13226_v46 = vld [vmem:[#allocation44_spill] sm:$0xff] }
 0x40e   : > { %2938 = vmatpush.msra.mxu0 %v13214_v35  ;;  %2982 = vmatpush.msrb.mxu3 %v1393_v16  ;;  %v688_v25 = vsel %vm13216_vm8, %v13215_v49, %v5183_v10  ;;  %v13220_v35 = vld [vmem:[#allocation83_spill] sm:$0xff]  ;;  %vm13233_vm8 = vcmp.lt.s32.totalorder %v7054_v20, 68 }
 0x40f   : > { %3058 = vperm.xlu2 %5781, %v9459_v23   ;;  %2740 = vmatpush.msrb.mxu2 %v721_v41  ;;  %v1918_v16 = vsel %vm1914_vm11, %v13219_v28, %v13218_v59  ;;  %v5164_v23 = vunpack.i.h.bf16 %v13220_v35  ;;  %v13221_v41 = vld [vmem:[#allocation40_spill] sm:$0xff]  ;;  %v656_v49 = vsel %vm13224_vm13, %v13223_v37, %v12336_v47  ;;  %v5163_v5 = vunpack.i.l.bf16 %v13220_v35  ;;  %v13229_v28 = vld [vmem:[#allocation107_spill] sm:$0xff]  ;;  %v13230_v37 = vld [vmem:[#allocation70_spill] sm:$0xff] }
 0x410   : > { %2778 = vmatpush.msrb.mxu1 %v688_v25  ;;  %2939 = vmatpush.msra.mxu0 %v13217_v62  ;;  %v13225_v25 = vld [vmem:[#allocation111_spill] sm:$0xff]  ;;  %v13227_v62 = vunpack.i.l.bf16 %v13222_v40  ;;  %v9750_v47 = vld [vmem:[#allocation7 + $0x18] sm:$0xff]  ;;  %vm13236_vm13 = vmmov %vm13233_vm8 }
 0x411   : > { %2983 = vmatpush.msrb.mxu3 %v13221_v41  ;;  %2741 = vmatpush.msrb.mxu2 %v1918_v16  ;;  %v5154_v16 = vunpack.i.h.bf16 %v13230_v37  ;;  %v13234_v40 = vld [vmem:[#allocation108_spill] sm:$0xff] }
 0x412   : > { %2779 = vmatpush.msrb.mxu1 %v656_v49  ;;  %2940 = vmatpush.msra.mxu0 %v13225_v25  ;;  %v655_v59 = vsel %vm13228_vm14, %v13227_v62, %v5173_v12  ;;  %v13231_v49 = vld [vmem:[#allocation31_spill] sm:$0xff]  ;;  %v5153_v62 = vunpack.i.l.bf16 %v13230_v37  ;;  %vm13237_vm14 = vcmask 130048  }
 0x413   : > { %2984 = vmatpush.msrb.mxu3 %v13226_v46  ;;  %2742 = vmatpush.msrb.mxu2 %v8791_v58  ;;  %v13232_v25 = vunpack.i.h.bf16 %v13231_v49  ;;  %v6228_v37 = vld [vmem:[#allocation7 + $0x10] sm:$0xff] }
 0x414   : > { %2780 = vmatpush.msrb.mxu1 %v655_v59  ;;  %2941 = vmatpush.msra.mxu0 %v13229_v28  ;;  %v13238_v28 = vunpack.i.h.bf16 %v7950_v14 }
 0x415   : > { %2743 = vmatpush.msrb.mxu2 %v8521_v6  ;;  %v623_v58 = vsel %vm13233_vm8, %v13232_v25, %v5164_v23  ;;  %2705 = vmatmul.f32.vlgmr.msra.gmra.mxu1 %v9750_v47  ;;  %v13235_v6 = vunpack.i.l.bf16 %v13231_v49  ;;  %vm13239_vm8 = vcmp.lt.s32.totalorder %v7054_v20, 106  ;;  %v13240_v25 = vld [vmem:[#allocation100_spill] sm:$0xff] }
 0x416   : > { %2781 = vmatpush.msrb.mxu1 %v623_v58  ;;  %2942 = vmatpush.msra.mxu0 %v13234_v40  ;;  %v13241_v49 = vld [vmem:[#allocation28_spill] sm:$0xff] }
 0x417   : > { %2744 = vmatpush.msrb.mxu2 %v8529_v13  ;;  %v622_v59 = vsel %vm13236_vm13, %v13235_v6, %v5163_v5  ;;  %4736 = vmatmul.msk.f32.vlgmr.msrb.gmra.mxu0 %vm13237_vm14, %v9171_v17  ;;  %v1586_v13 = vsel %vm13239_vm8, %v13238_v28, %v5499_v8  ;;  %v13242_v58 = vunpack.i.h.bf16 %v13241_v49  ;;  %vm13243_vm13 = vcmp.lt.s32.totalorder %v7054_v20, 69  ;;  %vm13245_vm14 = vmmov %vm13239_vm8  ;;  %v13246_v8 = vld [vmem:[#allocation101_spill] sm:$0xff] }
 0x418   : > { %2782 = vmatpush.msrb.mxu1 %v622_v59  ;;  %2745 = vmatmul.f32.vlgmr.msrb.gmra.mxu2 %v9226_v30  ;;  %v13244_v6 = vunpack.i.l.bf16 %v7950_v14  ;;  %v13247_v28 = vunpack.i.l.bf16 %v13241_v49  ;;  %vm13248_vm8 = vmmov %vm13243_vm13  ;;  %v13249_v14 = vunpack.i.h.bf16 %v12983_v22  ;;  %v13265_v49 = vld [vmem:[#allocation91_spill] sm:$0xff] }
 0x419   : > { %2829 = vmatpush.msra.mxu2 %v1586_v13  ;;  %2943 = vmatpush.msra.mxu0 %v13240_v25  ;;  %v590_v40 = vsel %vm13243_vm13, %v13242_v58, %v5154_v16  ;;  %vm13250_vm13 = vcmp.lt.s32.totalorder %v7054_v20, 107  ;;  %v13266_v58 = vunpack.i.h.bf16 %v13162_v4 }
 0x41a   : > { %2783 = vmatpush.msrb.mxu1 %v590_v40  ;;  %v1585_v59 = vsel %vm13245_vm14, %v13244_v6, %v5498_v2  ;;  %v589_v13 = vsel %vm13248_vm8, %v13247_v28, %v5153_v62  ;;  %v1553_v1 = vsel %vm13250_vm13, %v13249_v14, %v5479_v43  ;;  %v13251_v2 = vunpack.i.l.bf16 %v12983_v22  ;;  %vm13252_vm14 = vmmov %vm13250_vm13  ;;  %2985 = vmatmul.f32.vlgmr.msrb.gmra.mxu3 %v9750_v47  ;;  %v13274_v28 = vld [vmem:[#allocation29_spill] sm:$0xff] }
 0x41b   : > { %2830 = vmatpush.msra.mxu2 %v1585_v59  ;;  %2944 = vmatpush.msra.mxu0 %v13246_v8  ;;  %vm13254_vm8 = vcmp.lt.s32.totalorder %v7054_v20, 108  ;;  %v13255_v22 = vunpack.i.l.bf16 %v12996_v38  ;;  %v13259_v43 = vunpack.i.h.bf16 %v13144_v39  ;;  %v13267_v40 = vunpack.i.h.bf16 %v13043_v9  ;;  %v13269_v59 = vld [vmem:[#allocation34_spill] sm:$0xff]  ;;  %v13270_v39 = vld [vmem:[#allocation92_spill] sm:$0xff] }
 0x41c   : > { %2784 = vmatpush.msrb.mxu1 %v589_v13  ;;  %v1552_v25 = vsel %vm13252_vm14, %v13251_v2, %v5478_v19  ;;  %vm13256_vm13 = vmmov %vm13254_vm8  ;;  %v13261_v19 = vld [vmem:[#allocation178_spill] sm:$0xff]  ;;  %vm13268_vm14 = vcmp.lt.s32.totalorder %v7054_v20, 125  ;;  %v13275_v13 = vld [vmem:[#allocation172_spill] sm:$0xff]  ;;  %v13277_v2 = vunpack.i.h.bf16 %v13177_v55 }
 0x41d   : > { %3009 = vmatpush.msrb.mxu0 %v8950_v3  ;;  %2831 = vmatpush.msra.mxu2 %v1553_v1  ;;  %v9807_v3 = vld [vmem:[#allocation7] sm:$0xff]  ;;  %v1454_v6 = vsel %vm13268_vm14, %v13267_v40, %v13266_v58  ;;  %v5559_v14 = vunpack.i.h.bf16 %v13275_v13  ;;  %v13276_v1 = vld [vmem:[#allocation95_spill] sm:$0xff]  ;;  %v13289_v55 = vld [vmem:[#allocation170_spill] sm:$0xff] }
 0x41e   : > { %2849 = vmatpush.msra.mxu1 %v8443_v52  ;;  %v13253_v52 = vunpack.i.h.bf16 %v12996_v38  ;;  %v13262_v38 = vld [vmem:[#allocation48_spill] sm:$0xff]  ;;  %v13297_v58 = vld [vmem:[#allocation185_spill] sm:$0xff]  ;;  %v13298_v40 = vld [vmem:[#allocation166_spill] sm:$0xff] }
 0x41f   : > { %3010 = vmatpush.msrb.mxu0 %v8956_v0  ;;  %2785 = vmatmul.f32.vlgmr.msrb.gmra.mxu1 %v9807_v3  ;;  %v13299_v45 = vunpack.i.h.bf16 %v13298_v40 }
 0x420   : > { %2832 = vmatpush.msra.mxu2 %v1552_v25  ;;  %2850 = vmatpush.msra.mxu1 %v8447_v42  ;;  %v1520_v0 = vsel %vm13254_vm8, %v13253_v52, %v5459_v51  ;;  %v1519_v42 = vsel %vm13256_vm13, %v13255_v22, %v5458_v34  ;;  %v1486_v51 = vsel %vm1485_vm1, %v13263_v27, %v5438_v48  ;;  %v13264_v34 = vld [vmem:[#allocation179_spill] sm:$0xff]  ;;  %v13272_v48 = vunpack.i.l.bf16 %v13043_v9  ;;  %vm13273_vm8 = vmmov %vm13268_vm14 }
 0x421   : > { %3011 = vmatpush.msrb.mxu0 %v9026_v50  ;;  %v13257_v50 = vld [vmem:[#allocation182_spill] sm:$0xff]  ;;  %v13278_v25 = vunpack.i.h.bf16 %v13065_v61  ;;  %vm13279_vm13 = vcmp.lt.s32.totalorder %v7054_v20, 126  ;;  %v5558_v9 = vunpack.i.l.bf16 %v13275_v13  ;;  %v13282_v22 = vunpack.i.l.bf16 %v13065_v61  ;;  %v13292_v27 = vld [vmem:[#allocation99_spill] sm:$0xff]  ;;  %v13383_v13 = vld [vmem:[#allocation161_spill] sm:$0xff] }
 0x422   : > { %2833 = vmatpush.msra.mxu2 %v1520_v0  ;;  %2851 = vmatpush.msra.mxu1 %v8453_v53  ;;  %v13260_v53 = vunpack.i.h.bf16 %v13017_v7  ;;  %v13271_v7 = vunpack.i.l.bf16 %v13162_v4  ;;  %v13280_v4 = vld [vmem:[#allocation33_spill] sm:$0xff]  ;;  %vm13283_vm14 = vmmov %vm13279_vm13  ;;  %v13290_v61 = vunpack.i.h.bf16 %v13289_v55 }
 0x423   : > { %3012 = vmatpush.msrb.mxu0 %v9040_v21  ;;  %v1421_v52 = vsel %vm13279_vm13, %v13278_v25, %v13277_v2  ;;  %v13281_v0 = vld [vmem:[#allocation97_spill] sm:$0xff]  ;;  %vm13291_vm13 = vcmp.lt.s32.totalorder %v7054_v20, 103  ;;  %v13309_v25 = vunpack.i.h.bf16 %v13136_v26 }
 0x424   : > { %2834 = vmatpush.msra.mxu2 %v1519_v42  ;;  %2852 = vmatpush.msra.mxu1 %v13257_v50  ;;  %v1487_v21 = vsel %vm1485_vm1, %v13260_v53, %v13259_v43  ;;  %v1453_v8 = vsel %vm13273_vm8, %v13272_v48, %v13271_v7  ;;  %v1420_v42 = vsel %vm13283_vm14, %v13282_v22, %v5408_v11  ;;  %v13284_v50 = vld [vmem:[#allocation173_spill] sm:$0xff]  ;;  %v13286_v53 = vld [vmem:[#allocation98_spill] sm:$0xff]  ;;  %vm13288_vm8 = vcmp.lt.s32.totalorder %v7054_v20, 127 }
 0x425   : > { %3013 = vmatpush.msrb.mxu0 %v13258_v44  ;;  %v13285_v44 = vld [vmem:[#allocation168_spill] sm:$0xff]  ;;  %v1685_v11 = vsel %vm13291_vm13, %v13290_v61, %v5559_v14  ;;  %vm13294_vm14 = vmmov %vm13288_vm8  ;;  %v13304_v7 = vunpack.i.l.bf16 %v13298_v40  ;;  %v13321_v61 = vld [vmem:[#allocation143_spill] sm:$0xff] }
 0x426   : > { %2835 = vmatpush.msra.mxu2 %v1487_v21  ;;  %2853 = vmatpush.msra.mxu1 %v13261_v19  ;;  %v5539_v43 = vunpack.i.h.bf16 %v13285_v44  ;;  %v13287_v21 = vunpack.i.h.bf16 %v13095_v15  ;;  %v13335_v40 = vld [vmem:[#allocation132_spill] sm:$0xff] }
 0x427   : > { %3014 = vmatpush.msrb.mxu0 %v13262_v38  ;;  %v5538_v38 = vunpack.i.l.bf16 %v13285_v44  ;;  %v2506_v44 = vpop.f32.mrf.mxu0 }
 0x428   : > { %2836 = vmatpush.msra.mxu2 %v1486_v51  ;;  %2854 = vmatpush.msra.mxu1 %v13264_v34  ;;  %v1388_v19 = vsel %vm13288_vm8, %v13287_v21, %v5399_v32  ;;  %v13293_v51 = vunpack.i.l.bf16 %v13095_v15  ;;  %v13295_v34 = vunpack.i.l.bf16 %v13289_v55  ;;  %vm13296_vm8 = vmmov %vm13291_vm13  ;;  %vm13300_vm13 = vcmp.lt.s32.totalorder %v7054_v20, 104  ;;  %v13318_v21 = vld [vmem:[#allocation54_spill] sm:$0xff] }
 0x429   : > { %3015 = vmatpush.msrb.mxu0 %v13265_v49  ;;  %v1652_v15 = vsel %vm13300_vm13, %v13299_v45, %v5539_v43 }
 0x42a   : > { %2837 = vmatpush.msra.mxu2 %v1454_v6  ;;  %2855 = vmatpush.msra.mxu1 %v13269_v59  ;;  %v1387_v32 = vsel %vm13294_vm14, %v13293_v51, %v5398_v24  ;;  %v1684_v49 = vsel %vm13296_vm8, %v13295_v34, %v5558_v9  ;;  %v13301_v6 = vld [vmem:[#allocation39_spill] sm:$0xff]  ;;  %vm13305_vm14 = vmmov %vm13300_vm13  ;;  %vm13310_vm8 = vcmp.lt.s32.totalorder %v7054_v20, 47  ;;  %vm13314_vm13 = vcmp.lt.s32.totalorder %v7054_v20, 105  ;;  %v13328_v34 = vld [vmem:[#allocation86_spill] sm:$0xff] }
 0x42b   : > { %3016 = vmatpush.msrb.mxu0 %v13270_v39  ;;  %v13302_v24 = vld [vmem:[#allocation163_spill] sm:$0xff]  ;;  %v13303_v39 = vld [vmem:[#allocation186_spill] sm:$0xff]  ;;  %v1651_v48 = vsel %vm13305_vm14, %v13304_v7, %v5538_v38  ;;  %vm13317_vm14 = vmmov %vm13310_vm8 }
 0x42c   : > { %2838 = vmatpush.msra.mxu2 %v1453_v8  ;;  %2856 = vmatpush.msra.mxu1 %v13274_v28  ;;  %v5519_v59 = vunpack.i.h.bf16 %v13302_v24  ;;  %v13306_v8 = vld [vmem:[#allocation43_spill] sm:$0xff]  ;;  %v5518_v28 = vunpack.i.l.bf16 %v13302_v24  ;;  %v13340_v7 = vld [vmem:[#allocation138_spill] sm:$0xff] }
 0x42d   : > { %3017 = vmatpush.msrb.mxu0 %v13276_v1  ;;  %v13307_v1 = vld [vmem:[#allocation85_spill] sm:$0xff]  ;;  %v13324_v51 = vld [vmem:[#allocation151_spill] sm:$0xff] }
 0x42e   : > { %2839 = vmatpush.msra.mxu2 %v1421_v52  ;;  %2857 = vmatpush.msra.mxu1 %v13280_v4  ;;  %v13308_v2 = vunpack.i.h.bf16 %v13307_v1  ;;  %v13311_v4 = vld [vmem:[#allocation71_spill] sm:$0xff] }
 0x42f   : > { %3018 = vmatpush.msrb.mxu0 %v13281_v0  ;;  %v13312_v0 = vld [vmem:[#allocation169_spill] sm:$0xff] }
 0x430   : > { %2840 = vmatpush.msra.mxu2 %v1420_v42  ;;  %2858 = vmatpush.msra.mxu1 %v13284_v50  ;;  %v819_v52 = vsel %vm13310_vm8, %v13309_v25, %v13308_v2  ;;  %v13313_v22 = vunpack.i.h.bf16 %v13312_v0  ;;  %v13316_v50 = vunpack.i.l.bf16 %v13136_v26  ;;  %vm13320_vm8 = vmmov %vm13314_vm13  ;;  %v9954_v26 = vld [vmem:[#allocation7 + $0x20] sm:$0xff] }
 0x431   : > { %3019 = vmatpush.msrb.mxu0 %v13286_v53 }
 0x432   : > { %2841 = vmatpush.msra.mxu2 %v1388_v19  ;;  %2859 = vmatpush.msra.mxu1 %v1685_v11  ;;  %v1619_v42 = vsel %vm13314_vm13, %v13313_v22, %v5519_v59  ;;  %v13319_v19 = vunpack.i.l.bf16 %v13312_v0  ;;  %v13322_v11 = vld [vmem:[#allocation144_spill] sm:$0xff]  ;;  %vm13331_vm13 = vcmp.lt.s32.totalorder %v7054_v20, 66 }
 0x433   : > { %3020 = vmatpush.msrb.mxu0 %v13292_v27  ;;  %v13323_v27 = vld [vmem:[#allocation150_spill] sm:$0xff]  ;;  %v13351_v0 = vld [vmem:[#allocation80_spill] sm:$0xff] }
 0x434   : > { %2842 = vmatpush.msra.mxu2 %v1387_v32  ;;  %2860 = vmatpush.msra.mxu1 %v1684_v49  ;;  %v1618_v55 = vsel %vm13320_vm8, %v13319_v19, %v5518_v28  ;;  %v13325_v32 = vld [vmem:[#allocation145_spill] sm:$0xff]  ;;  %v13330_v49 = vunpack.i.h.bf16 %v13194_v36  ;;  %vm13339_vm8 = vcmp.lt.s32.totalorder %v7054_v20, 67  ;;  %v13352_v22 = vunpack.i.h.bf16 %v13351_v0  ;;  %v13362_v19 = vld [vmem:[#allocation60_spill] sm:$0xff] }
 0x435   : > { %3021 = vmatpush.msrb.mxu0 %v13297_v58  ;;  %v13332_v58 = vld [vmem:[#allocation131_spill] sm:$0xff] }
 0x436   : > { %2843 = vmatpush.msra.mxu2 %v13301_v6  ;;  %2861 = vmatpush.msra.mxu1 %v1652_v15  ;;  %v13338_v15 = vunpack.i.h.bf16 %v13211_v29 }
 0x437   : > { %3022 = vmatpush.msrb.mxu0 %v13303_v39 }
 0x438   : > { %2844 = vmatpush.msra.mxu2 %v13306_v8  ;;  %2862 = vmatpush.msra.mxu1 %v1651_v48 }
 0x439   : > { %2845 = vmatmul.f32.vlgmr.msra.gmra.mxu2 %v9750_v47  ;;  %3023 = vmatpush.msrb.mxu0 %v13311_v4  ;;  %v13315_v47 = vunpack.i.l.bf16 %v13307_v1  ;;  %v13344_v1 = vld [vmem:[#allocation73_spill] sm:$0xff] }
 0x43a   : > { %2909 = vmatpush.msrb.mxu2 %v819_v52  ;;  %2863 = vmatpush.msra.mxu1 %v1619_v42  ;;  %v13345_v2 = vunpack.i.h.bf16 %v13344_v1  ;;  %v13347_v52 = vld [vmem:[#allocation133_spill] sm:$0xff]  ;;  %v13348_v4 = vunpack.i.l.bf16 %v13344_v1  ;;  %v13354_v42 = vld [vmem:[#allocation123_spill] sm:$0xff] }
 0x43b   : > { %v818_v53 = vsel %vm13317_vm14, %v13316_v50, %v13315_v47  ;;  %3024 = vmatpush.msrb.mxu0 %v13318_v21  ;;  %vm13334_vm14 = vmmov %vm13331_vm13  ;;  %v13355_v47 = vunpack.i.l.bf16 %v13351_v0  ;;  %v13358_v50 = vld [vmem:[#allocation183_spill] sm:$0xff]  ;;  %v13361_v21 = vld [vmem:[#allocation129_spill] sm:$0xff] }
 0x43c   : > { %2910 = vmatpush.msrb.mxu2 %v818_v53  ;;  %2864 = vmatpush.msra.mxu1 %v1618_v55  ;;  %v13359_v53 = vld [vmem:[#allocation128_spill] sm:$0xff] }
 0x43d   : > { %2945 = vmatmul.f32.vlgmr.msra.gmra.mxu0 %v9007_v56  ;;  %2865 = vmatmul.f32.vlgmr.msra.gmra.mxu1 %v9954_v26  ;;  %v13326_v56 = vld [vmem:[#allocation63_spill] sm:$0xff]  ;;  %v13363_v55 = vld [vmem:[#allocation176_spill] sm:$0xff] }
 0x43e   : > { %2949 = vmatpush.msrb.mxu1 %v13321_v61  ;;  %2911 = vmatpush.msrb.mxu2 %v9185_v63  ;;  %v13327_v63 = vld [vmem:[#allocation146_spill] sm:$0xff]  ;;  %v13365_v61 = vld [vmem:[#allocation177_spill] sm:$0xff] }
 0x440   : > { %2950 = vmatpush.msrb.mxu1 %v13322_v11  ;;  %2912 = vmatpush.msrb.mxu2 %v9218_v33  ;;  %v13329_v33 = vunpack.i.h.bf16 %v13328_v34  ;;  %v13366_v11 = vld [vmem:[#allocation180_spill] sm:$0xff] }
 0x442   : > { %2951 = vmatpush.msrb.mxu1 %v13323_v27  ;;  %2913 = vmatpush.msrb.mxu2 %v9250_v18  ;;  %v687_v18 = vsel %vm13331_vm13, %v13330_v49, %v13329_v33  ;;  %vm13342_vm13 = vmmov %vm13339_vm8  ;;  %v13367_v27 = vld [vmem:[#allocation181_spill] sm:$0xff] }
 0x444   : > { %2952 = vmatpush.msrb.mxu1 %v13324_v51  ;;  %2914 = vmatpush.msrb.mxu2 %v9280_v31  ;;  %v13333_v31 = vunpack.i.l.bf16 %v13328_v34  ;;  %v13368_v51 = vld [vmem:[#allocation174_spill] sm:$0xff] }
 0x445   : > { %3025 = vmatmul.f32.vlgmr.msrb.gmra.mxu0 %v9226_v30 }
 0x446   : > { %2953 = vmatpush.msrb.mxu1 %v13325_v32  ;;  %2915 = vmatpush.msrb.mxu2 %v13326_v56  ;;  %v686_v30 = vsel %vm13334_vm14, %v5183_v10, %v13333_v31  ;;  %v13343_v10 = vld [vmem:[#allocation139_spill] sm:$0xff]  ;;  %vm13346_vm14 = vcmp.lt.s32.totalorder %v7054_v20, 68  ;;  %v13371_v32 = vld [vmem:[#allocation32_spill] sm:$0xff]  ;;  %v13372_v56 = vld [vmem:[#allocation38_spill] sm:$0xff] }
 0x447   : > { %v621_v25 = vsel %vm13346_vm14, %v5164_v23, %v13345_v2 }
 0x448   : > { %2954 = vmatpush.msrb.mxu1 %v13327_v63  ;;  %2916 = vmatpush.msrb.mxu2 %v9337_v54  ;;  %v13336_v54 = vld [vmem:[#allocation78_spill] sm:$0xff]  ;;  %v13373_v63 = vld [vmem:[#allocation171_spill] sm:$0xff] }
 0x449   : > { %v13337_v45 = vunpack.i.h.bf16 %v13336_v54  ;;  %v13341_v48 = vunpack.i.l.bf16 %v13336_v54  ;;  %v13374_v34 = vunpack.i.h.bf16 %v13373_v63  ;;  %v13376_v49 = vunpack.i.l.bf16 %v13373_v63 }
 0x44a   : > { %2955 = vmatpush.msrb.mxu1 %v13332_v58  ;;  %2917 = vmatpush.msrb.mxu2 %v687_v18  ;;  %v13378_v18 = vld [vmem:[#allocation165_spill] sm:$0xff]  ;;  %v13386_v54 = vunpack.i.l.bf16 %v13383_v13 }
 0x44b   : > { %v654_v39 = vsel %vm13339_vm8, %v13338_v15, %v13337_v45  ;;  %v653_v36 = vsel %vm13342_vm13, %v5173_v12, %v13341_v48  ;;  %vm13349_vm8 = vmmov %vm13346_vm14  ;;  %v13350_v12 = vld [vmem:[#allocation134_spill] sm:$0xff]  ;;  %vm13353_vm13 = vcmp.lt.s32.totalorder %v7054_v20, 69  ;;  %v13379_v58 = vunpack.i.h.bf16 %v13378_v18  ;;  %v2526_v45 = vpop.f32.mrf.mxu1  ;;  %v2586_v48 = vpop.f32.mrf.mxu0 }
 0x44c   : > { %2956 = vmatpush.msrb.mxu1 %v13335_v40  ;;  %2918 = vmatpush.msrb.mxu2 %v686_v30  ;;  %v620_v29 = vsel %vm13349_vm8, %v5163_v5, %v13348_v4  ;;  %v588_v23 = vsel %vm13353_vm13, %v5154_v16, %v13352_v22  ;;  %vm13356_vm14 = vmmov %vm13353_vm13  ;;  %v13357_v5 = vld [vmem:[#allocation124_spill] sm:$0xff]  ;;  %vm13369_vm8 = vcmask 130048   ;;  %vm13375_vm13 = vcmp.lt.s32.totalorder %v7054_v20, 103 }
 0x44d   : > { %v587_v35 = vsel %vm13356_vm14, %v5153_v62, %v13355_v47  ;;  %v13360_v16 = vld [vmem:[#allocation184_spill] sm:$0xff]  ;;  %v1691_v33 = vsel %vm13375_vm13, %v5559_v14, %v13374_v34  ;;  %vm13377_vm14 = vmmov %vm13375_vm13  ;;  %v13381_v30 = vunpack.i.l.bf16 %v13378_v18  ;;  %v13384_v40 = vunpack.i.h.bf16 %v13383_v13 }
 0x44e   : > { %2957 = vmatpush.msrb.mxu1 %v13340_v7  ;;  %2919 = vmatpush.msrb.mxu2 %v654_v39  ;;  %v13364_v62 = vld [vmem:[#allocation56_spill] sm:$0xff]  ;;  %v2527_v15 = vadd.f32 %v2526_v45, %v2506_v44  ;;  %v2566_v39 = vpop.f32.mrf.mxu3 }
 0x450   : > { %2958 = vmatpush.msrb.mxu1 %v13343_v10  ;;  %2920 = vmatpush.msrb.mxu2 %v653_v36 }
 0x452   : > { %2959 = vmatpush.msrb.mxu1 %v13347_v52  ;;  %2921 = vmatpush.msrb.mxu2 %v621_v25 }
 0x453   : > { %v2606_v10 = vpop.f32.mrf.mxu1  ;;  %v2686_v24 = vpop.f32.mrf.mxu0 }
 0x454   : > { %2960 = vmatpush.msrb.mxu1 %v13350_v12  ;;  %2922 = vmatpush.msrb.mxu2 %v620_v29 }
 0x456   : > { %2961 = vmatpush.msrb.mxu1 %v13354_v42  ;;  %2923 = vmatpush.msrb.mxu2 %v588_v23  ;;  %v2646_v1 = vpop.f32.mrf.mxu3 }
 0x458   : > { %2962 = vmatpush.msrb.mxu1 %v13357_v5  ;;  %2924 = vmatpush.msrb.mxu2 %v587_v35 }
 0x459   : > { %2925 = vmatmul.f32.vlgmr.msrb.gmra.mxu2 %v9807_v3  ;;  %v13370_v3 = vld [vmem:[#allocation175_spill] sm:$0xff] }
 0x45a   : > { %2989 = vmatpush.msra.mxu2 %v13358_v50  ;;  %2963 = vmatpush.msrb.mxu1 %v13359_v53 }
 0x45c   : > { %2990 = vmatpush.msra.mxu2 %v13360_v16  ;;  %2964 = vmatpush.msrb.mxu1 %v13361_v21  ;;  %v10078_v0 = vpop.permute.xlu1 %3050  ;;  %v10087_v21 = vld [vmem:[%s13388_s1] sm:$0xf]  ;;  %s13400_s1 = smov 60  }
 0x45d   : > { %2965 = vmatmul.f32.vlgmr.msrb.gmra.mxu1 %v6228_v37 }
 0x45e   : > { %3043 = vmatpush.msra.mxu1 %v13362_v19  ;;  %2991 = vmatpush.msra.mxu2 %v13363_v55  ;;  %v2726_v22 = vpop.f32.mrf.mxu3  ;;  %v3070_v55 = vperm.slane %v10087_v21, 0 }
 0x460   : > { %3044 = vmatpush.msra.mxu1 %v13364_v62  ;;  %2992 = vmatpush.msra.mxu2 %v13365_v61  ;;  %v3071_v61 = vperm.slane %v10087_v21, 1 }
 0x462   : > { %2993 = vmatpush.msra.mxu2 %v13366_v11 }
 0x464   : > { %2994 = vmatpush.msra.mxu2 %v13367_v27 }
 0x465   : > { %4737 = vmatmul.msk.f32.vlgmr.msra.gmra.mxu1 %vm13369_vm8, %v9171_v17  ;;  %v1690_v17 = vsel %vm13377_vm14, %v5558_v9, %v13376_v49  ;;  %vm13380_vm8 = vcmp.lt.s32.totalorder %v7054_v20, 104  ;;  %vm13385_vm14 = vcmp.lt.s32.totalorder %v7054_v20, 105 }
 0x466   : > { %2995 = vmatpush.msra.mxu2 %v13368_v51  ;;  %v1658_v31 = vsel %vm13380_vm8, %v5539_v43, %v13379_v58  ;;  %vm13382_vm13 = vmmov %vm13380_vm8  ;;  %v1625_v9 = vsel %vm13385_vm14, %v5519_v59, %v13384_v40  ;;  %v2766_v5 = vpop.f32.mrf.mxu0  ;;  %v2806_v63 = vpop.f32.mrf.mxu3 }
 0x467   : > { %v1657_v14 = vsel %vm13382_vm13, %v5538_v38, %v13381_v30  ;;  %vm13387_vm8 = vmmov %vm13385_vm14  ;;  %v2546_v38 = vpop.f32.mrf.mxu2  ;;  %vm13428_vm13 = vcmp.lt.s32.totalorder %v7054_v20, 106  ;;  %vm13437_vm14 = vcmp.lt.s32.totalorder %v7054_v20, 107 }
 0x468   : > { %2996 = vmatpush.msra.mxu2 %v13370_v3  ;;  %v1624_v43 = vsel %vm13387_vm8, %v5518_v28, %v13386_v54  ;;  %v2547_v7 = vadd.f32 %v2546_v38, %v2527_v15  ;;  %vm13441_vm8 = vcmp.lt.s32.totalorder %v7054_v20, 108 }
 0x469   : > { %v10081_v42 = vpop.permute.xlu2 %3058 }
 0x46a   : > { %2997 = vmatpush.msra.mxu2 %v13371_v32  ;;  %v2567_v59 = vadd.f32 %v2566_v39, %v2547_v7 }
 0x46c   : > { %2998 = vmatpush.msra.mxu2 %v13372_v56  ;;  %v2587_v2 = vadd.f32 %v2586_v48, %v2567_v59 }
 0x46e   : > { %2999 = vmatpush.msra.mxu2 %v1691_v33  ;;  %v2607_v4 = vadd.f32 %v2606_v10, %v2587_v2 }
 0x46f   : > { %v2626_v36 = vpop.f32.mrf.mxu2 }
 0x470   : > { %3000 = vmatpush.msra.mxu2 %v1690_v17  ;;  %v2627_v12 = vadd.f32 %v2626_v36, %v2607_v4  ;;  %v3073_v4 = vperm.slane %v10087_v21, 3 }
 0x471   : > { %v2826_v32 = vpop.f32.mrf.mxu0 }
 0x472   : > { %3001 = vmatpush.msra.mxu2 %v1658_v31  ;;  %v3053_v23 = vmul.f32 %v10078_v0, %v2627_v12  ;;  %v2886_v31 = vpop.f32.mrf.mxu3 }
 0x474   : > { %3002 = vmatpush.msra.mxu2 %v1657_v14  ;;  %v3061_v53 = vadd.f32 %v10081_v42, %v3053_v23 }
 0x476   : > { %3003 = vmatpush.msra.mxu2 %v1625_v9  ;;  %v3065_v37 = vmax.f32 %v3061_v53, 0.0 }
 0x477   : > { %v2666_v25 = vpop.f32.mrf.mxu2 }
 0x478   : > { %3004 = vmatpush.msra.mxu2 %v1624_v43  ;;  %v2667_v52 = vadd.f32 %v2666_v25, %v2646_v1  ;;  %v10093_v27 = vmul.f32 %v3070_v55, %v3065_v37 }
 0x479   : > { %3005 = vmatmul.f32.vlgmr.msra.gmra.mxu2 %v9954_v26 }
 0x47a   : > { %v2687_v28 = vadd.f32 %v2686_v24, %v2667_v52  ;;  %v3072_v24 = vperm.slane %v10087_v21, 2 }
 0x492   : > { %v2706_v29 = vpop.f32.mrf.mxu1 }
 0x493   : > { %v2707_v26 = vadd.f32 %v2706_v29, %v2687_v28 }
 0x494   : > { %v2906_v33 = vpop.f32.mrf.mxu0 }
 0x495   : > { %v2727_v47 = vadd.f32 %v2726_v22, %v2707_v26 }
 0x49b   : > { %v2746_v35 = vpop.f32.mrf.mxu2 }
 0x49c   : > { %v2747_v50 = vadd.f32 %v2746_v35, %v2727_v47  ;;  %v2786_v56 = vpop.f32.mrf.mxu1 }
 0x49d   : > { %v2807_v34 = vadd.f32 %v2806_v63, %v2786_v56  ;;  %v2986_v44 = vpop.f32.mrf.mxu3 }
 0x49e   : > { %v2767_v16 = vadd.f32 %v2766_v5, %v2747_v50 }
 0x49f   : > { %v2827_v17 = vadd.f32 %v2826_v32, %v2807_v34 }
 0x4a0   : > { %v3054_v19 = vmul.f32 %v10078_v0, %v2767_v16 }
 0x4a2   : > { %v3062_v62 = vadd.f32 %v10081_v42, %v3054_v19 }
 0x4a4   : > { %v3066_v11 = vmax.f32 %v3062_v62, 0.0 }
 0x4a6   : > { %v10095_v51 = vmul.f32 %v3071_v61, %v3066_v11 }
 0x4a8   : > { %13389 = vst [vmem:[#allocation67_spill] sm:$0xff] %v10095_v51  ;;  %v10099_v3 = vpack.i.bf16 %v10095_v51, %v10093_v27 }
 0x4aa   : > { %5793 = vrot.lane.b32.xlu1 %v10099_v3, %s12339_s22  ;;  %5788 = vrot.lane.b32.xlu2 %v10099_v3, %s12340_s9  ;;  %s13393_s22 = smov 63   ;;  %s13394_s9 = smov 43  }
 0x4ab   : > { %5783 = vrot.lane.b32.xlu0 %v10099_v3, %s12341_s4  ;;  %s13395_s4 = smov 44  }
 0x4b2   : > { %5808 = vrot.lane.b32.xlu1 %v10099_v3, %s12342_s30  ;;  %5803 = vrot.lane.b32.xlu2 %v10099_v3, %s12343_s16  ;;  %s13396_s30 = smov 45   ;;  %s13397_s16 = smov 42  }
 0x4b3   : > { %5798 = vrot.lane.b32.xlu0 %v10099_v3, %s13390_s26 }
 0x4ba   : > { %5823 = vrot.lane.b32.xlu1 %v10099_v3, %s13391_s23  ;;  %5818 = vrot.lane.b32.xlu2 %v10099_v3, %s13392_s19  ;;  %v2866_v18 = vpop.f32.mrf.mxu1  ;;  %v2946_v30 = vpop.f32.mrf.mxu0 }
 0x4bb   : > { %5813 = vrot.lane.b32.xlu0 %v10099_v3, %s13393_s22 }
 0x4bc   : > { %v2846_v49 = vpop.f32.mrf.mxu2 }
 0x4bd   : > { %v2847_v58 = vadd.f32 %v2846_v49, %v2827_v17 }
 0x4bf   : > { %v2867_v13 = vadd.f32 %v2866_v18, %v2847_v58 }
 0x4c1   : > { %v2887_v54 = vadd.f32 %v2886_v31, %v2867_v13 }
 0x4c2   : > { %5838 = vrot.lane.b32.xlu1 %v10099_v3, %s13394_s9  ;;  %5833 = vrot.lane.b32.xlu2 %v10099_v3, %s13395_s4  ;;  %v3026_v39 = vpop.f32.mrf.mxu0 }
 0x4c3   : > { %5828 = vrot.lane.b32.xlu0 %v10099_v3, %s13396_s30  ;;  %v2907_v38 = vadd.f32 %v2906_v33, %v2887_v54 }
 0x4c5   : > { %v3055_v7 = vmul.f32 %v10078_v0, %v2907_v38 }
 0x4c7   : > { %v3063_v10 = vadd.f32 %v10081_v42, %v3055_v7 }
 0x4c9   : > { %v3067_v25 = vmax.f32 %v3063_v10, 0.0 }
 0x4ca   : > { %5853 = vrot.lane.b32.xlu1 %v10099_v3, %s12555_s15  ;;  %5848 = vrot.lane.b32.xlu2 %v10099_v3, %s12558_s5 }
 0x4cb   : > { %5843 = vrot.lane.b32.xlu0 %v10099_v3, %s13397_s16  ;;  %v10181_v12 = vmul.f32 %v3072_v24, %v3067_v25 }
 0x4cd   : > { %13413 = vst [vmem:[#allocation103_spill] sm:$0xff] %v10181_v12 }
 0x4d2   : > { %5868 = vrot.lane.b32.xlu1 %v10099_v3, %s12561_s11  ;;  %5863 = vrot.lane.b32.xlu2 %v10099_v3, %s12564_s29 }
 0x4d3   : > { %5858 = vrot.lane.b32.xlu0 %v10099_v3, %s12557_s12 }
 0x4da   : > { %5883 = vrot.lane.b32.xlu1 %v10099_v3, %s12567_s17  ;;  %5878 = vrot.lane.b32.xlu2 %v10099_v3, %s12572_s21  ;;  %v2966_v9 = vpop.f32.mrf.mxu1 }
 0x4db   : > { %5873 = vrot.lane.b32.xlu0 %v10099_v3, %s13398_s8 }
 0x4dc   : > { %v2926_v14 = vpop.f32.mrf.mxu2 }
 0x4dd   : > { %v2947_v40 = vadd.f32 %v2946_v30, %v2926_v14 }
 0x4df   : > { %v2967_v43 = vadd.f32 %v2966_v9, %v2947_v40 }
 0x4e1   : > { %v2987_v45 = vadd.f32 %v2986_v44, %v2967_v43 }
 0x4e2   : > { %5903 = vrot.lane.b32.xlu1 %v10099_v3, %s13399_s0  ;;  %5893 = vrot.lane.b32.xlu2 %v10099_v3, %s13400_s1  ;;  %v3046_v36 = vpop.f32.mrf.mxu1 }
 0x4e3   : > { %5888 = vrot.lane.b32.xlu0 %v10099_v3, %s12571_s10 }
 0x4ea   : > { %5918 = vrot.lane.b32.xlu1 %v10099_v3, %s13401_s2  ;;  %5908 = vrot.lane.b32.xlu2 %v10099_v3, %s13402_s3  ;;  %s13420_s3 = smov 65  }
 0x4eb   : > { %5898 = vrot.lane.b32.xlu0 %v10099_v3, %s13403_s25 }
 0x4f2   : > { %5933 = vrot.lane.b32.xlu1 %v10099_v3, %s13404_s27  ;;  %5923 = vrot.lane.b32.xlu2 %v10099_v3, %s13405_s14  ;;  %s13412_s27 = smov 82  }
 0x4f3   : > { %5913 = vrot.lane.b32.xlu0 %v10099_v3, %s13406_s24 }
 0x4fa   : > { %5948 = vrot.lane.b32.xlu1 %v10099_v3, %s13407_s13  ;;  %5938 = vrot.lane.b32.xlu2 %v10099_v3, %s13408_s7  ;;  %s13417_s7 = smov 68   ;;  %s13419_s13 = smov 87  }
 0x4fb   : > { %5928 = vrot.lane.b32.xlu0 %v10099_v3, %s13409_s28 }
 0x4fc   : > { %v3006_v15 = vpop.f32.mrf.mxu2 }
 0x4fd   : > { %v3007_v48 = vadd.f32 %v3006_v15, %v2987_v45 }
 0x4ff   : > { %v3027_v59 = vadd.f32 %v3026_v39, %v3007_v48 }
 0x501   : > { %v3047_v1 = vadd.f32 %v3046_v36, %v3027_v59 }
 0x502   : > { %5958 = vrot.lane.b32.xlu1 %v10099_v3, %s13410_s18  ;;  %5953 = vrot.lane.b32.xlu2 %v10099_v3, %s13411_s6  ;;  %s13415_s6 = smov 85   ;;  %s13416_s18 = smov 86  }
 0x503   : > { %v3056_v2 = vmul.f32 %v10078_v0, %v3047_v1  ;;  %5943 = vrot.lane.b32.xlu0 %v10099_v3, %s13412_s27  ;;  %s13418_s27 = smov 69  }
 0x504   : > { %v10179_v28 = vpop.permute.xlu2 %5788 }
 0x505   : > { %v3064_v52 = vadd.f32 %v10081_v42, %v3056_v2  ;;  %v12397_v46 = vunpack.i.h.bf16 %v10179_v28 }
 0x507   : > { %v3068_v29 = vmax.f32 %v3064_v52, 0.0 }
 0x509   : > { %v10183_v26 = vmul.f32 %v3073_v4, %v3068_v29 }
 0x50a   : > { %5963 = vrot.lane.b32.xlu1 %v10099_v3, %s13415_s6  ;;  %5968 = vrot.lane.b32.xlu2 %v10099_v3, %s13416_s18  ;;  %s13421_s18 = smov 103  }
 0x50b   : > { %13414 = vst [vmem:[#allocation65_spill] sm:$0xff] %v10183_v26  ;;  %v10187_v0 = vpack.i.bf16 %v10183_v26, %v10181_v12  ;;  %v6112_v30 = vpack.i.bf16 %v10183_v26, %v10093_v27 }
 0x50c   : > { %v10195_v22 = vpop.permute.xlu2 %5803 }
 0x50d   : > { %5988 = vrot.lane.b32.xlu0 %v10187_v0, %s13417_s7  ;;  %s13423_s7 = smov 64   ;;  %v12366_v24 = vunpack.i.h.bf16 %v10195_v22  ;;  %v12374_v52 = vunpack.i.l.bf16 %v10195_v22 }
 0x512   : > { %5983 = vrot.lane.b32.xlu1 %v10187_v0, %s13418_s27  ;;  %5973 = vrot.lane.b32.xlu2 %v10099_v3, %s13419_s13  ;;  %s13446_s27 = smov 81  }
 0x514   : > { %v10203_v23 = vpop.permute.xlu2 %5818 }
 0x515   : > { %6003 = vrot.lane.b32.xlu0 %v10187_v0, %s13420_s3  ;;  %s13422_s3 = smov 67  }
 0x51a   : > { %5998 = vrot.lane.b32.xlu1 %v10187_v0, %s13390_s26  ;;  %5978 = vrot.lane.b32.xlu2 %v10099_v3, %s13421_s18 }
 0x51c   : > { %v10211_v42 = vpop.permute.xlu1 %5793  ;;  %v10213_v47 = vpop.permute.xlu2 %5833 }
 0x51d   : > { %6018 = vrot.lane.b32.xlu0 %v10187_v0, %s13392_s19  ;;  %v10215_v35 = vpop.permute.xlu0 %5783  ;;  %v12398_v6 = vunpack.i.h.bf16 %v10211_v42 }
 0x522   : > { %6013 = vrot.lane.b32.xlu1 %v10187_v0, %s13393_s22  ;;  %5993 = vrot.lane.b32.xlu2 %v10187_v0, %s13422_s3  ;;  %s13461_s22 = smov 83  }
 0x524   : > { %v10223_v5 = vpop.permute.xlu1 %5808  ;;  %v10225_v50 = vpop.permute.xlu2 %5848 }
 0x525   : > { %6033 = vrot.lane.b32.xlu0 %v10187_v0, %s13395_s4  ;;  %v10227_v53 = vpop.permute.xlu0 %5798  ;;  %v12363_v1 = vunpack.i.h.bf16 %v10223_v5  ;;  %v12381_v2 = vunpack.i.l.bf16 %v10223_v5  ;;  %s13459_s4 = smov 84  }
 0x52a   : > { %6028 = vrot.lane.b32.xlu1 %v10187_v0, %s13396_s30  ;;  %6008 = vrot.lane.b32.xlu2 %v10187_v0, %s13423_s7 }
 0x52c   : > { %v10235_v16 = vpop.permute.xlu1 %5823  ;;  %v10237_v21 = vpop.permute.xlu2 %5863 }
 0x52d   : > { %6048 = vrot.lane.b32.xlu0 %v10187_v0, %s12558_s5  ;;  %v10239_v19 = vpop.permute.xlu0 %5813 }
 0x52e   : > { %v12361_v36 = vunpack.i.h.bf16 %v10239_v19  ;;  %v12382_v59 = vunpack.i.l.bf16 %v10239_v19 }
 0x532   : > { %6043 = vrot.lane.b32.xlu1 %v10187_v0, %s13397_s16  ;;  %6023 = vrot.lane.b32.xlu2 %v10187_v0, %s13391_s23  ;;  %s13477_s16 = smov 86  }
 0x534   : > { %v10247_v55 = vpop.permute.xlu1 %5838  ;;  %v10249_v37 = vpop.permute.xlu2 %5878 }
 0x535   : > { %6063 = vrot.lane.b32.xlu0 %v10187_v0, %s12564_s29  ;;  %v10251_v62 = vpop.permute.xlu0 %5828 }
 0x53a   : > { %6058 = vrot.lane.b32.xlu1 %v10187_v0, %s12557_s12  ;;  %6038 = vrot.lane.b32.xlu2 %v10187_v0, %s13394_s9  ;;  %s13455_s9 = smov 82   ;;  %s13903_s12 = sld [smem:[#allocation18_spill]] }
 0x53c   : > { %v10259_v61 = vpop.permute.xlu1 %5853  ;;  %v10261_v11 = vpop.permute.xlu2 %5893 }
 0x53d   : > { %6078 = vrot.lane.b32.xlu0 %v10187_v0, %s12572_s21  ;;  %13424 = vst [vmem:[#allocation102_spill] sm:$0xff] %v10259_v61  ;;  %v12367_v32 = vunpack.i.h.bf16 %v10261_v11  ;;  %v12359_v56 = vunpack.i.l.bf16 %v10261_v11  ;;  %v10265_v63 = vpop.permute.xlu0 %5843 }
 0x53e   : > { %13425 = vst [vmem:[#allocation55_spill] sm:$0xff] %v10261_v11 }
 0x53f   : > { %13426 = vst [vmem:[#allocation94_spill] sm:$0xff] %v10265_v63  ;;  %v3796_v34 = vsel %vm2037_vm3, %v12359_v56, %v12367_v32 }
 0x540   : > { %4075 = vmatpush.msrb.mxu2 %v3796_v34  ;;  %v10367_v34 = vsel %vm784_vm4, %v12382_v59, %v12361_v36 }
 0x541   : > { %13435 = vst [vmem:[#allocation61_spill] sm:$0xff] %v10367_v34 }
 0x542   : > { %6073 = vrot.lane.b32.xlu1 %v10187_v0, %s13398_s8  ;;  %6053 = vrot.lane.b32.xlu2 %v10187_v0, %s12555_s15  ;;  %s4752_s15 = sshll.u32 %s13903_s12, 5 }
 0x544   : > { %v10279_v33 = vpop.permute.xlu1 %5868  ;;  %v10281_v49 = vpop.permute.xlu2 %5908 }
 0x545   : > { %6093 = vrot.lane.b32.xlu0 %v10187_v0, %s13399_s0  ;;  %13427 = vst [vmem:[#allocation50_spill] sm:$0xff] %v10281_v49  ;;  %v10283_v17 = vpop.permute.xlu0 %5858  ;;  %s13429_s0 = smov 1   ;;  %v12362_v15 = vunpack.i.h.bf16 %v10281_v49  ;;  %v12357_v39 = vunpack.i.l.bf16 %v10281_v49 }
 0x547   : > { %v3764_v25 = vsel %vm1971_vm9, %v12357_v39, %v12362_v15 }
 0x54a   : > { %6088 = vrot.lane.b32.xlu1 %v10187_v0, %s12571_s10  ;;  %6068 = vrot.lane.b32.xlu2 %v10187_v0, %s12561_s11  ;;  %s13905_s11 = sld [smem:[#allocation194_spill]] }
 0x54c   : > { %v10291_v18 = vpop.permute.xlu1 %5883  ;;  %v10293_v58 = vpop.permute.xlu2 %5923 }
 0x54d   : > { %6103 = vrot.lane.b32.xlu0 %v10187_v0, %s13406_s24  ;;  %v10295_v31 = vpop.permute.xlu0 %5873  ;;  %v12376_v36 = vunpack.i.h.bf16 %v10293_v58  ;;  %v12375_v15 = vunpack.i.l.bf16 %v10293_v58  ;;  %s13440_s24 = smov 127  }
 0x552   : > { %6118 = vrot.lane.b32.xlu1 %v10187_v0, %s13401_s2  ;;  %6083 = vrot.lane.b32.xlu2 %v10187_v0, %s12567_s17  ;;  %s13432_s2 = smov 62   ;;  %s13895_s17 = sld [smem:[#allocation23_spill]] }
 0x554   : > { %v10304_v14 = vpop.permute.xlu1 %5903  ;;  %v10306_v13 = vpop.permute.xlu2 %5938 }
 0x555   : > { %6113 = vrot.lane.b32.xlu0 %v6112_v30, %s12579_s20  ;;  %v12373_v40 = vunpack.i.h.bf16 %v10304_v14  ;;  %v12360_v9 = vunpack.i.l.bf16 %v10304_v14  ;;  %v10310_v54 = vpop.permute.xlu0 %5888 }
 0x557   : > { %v3576_v43 = vsel %vm13428_vm13, %v12360_v9, %v12373_v40  ;;  %vm13445_vm13 = vcmp.lt.s32.totalorder %v7054_v20, 125 }
 0x558   : > { %4052 = vmatpush.msrb.mxu1 %v3576_v43  ;;  %v10378_v43 = vsel %vm751_vm5, %v12381_v2, %v12363_v1  ;;  %s13897_s5 = sshll.u32 %s13895_s17, 6  ;;  %s4598_s3 = scalar_lea.sflag [#allocation6], %s13895_s17 }
 0x559   : > { %13436 = vst [vmem:[#allocation93_spill] sm:$0xff] %v10378_v43  ;;  %s11822_s10 = scalar_lea.vmem [#allocation10], %s13897_s5 }
 0x55a   : > { %6128 = vrot.lane.b32.xlu1 %v10187_v0, %s13405_s14  ;;  %6098 = vrot.lane.b32.xlu2 %v6112_v30, %s13429_s0  ;;  %s13453_s14 = smov 59   ;;  %s4610_s8 = sshll.u32 %s11822_s10, 4  ;;  %s4611_s8 = int_to_ptr.vmem [resolvable:$true] %s4610_s8 }
 0x55c   : > { %v10323_v44 = vpop.permute.xlu1 %5918  ;;  %v10325_v38 = vpop.permute.xlu2 %5953 }
 0x55d   : > { %6123 = vrot.lane.b32.xlu0 %v10187_v0, %s13403_s25  ;;  %13430 = vst [vmem:[#allocation59_spill] sm:$0xff] %v10325_v38  ;;  %v10327_v45 = vpop.permute.xlu0 %5898  ;;  %s13442_s25 = smov 126  }
 0x55e   : > { %13431 = vst [vmem:[#allocation64_spill] sm:$0xff] %v10327_v45  ;;  %v12364_v7 = vunpack.i.h.bf16 %v10327_v45  ;;  %v12358_v48 = vunpack.i.l.bf16 %v10327_v45 }
 0x560   : > { %v3780_v10 = vsel %vm2004_vm12, %v12358_v48, %v12364_v7  ;;  %v10401_v7 = vsel %vm718_vm6, %v12374_v52, %v12366_v24 }
 0x561   : > { %4076 = vmatpush.msrb.mxu2 %v3780_v10  ;;  %v12369_v10 = vunpack.i.h.bf16 %v10323_v44  ;;  %13438 = vst [vmem:[#allocation49_spill] sm:$0xff] %v10401_v7 }
 0x562   : > { %6138 = vrot.lane.b32.xlu1 %v10187_v0, %s13409_s28  ;;  %6108 = vrot.lane.b32.xlu2 %v10187_v0, %s13400_s1  ;;  %s13439_s1 = smov 104   ;;  %s13448_s28 = smov 105  }
 0x563   : > { %4077 = vmatpush.msrb.mxu2 %v3764_v25  ;;  %v12368_v25 = vunpack.i.l.bf16 %v10323_v44 }
 0x564   : > { %v10357_v4 = vpop.permute.xlu1 %5933  ;;  %v10359_v29 = vpop.permute.xlu2 %5968 }
 0x565   : > { %6133 = vrot.lane.b32.xlu0 %v10187_v0, %s13432_s2  ;;  %13433 = vst [vmem:[#allocation104_spill] sm:$0xff] %v10357_v4  ;;  %v10369_v30 = vpop.permute.xlu0 %5913  ;;  %4078 = vmatpush.msrb.mxu2 %v10367_v34  ;;  %v12372_v56 = vunpack.i.h.bf16 %v10357_v4  ;;  %v12371_v9 = vunpack.i.l.bf16 %v10357_v4  ;;  %v12437_v4 = vunpack.i.h.bf16 %v10279_v33 }
 0x566   : > { %13434 = vst [vmem:[#allocation41_spill] sm:$0xff] %v10359_v29  ;;  %v12370_v39 = vunpack.i.h.bf16 %v10369_v30  ;;  %v12365_v48 = vunpack.i.l.bf16 %v10369_v30 }
 0x567   : > { %4079 = vmatpush.msrb.mxu2 %v10378_v43  ;;  %v12407_v43 = vunpack.i.h.bf16 %v10235_v16 }
 0x568   : > { %v3560_v1 = vsel %vm13437_vm14, %v12365_v48, %v12370_v39  ;;  %v3544_v48 = vsel %vm13441_vm8, %v12368_v25, %v12369_v10  ;;  %v3528_v25 = vsel %vm1485_vm1, %v12375_v15, %v12376_v36  ;;  %v12380_v10 = vunpack.i.h.bf16 %v10306_v13 }
 0x569   : > { %4053 = vmatpush.msrb.mxu1 %v3560_v1  ;;  %4080 = vmatpush.msrb.mxu2 %v10401_v7  ;;  %v3736_v1 = vsel %vm1914_vm11, %v12371_v9, %v12372_v56  ;;  %v12379_v39 = vunpack.i.l.bf16 %v10306_v13  ;;  %v6167_v56 = vpack.i.bf16 %v10181_v12, %v10095_v51  ;;  %vm13447_vm14 = vcmp.lt.s32.totalorder %v7054_v20, 126 }
 0x56a   : > { %6148 = vrot.lane.b32.xlu1 %v10099_v3, %s13439_s1  ;;  %6153 = vrot.lane.b32.xlu2 %v10187_v0, %s13440_s24  ;;  %vm13451_vm8 = vcmp.lt.s32.totalorder %v7054_v20, 127  ;;  %v12409_v7 = vunpack.i.h.bf16 %v10227_v53  ;;  %v13524_v51 = vunpack.i.h.bf16 %v10237_v21  ;;  %s6341_s24 = scalar_lea.hbm %s13905_s11, 128 }
 0x56b   : > { %4054 = vmatpush.msrb.mxu1 %v3544_v48  ;;  %4081 = vmatpush.msrb.mxu2 %v3736_v1  ;;  %v3496_v15 = vsel %vm13447_vm14, %v12379_v39, %v12380_v10  ;;  %v12386_v39 = vunpack.i.h.bf16 %v10325_v38  ;;  %v12385_v10 = vunpack.i.l.bf16 %v10325_v38  ;;  %vm13457_vm14 = vcmp.lt.s32.totalorder %v7054_v20, 84 }
 0x56c   : > { %v10422_v24 = vpop.permute.xlu1 %5948  ;;  %v10424_v32 = vpop.permute.xlu2 %5973 }
 0x56d   : > { %6143 = vrot.lane.b32.xlu0 %v10187_v0, %s13442_s25  ;;  %13443 = vst [vmem:[#allocation88_spill] sm:$0xff] %v10422_v24  ;;  %v10432_v48 = vpop.permute.xlu0 %5928  ;;  %4055 = vmatpush.msrb.mxu1 %v3528_v25  ;;  %v12392_v40 = vunpack.i.h.bf16 %v10422_v24  ;;  %v12383_v52 = vunpack.i.l.bf16 %v10422_v24  ;;  %v13518_v24 = vunpack.i.l.bf16 %v10283_v17 }
 0x56e   : > { %13444 = vst [vmem:[#allocation62_spill] sm:$0xff] %v10424_v32  ;;  %v12378_v1 = vunpack.i.h.bf16 %v10432_v48  ;;  %v12377_v9 = vunpack.i.l.bf16 %v10432_v48 }
 0x570   : > { %v3512_v25 = vsel %vm13445_vm13, %v12377_v9, %v12378_v1  ;;  %vm13454_vm13 = vcmp.lt.s32.totalorder %v7054_v20, 83 }
 0x571   : > { %4056 = vmatpush.msrb.mxu1 %v3512_v25  ;;  %v3480_v25 = vsel %vm13451_vm8, %v12383_v52, %v12392_v40  ;;  %vm13458_vm8 = vcmp.lt.s32.totalorder %v7054_v20, 85 }
 0x572   : > { %6163 = vrot.lane.b32.xlu1 %v10187_v0, %s13446_s27  ;;  %6168 = vrot.lane.b32.xlu2 %v6167_v56, %s13429_s0 }
 0x573   : > { %4057 = vmatpush.msrb.mxu1 %v3496_v15 }
 0x574   : > { %v10459_v36 = vpop.permute.xlu1 %5958  ;;  %v10461_v9 = vpop.permute.xlu2 %5978 }
 0x575   : > { %6158 = vrot.lane.b32.xlu0 %v10099_v3, %s13448_s28  ;;  %13449 = vst [vmem:[#allocation126_spill] sm:$0xff] %v10459_v36  ;;  %v10469_v1 = vpop.permute.xlu0 %5943  ;;  %4058 = vmatpush.msrb.mxu1 %v3480_v25  ;;  %v12388_v59 = vunpack.i.h.bf16 %v10459_v36  ;;  %v12387_v41 = vunpack.i.l.bf16 %v10459_v36  ;;  %v13465_v40 = vunpack.i.l.bf16 %v10461_v9 }
 0x576   : > { %13450 = vst [vmem:[#allocation58_spill] sm:$0xff] %v10461_v9  ;;  %v12389_v15 = vunpack.i.h.bf16 %v10469_v1  ;;  %v12384_v2 = vunpack.i.l.bf16 %v10469_v1 }
 0x577   : > { %13452 = vst [vmem:[#allocation159_spill] sm:$0xff] %v10469_v1  ;;  %4059 = vmatpush.msrb.mxu1 %v10093_v27  ;;  %v3704_v27 = vsel %vm13454_vm13, %v12385_v10, %v12386_v39  ;;  %vm13460_vm13 = vcmp.lt.s32.totalorder %v7054_v20, 86 }
 0x578   : > { %v3720_v25 = vsel %vm12396_vm7, %v12384_v2, %v12389_v15 }
 0x579   : > { %4082 = vmatpush.msrb.mxu2 %v3720_v25 }
 0x57a   : > { %6178 = vrot.lane.b32.xlu1 %v10099_v3, %s13453_s14  ;;  %6183 = vrot.lane.b32.xlu2 %v6167_v56, %s12579_s20  ;;  %v3688_v3 = vsel %vm13457_vm14, %v12387_v41, %v12388_v59  ;;  %v12395_v41 = vunpack.i.h.bf16 %v10424_v32  ;;  %vm13463_vm14 = vcmp.lt.s32.totalorder %v7054_v20, 87  ;;  %s4609_s20 = scalar_lea.hbm %s13905_s11, %s4752_s15 }
 0x57b   : > { %4083 = vmatpush.msrb.mxu2 %v3704_v27  ;;  %v12393_v27 = vunpack.i.l.bf16 %v10359_v29  ;;  %s4612_s23 = sshll.u32 %s4609_s20, 4  ;;  %s4613_s23 = int_to_ptr.hbm [resolvable:$true] %s4612_s23 }
 0x57c   : > { %v10495_v52 = vpop.permute.xlu1 %5963  ;;  %v10497_v2 = vpop.permute.xlu2 %5993  ;;  %s6335_s7 = sshra.s32 %s4613_s23, 4  ;;  %s6336_s7 = int_to_ptr.hbm [resolvable:$true] %s6335_s7 }
 0x57d   : > { %6173 = vrot.lane.b32.xlu0 %v10187_v0, %s13455_s9  ;;  %13456 = vst [vmem:[#allocation87_spill] sm:$0xff] %v10495_v52  ;;  %v12391_v56 = vunpack.i.h.bf16 %v10495_v52  ;;  %v12390_v25 = vunpack.i.l.bf16 %v10495_v52  ;;  %4084 = vmatpush.msrb.mxu2 %v3688_v3  ;;  %v12394_v0 = vunpack.i.h.bf16 %v10359_v29  ;;  %v13464_v3 = vunpack.i.h.bf16 %v10461_v9  ;;  %s6337_s0 = scalar_lea.hbm %s6336_s7, 64  ;;  %p6342_p0 = scmp.lt.s32.totalorder %s6336_s7, %s13905_s11 }
 0x57e   : > { %v12425_v52 = vunpack.i.h.bf16 %v10259_v61  ;;  %p6338_p4 = scmp.ne.s32.totalorder %s6336_s7, %s6337_s0  ;;  %p6343_p7 = scmp.lt.s32.totalorder %s6341_s24, %s6337_s0 }
 0x57f   : > { %v10507_v10 = vpop.permute.xlu0 %5988  ;;  %v3672_v39 = vsel %vm13458_vm8, %v12390_v25, %v12391_v56  ;;  %v3656_v25 = vsel %vm13460_vm13, %v12393_v27, %v12394_v0  ;;  %v5995_v56 = vunpack.i.l.bf16 %v10497_v2  ;;  %v13462_v27 = vunpack.i.l.bf16 %v10424_v32 }
 0x580   : > { %4085 = vmatpush.msrb.mxu2 %v3672_v39  ;;  %v5990_v39 = vunpack.i.l.bf16 %v10507_v10  ;;  %vm13466_vm8 = vcmp.lt.s32.totalorder %v7054_v20, 103  ;;  %vm13467_vm13 = vcmp.lt.s32.totalorder %v7054_v20, 67  ;;  %p6339_p6 = pnand %p6338_p4, %p6544_p11  ;;  %p6344_p5 = por %p6343_p7, %p6342_p0 }
 0x581   : > { %v3640_v0 = vsel %vm13463_vm14, %v13462_v27, %v12395_v41  ;;  %v3624_v8 = vsel %vm13466_vm8, %v13465_v40, %v13464_v3  ;;  %v10561_v27 = vsel %vm13467_vm13, %v12398_v6, %v5995_v56  ;;  %vm13469_vm14 = vcmp.lt.s32.totalorder %v7054_v20, 68  ;;  %vm13472_vm7 = vmmov %vm13467_vm13 }
 0x582   : > { %3682 = vrot.lane.b32.xlu1 %v10181_v12, %s13459_s4  ;;  %3666 = vrot.lane.b32.xlu2 %v10181_v12, %s13415_s6  ;;  %13468 = vst [vmem:[#allocation137_spill] sm:$0xff] %v10561_v27  ;;  %v10567_v41 = vsel %vm13469_vm14, %v12397_v46, %v5990_v39  ;;  %vm13475_vm8 = vmmov %vm13469_vm14  ;;  %vm13482_vm14 = vcmp.lt.s32.totalorder %v7054_v20, 46  ;;  %p6340_p13 = pneg %p6339_p6 }
 0x583   : > { %4086 = vmatpush.msrb.mxu2 %v3656_v25  ;;  %13470 = vst [vmem:[#allocation156_spill] sm:$0xff] %v10567_v41 }
 0x584   : > { %v10537_v15 = vpop.permute.xlu1 %5983  ;;  %v10539_v59 = vpop.permute.xlu2 %6008  ;;  %p6345_p8 = pnand %p6344_p5, %p6340_p13 }
 0x585   : > { %3698 = vrot.lane.b32.xlu0 %v10181_v12, %s13461_s22  ;;  %4087 = vmatpush.msrb.mxu2 %v3640_v0  ;;  %v13471_v0 = vunpack.i.h.bf16 %v10497_v2  ;;  %v5985_v3 = vunpack.i.l.bf16 %v10537_v15 }
 0x587   : > { %v10549_v25 = vpop.permute.xlu0 %6003  ;;  %4088 = vmatpush.msrb.mxu2 %v3624_v8  ;;  %v10573_v57 = vsel %vm13472_vm7, %v5995_v56, %v13471_v0  ;;  %v13474_v8 = vunpack.i.h.bf16 %v10507_v10  ;;  %v12400_v0 = vunpack.i.h.bf16 %v10537_v15  ;;  %vm13478_vm7 = vcmp.lt.s32.totalorder %v7054_v20, 69 }
 0x588   : > { %13473 = vst [vmem:[#allocation90_spill] sm:$0xff] %v10573_v57  ;;  %vm13480_vm13 = vmmov %vm13478_vm7 }
 0x589   : > { %v10579_v40 = vsel %vm13475_vm8, %v5990_v39, %v13474_v8  ;;  %v12399_v39 = vunpack.i.h.bf16 %v10215_v35  ;;  %v10606_v60 = vsel %vm13480_vm13, %v5985_v3, %v12400_v0  ;;  %vm13484_vm8 = vcmp.lt.s32.totalorder %v7054_v20, 47  ;;  %vm13488_vm13 = vmmov %vm13482_vm14 }
 0x58a   : > { %13476 = vst [vmem:[#allocation162_spill] sm:$0xff] %v10579_v40  ;;  %3634 = vrot.lane.b32.xlu1 %v10181_v12, %s13419_s13  ;;  %3618 = vrot.lane.b32.xlu2 %v10181_v12, %s13421_s18 }
 0x58b   : > { %v10600_v8 = vsel %vm13478_vm7, %v12399_v39, %v5985_v3  ;;  %13481 = vst [vmem:[#allocation51_spill] sm:$0xff] %v10606_v60  ;;  %vm13486_vm7 = vcmp.lt.s32.totalorder %v7054_v20, 66 }
 0x58c   : > { %v10588_v46 = vpop.permute.xlu1 %5998  ;;  %v10590_v56 = vpop.permute.xlu2 %6023  ;;  %13479 = vst [vmem:[#allocation160_spill] sm:$0xff] %v10600_v8 }
 0x58d   : > { %3650 = vrot.lane.b32.xlu0 %v10181_v12, %s13477_s16  ;;  %v6000_v40 = vunpack.i.l.bf16 %v10588_v46  ;;  %v6025_v39 = vunpack.i.l.bf16 %v10590_v56  ;;  %v12410_v0 = vunpack.i.h.bf16 %v10590_v56 }
 0x58f   : > { %v10593_v6 = vpop.permute.xlu0 %6018  ;;  %v10633_v34 = vsel %vm13482_vm14, %v12407_v43, %v6025_v39  ;;  %v10645_v60 = vsel %vm13486_vm7, %v12409_v7, %v6000_v40  ;;  %v10651_v9 = vsel %vm13488_vm13, %v6025_v39, %v12410_v0  ;;  %vm13491_vm14 = vmmov %vm13484_vm8  ;;  %vm13498_vm13 = vcmp.lt.s32.totalorder %v7054_v20, 44 }
 0x590   : > { %v6020_v57 = vunpack.i.l.bf16 %v10593_v6  ;;  %13483 = vst [vmem:[#allocation125_spill] sm:$0xff] %v10633_v34  ;;  %v13490_v43 = vunpack.i.h.bf16 %v10593_v6 }
 0x591   : > { %13487 = vst [vmem:[#allocation89_spill] sm:$0xff] %v10645_v60 }
 0x592   : > { %3602 = vrot.lane.b32.xlu1 %v10181_v12, %s13439_s1  ;;  %3586 = vrot.lane.b32.xlu2 %v10181_v12, %s13448_s28  ;;  %13489 = vst [vmem:[#allocation84_spill] sm:$0xff] %v10651_v9  ;;  %v10657_v34 = vsel %vm13491_vm14, %v6020_v57, %v13490_v43 }
 0x593   : > { %13492 = vst [vmem:[#allocation147_spill] sm:$0xff] %v10657_v34  ;;  %v12416_v34 = vunpack.i.h.bf16 %v10247_v55 }
 0x594   : > { %v10617_v8 = vpop.permute.xlu1 %6013  ;;  %v10619_v41 = vpop.permute.xlu2 %6038 }
 0x595   : > { %3806 = vrot.lane.b32.xlu0 %v10181_v12, %s13453_s14  ;;  %v12408_v12 = vunpack.i.h.bf16 %v10203_v23  ;;  %v6040_v39 = vunpack.i.l.bf16 %v10619_v41  ;;  %v12417_v0 = vunpack.i.h.bf16 %v10619_v41 }
 0x597   : > { %v10624_v27 = vpop.permute.xlu0 %6033  ;;  %v10639_v3 = vsel %vm13484_vm8, %v12408_v12, %v6020_v57  ;;  %v13493_v12 = vunpack.i.h.bf16 %v10588_v46  ;;  %vm13494_vm8 = vmmov %vm13486_vm7  ;;  %vm13496_vm7 = vcmp.lt.s32.totalorder %v7054_v20, 43 }
 0x598   : > { %13485 = vst [vmem:[#allocation82_spill] sm:$0xff] %v10639_v3  ;;  %v6035_v57 = vunpack.i.l.bf16 %v10624_v27  ;;  %v10685_v9 = vsel %vm13496_vm7, %v12416_v34, %v6040_v39  ;;  %vm13500_vm14 = vmmov %vm13496_vm7  ;;  %v13502_v32 = vunpack.i.h.bf16 %v10624_v27  ;;  %vm13505_vm7 = vcmp.lt.s32.totalorder %v7054_v20, 25 }
 0x599   : > { %v10663_v3 = vsel %vm13494_vm8, %v6000_v40, %v13493_v12  ;;  %13497 = vst [vmem:[#allocation152_spill] sm:$0xff] %v10685_v9  ;;  %v10697_v12 = vsel %vm13500_vm14, %v6040_v39, %v12417_v0  ;;  %vm13503_vm8 = vmmov %vm13498_vm13  ;;  %v12427_v9 = vunpack.i.h.bf16 %v10251_v62  ;;  %vm13509_vm14 = vcmp.lt.s32.totalorder %v7054_v20, 45 }
 0x59a   : > { %13495 = vst [vmem:[#allocation57_spill] sm:$0xff] %v10663_v3  ;;  %3684 = vrot.lane.b32.xlu1 %v10183_v26, %s13459_s4  ;;  %3668 = vrot.lane.b32.xlu2 %v10183_v26, %s13415_s6  ;;  %v12415_v3 = vunpack.i.h.bf16 %v10213_v47  ;;  %v10703_v29 = vsel %vm13503_vm8, %v6035_v57, %v13502_v32  ;;  %vm13511_vm8 = vmmov %vm13505_vm7 }
 0x59b   : > { %13501 = vst [vmem:[#allocation79_spill] sm:$0xff] %v10697_v12  ;;  %v12426_v12 = vunpack.i.h.bf16 %v10225_v50 }
 0x59c   : > { %v10673_v43 = vpop.permute.xlu1 %6028  ;;  %v6054_v7 = vpop.permute.xlu2 %6053  ;;  %v10691_v60 = vsel %vm13498_vm13, %v12415_v3, %v6035_v57  ;;  %13504 = vst [vmem:[#allocation136_spill] sm:$0xff] %v10703_v29  ;;  %vm13507_vm13 = vcmp.lt.s32.totalorder %v7054_v20, 41 }
 0x59d   : > { %3700 = vrot.lane.b32.xlu0 %v10183_v26, %s13461_s22  ;;  %13499 = vst [vmem:[#allocation117_spill] sm:$0xff] %v10691_v60  ;;  %v6030_v3 = vunpack.i.l.bf16 %v10673_v43  ;;  %v6055_v34 = vunpack.i.l.bf16 %v6054_v7  ;;  %v6056_v0 = vunpack.i.h.bf16 %v6054_v7  ;;  %vm13513_vm10 = vmmov %vm13507_vm13 }
 0x59f   : > { %v10677_v40 = vpop.permute.xlu0 %6048  ;;  %v10726_v38 = vsel %vm13505_vm7, %v12425_v52, %v6055_v34  ;;  %v10742_v39 = vsel %vm13511_vm8, %v6055_v34, %v6056_v0  ;;  %vm13516_vm7 = vmmov %vm13509_vm14  ;;  %v12436_v34 = vunpack.i.h.bf16 %v10265_v63  ;;  %vm13525_vm8 = vcmp.lt.s32.totalorder %v7054_v20, 23 }
 0x5a0   : > { %v6050_v60 = vunpack.i.l.bf16 %v10677_v40  ;;  %v6051_v32 = vunpack.i.h.bf16 %v10677_v40  ;;  %13506 = vst [vmem:[#allocation53_spill] sm:$0xff] %v10726_v38  ;;  %v10738_v40 = vsel %vm13509_vm14, %v12427_v9, %v6030_v3  ;;  %v13515_v38 = vunpack.i.h.bf16 %v10673_v43 }
 0x5a1   : > { %13510 = vst [vmem:[#allocation127_spill] sm:$0xff] %v10738_v40  ;;  %vm13522_vm14 = vcmp.lt.s32.totalorder %v7054_v20, 22 }
 0x5a2   : > { %3636 = vrot.lane.b32.xlu1 %v10183_v26, %s13419_s13  ;;  %3620 = vrot.lane.b32.xlu2 %v10183_v26, %s13421_s18  ;;  %v10732_v7 = vsel %vm13507_vm13, %v12426_v12, %v6050_v60  ;;  %13512 = vst [vmem:[#allocation149_spill] sm:$0xff] %v10742_v39  ;;  %v10746_v52 = vsel %vm13513_vm10, %v6050_v60, %v6051_v32  ;;  %vm13519_vm10 = vcmp.lt.s32.totalorder %v7054_v20, 24  ;;  %vm13520_vm13 = vcmp.lt.s32.totalorder %v7054_v20, 42  ;;  %s13645_s18 = sld [smem:[#allocation193_spill]] }
 0x5a3   : > { %13508 = vst [vmem:[#allocation141_spill] sm:$0xff] %v10732_v7  ;;  %v10752_v12 = vsel %vm13516_vm7, %v6030_v3, %v13515_v38  ;;  %vm13528_vm7 = vcmp.lt.s32.totalorder %v7054_v20, 25 }
 0x5a4   : > { %v6044_v57 = vpop.permute.xlu1 %6043  ;;  %v10715_v29 = vpop.permute.xlu2 %6068  ;;  %13514 = vst [vmem:[#allocation46_spill] sm:$0xff] %v10746_v52 }
 0x5a5   : > { %3652 = vrot.lane.b32.xlu0 %v10183_v26, %s13477_s16  ;;  %13517 = vst [vmem:[#allocation77_spill] sm:$0xff] %v10752_v12  ;;  %v6045_v9 = vunpack.i.l.bf16 %v6044_v57  ;;  %v6070_v60 = vunpack.i.l.bf16 %v10715_v29  ;;  %v6046_v38 = vunpack.i.h.bf16 %v6044_v57 }
 0x5a7   : > { %v10720_v36 = vpop.permute.xlu0 %6063  ;;  %v10782_v12 = vsel %vm13520_vm13, %v12436_v34, %v6045_v9  ;;  %v13529_v34 = vunpack.i.h.bf16 %v10715_v29  ;;  %vm13533_vm13 = vmmov %vm13525_vm8 }
 0x5a8   : > { %v6065_v52 = vunpack.i.l.bf16 %v10720_v36  ;;  %13521 = vst [vmem:[#allocation116_spill] sm:$0xff] %v10782_v12 }
 0x5aa   : > { %3588 = vrot.lane.b32.xlu1 %v10183_v26, %s13448_s28  ;;  %3808 = vrot.lane.b32.xlu2 %v10183_v26, %s13453_s14 }
 0x5ac   : > { %v6059_v39 = vpop.permute.xlu1 %6058  ;;  %v10763_v40 = vpop.permute.xlu2 %6083 }
 0x5ad   : > { %3604 = vrot.lane.b32.xlu0 %v10183_v26, %s13439_s1  ;;  %v6061_v7 = vunpack.i.h.bf16 %v6059_v39  ;;  %v10788_v26 = vsel %vm13522_vm14, %v12437_v4, %v6070_v60  ;;  %v13532_v4 = vunpack.i.h.bf16 %v10720_v36 }
 0x5ae   : > { %13523 = vst [vmem:[#allocation52_spill] sm:$0xff] %v10788_v26 }
 0x5af   : > { %v10767_v1 = vpop.permute.xlu0 %6078  ;;  %v3333_v57 = vsel %vm13519_vm10, %v6061_v7, %v13518_v24  ;;  %v10794_v24 = vsel %vm13525_vm8, %v13524_v51, %v6065_v52  ;;  %vm13530_vm10 = vmmov %vm13522_vm14  ;;  %v10810_v26 = vsel %vm13533_vm13, %v6065_v52, %v13532_v4  ;;  %vm13535_vm14 = vcmp.lt.s32.totalorder %v7054_v20, 42 }
 0x5b0   : > { %4029 = vmatpush.msra.mxu3 %v3333_v57  ;;  %13526 = vst [vmem:[#allocation72_spill] sm:$0xff] %v10794_v24  ;;  %v13527_v57 = vunpack.i.l.bf16 %v10259_v61  ;;  %v10804_v12 = vsel %vm13530_vm10, %v6070_v60, %v13529_v34  ;;  %v10814_v51 = vsel %vm13535_vm14, %v6045_v9, %v6046_v38  ;;  %v6085_v61 = vunpack.i.l.bf16 %v10763_v40 }
 0x5b1   : > { %13531 = vst [vmem:[#allocation167_spill] sm:$0xff] %v10804_v12  ;;  %v13537_v34 = vunpack.i.l.bf16 %v10225_v50  ;;  %vm13538_vm8 = vcmp.lt.s32.totalorder %v7054_v20, 41  ;;  %v12444_v4 = vunpack.i.l.bf16 %v10213_v47  ;;  %v12442_v52 = vunpack.i.h.bf16 %v10249_v37 }
 0x5b2   : > { %v3317_v3 = vsel %vm13528_vm7, %v6056_v0, %v13527_v57  ;;  %13534 = vst [vmem:[#allocation109_spill] sm:$0xff] %v10810_v26  ;;  %v6060_v57 = vunpack.i.l.bf16 %v6059_v39  ;;  %vm13540_vm7 = vmmov %vm13535_vm14  ;;  %v13542_v39 = vunpack.i.h.bf16 %v10619_v41  ;;  %vm13543_vm10 = vcmp.lt.s32.totalorder %v7054_v20, 43 }
 0x5b3   : > { %13536 = vst [vmem:[#allocation135_spill] sm:$0xff] %v10814_v51  ;;  %4030 = vmatpush.msra.mxu3 %v3317_v3  ;;  %v3301_v60 = vsel %vm13538_vm8, %v6051_v32, %v13537_v34  ;;  %v6080_v51 = vunpack.i.l.bf16 %v10767_v1  ;;  %v13539_v34 = vunpack.i.l.bf16 %v10265_v63  ;;  %vm13545_vm13 = vcmp.lt.s32.totalorder %v7054_v20, 1 }
 0x5b4   : > { %v10827_v24 = vpop.permute.xlu1 %6073  ;;  %v10829_v3 = vpop.permute.xlu2 %6098  ;;  %vm13547_vm14 = vcmp.lt.s32.totalorder %v7054_v20, 24  ;;  %vm13554_vm8 = vcmp.lt.s32.totalorder %v7054_v20, 44 }
 0x5b5   : > { %4031 = vmatpush.msra.mxu3 %v3301_v60  ;;  %v12443_v26 = vunpack.i.l.bf16 %v10829_v3  ;;  %v3285_v9 = vsel %vm13540_vm7, %v6046_v38, %v13539_v34  ;;  %v13541_v60 = vunpack.i.l.bf16 %v10247_v55  ;;  %v13544_v12 = vunpack.i.h.bf16 %v10829_v3  ;;  %vm13557_vm7 = vmmov %vm13547_vm14 }
 0x5b6   : > { %v13546_v38 = vunpack.i.h.bf16 %v10283_v17 }
 0x5b7   : > { %v10834_v32 = vpop.permute.xlu0 %6093  ;;  %4032 = vmatpush.msra.mxu3 %v3285_v9  ;;  %v3269_v0 = vsel %vm13543_vm10, %v13542_v39, %v13541_v60  ;;  %v3461_v63 = vsel %vm13545_vm13, %v13544_v12, %v12443_v26  ;;  %v13548_v9 = vunpack.i.h.bf16 %v10291_v18  ;;  %v10870_v39 = vsel %vm1213_vm2, %v12442_v52, %v6080_v51 }
 0x5b8   : > { %v10858_v34 = vsel %vm13547_vm14, %v13546_v38, %v6060_v57  ;;  %4060 = vmatpush.msrb.mxu1 %v3461_v63  ;;  %13550 = vst [vmem:[#allocation164_spill] sm:$0xff] %v10870_v39  ;;  %v13551_v12 = vunpack.i.h.bf16 %v10763_v40  ;;  %v12445_v38 = vunpack.i.l.bf16 %v10251_v62  ;;  %v10893_v26 = vsel %vm13557_vm7, %v6060_v57, %v6061_v7 }
 0x5b9   : > { %v10864_v41 = vsel %vm1246_vm0, %v13548_v9, %v6085_v61  ;;  %4033 = vmatpush.msra.mxu3 %v3269_v0  ;;  %v13553_v9 = vunpack.i.h.bf16 %v10624_v27  ;;  %v13555_v0 = vunpack.i.h.bf16 %v10767_v1  ;;  %13558 = vst [vmem:[#allocation118_spill] sm:$0xff] %v10893_v26  ;;  %v13559_v27 = vunpack.i.h.bf16 %v10673_v43 }
 0x5ba   : > { %13549 = vst [vmem:[#allocation158_spill] sm:$0xff] %v10864_v41  ;;  %v10876_v60 = vsel %vm1246_vm0, %v6085_v61, %v13551_v12  ;;  %v12446_v61 = vunpack.i.l.bf16 %v10235_v16  ;;  %vm13560_vm10 = vcmp.lt.s32.totalorder %v7054_v20, 45  ;;  %v12447_v7 = vunpack.i.l.bf16 %v10203_v23 }
 0x5bb   : > { %13552 = vst [vmem:[#allocation47_spill] sm:$0xff] %v10876_v60  ;;  %v3253_v63 = vsel %vm13554_vm8, %v13553_v9, %v12444_v4  ;;  %v10889_v52 = vsel %vm1213_vm2, %v6080_v51, %v13555_v0  ;;  %v3237_v12 = vsel %vm13560_vm10, %v13559_v27, %v12445_v38  ;;  %v6075_v4 = vunpack.i.l.bf16 %v10827_v24 }
 0x5bc   : > { %13556 = vst [vmem:[#allocation66_spill] sm:$0xff] %v10889_v52  ;;  %4034 = vmatpush.msra.mxu3 %v3253_v63  ;;  %v6089_v51 = vpop.permute.xlu1 %6088  ;;  %v10904_v0 = vpop.permute.xlu2 %6108  ;;  %v13561_v43 = vunpack.i.h.bf16 %v10590_v56  ;;  %vm13562_vm13 = vcmp.lt.s32.totalorder %v7054_v20, 46  ;;  %v12448_v38 = vunpack.i.h.bf16 %v10295_v31  ;;  %vm13564_vm14 = vcmp.lt.s32.totalorder %v7054_v20, 47 }
 0x5bd   : > { %vm13565_vm8 = vcmp.lt.s32.totalorder %v7054_v20, 21  ;;  %v13571_v9 = vunpack.i.h.bf16 %v10617_v8  ;;  %vm13581_vm10 = vcmp.lt.s32.totalorder %v7054_v20, 66 }
 0x5be   : > { %4035 = vmatpush.msra.mxu3 %v3237_v12  ;;  %v3221_v27 = vsel %vm13562_vm13, %v13561_v43, %v12446_v61  ;;  %v13563_v12 = vunpack.i.h.bf16 %v10593_v6  ;;  %v10928_v56 = vsel %vm13565_vm8, %v12448_v38, %v6075_v4  ;;  %v13567_v43 = vunpack.i.h.bf16 %v10827_v24  ;;  %vm13568_vm7 = vmmov %vm13565_vm8 }
 0x5bf   : > { %v10908_v63 = vpop.permute.xlu0 %6103  ;;  %13566 = vst [vmem:[#allocation155_spill] sm:$0xff] %v10928_v56  ;;  %v13570_v6 = vunpack.i.l.bf16 %v10239_v19  ;;  %v6090_v38 = vunpack.i.l.bf16 %v6089_v51  ;;  %v13580_v56 = vunpack.i.h.bf16 %v10588_v46  ;;  %vm13582_vm13 = vcmp.lt.s32.totalorder %v7054_v20, 2 }
 0x5c0   : > { %4036 = vmatpush.msra.mxu3 %v3221_v27  ;;  %v3205_v57 = vsel %vm13564_vm14, %v13563_v12, %v12447_v7  ;;  %v10934_v27 = vsel %vm13568_vm7, %v6075_v4, %v13567_v43  ;;  %v13573_v12 = vunpack.i.l.bf16 %v10223_v5  ;;  %v13574_v7 = vunpack.i.h.bf16 %v10539_v59 }
 0x5c1   : > { %13569 = vst [vmem:[#allocation153_spill] sm:$0xff] %v10934_v27  ;;  %v6091_v43 = vunpack.i.h.bf16 %v6089_v51  ;;  %v13577_v27 = vunpack.i.h.bf16 %v10549_v25  ;;  %v12453_v51 = vunpack.i.h.bf16 %v10310_v54  ;;  %vm13587_vm14 = vcmp.lt.s32.totalorder %v7054_v20, 67 }
 0x5c2   : > { %4037 = vmatpush.msra.mxu3 %v3205_v57  ;;  %v10943_v57 = vsel %vm784_vm4, %v13571_v9, %v13570_v6  ;;  %v10952_v4 = vsel %vm751_vm5, %v13574_v7, %v13573_v12  ;;  %vm13591_vm8 = vcmp.lt.s32.totalorder %v7054_v20, 68  ;;  %vm13595_vm7 = vcmp.lt.s32.totalorder %v7054_v20, 69 }
 0x5c3   : > { %13572 = vst [vmem:[#allocation96_spill] sm:$0xff] %v10943_v57  ;;  %v10992_v9 = vsel %vm1279_vm15, %v12453_v51, %v6090_v38  ;;  %v10996_v46 = vsel %vm1279_vm15, %v6090_v38, %v6091_v43  ;;  %v13588_v51 = vunpack.i.l.bf16 %v10310_v54 }
 0x5c4   : > { %4038 = vmatpush.msra.mxu3 %v10943_v57  ;;  %13575 = vst [vmem:[#allocation157_spill] sm:$0xff] %v10952_v4  ;;  %v10954_v61 = vpop.permute.xlu1 %6118  ;;  %v10956_v26 = vpop.permute.xlu2 %6153  ;;  %v13576_v57 = vunpack.i.l.bf16 %v10195_v22 }
 0x5c5   : > { %13583 = vst [vmem:[#allocation121_spill] sm:$0xff] %v10992_v9  ;;  %v3429_v38 = vsel %vm1279_vm15, %v6091_v43, %v13588_v51  ;;  %v13592_v43 = vunpack.i.l.bf16 %v10291_v18  ;;  %v13593_v51 = vunpack.i.h.bf16 %v10763_v40  ;;  %v13596_v40 = vunpack.i.l.bf16 %v10249_v37 }
 0x5c6   : > { %4039 = vmatpush.msra.mxu3 %v10952_v4  ;;  %v10968_v7 = vsel %vm718_vm6, %v13577_v27, %v13576_v57  ;;  %v13579_v4 = vunpack.i.l.bf16 %v10227_v53  ;;  %13584 = vst [vmem:[#allocation45_spill] sm:$0xff] %v10996_v46  ;;  %v11038_v27 = vld [vmem:[#allocation9] sm:$0xff]  ;;  %v13651_v46 = vld [vmem:[#allocation67_spill] sm:$0xff] }
 0x5c7   : > { %v10960_v6 = vpop.permute.xlu0 %6113  ;;  %13578 = vst [vmem:[#allocation148_spill] sm:$0xff] %v10968_v7 }
 0x5c8   : > { %v12452_v12 = vunpack.i.h.bf16 %v10960_v6  ;;  %v12451_v52 = vunpack.i.l.bf16 %v10960_v6  ;;  %4040 = vmatpush.msra.mxu3 %v10968_v7  ;;  %v3141_v60 = vsel %vm13581_vm10, %v13580_v56, %v13579_v4  ;;  %v13586_v4 = vunpack.i.h.bf16 %v10497_v2 }
 0x5c9   : > { %v12454_v56 = vunpack.i.l.bf16 %v10215_v35  ;;  %v13590_v2 = vunpack.i.h.bf16 %v10507_v10  ;;  %vm13600_vm10 = vcmp.lt.s32.totalorder %v7054_v20, 106  ;;  %v13619_v7 = vunpack.i.h.bf16 %v10432_v48 }
 0x5ca   : > { %4041 = vmatpush.msra.mxu3 %v3141_v60  ;;  %v3445_v57 = vsel %vm13582_vm13, %v12452_v12, %v12451_v52  ;;  %v13585_v60 = vunpack.i.l.bf16 %v10211_v42  ;;  %vm13602_vm13 = vcmp.lt.s32.totalorder %v7054_v20, 21 }
 0x5cb   : > { %4061 = vmatpush.msrb.mxu1 %v3445_v57  ;;  %v13589_v57 = vunpack.i.l.bf16 %v10179_v28 }
 0x5cc   : > { %v3125_v52 = vsel %vm13587_vm14, %v13586_v4, %v13585_v60  ;;  %v11022_v12 = vpop.permute.xlu2 %6168  ;;  %v13604_v4 = vunpack.i.h.bf16 %v10369_v30  ;;  %vm13605_vm14 = vcmp.lt.s32.totalorder %v7054_v20, 107 }
 0x5cd   : > { %4042 = vmatpush.msra.mxu3 %v3125_v52  ;;  %4062 = vmatpush.msrb.mxu1 %v3429_v38  ;;  %v3109_v60 = vsel %vm13591_vm8, %v13590_v2, %v13589_v57  ;;  %v11020_v52 = vpop.permute.xlu1 %6128  ;;  %v3413_v38 = vsel %vm1246_vm0, %v13593_v51, %v13592_v43  ;;  %v13594_v57 = vunpack.i.h.bf16 %v10537_v15  ;;  %v13597_v43 = vunpack.i.h.bf16 %v10767_v1 }
 0x5ce   : > { %v13599_v15 = vunpack.i.h.bf16 %v10304_v14  ;;  %v13601_v1 = vunpack.i.h.bf16 %v10827_v24  ;;  %v13606_v24 = vunpack.i.h.bf16 %v10715_v29  ;;  %vm13607_vm8 = vcmp.lt.s32.totalorder %v7054_v20, 22 }
 0x5cf   : > { %4043 = vmatpush.msra.mxu3 %v3109_v60  ;;  %v11030_v10 = vpop.permute.xlu0 %6123  ;;  %4063 = vmatpush.msrb.mxu1 %v3413_v38  ;;  %v3093_v2 = vsel %vm13595_vm7, %v13594_v57, %v12454_v56  ;;  %v12455_v60 = vunpack.i.l.bf16 %v10295_v31  ;;  %v3397_v51 = vsel %vm1213_vm2, %v13597_v43, %v13596_v40  ;;  %v13598_v38 = vunpack.i.l.bf16 %v10834_v32 }
 0x5d0   : > { %v12456_v56 = vunpack.i.l.bf16 %v10279_v33  ;;  %v13603_v43 = vunpack.i.l.bf16 %v10908_v63  ;;  %vm13610_vm7 = vcmp.lt.s32.totalorder %v7054_v20, 108  ;;  %v13611_v29 = vunpack.i.h.bf16 %v10720_v36 }
 0x5d1   : > { %4044 = vmatpush.msra.mxu3 %v3093_v2  ;;  %v3575_v57 = vsel %vm13600_vm10, %v13599_v15, %v13598_v38  ;;  %4064 = vmatpush.msrb.mxu1 %v3397_v51  ;;  %v12458_v2 = vunpack.i.l.bf16 %v11020_v52  ;;  %v3381_v40 = vsel %vm13602_vm13, %v13601_v1, %v12455_v60  ;;  %v12460_v51 = vunpack.i.l.bf16 %v10904_v0 }
 0x5d2   : > { %v3559_v38 = vsel %vm13605_vm14, %v13604_v4, %v13603_v43  ;;  %4045 = vmatmul.f32.vlgmr.msra.gmra.mxu3 %v11038_v27  ;;  %v12457_v15 = vunpack.i.l.bf16 %v10237_v21  ;;  %v13608_v1 = vunpack.i.l.bf16 %v10954_v61  ;;  %v13609_v60 = vunpack.i.h.bf16 %v10323_v44 }
 0x5d3   : > { %4144 = vmatpush.msrb.mxu3 %v3575_v57  ;;  %4065 = vmatpush.msrb.mxu1 %v3381_v40  ;;  %v3365_v57 = vsel %vm13607_vm8, %v13606_v24, %v12456_v56  ;;  %vm13612_vm10 = vcmp.lt.s32.totalorder %v7054_v20, 23  ;;  %v13613_v56 = vunpack.i.h.bf16 %v10293_v58  ;;  %v13614_v36 = vunpack.i.h.bf16 %v10261_v11 }
 0x5d4   : > { %v3543_v4 = vsel %vm13610_vm7, %v13609_v60, %v13608_v1  ;;  %v3349_v24 = vsel %vm13612_vm10, %v13611_v29, %v12457_v15  ;;  %v13616_v1 = vunpack.i.l.bf16 %v11030_v10  ;;  %vm13620_vm13 = vcmp.lt.s32.totalorder %v7054_v20, 125 }
 0x5d5   : > { %4145 = vmatpush.msrb.mxu3 %v3559_v38  ;;  %4066 = vmatpush.msrb.mxu1 %v3365_v57  ;;  %v11084_v40 = vpop.permute.xlu1 %6138  ;;  %v11086_v38 = vpop.permute.xlu2 %6183  ;;  %v3527_v60 = vsel %vm1485_vm1, %v13613_v56, %v12458_v2  ;;  %v11100_v57 = vld [vmem:[#allocation9 + $0x8] sm:$0xff]  ;;  %v3795_v29 = vsel %vm2037_vm3, %v13614_v36, %v12460_v51  ;;  %v11113_v56 = vld [vmem:[#allocation9 + $0x20] sm:$0xff]  ;;  %v13623_v2 = vunpack.i.h.bf16 %v11022_v12  ;;  %vm13624_vm14 = vcmp.lt.s32.totalorder %v7054_v20, 1 }
 0x5d6   : > { %13615 = vst [vmem:[#allocation122_spill] sm:$0xff] %v11113_v56  ;;  %v6447_v11 = vmov 4   ;;  %vm13638_vm8 = vcmp.lt.s32.totalorder %v7054_v20, 104  ;;  %vm13640_vm7 = vcmp.lt.s32.totalorder %v7054_v20, 126  ;;  %vm13643_vm10 = vcmp.lt.s32.totalorder %v7054_v20, 2 }
 0x5d7   : > { %4146 = vmatpush.msrb.mxu3 %v3543_v4  ;;  %v11104_v43 = vpop.permute.xlu0 %6133  ;;  %4067 = vmatpush.msrb.mxu1 %v3349_v24  ;;  %v13617_v4 = vunpack.i.h.bf16 %v10327_v45  ;;  %v13652_v41 = vunpack.i.l.bf16 %v11022_v12 }
 0x5d8   : > { %v12461_v15 = vunpack.i.l.bf16 %v11104_v43  ;;  %4068 = vmatmul.f32.vlgmr.msrb.gmra.mxu1 %v11100_v57  ;;  %6187 = vset.pattern.permute.xlu0 %v6447_v11 }
 0x5d9   : > { %4147 = vmatpush.msrb.mxu3 %v3527_v60  ;;  %4167 = vmatpush.msra.mxu1 %v3795_v29  ;;  %v3779_v24 = vsel %vm2004_vm12, %v13617_v4, %v13616_v1  ;;  %v13618_v60 = vunpack.i.l.bf16 %v11084_v40  ;;  %v13621_v29 = vunpack.i.h.bf16 %v10281_v49  ;;  %v13622_v4 = vunpack.i.h.bf16 %v10829_v3 }
 0x5da   : > { %4048 = vmatmul.f32.gmra.mxu3 %v11113_v56  ;;  %6188 = vset.pattern.permute.xlu1 %v6447_v11  ;;  %v6229_v11 = vld [vmem:[%s13645_s18] sm:$0xff]  ;;  %v13657_v56 = vunpack.i.l.bf16 %v11086_v38 }
 0x5db   : > { %v3511_v36 = vsel %vm13620_vm13, %v13619_v7, %v13618_v60  ;;  %4168 = vmatpush.msra.mxu1 %v3779_v24  ;;  %v3763_v51 = vsel %vm1971_vm9, %v13621_v29, %v12461_v15  ;;  %v11143_v7 = vsel %vm13624_vm14, %v13623_v2, %v13622_v4  ;;  %v13626_v60 = vunpack.i.l.bf16 %v10617_v8  ;;  %v11160_v2 = vld [vmem:[#allocation9 + $0x28] sm:$0xff]  ;;  %4398 = vperm.xlu0 %6187, %v6229_v11  }
 0x5dc   : > { %4148 = vmatpush.msrb.mxu3 %v3511_v36  ;;  %13625 = vst [vmem:[#allocation140_spill] sm:$0xff] %v11143_v7  ;;  %v13627_v36 = vunpack.i.h.bf16 %v10239_v19  ;;  %v13630_v19 = vunpack.i.l.bf16 %v10539_v59  ;;  %v13633_v4 = vunpack.i.l.bf16 %v10549_v25  ;;  %v13642_v15 = vunpack.i.h.bf16 %v11086_v38 }
 0x5dd   : > { %4169 = vmatpush.msra.mxu1 %v3763_v51  ;;  %v11156_v1 = vpop.permute.xlu1 %6148  ;;  %v11158_v49 = vpop.permute.xlu2 %3666  ;;  %v13634_v51 = vunpack.i.h.bf16 %v10195_v22  ;;  %v13639_v22 = vunpack.i.h.bf16 %v10306_v13  ;;  %vm13649_vm13 = vcmp.lt.s32.totalorder %v7054_v20, 127 }
 0x5de   : > { %v11152_v29 = vsel %vm784_vm4, %v13627_v36, %v13626_v60  ;;  %13629 = vst [vmem:[#allocation112_spill] sm:$0xff] %v11156_v1  ;;  %v13631_v60 = vunpack.i.h.bf16 %v10223_v5  ;;  %v13636_v5 = vunpack.i.h.bf16 %v11156_v1 }
 0x5df   : > { %13628 = vst [vmem:[#allocation154_spill] sm:$0xff] %v11152_v29  ;;  %4170 = vmatpush.msra.mxu1 %v11152_v29  ;;  %v11164_v24 = vpop.permute.xlu0 %6143  ;;  %v11183_v29 = vsel %vm718_vm6, %v13634_v51, %v13633_v4  ;;  %v13641_v4 = vunpack.i.h.bf16 %v10960_v6 }
 0x5e0   : > { %v11172_v36 = vsel %vm751_vm5, %v13631_v60, %v13630_v19  ;;  %v12467_v45 = vunpack.i.l.bf16 %v11164_v24  ;;  %13635 = vst [vmem:[#allocation113_spill] sm:$0xff] %v11183_v29  ;;  %v13637_v19 = vunpack.i.l.bf16 %v11156_v1  ;;  %4071 = vmatmul.f32.gmra.mxu1 %v11160_v2 }
 0x5e1   : > { %13632 = vst [vmem:[#allocation35_spill] sm:$0xff] %v11172_v36  ;;  %4171 = vmatpush.msra.mxu1 %v11172_v36 }
 0x5e2   : > { %v3608_v60 = vsel %vm13638_vm8, %v13637_v19, %v13636_v5  ;;  %v3495_v51 = vsel %vm13640_vm7, %v13639_v22, %v12467_v45  ;;  %v11205_v5 = vsel %vm13643_vm10, %v13642_v15, %v13641_v4  ;;  %v6230_v15 = vld [vmem:[%s13645_s18 + $0x8] sm:$0xff]  ;;  %vm13656_vm8 = vcmp.lt.s32.totalorder %v7054_v20, 105  ;;  %vm13659_vm7 = vmmov %vm13643_vm10 }
 0x5e3   : > { %4172 = vmatpush.msra.mxu1 %v11183_v29  ;;  %4089 = vmatpush.msrb.mxu2 %v3608_v60  ;;  %13644 = vst [vmem:[#allocation130_spill] sm:$0xff] %v11205_v5  ;;  %v13646_v60 = vunpack.i.l.bf16 %v10956_v26  ;;  %v13647_v29 = vld [vmem:[#allocation88_spill] sm:$0xff]  ;;  %vm13672_vm10 = vcmp.lt.s32.totalorder %v7054_v20, 82 }
 0x5e4   : > { %4149 = vmatpush.msrb.mxu3 %v3495_v51  ;;  %v13648_v22 = vunpack.i.h.bf16 %v13647_v29  ;;  %4402 = vperm.xlu1 %6188, %v6230_v15   ;;  %v13654_v5 = vld [vmem:[#allocation104_spill] sm:$0xff] }
 0x5e5   : > { %v11221_v4 = vpop.permute.xlu1 %6163  ;;  %v11223_v36 = vpop.permute.xlu2 %3618  ;;  %v13655_v9 = vunpack.i.h.bf16 %v13654_v5 }
 0x5e6   : > { %v3479_v45 = vsel %vm13649_vm13, %v13648_v22, %v13646_v60  ;;  %v12471_v19 = vunpack.i.l.bf16 %v11221_v4  ;;  %vm13675_vm13 = vcmp.lt.s32.totalorder %v7054_v20, 24 }
 0x5e7   : > { %4150 = vmatpush.msrb.mxu3 %v3479_v45  ;;  %v11226_v39 = vpop.permute.xlu0 %6158  ;;  %v13653_v45 = vunpack.i.l.bf16 %v10829_v3 }
 0x5e8   : > { %13650 = vst [vmem:[#allocation75_spill] sm:$0xff] %v11226_v39  ;;  %v12474_v60 = vunpack.i.h.bf16 %v11226_v39  ;;  %v12472_v22 = vunpack.i.l.bf16 %v11226_v39  ;;  %v3735_v7 = vsel %vm1914_vm11, %v13655_v9, %v12471_v19  ;;  %v13660_v9 = vunpack.i.h.bf16 %v10310_v54 }
 0x5e9   : > { %4151 = vmatpush.msrb.mxu3 %v13651_v46  ;;  %v3460_v51 = vsel %vm13624_vm14, %v13653_v45, %v13652_v41  ;;  %v11243_v46 = vld [vmem:[#allocation9 + $0x10] sm:$0xff]  ;;  %v13658_v41 = vunpack.i.l.bf16 %v10960_v6  ;;  %4173 = vmatpush.msra.mxu1 %v3735_v7  ;;  %v6448_v45 = vmov 5   ;;  %v13661_v19 = vunpack.i.l.bf16 %v10310_v54 }
 0x5ea   : > { %v3592_v3 = vsel %vm13656_vm8, %v12472_v22, %v12474_v60  ;;  %6189 = vset.pattern.permute.xlu2 %v6448_v45  ;;  %v13662_v7 = vunpack.i.h.bf16 %v10291_v18  ;;  %6191 = vset.pattern.permute.xlu0 %v6448_v45  ;;  %vm13678_vm14 = vcmp.lt.s32.totalorder %v7054_v20, 22  ;;  %v13679_v60 = vld [vmem:[#allocation102_spill] sm:$0xff]  ;;  %vm13682_vm8 = vcmp.lt.s32.totalorder %v7054_v20, 25 }
 0x5eb   : > { %4152 = vmatpush.msrb.mxu3 %v3460_v51  ;;  %v3444_v51 = vsel %vm13659_vm7, %v13658_v41, %v13657_v56  ;;  %4090 = vmatpush.msrb.mxu2 %v3592_v3  ;;  %v3428_v22 = vsel %vm1279_vm15, %v13661_v19, %v13660_v9  ;;  %v13663_v3 = vunpack.i.l.bf16 %v10291_v18  ;;  %v13665_v9 = vunpack.i.l.bf16 %v10249_v37 }
 0x5ec   : > { %4091 = vmatmul.f32.vlgmr.msrb.gmra.mxu2 %v11243_v46  ;;  %6190 = vset.pattern.permute.xlu1 %v6448_v45  ;;  %v11291_v45 = vld [vmem:[#allocation9 + $0x30] sm:$0xff]  ;;  %vm4022_vm15 = vcmask 64512   ;;  %vm13685_vm7 = vcmp.lt.s32.totalorder %v7054_v20, 23 }
 0x5ed   : > { %4153 = vmatpush.msrb.mxu3 %v3444_v51  ;;  %4418 = vperm.xlu1 %6190, %v6230_v15   ;;  %v11264_v6 = vpop.permute.xlu1 %6178  ;;  %v11266_v56 = vpop.permute.xlu2 %3586  ;;  %v3412_v41 = vsel %vm1246_vm0, %v13663_v3, %v13662_v7  ;;  %vm13666_vm0 = vcmp.lt.s32.totalorder %v7054_v20, 59  ;;  %v11293_v7 = vld [vmem:[#allocation9 + $0x18] sm:$0xff]  ;;  %v13667_v3 = vunpack.i.h.bf16 %v10295_v31 }
 0x5ee   : > { %4414 = vperm.xlu2 %6189, %v6229_v11   ;;  %v12475_v54 = vunpack.i.h.bf16 %v11264_v6  ;;  %v12473_v19 = vunpack.i.l.bf16 %v11264_v6 }
 0x5ef   : > { %4154 = vmatpush.msrb.mxu3 %v3428_v22  ;;  %v11276_v51 = vpop.permute.xlu0 %6173  ;;  %v13664_v22 = vunpack.i.h.bf16 %v10249_v37  ;;  %v13668_v37 = vunpack.i.l.bf16 %v10295_v31  ;;  %v13673_v31 = vunpack.i.h.bf16 %v10283_v17 }
 0x5f0   : > { %v12476_v15 = vunpack.i.l.bf16 %v11276_v51  ;;  %v3812_v11 = vsel %vm13666_vm0, %v12473_v19, %v12475_v54  ;;  %v13680_v54 = vunpack.i.h.bf16 %v13679_v60  ;;  %vm13690_vm0 = vcmp.lt.s32.totalorder %v7054_v20, 41 }
 0x5f1   : > { %4155 = vmatpush.msrb.mxu3 %v3412_v41  ;;  %v3396_v18 = vsel %vm1213_vm2, %v13665_v9, %v13664_v22  ;;  %4113 = vmatpush.msra.mxu0 %v3812_v11  ;;  %vm13669_vm2 = vcmp.lt.s32.totalorder %v7054_v20, 21  ;;  %v13670_v22 = vld [vmem:[#allocation159_spill] sm:$0xff]  ;;  %v13674_v11 = vunpack.i.l.bf16 %v10283_v17 }
 0x5f2   : > { %v3380_v41 = vsel %vm13669_vm2, %v13668_v37, %v13667_v3  ;;  %v13671_v9 = vunpack.i.h.bf16 %v13670_v22  ;;  %4738 = vmatmul.msk.f32.vlgmr.msra.gmra.mxu0 %vm4022_vm15, %v11293_v7  ;;  %v13676_v37 = vunpack.i.h.bf16 %v10279_v33  ;;  %vm13693_vm2 = vcmp.lt.s32.totalorder %v7054_v20, 83 }
 0x5f3   : > { %4156 = vmatpush.msrb.mxu3 %v3396_v18  ;;  %v3332_v3 = vsel %vm13675_vm13, %v13674_v11, %v13673_v31  ;;  %v13684_v11 = vunpack.i.l.bf16 %v10237_v21  ;;  %vm13701_vm13 = vcmp.lt.s32.totalorder %v7054_v20, 84 }
 0x5f4   : > { %v3719_v18 = vsel %vm13672_vm10, %v13671_v9, %v12476_v15  ;;  %4094 = vmatmul.f32.gmra.mxu2 %v11291_v45  ;;  %v13677_v9 = vunpack.i.l.bf16 %v10279_v33  ;;  %4121 = vmatpush.msrb.mxu0 %v3332_v3  ;;  %v13681_v15 = vunpack.i.l.bf16 %v13679_v60  ;;  %v13683_v33 = vunpack.i.h.bf16 %v10237_v21  ;;  %v13695_v3 = vld [vmem:[#allocation94_spill] sm:$0xff] }
 0x5f5   : > { %4157 = vmatpush.msrb.mxu3 %v3380_v41  ;;  %4174 = vmatpush.msra.mxu1 %v3719_v18  ;;  %v12477_v18 = vunpack.i.h.bf16 %v11030_v10  ;;  %v11330_v19 = vpop.permute.xlu1 %3682  ;;  %v11332_v31 = vpop.permute.xlu2 %3668  ;;  %v13686_v60 = vunpack.i.h.bf16 %v10904_v0  ;;  %v13689_v21 = vunpack.i.l.bf16 %v10225_v50  ;;  %vm13698_vm10 = vcmp.lt.s32.totalorder %v7054_v20, 42 }
 0x5f6   : > { %v3364_v41 = vsel %vm13678_vm14, %v13677_v9, %v13676_v37  ;;  %v3316_v17 = vsel %vm13682_vm8, %v13681_v15, %v13680_v54  ;;  %v3348_v37 = vsel %vm13685_vm7, %v13684_v11, %v13683_v33  ;;  %v13687_v54 = vunpack.i.l.bf16 %v10904_v0 }
 0x5f7   : > { %4158 = vmatpush.msrb.mxu3 %v3364_v41  ;;  %4122 = vmatpush.msrb.mxu0 %v3316_v17  ;;  %v11341_v9 = vpop.permute.xlu0 %3698  ;;  %v13688_v41 = vunpack.i.h.bf16 %v10225_v50  ;;  %v13691_v17 = vld [vmem:[#allocation59_spill] sm:$0xff]  ;;  %vm13706_vm14 = vcmp.lt.s32.totalorder %v7054_v20, 43  ;;  %vm13709_vm8 = vcmp.lt.s32.totalorder %v7054_v20, 85  ;;  %vm13715_vm7 = vcmp.lt.s32.totalorder %v7054_v20, 44 }
 0x5f8   : > { %v3794_v15 = vsel %vm2037_vm3, %v13687_v54, %v13686_v60  ;;  %v13692_v11 = vunpack.i.h.bf16 %v13691_v17  ;;  %v13694_v60 = vunpack.i.l.bf16 %v11030_v10  ;;  %v11366_v50 = vld [vmem:[#allocation9 + $0x38] sm:$0xff] }
 0x5f9   : > { %4159 = vmatpush.msrb.mxu3 %v3348_v37  ;;  %v3300_v33 = vsel %vm13690_vm0, %v13689_v21, %v13688_v41  ;;  %v13696_v41 = vunpack.i.h.bf16 %v13695_v3  ;;  %vm13724_vm0 = vcmp.lt.s32.totalorder %v7054_v20, 86 }
 0x5fa   : > { %v3703_v37 = vsel %vm13693_vm2, %v13692_v11, %v11341_v9  ;;  %4123 = vmatpush.msrb.mxu0 %v3300_v33  ;;  %v3778_v54 = vsel %vm2004_vm12, %v13694_v60, %v12477_v18  ;;  %v13699_v33 = vld [vmem:[#allocation126_spill] sm:$0xff]  ;;  %v13702_v60 = vunpack.i.h.bf16 %v11104_v43  ;;  %v13703_v18 = vunpack.i.l.bf16 %v11104_v43  ;;  %4160 = vmatmul.f32.vlgmr.msrb.gmra.mxu3 %v11100_v57 }
 0x5fb   : > { %4259 = vmatpush.msra.mxu3 %v3794_v15  ;;  %4175 = vmatpush.msra.mxu1 %v3703_v37  ;;  %v13697_v15 = vunpack.i.l.bf16 %v13695_v3  ;;  %v13700_v11 = vunpack.i.h.bf16 %v13699_v33  ;;  %v13704_v3 = vunpack.i.h.bf16 %v10247_v55  ;;  %vm13733_vm2 = vcmp.lt.s32.totalorder %v7054_v20, 87 }
 0x5fc   : > { %v3762_v17 = vsel %vm1971_vm9, %v13703_v18, %v13702_v60  ;;  %4739 = vmatmul.msk.f32.gmra.mxu0 %vm4022_vm15, %v11366_v50  ;;  %v13710_v18 = vunpack.i.h.bf16 %v10617_v8 }
 0x5fd   : > { %v3284_v21 = vsel %vm13698_vm10, %v13697_v15, %v13696_v41  ;;  %4260 = vmatpush.msra.mxu3 %v3778_v54  ;;  %v3687_v37 = vsel %vm13701_vm13, %v13700_v11, %v11330_v19  ;;  %v13705_v54 = vunpack.i.l.bf16 %v10247_v55  ;;  %v13707_v15 = vld [vmem:[#allocation87_spill] sm:$0xff]  ;;  %v13713_v55 = vunpack.i.h.bf16 %v10213_v47 }
 0x5fe   : > { %4124 = vmatpush.msrb.mxu0 %v3284_v21  ;;  %4176 = vmatpush.msra.mxu1 %v3687_v37  ;;  %v13708_v21 = vunpack.i.h.bf16 %v13707_v15  ;;  %v13711_v37 = vunpack.i.l.bf16 %v10617_v8  ;;  %vm13741_vm10 = vcmp.lt.s32.totalorder %v7054_v20, 103  ;;  %vm13744_vm13 = vcmp.lt.s32.totalorder %v7054_v20, 82 }
 0x5ff   : > { %v3268_v41 = vsel %vm13706_vm14, %v13705_v54, %v13704_v3  ;;  %4261 = vmatpush.msra.mxu3 %v3762_v17  ;;  %v13714_v17 = vunpack.i.l.bf16 %v10213_v47  ;;  %v11413_v54 = vpop.permute.xlu1 %3634  ;;  %v11418_v8 = vpop.permute.xlu0 %3650  ;;  %vm13747_vm14 = vcmp.lt.s32.totalorder %v7054_v20, 104 }
 0x600   : > { %v3671_v11 = vsel %vm13709_vm8, %v13708_v21, %v11158_v49  ;;  %4125 = vmatpush.msrb.mxu0 %v3268_v41  ;;  %v11404_v60 = vsel %vm784_vm4, %v13711_v37, %v13710_v18  ;;  %v11415_v41 = vpop.permute.xlu2 %3620  ;;  %v13717_v18 = vunpack.i.l.bf16 %v10539_v59  ;;  %v13719_v37 = vunpack.i.h.bf16 %v10251_v62 }
 0x601   : > { %4177 = vmatpush.msra.mxu1 %v3671_v11  ;;  %13712 = vst [vmem:[#allocation119_spill] sm:$0xff] %v11404_v60  ;;  %v3252_v3 = vsel %vm13715_vm7, %v13714_v17, %v13713_v55  ;;  %4262 = vmatpush.msra.mxu3 %v11404_v60  ;;  %v13716_v11 = vunpack.i.h.bf16 %v10539_v59  ;;  %v13720_v55 = vunpack.i.l.bf16 %v10251_v62  ;;  %vm13721_vm4 = vcmp.lt.s32.totalorder %v7054_v20, 45 }
 0x602   : > { %4126 = vmatpush.msrb.mxu0 %v3252_v3  ;;  %v13722_v3 = vld [vmem:[#allocation41_spill] sm:$0xff]  ;;  %v13726_v60 = vunpack.i.l.bf16 %v10549_v25  ;;  %4163 = vmatmul.f32.gmra.mxu3 %v11160_v2  ;;  %vm13749_vm8 = vcmp.lt.s32.totalorder %v7054_v20, 59  ;;  %vm13752_vm7 = vcmp.lt.s32.totalorder %v7054_v20, 106 }
 0x603   : > { %v11426_v47 = vsel %vm751_vm5, %v13717_v18, %v13716_v11  ;;  %v3236_v17 = vsel %vm13721_vm4, %v13720_v55, %v13719_v37  ;;  %v13723_v21 = vunpack.i.h.bf16 %v13722_v3  ;;  %v13725_v18 = vunpack.i.h.bf16 %v10549_v25  ;;  %v13739_v11 = vld [vmem:[#allocation58_spill] sm:$0xff] }
 0x604   : > { %13718 = vst [vmem:[#allocation42_spill] sm:$0xff] %v11426_v47  ;;  %4263 = vmatpush.msra.mxu3 %v11426_v47  ;;  %4127 = vmatpush.msrb.mxu0 %v3236_v17  ;;  %v13728_v37 = vunpack.i.h.bf16 %v10235_v16  ;;  %v13729_v55 = vunpack.i.l.bf16 %v10235_v16  ;;  %vm13730_vm5 = vcmp.lt.s32.totalorder %v7054_v20, 46  ;;  %v13734_v25 = vunpack.i.h.bf16 %v11221_v4 }
 0x605   : > { %v3655_v59 = vsel %vm13724_vm0, %v13723_v21, %v11418_v8  ;;  %v11448_v62 = vsel %vm718_vm6, %v13726_v60, %v13725_v18  ;;  %v13731_v21 = vld [vmem:[#allocation62_spill] sm:$0xff]  ;;  %v13735_v60 = vunpack.i.l.bf16 %v11221_v4  ;;  %v13736_v18 = vunpack.i.h.bf16 %v10203_v23  ;;  %vm13755_vm0 = vmmov %vm13749_vm8 }
 0x606   : > { %4178 = vmatpush.msra.mxu1 %v3655_v59  ;;  %13727 = vst [vmem:[#allocation120_spill] sm:$0xff] %v11448_v62  ;;  %v3220_v47 = vsel %vm13730_vm5, %v13729_v55, %v13728_v37  ;;  %4264 = vmatpush.msra.mxu3 %v11448_v62  ;;  %v13732_v17 = vunpack.i.h.bf16 %v13731_v21  ;;  %v13737_v37 = vunpack.i.l.bf16 %v10203_v23  ;;  %vm13738_vm6 = vcmp.lt.s32.totalorder %v7054_v20, 47 }
 0x607   : > { %4128 = vmatpush.msrb.mxu0 %v3220_v47  ;;  %v3734_v16 = vsel %vm1914_vm11, %v13735_v60, %v13734_v25  ;;  %v13742_v25 = vunpack.i.h.bf16 %v11276_v51  ;;  %v13743_v60 = vunpack.i.l.bf16 %v11276_v51  ;;  %vm13754_vm4 = vcmp.lt.s32.totalorder %v7054_v20, 105 }
 0x608   : > { %v3639_v59 = vsel %vm13733_vm2, %v13732_v17, %v11413_v54  ;;  %v3204_v55 = vsel %vm13738_vm6, %v13737_v37, %v13736_v18  ;;  %4265 = vmatpush.msra.mxu3 %v3734_v16  ;;  %v13740_v17 = vunpack.i.h.bf16 %v13739_v11  ;;  %v11486_v18 = vpop.permute.xlu1 %3602  ;;  %v6106_v16 = vunpack.i.h.bf16 %v10908_v63  ;;  %v13745_v37 = vld [vmem:[#allocation61_spill] sm:$0xff]  ;;  %v11490_v62 = vpop.permute.xlu2 %3808  ;;  %vm13763_vm6 = vmmov %vm13752_vm7 }
 0x609   : > { %4179 = vmatpush.msra.mxu1 %v3639_v59  ;;  %v6096_v59 = vunpack.i.h.bf16 %v10834_v32  ;;  %4129 = vmatpush.msrb.mxu0 %v3204_v55  ;;  %v3718_v23 = vsel %vm13744_vm13, %v13743_v60, %v13742_v25  ;;  %v13746_v55 = vunpack.i.h.bf16 %v11156_v1  ;;  %v13748_v25 = vunpack.i.h.bf16 %v11264_v6 }
 0x60a   : > { %v3623_v47 = vsel %vm13741_vm10, %v13740_v17, %v11223_v36  ;;  %4266 = vmatpush.msra.mxu3 %v3718_v23  ;;  %v3807_v17 = vpop.permute.xlu0 %3806  ;;  %v6121_v23 = vunpack.i.h.bf16 %v10954_v61  ;;  %v13751_v11 = vunpack.i.l.bf16 %v10834_v32  ;;  %v13757_v32 = vunpack.i.l.bf16 %v10908_v63 }
 0x60b   : > { %4180 = vmatpush.msra.mxu1 %v3623_v47  ;;  %4130 = vmatpush.msrb.mxu0 %v13745_v37  ;;  %v3607_v47 = vsel %vm13747_vm14, %v13746_v55, %v11486_v18  ;;  %v3811_v60 = vsel %vm13749_vm8, %v13748_v25, %v3807_v17  ;;  %v13750_v37 = vld [vmem:[#allocation93_spill] sm:$0xff]  ;;  %v13753_v55 = vunpack.i.h.bf16 %v11226_v39  ;;  %v6131_v25 = vunpack.i.h.bf16 %v11020_v52 }
 0x60c   : > { %4205 = vmatpush.msra.mxu2 %v3811_v60  ;;  %v3574_v1 = vsel %vm13752_vm7, %v13751_v11, %v6096_v59  ;;  %v13756_v60 = vld [vmem:[#allocation49_spill] sm:$0xff]  ;;  %vm13758_vm5 = vcmp.lt.s32.totalorder %v7054_v20, 107  ;;  %vm13761_vm2 = vcmp.lt.s32.totalorder %v7054_v20, 66  ;;  %v13764_v63 = vunpack.i.l.bf16 %v10954_v61 }
 0x60d   : > { %4181 = vmatpush.msra.mxu1 %v3607_v47  ;;  %4131 = vmatpush.msrb.mxu0 %v13750_v37  ;;  %v3591_v21 = vsel %vm13754_vm4, %v13753_v55, %v11266_v56  ;;  %v3810_v47 = vsel %vm13755_vm0, %v3807_v17, %v11490_v62  ;;  %v3558_v11 = vsel %vm13758_vm5, %v13757_v32, %v6106_v16  ;;  %v13759_v37 = vunpack.i.h.bf16 %v10227_v53  ;;  %vm13770_vm14 = vmmov %vm13758_vm5 }
 0x60e   : > { %4236 = vmatpush.msrb.mxu2 %v3574_v1  ;;  %v13760_v55 = vunpack.i.l.bf16 %v10227_v53  ;;  %v13762_v1 = vunpack.i.l.bf16 %v10304_v14  ;;  %vm13765_vm10 = vcmp.lt.s32.totalorder %v7054_v20, 108  ;;  %v6141_v53 = vunpack.i.h.bf16 %v11084_v40 }
 0x60f   : > { %4182 = vmatpush.msra.mxu1 %v3591_v21  ;;  %4132 = vmatpush.msrb.mxu0 %v13756_v60  ;;  %v3542_v17 = vsel %vm13765_vm10, %v13764_v63, %v6121_v23  ;;  %v13767_v60 = vunpack.i.l.bf16 %v10211_v42  ;;  %vm13768_vm13 = vcmp.lt.s32.totalorder %v7054_v20, 67  ;;  %vm13774_vm8 = vcmp.lt.s32.totalorder %v7054_v20, 68  ;;  %vm13777_vm4 = vmmov %vm13765_vm10 }
 0x610   : > { %v3140_v39 = vsel %vm13761_vm2, %v13760_v55, %v13759_v37  ;;  %4237 = vmatpush.msrb.mxu2 %v3558_v11  ;;  %4183 = vmatmul.f32.vlgmr.msra.gmra.mxu1 %v11243_v46  ;;  %v3577_v21 = vsel %vm13763_vm6, %v6096_v59, %v13762_v1  ;;  %v11544_v14 = vpop.permute.xlu1 %3684  ;;  %v13771_v11 = vunpack.i.l.bf16 %v11020_v52  ;;  %v13772_v37 = vunpack.i.h.bf16 %v10179_v28 }
 0x611   : > { %4297 = vmatpush.msrb.mxu1 %v3810_v47  ;;  %4133 = vmatpush.msrb.mxu0 %v3140_v39  ;;  %v13766_v47 = vunpack.i.h.bf16 %v10211_v42  ;;  %v13769_v39 = vunpack.i.l.bf16 %v10369_v30  ;;  %v13773_v55 = vunpack.i.l.bf16 %v10179_v28  ;;  %vm13775_vm7 = vcmp.lt.s32.totalorder %v7054_v20, 83 }
 0x612   : > { %4238 = vmatpush.msrb.mxu2 %v3542_v17  ;;  %v11550_v59 = vpop.permute.xlu0 %3700  ;;  %v3526_v42 = vsel %vm1485_vm1, %v13771_v11, %v6131_v25  ;;  %v13776_v52 = vunpack.i.l.bf16 %v10323_v44  ;;  %v13779_v63 = vunpack.i.l.bf16 %v10215_v35  ;;  %vm13780_vm0 = vcmp.lt.s32.totalorder %v7054_v20, 69 }
 0x613   : > { %4328 = vmatpush.msra.mxu1 %v3577_v21  ;;  %v3124_v32 = vsel %vm13768_vm13, %v13767_v60, %v13766_v47  ;;  %v3561_v61 = vsel %vm13770_vm14, %v6106_v16, %v13769_v39  ;;  %v3108_v1 = vsel %vm13774_vm8, %v13773_v55, %v13772_v37  ;;  %v3702_v30 = vsel %vm13775_vm7, %v11341_v9, %v11550_v59 }
 0x614   : > { %4134 = vmatpush.msrb.mxu0 %v3124_v32  ;;  %4239 = vmatpush.msrb.mxu2 %v3526_v42  ;;  %v6146_v16 = vunpack.i.h.bf16 %v11164_v24  ;;  %v3545_v28 = vsel %vm13777_vm4, %v6121_v23, %v13776_v52  ;;  %v13778_v21 = vunpack.i.h.bf16 %v10215_v35  ;;  %v13781_v17 = vunpack.i.l.bf16 %v11084_v40  ;;  %v13796_v42 = vld [vmem:[#allocation141_spill] sm:$0xff]  ;;  %v13805_v52 = vld [vmem:[#allocation122_spill] sm:$0xff] }
 0x615   : > { %4329 = vmatpush.msra.mxu1 %v3561_v61  ;;  %4740 = vmatmul.msk.f32.vlgmr.msra.gmra.mxu2 %vm4022_vm15, %v11293_v7  ;;  %vm13782_vm5 = vcmp.lt.s32.totalorder %v7054_v20, 125  ;;  %v6156_v60 = vunpack.i.h.bf16 %v10956_v26  ;;  %vm13783_vm2 = vcmp.lt.s32.totalorder %v7054_v20, 84  ;;  %v13784_v35 = vunpack.i.l.bf16 %v10293_v58 }
 0x616   : > { %4135 = vmatpush.msrb.mxu0 %v3108_v1  ;;  %4267 = vmatpush.msra.mxu3 %v3702_v30  ;;  %v3092_v9 = vsel %vm13780_vm0, %v13779_v63, %v13778_v21  ;;  %v3510_v47 = vsel %vm13782_vm5, %v13781_v17, %v6141_v53  ;;  %v3686_v44 = vsel %vm13783_vm2, %v11330_v19, %v11544_v14  ;;  %v13785_v23 = vunpack.i.l.bf16 %v11164_v24  ;;  %vm13789_vm13 = vmmov %vm13782_vm5 }
 0x617   : > { %4330 = vmatpush.msra.mxu1 %v3545_v28  ;;  %4240 = vmatpush.msrb.mxu2 %v3510_v47  ;;  %v3529_v40 = vsel %vm1485_vm1, %v6131_v25, %v13784_v35  ;;  %vm13786_vm6 = vcmp.lt.s32.totalorder %v7054_v20, 126  ;;  %vm13787_vm10 = vcmp.lt.s32.totalorder %v7054_v20, 85  ;;  %v13788_v58 = vunpack.i.l.bf16 %v10432_v48  ;;  %v13807_v28 = vld [vmem:[#allocation65_spill] sm:$0xff]  ;;  %v13816_v35 = vld [vmem:[#allocation127_spill] sm:$0xff] }
 0x618   : > { %4136 = vmatpush.msrb.mxu0 %v3092_v9  ;;  %4268 = vmatpush.msra.mxu3 %v3686_v44  ;;  %v3494_v32 = vsel %vm13786_vm6, %v13785_v23, %v6146_v16  ;;  %v3670_v19 = vsel %vm13787_vm10, %v11158_v49, %v11332_v31  ;;  %v11606_v39 = vpop.permute.xlu1 %3636  ;;  %v13791_v24 = vunpack.i.l.bf16 %v10956_v26  ;;  %vm13792_vm1 = vcmp.lt.s32.totalorder %v7054_v20, 127  ;;  %vm13794_vm14 = vmmov %vm13786_vm6  ;;  %v13797_v26 = vld [vmem:[#allocation103_spill] sm:$0xff]  ;;  %v13812_v47 = vld [vmem:[#allocation117_spill] sm:$0xff] }
 0x619   : > { %4137 = vmatmul.f32.vlgmr.msrb.gmra.mxu0 %v11038_v27  ;;  %4331 = vmatpush.msra.mxu1 %v3529_v40  ;;  %v3513_v25 = vsel %vm13789_vm13, %v6141_v53, %v13788_v58  ;;  %v13793_v49 = vunpack.i.l.bf16 %v10306_v13  ;;  %vm13795_vm8 = vcmp.lt.s32.totalorder %v7054_v20, 86  ;;  %v13798_v13 = vld [vmem:[#allocation116_spill] sm:$0xff]  ;;  %v13799_v37 = vunpack.i.l.bf16 %v13647_v29  ;;  %vm13800_vm7 = vmmov %vm13792_vm1  ;;  %v13815_v44 = vld [vmem:[#allocation121_spill] sm:$0xff] }
 0x61a   : > { %4213 = vmatpush.msra.mxu0 %v10858_v34  ;;  %4241 = vmatpush.msrb.mxu2 %v3494_v32  ;;  %v13790_v34 = vld [vmem:[#allocation53_spill] sm:$0xff]  ;;  %v3478_v61 = vsel %vm13792_vm1, %v13791_v24, %v6156_v60  ;;  %v11613_v11 = vpop.permute.xlu0 %3652  ;;  %v13802_v1 = vunpack.i.l.bf16 %v11022_v12  ;;  %vm13803_vm4 = vcmp.lt.s32.totalorder %v7054_v20, 1  ;;  %vm13804_vm0 = vcmp.lt.s32.totalorder %v7054_v20, 87  ;;  %v13806_v29 = vld [vmem:[#allocation152_spill] sm:$0xff]  ;;  %v13819_v23 = vld [vmem:[#allocation158_spill] sm:$0xff] }
 0x61b   : > { %4269 = vmatpush.msra.mxu3 %v3670_v19  ;;  %4332 = vmatpush.msra.mxu1 %v3513_v25  ;;  %v3497_v48 = vsel %vm13794_vm14, %v6146_v16, %v13793_v49  ;;  %v3654_v53 = vsel %vm13795_vm8, %v11418_v8, %v11613_v11  ;;  %v3481_v55 = vsel %vm13800_vm7, %v6156_v60, %v13799_v37  ;;  %v13801_v8 = vunpack.i.h.bf16 %v11022_v12  ;;  %v13813_v60 = vld [vmem:[#allocation140_spill] sm:$0xff]  ;;  %v13822_v19 = vld [vmem:[#allocation125_spill] sm:$0xff]  ;;  %v13826_v24 = vld [vmem:[#allocation47_spill] sm:$0xff] }
 0x61c   : > { %4214 = vmatpush.msra.mxu0 %v13790_v34  ;;  %4242 = vmatpush.msrb.mxu2 %v3478_v61  ;;  %v3638_v16 = vsel %vm13804_vm0, %v11413_v54, %v11606_v39  ;;  %v13808_v21 = vunpack.i.h.bf16 %v11086_v38  ;;  %v13809_v12 = vunpack.i.l.bf16 %v11086_v38  ;;  %vm13810_vm5 = vcmp.lt.s32.totalorder %v7054_v20, 2  ;;  %v13823_v58 = vld [vmem:[#allocation45_spill] sm:$0xff]  ;;  %v13824_v25 = vld [vmem:[#allocation164_spill] sm:$0xff]  ;;  %v13825_v34 = vld [vmem:[#allocation82_spill] sm:$0xff] }
 0x61d   : > { %4186 = vmatmul.f32.gmra.mxu1 %v11291_v45  ;;  %4270 = vmatpush.msra.mxu3 %v3654_v53  ;;  %v3459_v30 = vsel %vm13803_vm4, %v13802_v1, %v13801_v8  ;;  %vm13811_vm2 = vcmp.lt.s32.totalorder %v7054_v20, 103  ;;  %vm13814_vm6 = vcmp.lt.s32.totalorder %v7054_v20, 104  ;;  %vm13818_vm10 = vcmp.lt.s32.totalorder %v7054_v20, 105  ;;  %v13829_v61 = vld [vmem:[#allocation66_spill] sm:$0xff]  ;;  %v13831_v49 = vld [vmem:[#allocation35_spill] sm:$0xff]  ;;  %v13833_v53 = vld [vmem:[#allocation72_spill] sm:$0xff] }
 0x61e   : > { %4215 = vmatpush.msra.mxu0 %v13796_v42  ;;  %4333 = vmatpush.msra.mxu1 %v3497_v48  ;;  %v3443_v63 = vsel %vm13810_vm5, %v13809_v12, %v13808_v21  ;;  %v3622_v9 = vsel %vm13811_vm2, %v11223_v36, %v11415_v41  ;;  %v13817_v36 = vld [vmem:[#allocation130_spill] sm:$0xff]  ;;  %v13820_v32 = vunpack.i.l.bf16 %v11264_v6  ;;  %vm13821_vm13 = vcmp.lt.s32.totalorder %v7054_v20, 59  ;;  %v13832_v48 = vld [vmem:[#allocation153_spill] sm:$0xff]  ;;  %vm13873_vm1 = vmmov %vm13795_vm8 }
 0x61f   : > { %4243 = vmatpush.msrb.mxu2 %v13797_v26  ;;  %4271 = vmatpush.msra.mxu3 %v3638_v16  ;;  %v13828_v6 = vld [vmem:[#allocation154_spill] sm:$0xff]  ;;  %v13834_v42 = vld [vmem:[#allocation113_spill] sm:$0xff]  ;;  %v13835_v26 = vld [vmem:[#allocation167_spill] sm:$0xff] }
 0x620   : > { %4741 = vmatmul.msk.f32.gmra.mxu2 %vm4022_vm15, %v11366_v50  ;;  %4216 = vmatpush.msra.mxu0 %v13798_v13  ;;  %v11656_v54 = vpop.permute.xlu1 %3588  ;;  %v13836_v13 = vld [vmem:[#allocation55_spill] sm:$0xff]  ;;  %v13839_v1 = vld [vmem:[#allocation89_spill] sm:$0xff]  ;;  %v13841_v16 = vld [vmem:[#allocation64_spill] sm:$0xff] }
 0x621   : > { %4334 = vmatpush.msra.mxu1 %v3481_v55  ;;  %4244 = vmatpush.msrb.mxu2 %v3459_v30  ;;  %v3590_v40 = vsel %vm13818_vm10, %v11266_v56, %v11656_v54  ;;  %v13827_v56 = vld [vmem:[#allocation155_spill] sm:$0xff]  ;;  %v13837_v37 = vunpack.i.l.bf16 %v13836_v13  ;;  %v13838_v55 = vunpack.i.h.bf16 %v10904_v0  ;;  %v13840_v30 = vld [vmem:[#allocation109_spill] sm:$0xff]  ;;  %v13845_v12 = vld [vmem:[#allocation50_spill] sm:$0xff] }
 0x622   : > { %4140 = vmatmul.f32.gmra.mxu0 %v13805_v52  ;;  %4272 = vmatpush.msra.mxu3 %v3622_v9  ;;  %v11658_v17 = vpop.permute.xlu0 %3604  ;;  %v13844_v0 = vld [vmem:[#allocation137_spill] sm:$0xff]  ;;  %v13847_v9 = vunpack.i.h.bf16 %v11104_v43  ;;  %v13853_v43 = vld [vmem:[#allocation148_spill] sm:$0xff]  ;;  %vm13881_vm14 = vmmov %vm13811_vm2 }
 0x623   : > { %4217 = vmatpush.msra.mxu0 %v13806_v29  ;;  %4335 = vmatpush.msra.mxu1 %v13807_v28  ;;  %v3606_v38 = vsel %vm13814_vm6, %v11486_v18, %v11658_v17  ;;  %v3813_v18 = vsel %vm13821_vm13, %v11490_v62, %v13820_v32  ;;  %v13830_v62 = vld [vmem:[#allocation52_spill] sm:$0xff]  ;;  %v3797_v8 = vsel %vm2037_vm3, %v13838_v55, %v13837_v37  ;;  %v13842_v29 = vunpack.i.l.bf16 %v13841_v16  ;;  %vm13885_vm8 = vmmov %vm13814_vm6  ;;  %v13891_v55 = vld [vmem:[#allocation57_spill] sm:$0xff] }
 0x624   : > { %4245 = vmatpush.msrb.mxu2 %v3443_v63  ;;  %4273 = vmatpush.msra.mxu3 %v3606_v38  ;;  %v13843_v28 = vunpack.i.h.bf16 %v11030_v10  ;;  %v13846_v63 = vunpack.i.l.bf16 %v13845_v12  ;;  %v13848_v10 = vld [vmem:[#allocation156_spill] sm:$0xff]  ;;  %vm13867_vm3 = vcmp.lt.s32.totalorder %v7054_v20, 84  ;;  %vm13889_vm7 = vmmov %vm13818_vm10 }
 0x625   : > { %4218 = vmatpush.msra.mxu0 %v13812_v47  ;;  %4336 = vmatpush.msra.mxu1 %v13813_v60  ;;  %v13849_v60 = vld [vmem:[#allocation96_spill] sm:$0xff] }
 0x626   : > { %4246 = vmatpush.msrb.mxu2 %v13815_v44  ;;  %4274 = vmatpush.msra.mxu3 %v3590_v40  ;;  %v3781_v21 = vsel %vm2004_vm12, %v13843_v28, %v13842_v29  ;;  %v3765_v47 = vsel %vm1971_vm9, %v13847_v9, %v13846_v63  ;;  %v13850_v38 = vld [vmem:[#allocation160_spill] sm:$0xff]  ;;  %v13851_v44 = vld [vmem:[#allocation157_spill] sm:$0xff]  ;;  %v13855_v40 = vunpack.i.l.bf16 %v13654_v5  ;;  %vm13860_vm12 = vcmp.lt.s32.totalorder %v7054_v20, 82  ;;  %v13862_v5 = vld [vmem:[#allocation59_spill] sm:$0xff] }
 0x627   : > { %4219 = vmatpush.msra.mxu0 %v13816_v35  ;;  %4337 = vmatpush.msra.mxu1 %v13817_v36  ;;  %v13852_v35 = vld [vmem:[#allocation118_spill] sm:$0xff]  ;;  %v13854_v36 = vld [vmem:[#allocation149_spill] sm:$0xff]  ;;  %vm13870_vm9 = vcmp.lt.s32.totalorder %v7054_v20, 85 }
 0x628   : > { %4247 = vmatpush.msrb.mxu2 %v13819_v23  ;;  %4389 = vmatpush.msrb.mxu3 %v3813_v18  ;;  %v13856_v23 = vunpack.i.h.bf16 %v11221_v4  ;;  %v13857_v18 = vld [vmem:[#allocation46_spill] sm:$0xff]  ;;  %v13863_v4 = vunpack.i.l.bf16 %v13862_v5 }
 0x629   : > { %4220 = vmatpush.msra.mxu0 %v13822_v19  ;;  %4338 = vmatpush.msra.mxu1 %v13823_v58  ;;  %v13858_v19 = vunpack.i.l.bf16 %v13670_v22  ;;  %v13866_v22 = vunpack.i.l.bf16 %v13699_v33  ;;  %v13871_v33 = vld [vmem:[#allocation77_spill] sm:$0xff] }
 0x62a   : > { %4248 = vmatpush.msrb.mxu2 %v13824_v25  ;;  %4275 = vmatmul.f32.vlgmr.msra.gmra.mxu3 %v11243_v46  ;;  %v3737_v32 = vsel %vm1914_vm11, %v13856_v23, %v13855_v40  ;;  %v13861_v25 = vld [vmem:[#allocation135_spill] sm:$0xff]  ;;  %vm13864_vm11 = vcmp.lt.s32.totalorder %v7054_v20, 83 }
 0x62b   : > { %4221 = vmatpush.msra.mxu0 %v13825_v34  ;;  %4339 = vmatpush.msra.mxu1 %v13826_v24  ;;  %v3705_v34 = vsel %vm13864_vm11, %v11550_v59, %v13863_v4  ;;  %v13868_v24 = vld [vmem:[#allocation136_spill] sm:$0xff] }
 0x62c   : > { %4249 = vmatpush.msrb.mxu2 %v13827_v56  ;;  %4742 = vmatmul.msk.f32.vlgmr.msrb.gmra.mxu1 %vm4022_vm15, %v11293_v7  ;;  %v13869_v56 = vunpack.i.l.bf16 %v13707_v15 }
 0x62d   : > { %4222 = vmatpush.msra.mxu0 %v13828_v6  ;;  %4340 = vmatpush.msra.mxu1 %v13829_v61  ;;  %v13872_v6 = vunpack.i.l.bf16 %v13722_v3  ;;  %v13875_v61 = vld [vmem:[#allocation62_spill] sm:$0xff] }
 0x62e   : > { %4250 = vmatpush.msrb.mxu2 %v13830_v62  ;;  %v3673_v59 = vsel %vm13870_vm9, %v11332_v31, %v13869_v56  ;;  %v13876_v15 = vunpack.i.l.bf16 %v13875_v61  ;;  %v13878_v62 = vld [vmem:[#allocation147_spill] sm:$0xff] }
 0x62f   : > { %4223 = vmatpush.msra.mxu0 %v13831_v49  ;;  %4341 = vmatpush.msra.mxu1 %v13832_v48  ;;  %v13883_v48 = vld [vmem:[#allocation112_spill] sm:$0xff] }
 0x630   : > { %4251 = vmatpush.msrb.mxu2 %v13833_v53  ;;  %v13884_v53 = vunpack.i.l.bf16 %v13883_v48 }
 0x631   : > { %4224 = vmatpush.msra.mxu0 %v13834_v42  ;;  %4342 = vmatpush.msra.mxu1 %v13835_v26  ;;  %v13887_v26 = vld [vmem:[#allocation75_spill] sm:$0xff] }
 0x632   : > { %4351 = vmatpush.msra.mxu2 %v3797_v8  ;;  %4278 = vmatmul.f32.gmra.mxu3 %v11291_v45  ;;  %v3609_v42 = vsel %vm13885_vm8, %v11658_v17, %v13884_v53  ;;  %v13888_v13 = vunpack.i.l.bf16 %v13887_v26  ;;  %v13892_v8 = vld [vmem:[#allocation90_spill] sm:$0xff]  ;;  %v13894_v17 = vld [vmem:[#allocation51_spill] sm:$0xff] }
 0x633   : > { %4225 = vmatpush.msra.mxu0 %v13839_v1  ;;  %4343 = vmatpush.msra.mxu1 %v13840_v30  ;;  %v13893_v1 = vld [vmem:[#allocation162_spill] sm:$0xff] }
 0x634   : > { %4352 = vmatpush.msra.mxu2 %v3781_v21  ;;  %4743 = vmatmul.msk.f32.gmra.mxu1 %vm4022_vm15, %v11366_v50  ;;  %v3593_v37 = vsel %vm13889_vm7, %v11656_v54, %v13888_v13 }
 0x635   : > { %4252 = vmatmul.f32.vlgmr.msrb.gmra.mxu2 %v11100_v57  ;;  %4226 = vmatpush.msra.mxu0 %v13844_v0 }
 0x636   : > { %4353 = vmatpush.msra.mxu2 %v3765_v47 }
 0x637   : > { %4227 = vmatpush.msra.mxu0 %v13848_v10 }
 0x638   : > { %4354 = vmatpush.msra.mxu2 %v13849_v60 }
 0x639   : > { %4228 = vmatpush.msra.mxu0 %v13850_v38 }
 0x63a   : > { %4355 = vmatpush.msra.mxu2 %v13851_v44  ;;  %4229 = vmatmul.f32.vlgmr.msra.gmra.mxu0 %v11038_v27 }
 0x63b   : > { %4305 = vmatpush.msrb.mxu0 %v13852_v35  ;;  %4744 = vmatmul.msk.f32.vlgmr.msrb.gmra.mxu3 %vm4022_vm15, %v11293_v7  ;;  %v13859_v7 = vunpack.i.h.bf16 %v11276_v51  ;;  %v3689_v51 = vsel %vm13867_vm3, %v11544_v14, %v13866_v22  ;;  %v3657_v14 = vsel %vm13873_vm1, %v11613_v11, %v13872_v6  ;;  %v13882_v11 = vld [vmem:[#allocation119_spill] sm:$0xff] }
 0x63c   : > { %4356 = vmatpush.msra.mxu2 %v13853_v43  ;;  %4344 = vmatmul.f32.vlgmr.msra.gmra.mxu1 %v11100_v57  ;;  %v13865_v57 = vld [vmem:[#allocation79_spill] sm:$0xff] }
 0x63d   : > { %4255 = vmatmul.f32.gmra.mxu2 %v11160_v2  ;;  %4306 = vmatpush.msrb.mxu0 %v13854_v36  ;;  %v3721_v58 = vsel %vm13860_vm12, %v13859_v7, %v13858_v19 }
 0x63e   : > { %4357 = vmatpush.msra.mxu2 %v3737_v32 }
 0x63f   : > { %4307 = vmatpush.msrb.mxu0 %v13857_v18 }
 0x640   : > { %4358 = vmatpush.msra.mxu2 %v3721_v58 }
 0x641   : > { %4308 = vmatpush.msrb.mxu0 %v13861_v25 }
 0x642   : > { %4359 = vmatpush.msra.mxu2 %v3705_v34  ;;  %4232 = vmatmul.f32.gmra.mxu0 %v13805_v52 }
 0x643   : > { %4309 = vmatpush.msrb.mxu0 %v13865_v57  ;;  %4745 = vmatmul.msk.f32.gmra.mxu3 %vm4022_vm15, %v11366_v50  ;;  %v13874_v50 = vld [vmem:[#allocation84_spill] sm:$0xff]  ;;  %vm13877_vm15 = vmmov %vm13804_vm0 }
 0x644   : > { %4360 = vmatpush.msra.mxu2 %v3689_v51  ;;  %4347 = vmatmul.f32.gmra.mxu1 %v11160_v2  ;;  %v3641_v31 = vsel %vm13877_vm15, %v11606_v39, %v13876_v15  ;;  %v13879_v2 = vld [vmem:[#allocation58_spill] sm:$0xff] }
 0x645   : > { %4310 = vmatpush.msrb.mxu0 %v13868_v24  ;;  %v13880_v49 = vunpack.i.l.bf16 %v13879_v2  ;;  %v13886_v39 = vld [vmem:[#allocation42_spill] sm:$0xff] }
 0x646   : > { %4361 = vmatpush.msra.mxu2 %v3673_v59 }
 0x647   : > { %4311 = vmatpush.msrb.mxu0 %v13871_v33  ;;  %v3625_v3 = vsel %vm13881_vm14, %v11415_v41, %v13880_v49  ;;  %v13890_v41 = vld [vmem:[#allocation120_spill] sm:$0xff] }
 0x648   : > { %4362 = vmatpush.msra.mxu2 %v3657_v14  ;;  %v11809_v0 = vpop.permute.xlu2 %4414 }
 0x649   : > { %4312 = vmatpush.msrb.mxu0 %v13874_v50 }
 0x64a   : > { %4363 = vmatpush.msra.mxu2 %v3641_v31  ;;  %v13896_v31 = vld [vmem:[#allocation25_spill] sm:$0xff] }
 0x64b   : > { %4313 = vmatpush.msrb.mxu0 %v13878_v62 }
 0x64c   : > { %4364 = vmatpush.msra.mxu2 %v3625_v3 }
 0x64d   : > { %4314 = vmatpush.msrb.mxu0 %v13882_v11  ;;  %v11807_v28 = vpop.permute.xlu0 %4398 }
 0x64e   : > { %4365 = vmatpush.msra.mxu2 %v3609_v42 }
 0x64f   : > { %4315 = vmatpush.msrb.mxu0 %v13886_v39 }
 0x650   : > { %4366 = vmatpush.msra.mxu2 %v3593_v37 }
 0x651   : > { %4316 = vmatpush.msrb.mxu0 %v13890_v41  ;;  %4367 = vmatmul.f32.vlgmr.msra.gmra.mxu2 %v11243_v46 }
 0x653   : > { %4317 = vmatpush.msrb.mxu0 %v13891_v55 }
 0x655   : > { %4318 = vmatpush.msrb.mxu0 %v13892_v8  ;;  %v4046_v20 = vpop.f32.mrf.mxu3  ;;  %v4069_v54 = vpop.f32.mrf.mxu1 }
 0x656   : > { %v4070_v30 = vadd.f32 %v4069_v54, %v4046_v20  ;;  %v11812_v63 = vpop.permute.xlu1 %4402 }
 0x657   : > { %4319 = vmatpush.msrb.mxu0 %v13893_v1 }
 0x659   : > { %4320 = vmatpush.msrb.mxu0 %v13894_v17  ;;  %4370 = vmatmul.f32.gmra.mxu2 %v11291_v45 }
 0x65a   : > { %4321 = vmatmul.f32.vlgmr.msrb.gmra.mxu0 %v11038_v27 }
 0x65d   : > { %v4049_v9 = vpop.f32.mrf.mxu3 }
 0x65f   : > { %v11815_v43 = vpop.permute.xlu1 %4418 }
 0x662   : > { %4324 = vmatmul.f32.gmra.mxu0 %v13805_v52  ;;  %v4072_v52 = vpop.f32.mrf.mxu1 }
 0x663   : > { %v4073_v47 = vadd.f32 %v4072_v52, %v4049_v9 }
 0x66f   : > { %v4092_v16 = vpop.f32.mrf.mxu2  ;;  %v4115_v46 = vpop.f32.mrf.mxu0 }
 0x670   : > { %v4093_v29 = vadd.f32 %v4092_v16, %v4070_v30 }
 0x672   : > { %v4116_v21 = vadd.f32 %v4115_v46, %v4093_v29 }
 0x674   : > { %v4405_v12 = vmul.f32 %v11807_v28, %v4116_v21  ;;  %v13898_v21 = vld [vmem:[#allocation26_spill] sm:$0xff] }
 0x676   : > { %v4421_v45 = vadd.f32 %v11809_v0, %v4405_v12 }
 0x677   : > { %v4095_v10 = vpop.f32.mrf.mxu2 }
 0x678   : > { %v4429_v27 = vsub.f32 0.0, %v4421_v45  ;;  %v4096_v44 = vadd.f32 %v4095_v10, %v4073_v47 }
 0x679   : > { %v4118_v38 = vpop.f32.mrf.mxu0 }
 0x67a   : > { %v4437_v60 = vmul.f32 1.442695, %v4429_v27  ;;  %v4119_v35 = vadd.f32 %v4118_v38, %v4096_v44 }
 0x67c   : > { %6192 = vpow2.f32 %v4437_v60  ;;  %v4409_v36 = vmul.f32 %v11812_v63, %v4119_v35 }
 0x67d   : > { %v4161_v22 = vpop.f32.mrf.mxu3 }
 0x67e   : > { %v4425_v40 = vadd.f32 %v11815_v43, %v4409_v36 }
 0x680   : > { %v4433_v18 = vsub.f32 0.0, %v4425_v40 }
 0x682   : > { %v6193_v23 = vpop.eup %6192  ;;  %v4445_v19 = vmul.f32 1.442695, %v4433_v18 }
 0x683   : > { %v4453_v32 = vadd.f32 1.0, %v6193_v23 }
 0x685   : > { %6194 = vrcp.f32 %v4453_v32  ;;  %v4472_v25 = vand.u32 2147483648, %v4453_v32  ;;  %vm4466_vm4 = vweird.f32 %v4453_v32  ;;  %v4470_v34 = vand.u32 2147483647, %v4453_v32  ;;  %v4164_v41 = vpop.f32.mrf.mxu3 }
 0x686   : > { %6196 = vpow2.f32 %v4445_v19 }
 0x687   : > { %v4473_v24 = vor.u32 1.1754944e-38, %v4472_v25  ;;  %vm4471_vm2 = vcmp.eq.f32.partialorder %v4470_v34, 8.507059e+37 }
 0x68b   : > { %v6195_v7 = vpop.eup %6194 }
 0x68c   : > { %v4462_v58 = vmul.f32 %v6195_v7, %v4453_v32  ;;  %v6197_v5 = vpop.eup %6196  ;;  %vm4467_vm0 = vweird.f32 %v6195_v7 }
 0x68d   : > { %v4457_v57 = vadd.f32 1.0, %v6197_v5  ;;  %vm4468_vm5 = vmor %vm4466_vm4, %vm4467_vm0  ;;  %v4184_v59 = vpop.f32.mrf.mxu1 }
 0x68e   : > { %v4463_v4 = vsub.f32 1.0, %v4462_v58 }
 0x68f   : > { %6198 = vrcp.f32 %v4457_v57  ;;  %vm4526_vm6 = vweird.f32 %v4457_v57  ;;  %v4532_v48 = vand.u32 2147483648, %v4457_v57  ;;  %v4530_v42 = vand.u32 2147483647, %v4457_v57 }
 0x690   : > { %v4464_v51 = vmul.f32 %v6195_v7, %v4463_v4 }
 0x691   : > { %v4533_v55 = vor.u32 1.1754944e-38, %v4532_v48  ;;  %vm4531_vm12 = vcmp.eq.f32.partialorder %v4530_v42, 8.507059e+37 }
 0x692   : > { %v4465_v33 = vadd.f32 %v6195_v7, %v4464_v51 }
 0x694   : > { %v4469_v14 = vsel %vm4468_vm5, %v6195_v7, %v4465_v33 }
 0x695   : > { %v4474_v15 = vsel %vm4471_vm2, %v4473_v24, %v4469_v14  ;;  %v6199_v49 = vpop.eup %6198  ;;  %v13899_v24 = vld [vmem:[#allocation24_spill] sm:$0xff] }
 0x696   : > { %v4138_v56 = vpop.f32.mrf.mxu0  ;;  %v4581_v62 = vmul.f32 %v4474_v15, %v13896_v31  ;;  %v4522_v3 = vmul.f32 %v6199_v49, %v4457_v57  ;;  %vm4527_vm10 = vweird.f32 %v6199_v49 }
 0x697   : > { %v4162_v6 = vadd.f32 %v4161_v22, %v4138_v56  ;;  %vm4528_vm13 = vmor %vm4526_vm6, %vm4527_vm10 }
 0x698   : > { %v4207_v61 = vpop.f32.mrf.mxu2  ;;  %4589 = vst [vmem:[%s11822_s10] sm:$0xff] %v4581_v62  ;;  %v4523_v53 = vsub.f32 1.0, %v4522_v3 }
 0x699   : > { %v4185_v50 = vadd.f32 %v4184_v59, %v4162_v6 }
 0x69a   : > { %v4524_v26 = vmul.f32 %v6199_v49, %v4523_v53  ;;  %v4187_v1 = vpop.f32.mrf.mxu1 }
 0x69b   : > { %v4208_v2 = vadd.f32 %v4207_v61, %v4185_v50 }
 0x69c   : > { %v4525_v17 = vadd.f32 %v6199_v49, %v4524_v26 }
 0x69d   : > { %v4406_v11 = vmul.f32 %v11807_v28, %v4208_v2 }
 0x69e   : > { %v4529_v16 = vsel %vm4528_vm13, %v6199_v49, %v4525_v17 }
 0x69f   : > { %v4422_v39 = vadd.f32 %v11809_v0, %v4406_v11  ;;  %v4141_v37 = vpop.f32.mrf.mxu0  ;;  %v4534_v29 = vsel %vm4531_vm12, %v4533_v55, %v4529_v16 }
 0x6a0   : > { %v4165_v8 = vadd.f32 %v4164_v41, %v4141_v37  ;;  %v4585_v12 = vmul.f32 %v4534_v29, %v13898_v21 }
 0x6a1   : > { %v4430_v13 = vsub.f32 0.0, %v4422_v39 }
 0x6a2   : > { %v4188_v30 = vadd.f32 %v4187_v1, %v4165_v8  ;;  %4593 = vst [vmem:[%s11822_s10 + $0x20] sm:$0xff] %v4585_v12  ;;  %v13900_v8 = vld [vmem:[#allocation27_spill] sm:$0xff] }
 0x6a3   : > { %v4439_v20 = vmul.f32 1.442695, %v4430_v13  ;;  %v4210_v54 = vpop.f32.mrf.mxu2 }
 0x6a4   : > { %v4211_v46 = vadd.f32 %v4210_v54, %v4188_v30 }
 0x6a5   : > { %6200 = vpow2.f32 %v4439_v20 }
 0x6a6   : > { %v4410_v45 = vmul.f32 %v11812_v63, %v4211_v46 }
 0x6a8   : > { %v4426_v27 = vadd.f32 %v11815_v43, %v4410_v45 }
 0x6a9   : > { %v4299_v5 = vpop.f32.mrf.mxu1 }
 0x6aa   : > { %v4434_v47 = vsub.f32 0.0, %v4426_v27 }
 0x6ab   : > { %v6201_v9 = vpop.eup %6200 }
 0x6ac   : > { %v4454_v52 = vadd.f32 1.0, %v6201_v9  ;;  %v4447_v10 = vmul.f32 1.442695, %v4434_v47 }
 0x6ad   : > { %v4276_v19 = vpop.f32.mrf.mxu3 }
 0x6ae   : > { %6202 = vrcp.f32 %v4454_v52  ;;  %v4487_v44 = vand.u32 2147483648, %v4454_v52  ;;  %vm4481_vm11 = vweird.f32 %v4454_v52  ;;  %v4485_v40 = vand.u32 2147483647, %v4454_v52 }
 0x6af   : > { %6204 = vpow2.f32 %v4447_v10 }
 0x6b0   : > { %v4488_v25 = vor.u32 1.1754944e-38, %v4487_v44  ;;  %vm4486_vm1 = vcmp.eq.f32.partialorder %v4485_v40, 8.507059e+37 }
 0x6b1   : > { %v4302_v53 = vpop.f32.mrf.mxu1 }
 0x6b4   : > { %v6203_v60 = vpop.eup %6202 }
 0x6b5   : > { %v4477_v38 = vmul.f32 %v6203_v60, %v4454_v52  ;;  %v6205_v35 = vpop.eup %6204  ;;  %vm4482_vm3 = vweird.f32 %v6203_v60  ;;  %v4279_v3 = vpop.f32.mrf.mxu3 }
 0x6b6   : > { %v4458_v32 = vadd.f32 1.0, %v6205_v35  ;;  %vm4483_vm9 = vmor %vm4481_vm11, %vm4482_vm3 }
 0x6b7   : > { %v4478_v36 = vsub.f32 1.0, %v4477_v38  ;;  %v4230_v23 = vpop.f32.mrf.mxu0 }
 0x6b8   : > { %v4253_v18 = vpop.f32.mrf.mxu2  ;;  %6206 = vrcp.f32 %v4458_v32  ;;  %vm4541_vm15 = vweird.f32 %v4458_v32  ;;  %v4547_v50 = vand.u32 2147483648, %v4458_v32  ;;  %v4545_v15 = vand.u32 2147483647, %v4458_v32 }
 0x6b9   : > { %v4479_v7 = vmul.f32 %v6203_v60, %v4478_v36  ;;  %v4254_v58 = vadd.f32 %v4253_v18, %v4230_v23  ;;  %v4345_v29 = vpop.f32.mrf.mxu1 }
 0x6ba   : > { %v4548_v42 = vor.u32 1.1754944e-38, %v4547_v50  ;;  %vm4546_vm7 = vcmp.eq.f32.partialorder %v4545_v15, 8.507059e+37 }
 0x6bb   : > { %v4480_v4 = vadd.f32 %v6203_v60, %v4479_v7  ;;  %v4277_v34 = vadd.f32 %v4276_v19, %v4254_v58  ;;  %v13901_v7 = vld [vmem:[#allocation43_spill] sm:$0xff] }
 0x6bd   : > { %v4484_v57 = vsel %vm4483_vm9, %v6203_v60, %v4480_v4  ;;  %v4300_v22 = vadd.f32 %v4299_v5, %v4277_v34 }
 0x6be   : > { %v4489_v51 = vsel %vm4486_vm1, %v4488_v25, %v4484_v57  ;;  %v6207_v33 = vpop.eup %6206  ;;  %v4391_v38 = vpop.f32.mrf.mxu3 }
 0x6bf   : > { %v4582_v56 = vmul.f32 %v4489_v51, %v13899_v24  ;;  %v4407_v59 = vmul.f32 %v11807_v28, %v4300_v22  ;;  %v4537_v6 = vmul.f32 %v6207_v33, %v4458_v32  ;;  %vm4542_vm14 = vweird.f32 %v6207_v33  ;;  %v4233_v62 = vpop.f32.mrf.mxu0 }
 0x6c0   : > { %v4256_v2 = vpop.f32.mrf.mxu2  ;;  %vm4543_vm8 = vmor %vm4541_vm15, %vm4542_vm14 }
 0x6c1   : > { %4590 = vst [vmem:[%s11822_s10 + $0x8] sm:$0xff] %v4582_v56  ;;  %v4423_v14 = vadd.f32 %v11809_v0, %v4407_v59  ;;  %v4538_v61 = vsub.f32 1.0, %v4537_v6  ;;  %v4257_v49 = vadd.f32 %v4256_v2, %v4233_v62  ;;  %v4348_v34 = vpop.f32.mrf.mxu1 }
 0x6c3   : > { %v4431_v31 = vsub.f32 0.0, %v4423_v14  ;;  %v4539_v11 = vmul.f32 %v6207_v33, %v4538_v61  ;;  %v4280_v39 = vadd.f32 %v4279_v3, %v4257_v49 }
 0x6c5   : > { %v4441_v48 = vmul.f32 1.442695, %v4431_v31  ;;  %v4540_v26 = vadd.f32 %v6207_v33, %v4539_v11  ;;  %v4303_v13 = vadd.f32 %v4302_v53, %v4280_v39  ;;  %v13902_v11 = vld [vmem:[#allocation39_spill] sm:$0xff] }
 0x6c6   : > { %v4394_v59 = vpop.f32.mrf.mxu3 }
 0x6c7   : > { %6208 = vpow2.f32 %v4441_v48  ;;  %v4544_v37 = vsel %vm4543_vm8, %v6207_v33, %v4540_v26  ;;  %v4411_v55 = vmul.f32 %v11812_v63, %v4303_v13 }
 0x6c8   : > { %v4549_v41 = vsel %vm4546_vm7, %v4548_v42, %v4544_v37 }
 0x6c9   : > { %v4586_v1 = vmul.f32 %v4549_v41, %v13900_v8  ;;  %v4427_v17 = vadd.f32 %v11815_v43, %v4411_v55 }
 0x6cb   : > { %4594 = vst [vmem:[%s11822_s10 + $0x28] sm:$0xff] %v4586_v1  ;;  %v4435_v30 = vsub.f32 0.0, %v4427_v17 }
 0x6cd   : > { %v6209_v20 = vpop.eup %6208  ;;  %v4449_v16 = vmul.f32 1.442695, %v4435_v30 }
 0x6ce   : > { %v4455_v54 = vadd.f32 1.0, %v6209_v20 }
 0x6d0   : > { %6210 = vrcp.f32 %v4455_v54  ;;  %v4502_v27 = vand.u32 2147483648, %v4455_v54  ;;  %vm4496_vm4 = vweird.f32 %v4455_v54  ;;  %v4500_v35 = vand.u32 2147483647, %v4455_v54 }
 0x6d1   : > { %6212 = vpow2.f32 %v4449_v16  ;;  %v13904_v16 = vld [vmem:[#allocation44_spill] sm:$0xff] }
 0x6d2   : > { %v4503_v36 = vor.u32 1.1754944e-38, %v4502_v27  ;;  %vm4501_vm2 = vcmp.eq.f32.partialorder %v4500_v35, 8.507059e+37 }
 0x6d4   : > { %v4368_v45 = vpop.f32.mrf.mxu2 }
 0x6d6   : > { %v6211_v46 = vpop.eup %6210 }
 0x6d7   : > { %v4492_v21 = vmul.f32 %v6211_v46, %v4455_v54  ;;  %v4322_v12 = vpop.f32.mrf.mxu0  ;;  %v6213_v52 = vpop.eup %6212  ;;  %vm4497_vm0 = vweird.f32 %v6211_v46 }
 0x6d8   : > { %v4346_v9 = vadd.f32 %v4345_v29, %v4322_v12  ;;  %v4459_v10 = vadd.f32 1.0, %v6213_v52  ;;  %vm4498_vm5 = vmor %vm4496_vm4, %vm4497_vm0 }
 0x6d9   : > { %v4493_v47 = vsub.f32 1.0, %v4492_v21 }
 0x6da   : > { %v4369_v60 = vadd.f32 %v4368_v45, %v4346_v9  ;;  %6214 = vrcp.f32 %v4459_v10  ;;  %v4562_v56 = vand.u32 2147483648, %v4459_v10  ;;  %vm4556_vm6 = vweird.f32 %v4459_v10 }
 0x6db   : > { %v4494_v44 = vmul.f32 %v6211_v46, %v4493_v47 }
 0x6dc   : > { %v4392_v23 = vadd.f32 %v4391_v38, %v4369_v60  ;;  %v4371_v24 = vpop.f32.mrf.mxu2  ;;  %v4563_v61 = vor.u32 1.1754944e-38, %v4562_v56  ;;  %v13907_v60 = vld [vmem:[#allocation40_spill] sm:$0xff] }
 0x6dd   : > { %v4495_v40 = vadd.f32 %v6211_v46, %v4494_v44 }
 0x6de   : > { %v4408_v18 = vmul.f32 %v11807_v28, %v4392_v23  ;;  %v4560_v28 = vand.u32 2147483647, %v4459_v10 }
 0x6df   : > { %v4499_v32 = vsel %vm4498_vm5, %v6211_v46, %v4495_v40  ;;  %v4325_v4 = vpop.f32.mrf.mxu0 }
 0x6e0   : > { %v4504_v19 = vsel %vm4501_vm2, %v4503_v36, %v4499_v32  ;;  %v4424_v25 = vadd.f32 %v11809_v0, %v4408_v18  ;;  %v6215_v5 = vpop.eup %6214  ;;  %v4349_v51 = vadd.f32 %v4348_v34, %v4325_v4  ;;  %vm4561_vm12 = vcmp.eq.f32.partialorder %v4560_v28, 8.507059e+37 }
 0x6e1   : > { %v4583_v58 = vmul.f32 %v4504_v19, %v13901_v7  ;;  %v4552_v57 = vmul.f32 %v6215_v5, %v4459_v10  ;;  %vm4557_vm10 = vweird.f32 %v6215_v5 }
 0x6e2   : > { %v4432_v22 = vsub.f32 0.0, %v4424_v25  ;;  %v4372_v14 = vadd.f32 %v4371_v24, %v4349_v51  ;;  %vm4558_vm13 = vmor %vm4556_vm6, %vm4557_vm10 }
 0x6e3   : > { %4591 = vst [vmem:[%s11822_s10 + $0x10] sm:$0xff] %v4583_v58  ;;  %v4553_v33 = vsub.f32 1.0, %v4552_v57 }
 0x6e4   : > { %v4443_v6 = vmul.f32 1.442695, %v4432_v22  ;;  %v4395_v0 = vadd.f32 %v4394_v59, %v4372_v14 }
 0x6e5   : > { %v4554_v50 = vmul.f32 %v6215_v5, %v4553_v33 }
 0x6e6   : > { %6216 = vpow2.f32 %v4443_v6  ;;  %v4412_v31 = vmul.f32 %v11812_v63, %v4395_v0 }
 0x6e7   : > { %v4555_v15 = vadd.f32 %v6215_v5, %v4554_v50 }
 0x6e8   : > { %v4428_v2 = vadd.f32 %v11815_v43, %v4412_v31 }
 0x6e9   : > { %v4559_v62 = vsel %vm4558_vm13, %v6215_v5, %v4555_v15 }
 0x6ea   : > { %v4564_v49 = vsel %vm4561_vm12, %v4563_v61, %v4559_v62  ;;  %v4436_v53 = vsub.f32 0.0, %v4428_v2 }
 0x6eb   : > { %v4587_v48 = vmul.f32 %v4564_v49, %v13902_v11 }
 0x6ec   : > { %v6217_v3 = vpop.eup %6216  ;;  %v4451_v39 = vmul.f32 1.442695, %v4436_v53 }
 0x6ed   : > { %v4456_v42 = vadd.f32 1.0, %v6217_v3  ;;  %4595 = vst [vmem:[%s11822_s10 + $0x30] sm:$0xff] %v4587_v48 }
 0x6ef   : > { %6218 = vrcp.f32 %v4456_v42  ;;  %v4517_v55 = vand.u32 2147483648, %v4456_v42  ;;  %v4515_v8 = vand.u32 2147483647, %v4456_v42  ;;  %vm4511_vm3 = vweird.f32 %v4456_v42 }
 0x6f0   : > { %6220 = vpow2.f32 %v4451_v39 }
 0x6f1   : > { %v4518_v17 = vor.u32 1.1754944e-38, %v4517_v55  ;;  %vm4516_vm1 = vcmp.eq.f32.partialorder %v4515_v8, 8.507059e+37 }
 0x6f5   : > { %v6219_v26 = vpop.eup %6218 }
 0x6f6   : > { %v6221_v13 = vpop.eup %6220  ;;  %v4507_v37 = vmul.f32 %v6219_v26, %v4456_v42  ;;  %vm4512_vm11 = vweird.f32 %v6219_v26 }
 0x6f7   : > { %v4460_v41 = vadd.f32 1.0, %v6221_v13  ;;  %vm4513_vm9 = vmor %vm4511_vm3, %vm4512_vm11 }
 0x6f8   : > { %v4508_v63 = vsub.f32 1.0, %v4507_v37 }
 0x6f9   : > { %6222 = vrcp.f32 %v4460_v41  ;;  %v4577_v12 = vand.u32 2147483648, %v4460_v41  ;;  %v4575_v27 = vand.u32 2147483647, %v4460_v41  ;;  %vm4571_vm14 = vweird.f32 %v4460_v41 }
 0x6fa   : > { %v4509_v43 = vmul.f32 %v6219_v26, %v4508_v63 }
 0x6fb   : > { %v4578_v52 = vor.u32 1.1754944e-38, %v4577_v12  ;;  %vm4576_vm7 = vcmp.eq.f32.partialorder %v4575_v27, 8.507059e+37 }
 0x6fc   : > { %v4510_v1 = vadd.f32 %v6219_v26, %v4509_v43 }
 0x6fe   : > { %v4514_v20 = vsel %vm4513_vm9, %v6219_v26, %v4510_v1 }
 0x6ff   : > { %v6223_v54 = vpop.eup %6222  ;;  %v4519_v30 = vsel %vm4516_vm1, %v4518_v17, %v4514_v20 }
 0x700   : > { %v4584_v29 = vmul.f32 %v4519_v30, %v13904_v16  ;;  %v4567_v46 = vmul.f32 %v6223_v54, %v4460_v41  ;;  %vm4572_vm15 = vweird.f32 %v6223_v54 }
 0x701   : > { %vm4573_vm8 = vmor %vm4571_vm14, %vm4572_vm15 }
 0x702   : > { %4592 = vst [vmem:[%s11822_s10 + $0x18] sm:$0xff] %v4584_v29  ;;  %v4568_v21 = vsub.f32 1.0, %v4567_v46 }
 0x704   : > { %v4569_v45 = vmul.f32 %v6223_v54, %v4568_v21 }
 0x706   : > { %v4570_v9 = vadd.f32 %v6223_v54, %v4569_v45 }
 0x708   : > { %v4574_v47 = vsel %vm4573_vm8, %v6223_v54, %v4570_v9 }
 0x709   : > { %v4579_v10 = vsel %vm4576_vm7, %v4578_v52, %v4574_v47 }
 0x70a   : > { %v4588_v38 = vmul.f32 %v4579_v10, %v13907_v60 }
 0x70c   : > { %4596 = vst [vmem:[%s11822_s10 + $0x38] sm:$0xff] %v4588_v38 }
 0x70d   : > { %6348 = shalt.err (!%p6345_p8)
}
 0x70e   : > { %s6449_s28 = smov 512   ;;  %s6450_s14 = smov 1024  }
 0x70f   : > { %s6451_s9 = smov 32  }
 0x710   : > { %4763 = dma.vmem_to_hbm [thread:$0]  (%p6544_p11), %s4611_s8, 1024, %s4613_s23, %s4598_s3, %s6449_s28, %s6450_s14, %s6451_s9  }
 0x711 PF: > { %s13908_s4 = sld [smem:[#allocation14_spill]] }
 0x712   : > { %s13910_s16 = sld [smem:[#allocation17_spill]] }
 0x717   : > { %s4627_s6 = sand.u32 1, %s13908_s4  }
 0x718   : > { %p13911_p9 = scmp.ge.s32.totalorder %s13910_s16, 2  ;;  %s4628_s13 = scalar_lea.sflag [#allocation6], %s4627_s6 }
 0x71a   : > { %p4777_p10 = pnand %p13911_p9, %p6548_p12 }
 0x71c   : > { %p4778_p1 = pneg %p4777_p10 }
 0x71e   : > { %6374 = dma.done.wait (%p4778_p1), %s4628_s13, 1024  }
 0x71f   : > { %6376 = vsyncadd (%p4778_p1), %s4628_s13, 4294966272  ;;  %s13912_s27 = sld [smem:[#allocation19_spill]] }
 0x720   : > { %s13913_s24 = sld [smem:[#allocation15_spill]] }
 0x721   : > { %s13914_s25 = sld [smem:[#allocation16_spill]] }
 0x722   : > { %s13915_s26 = sld [smem:[#allocation20_spill]] }
 0x725   : > { %p21_p2 = scmp.ge.s32.totalorder %s13912_s27, 4  }
 0x727   :  { %23 = sbr.rel (!%p21_p2) target bundleno = 15 (0xf), region = 101 }
 0x72c   :  { %4634 = vsyncpa [#allocation5], 1 }
 0x72d   :  { %4636 = vsyncpa [#allocation5 + $0x1], 1 }
 0x72e   :  { %4637 = vsyncpa [#allocation8], 1 }
 0x72f   :  { %4638 = vsyncpa [#allocation6], 1 }
 0x730   :  { %4640 = vsyncpa [#allocation6 + $0x1], 1 }

</bundles_post_ra>
